<compile_context>
chip_gen: v5e
topology: v5e:2x2
jax: 0.10.0
libtpu: 0.0.40
codegen_flags: <defaults>
</compile_context>

<pallas_src>
import numpy as np

import jax
import jax.numpy as jnp
from jax.experimental import pallas as pl
from jax.experimental.pallas import tpu as pltpu

# ----------------------------------------------------------------------------
# Model / layout constants
# ----------------------------------------------------------------------------
ACTION_SIZE = 7
H, W = 6, 7                      # Connect-4 board
HP, WP = H + 2, W + 2            # zero-padded board height/width (8, 9)
C1, C2 = 32, 64                  # conv channel counts
NF1 = 128                        # fc1 width

K_IN = 128                       # lane-padded input row width   (>= WP)
N1P = 384                        # lane-padded conv1 act width   (>= WP*C1 = 288), 3*128
N2P = 640                        # lane-padded conv2 act width   (>= WP*C2 = 576), 5*128
NOUT = 128                       # lane-padded fc2 output width  (>= 7)

BT_CAP = 64                      # max boards per grid tile (512 board-rows)
BT_ALIGN = 16                    # keep bf16 sublane slices (16,128)-aligned


# ----------------------------------------------------------------------------
# Fused kernel: conv1 -> conv2 -> fc1 -> fc2, all weights resident in VMEM
# ----------------------------------------------------------------------------
def _dqn_kernel(x_ref, w1_ref, b1_ref, w2_ref, b2_ref,
                wf1_ref, bf1_ref, wf2_ref, bf2_ref,
                o_ref, a1_scr, a2_scr):
    f32, bf16 = jnp.float32, jnp.bfloat16
    bt = o_ref.shape[0]          # boards in this tile
    m = H * bt                   # rows of the 6 interior planes (h_p = 1..6)

    def conv(src_ref, w_ref, b_ref):
        # out[h_p, b] = relu( sum_kh src[h_p + kh - 1, b] @ w[kh] + bias ),
        # computed only for the interior planes h_p = 1..6.  src is plane-major
        # (row = h_p*bt + b) so the kh shift is a +/-bt-row shift: every LHS
        # slice starts at a multiple of bt (>=16) and stays tile-aligned.
        acc = jnp.dot(src_ref[pl.ds(0 * bt, m), :], w_ref[0],
                      preferred_element_type=f32)
        acc = acc + jnp.dot(src_ref[pl.ds(1 * bt, m), :], w_ref[1],
                            preferred_element_type=f32)
        acc = acc + jnp.dot(src_ref[pl.ds(2 * bt, m), :], w_ref[2],
                            preferred_element_type=f32)
        return jnp.maximum(acc + b_ref[...], 0.0)

    # ---- conv1 + ReLU (interior planes only) --------------------------------
    # conv2 must see true zeros at the h-padding planes (h_p = 0 and 7), so
    # those planes of the conv1 activation are written as zeros every step
    # (scratch persists across "parallel" grid steps / cores).
    y1 = conv(x_ref, w1_ref, b1_ref)                       # (6*bt, N1P) f32
    zeros1 = jnp.zeros((bt, a1_scr.shape[1]), bf16)
    a1_scr[pl.ds(0, bt), :] = zeros1
    a1_scr[pl.ds((HP - 1) * bt, bt), :] = zeros1
    a1_scr[pl.ds(bt, m), :] = y1.astype(bf16)              # single cast at store

    # ---- conv2 + ReLU --------------------------------------------------------
    # (w-padding columns of a1 hold non-zero values; the packed conv2 weight
    #  zeros those input lanes, see pack_params/band(zero_pad_inputs=True).)
    y2 = conv(a1_scr, w2_ref, b2_ref)                      # (6*bt, N2P) f32
    a2_scr[...] = y2.astype(bf16)

    # ---- fc1 + ReLU: one (bt, N2P) x (N2P, 128) matmul per board row h ------
    # Compacted: M = bt (one output row per board), no 8x overcompute.
    acc = jnp.dot(a2_scr[pl.ds(0, bt), :], wf1_ref[0], preferred_element_type=f32)
    for hh in range(1, H):
        acc = acc + jnp.dot(a2_scr[pl.ds(hh * bt, bt), :], wf1_ref[hh],
                            preferred_element_type=f32)
    z = jnp.maximum(acc + bf1_ref[...], 0.0).astype(bf16)

    # ---- fc2 (lane-padded 7 -> 128), one output row per board ----------------
    o_ref[...] = jnp.dot(z, wf2_ref[...], preferred_element_type=f32) + bf2_ref[...]


def _dqn_pallas_call(n_tiles, bt):
    return pl.pallas_call(
        _dqn_kernel,
        out_shape=jax.ShapeDtypeStruct((n_tiles * bt, NOUT), jnp.float32),
        grid=(n_tiles,),
        in_specs=[
            pl.BlockSpec((HP * bt, K_IN), lambda i: (i, 0)),     # plane-major board input
            pl.BlockSpec((3, K_IN, N1P), lambda i: (0, 0, 0)),   # conv1 banded W
            pl.BlockSpec((1, N1P), lambda i: (0, 0)),            # conv1 bias
            pl.BlockSpec((3, N1P, N2P), lambda i: (0, 0, 0)),    # conv2 banded W
            pl.BlockSpec((1, N2P), lambda i: (0, 0)),            # conv2 bias
            pl.BlockSpec((H, N2P, NF1), lambda i: (0, 0, 0)),    # fc1 per-row W
            pl.BlockSpec((1, NF1), lambda i: (0, 0)),            # fc1 bias
            pl.BlockSpec((NF1, NOUT), lambda i: (0, 0)),         # fc2 W (padded)
            pl.BlockSpec((1, NOUT), lambda i: (0, 0)),           # fc2 bias (padded)
        ],
        out_specs=pl.BlockSpec((bt, NOUT), lambda i: (i, 0)),    # one row per board
        scratch_shapes=[
            pltpu.VMEM((HP * bt, N1P), jnp.bfloat16),            # conv1 act (8 planes)
            pltpu.VMEM((H * bt, N2P), jnp.bfloat16),             # conv2 act (6 planes)
        ],
        compiler_params=pltpu.CompilerParams(
            dimension_semantics=("parallel",),
            vmem_limit_bytes=32 * 1024 * 1024,
        ),
    )


@jax.jit
def dqn_forward(packed, x):
    """Q(s, .) for a batch of 6x7 boards.  x reshapes to (-1, 6, 7); returns (B, 7)."""
    xb = x.reshape(-1, H, W)
    b = xb.shape[0]

    # Boards per tile: multiple of 16, capped at BT_CAP; for batch >= 32 force
    # >= 2 grid steps so v7x's second TensorCore gets work.
    n_tiles = max(1, -(-b // BT_CAP))
    if n_tiles == 1 and b >= 2 * BT_ALIGN:
        n_tiles = 2
    bt = min(BT_CAP, ((-(-b // n_tiles) + BT_ALIGN - 1) // BT_ALIGN) * BT_ALIGN)
    b_pad = n_tiles * bt

    # Zero-pad the board (conv padding=1), pad the batch, and go plane-major
    # per tile: row = h_p * bt + board, lanes = padded column w_p (-> 128).
    # Board values (-1/0/1) are exact in bf16, halving the input DMA.
    xp = jnp.pad(xb.astype(jnp.bfloat16), ((0, b_pad - b), (1, 1), (1, 1)))  # (b_pad, 8, 9)
    xp = xp.reshape(n_tiles, bt, HP, WP).transpose(0, 2, 1, 3)               # (tiles, 8, bt, 9)
    xp = jnp.pad(xp, ((0, 0), (0, 0), (0, 0), (0, K_IN - WP)))
    xp = xp.reshape(n_tiles * HP * bt, K_IN)

    out = _dqn_pallas_call(n_tiles, bt)(
        xp,
        packed["w1"], packed["b1"], packed["w2"], packed["b2"],
        packed["wf1"], packed["bf1"], packed["wf2"], packed["bf2"])
    # Row b is board b; only the first 7 lanes are real actions.
    return out[:b, :ACTION_SIZE]


# ----------------------------------------------------------------------------
# One-time weight packing (banded conv weights, permuted fc1, lane padding)
# ----------------------------------------------------------------------------
def pack_params(params):
    def f(a):
        return np.asarray(a, np.float32)

    c1w, c1b = f(params["conv1_w"]), f(params["conv1_b"])   # (32,1,3,3), (32,)
    c2w, c2b = f(params["conv2_w"]), f(params["conv2_b"])   # (64,32,3,3), (64,)
    f1w, f1b = f(params["fc1_w"]), f(params["fc1_b"])       # (128, 2688), (128,)
    f2w, f2b = f(params["fc2_w"]), f(params["fc2_b"])       # (7, 128), (7,)

    def band(wc, zero_pad_inputs):
        # wc: (Cout, Cin, 3, 3) -> (3, WP*Cin, WP*Cout); lane index = w_p*C + c.
        # M[kh][(w_in, ci), (w_out, co)] = wc[co, ci, kh, w_in - w_out + 1].
        cout, cin = wc.shape[0], wc.shape[1]
        m = np.zeros((3, WP * cin, WP * cout), np.float32)
        for kh in range(3):
            for wo in range(WP):
                for kw in range(3):
                    wi = wo + kw - 1
                    if 0 <= wi < WP:
                        m[kh, wi * cin:(wi + 1) * cin,
                          wo * cout:(wo + 1) * cout] = wc[:, :, kh, kw].T
        if zero_pad_inputs:
            # Input lanes at w_p in {0, WP-1} are the conv zero-padding columns:
            # zero those weight rows so non-zero junk there can never leak in.
            m[:, :cin, :] = 0.0
            m[:, (WP - 1) * cin:, :] = 0.0
        return m

    w1 = band(c1w, zero_pad_inputs=False)                      # (3, 9, 288)
    w1 = np.pad(w1, ((0, 0), (0, K_IN - WP), (0, N1P - WP * C1)))
    b1 = np.pad(np.tile(c1b, WP), (0, N1P - WP * C1))[None, :]

    w2 = band(c2w, zero_pad_inputs=True)                       # (3, 288, 576)
    w2 = np.pad(w2, ((0, 0), (0, N1P - WP * C1), (0, N2P - WP * C2)))
    b2 = np.pad(np.tile(c2b, WP), (0, N2P - WP * C2))[None, :]

    # fc1: torch flatten index = c*42 + h*7 + w ; our lane index = w_p*C2 + c,
    # the h index is handled by one (N2P, 128) weight per board row.
    f1r = f1w.reshape(NF1, C2, H, W)                           # (n, c, h, w)
    wf1 = np.zeros((H, N2P, NF1), np.float32)
    for h in range(H):
        for wp in range(1, WP - 1):
            wf1[h, wp * C2:(wp + 1) * C2, :] = f1r[:, :, h, wp - 1].T
    bf1 = f1b[None, :]

    wf2 = np.zeros((NF1, NOUT), np.float32)
    wf2[:, :ACTION_SIZE] = f2w.T
    bf2 = np.zeros((1, NOUT), np.float32)
    bf2[0, :ACTION_SIZE] = f2b

    return {
        "w1": jnp.asarray(w1, jnp.bfloat16),
        "b1": jnp.asarray(b1, jnp.float32),
        "w2": jnp.asarray(w2, jnp.bfloat16),
        "b2": jnp.asarray(b2, jnp.float32),
        "wf1": jnp.asarray(wf1, jnp.bfloat16),
        "bf1": jnp.asarray(bf1, jnp.float32),
        "wf2": jnp.asarray(wf2, jnp.bfloat16),
        "bf2": jnp.asarray(bf2, jnp.float32),
    }


# ----------------------------------------------------------------------------
# DQN parameters (deterministic, PyTorch-default-style uniform init)
# ----------------------------------------------------------------------------
def init_dqn_params(key):
    def uniform(key, shape, fan_in):
        bound = 1.0 / jnp.sqrt(jnp.float32(fan_in))
        return jax.random.uniform(key, shape, jnp.float32, -bound, bound)

    keys = jax.random.split(key, 8)
    return {
        "conv1_w": uniform(keys[0], (C1, 1, 3, 3), 1 * 9),
        "conv1_b": uniform(keys[1], (C1,), 1 * 9),
        "conv2_w": uniform(keys[2], (C2, C1, 3, 3), C1 * 9),
        "conv2_b": uniform(keys[3], (C2,), C1 * 9),
        "fc1_w": uniform(keys[4], (NF1, C2 * H * W), C2 * H * W),
        "fc1_b": uniform(keys[5], (NF1,), C2 * H * W),
        "fc2_w": uniform(keys[6], (ACTION_SIZE, NF1), NF1),
        "fc2_b": uniform(keys[7], (ACTION_SIZE,), NF1),
    }


# ----------------------------------------------------------------------------
# Pure-JAX reference (matches torch DQN.forward) for a silent sanity check
# ----------------------------------------------------------------------------
def dqn_forward_ref(params, x):
    x = x.reshape(-1, 1, H, W).astype(jnp.float32)
    b = x.shape[0]

    def conv(x, w, bb):
        y = jax.lax.conv_general_dilated(
            x, w, window_strides=(1, 1), padding=((1, 1), (1, 1)),
            dimension_numbers=("NCHW", "OIHW", "NCHW"))
        return jax.nn.relu(y + bb[None, :, None, None])

    x = conv(x, params["conv1_w"], params["conv1_b"])
    x = conv(x, params["conv2_w"], params["conv2_b"])
    x = x.reshape(b, -1)
    x = jax.nn.relu(x @ params["fc1_w"].T + params["fc1_b"])
    return x @ params["fc2_w"].T + params["fc2_b"]


# ----------------------------------------------------------------------------
if __name__ == "__main__":
    key = jax.random.PRNGKey(0)
    k_params, k_x = jax.random.split(key)

    params = init_dqn_params(k_params)
    packed = pack_params(params)     # one-time repack: banded, permuted, bf16, lane-padded

    batch = 2
    # Connect-4 style board states, flattened (forward re-views to (B,1,6,7)).
    x = jax.random.randint(k_x, (batch, H * W), minval=-1, maxval=2).astype(jnp.float32)

    out = jax.block_until_ready(dqn_forward(packed, x))
    assert out.shape == (batch, ACTION_SIZE), out.shape

    # The kernel feeds the MXU in bf16, so compare against a reference that uses
    # bf16-rounded weights (f32 math otherwise).
    params_bf = {k: (jnp.asarray(v, jnp.bfloat16).astype(jnp.float32)
                     if k.endswith("_w") else v) for k, v in params.items()}
    ref = jax.block_until_ready(dqn_forward_ref(params_bf, x))
    assert jnp.allclose(out, ref, atol=2e-2, rtol=2e-2), (out, ref)

    print("KERNEL_OK")
</pallas_src>

<mosaic_0001>
module attributes {stable_mosaic.version = 11 : i64} {
  func.func @_dqn_kernel(%arg0: i32, %arg1: memref<128x128xbf16, #tpu.memory_space<vmem>>, %arg2: memref<3x128x384xbf16, #tpu.memory_space<vmem>>, %arg3: memref<1x384xf32, #tpu.memory_space<vmem>>, %arg4: memref<3x384x640xbf16, #tpu.memory_space<vmem>>, %arg5: memref<1x640xf32, #tpu.memory_space<vmem>>, %arg6: memref<6x640x128xbf16, #tpu.memory_space<vmem>>, %arg7: memref<1x128xf32, #tpu.memory_space<vmem>>, %arg8: memref<128x128xbf16, #tpu.memory_space<vmem>>, %arg9: memref<1x128xf32, #tpu.memory_space<vmem>>, %arg10: memref<16x128xf32, #tpu.memory_space<vmem>>, %arg11: memref<128x384xbf16, #tpu.memory_space<vmem>>, %arg12: memref<96x640xbf16, #tpu.memory_space<vmem>>) attributes {dimension_semantics = [#tpu.dimension_semantics<parallel>], iteration_bounds = array<i64: 1>, scalar_prefetch = 0 : i64, scratch_operands = 2 : i64, tpu.core_type = #tpu.core_type<tc>, window_params = [{transform_indices = @transform_0, window_bounds = array<i64: 128, 128>}, {pipeline_mode = #tpu.pipeline_mode<synchronous>, transform_indices = @transform_1, window_bounds = array<i64: 3, 128, 384>}, {pipeline_mode = #tpu.pipeline_mode<synchronous>, transform_indices = @transform_2, window_bounds = array<i64: 1, 384>}, {pipeline_mode = #tpu.pipeline_mode<synchronous>, transform_indices = @transform_3, window_bounds = array<i64: 3, 384, 640>}, {pipeline_mode = #tpu.pipeline_mode<synchronous>, transform_indices = @transform_4, window_bounds = array<i64: 1, 640>}, {pipeline_mode = #tpu.pipeline_mode<synchronous>, transform_indices = @transform_5, window_bounds = array<i64: 6, 640, 128>}, {pipeline_mode = #tpu.pipeline_mode<synchronous>, transform_indices = @transform_6, window_bounds = array<i64: 1, 128>}, {pipeline_mode = #tpu.pipeline_mode<synchronous>, transform_indices = @transform_7, window_bounds = array<i64: 128, 128>}, {pipeline_mode = #tpu.pipeline_mode<synchronous>, transform_indices = @transform_8, window_bounds = array<i64: 1, 128>}, {transform_indices = @transform_9, window_bounds = array<i64: 16, 128>}]} {
    %c0 = arith.constant 0 : index
    %c0_0 = arith.constant 0 : index
    %0 = vector.load %arg1[%c0, %c0_0] : memref<128x128xbf16, #tpu.memory_space<vmem>>, vector<96x128xbf16>
    %c0_1 = arith.constant 0 : index
    %c0_2 = arith.constant 0 : index
    %c0_3 = arith.constant 0 : index
    %1 = vector.load %arg2[%c0_1, %c0_2, %c0_3] : memref<3x128x384xbf16, #tpu.memory_space<vmem>>, vector<1x128x384xbf16>
    %2 = vector.shape_cast %1 : vector<1x128x384xbf16> to vector<128x384xbf16>
    %cst = arith.constant dense<0.000000e+00> : vector<96x384xf32>
    %3 = tpu.matmul %0, %2, %cst {dimension_numbers = #tpu.dot_dimension_numbers<[1], [0], [0], [1], [0, 0, 1, 1], [], []>} : vector<96x128xbf16>, vector<128x384xbf16>, vector<96x384xf32> -> vector<96x384xf32>
    %c16 = arith.constant 16 : index
    %c0_4 = arith.constant 0 : index
    %4 = vector.load %arg1[%c16, %c0_4] : memref<128x128xbf16, #tpu.memory_space<vmem>>, vector<96x128xbf16>
    %c1 = arith.constant 1 : index
    %c0_5 = arith.constant 0 : index
    %c0_6 = arith.constant 0 : index
    %5 = vector.load %arg2[%c1, %c0_5, %c0_6] : memref<3x128x384xbf16, #tpu.memory_space<vmem>>, vector<1x128x384xbf16>
    %6 = vector.shape_cast %5 : vector<1x128x384xbf16> to vector<128x384xbf16>
    %cst_7 = arith.constant dense<0.000000e+00> : vector<96x384xf32>
    %7 = tpu.matmul %4, %6, %cst_7 {dimension_numbers = #tpu.dot_dimension_numbers<[1], [0], [0], [1], [0, 0, 1, 1], [], []>} : vector<96x128xbf16>, vector<128x384xbf16>, vector<96x384xf32> -> vector<96x384xf32>
    %8 = arith.addf %3, %7 : vector<96x384xf32>
    %c32 = arith.constant 32 : index
    %c0_8 = arith.constant 0 : index
    %9 = vector.load %arg1[%c32, %c0_8] : memref<128x128xbf16, #tpu.memory_space<vmem>>, vector<96x128xbf16>
    %c2 = arith.constant 2 : index
    %c0_9 = arith.constant 0 : index
    %c0_10 = arith.constant 0 : index
    %10 = vector.load %arg2[%c2, %c0_9, %c0_10] : memref<3x128x384xbf16, #tpu.memory_space<vmem>>, vector<1x128x384xbf16>
    %11 = vector.shape_cast %10 : vector<1x128x384xbf16> to vector<128x384xbf16>
    %cst_11 = arith.constant dense<0.000000e+00> : vector<96x384xf32>
    %12 = tpu.matmul %9, %11, %cst_11 {dimension_numbers = #tpu.dot_dimension_numbers<[1], [0], [0], [1], [0, 0, 1, 1], [], []>} : vector<96x128xbf16>, vector<128x384xbf16>, vector<96x384xf32> -> vector<96x384xf32>
    %13 = arith.addf %8, %12 : vector<96x384xf32>
    %c0_12 = arith.constant 0 : index
    %c0_13 = arith.constant 0 : index
    %14 = vector.load %arg3[%c0_12, %c0_13] : memref<1x384xf32, #tpu.memory_space<vmem>>, vector<1x384xf32>
    %15 = vector.broadcast %14 : vector<1x384xf32> to vector<96x384xf32>
    %16 = arith.addf %13, %15 : vector<96x384xf32>
    %cst_14 = arith.constant 0.000000e+00 : f32
    %17 = vector.broadcast %cst_14 : f32 to vector<96x384xf32>
    %18 = arith.maximumf %16, %17 : vector<96x384xf32>
    %cst_15 = arith.constant 0.000000e+00 : bf16
    %19 = vector.broadcast %cst_15 : bf16 to vector<16x384xbf16>
    %c0_16 = arith.constant 0 : index
    %c0_17 = arith.constant 0 : index
    %20 = vector.load %arg11[%c0_16, %c0_17] : memref<128x384xbf16, #tpu.memory_space<vmem>>, vector<16x384xbf16>
    tpu.vector_store %arg11[%c0_16, %c0_17], %19 {strides = array<i32>} : memref<128x384xbf16, #tpu.memory_space<vmem>>, vector<16x384xbf16>,
    %c112 = arith.constant 112 : index
    %c0_18 = arith.constant 0 : index
    %21 = vector.load %arg11[%c112, %c0_18] : memref<128x384xbf16, #tpu.memory_space<vmem>>, vector<16x384xbf16>
    tpu.vector_store %arg11[%c112, %c0_18], %19 {strides = array<i32>} : memref<128x384xbf16, #tpu.memory_space<vmem>>, vector<16x384xbf16>,
    %22 = arith.truncf %18 : vector<96x384xf32> to vector<96x384xbf16>
    %c16_19 = arith.constant 16 : index
    %c0_20 = arith.constant 0 : index
    %23 = vector.load %arg11[%c16_19, %c0_20] : memref<128x384xbf16, #tpu.memory_space<vmem>>, vector<96x384xbf16>
    tpu.vector_store %arg11[%c16_19, %c0_20], %22 {strides = array<i32>} : memref<128x384xbf16, #tpu.memory_space<vmem>>, vector<96x384xbf16>,
    %c0_21 = arith.constant 0 : index
    %c0_22 = arith.constant 0 : index
    %24 = vector.load %arg11[%c0_21, %c0_22] : memref<128x384xbf16, #tpu.memory_space<vmem>>, vector<96x384xbf16>
    %c0_23 = arith.constant 0 : index
    %c0_24 = arith.constant 0 : index
    %c0_25 = arith.constant 0 : index
    %25 = vector.load %arg4[%c0_23, %c0_24, %c0_25] : memref<3x384x640xbf16, #tpu.memory_space<vmem>>, vector<1x384x640xbf16>
    %26 = vector.shape_cast %25 : vector<1x384x640xbf16> to vector<384x640xbf16>
    %cst_26 = arith.constant dense<0.000000e+00> : vector<96x640xf32>
    %27 = tpu.matmul %24, %26, %cst_26 {dimension_numbers = #tpu.dot_dimension_numbers<[1], [0], [0], [1], [0, 0, 1, 1], [], []>} : vector<96x384xbf16>, vector<384x640xbf16>, vector<96x640xf32> -> vector<96x640xf32>
    %c16_27 = arith.constant 16 : index
    %c0_28 = arith.constant 0 : index
    %28 = vector.load %arg11[%c16_27, %c0_28] : memref<128x384xbf16, #tpu.memory_space<vmem>>, vector<96x384xbf16>
    %c1_29 = arith.constant 1 : index
    %c0_30 = arith.constant 0 : index
    %c0_31 = arith.constant 0 : index
    %29 = vector.load %arg4[%c1_29, %c0_30, %c0_31] : memref<3x384x640xbf16, #tpu.memory_space<vmem>>, vector<1x384x640xbf16>
    %30 = vector.shape_cast %29 : vector<1x384x640xbf16> to vector<384x640xbf16>
    %cst_32 = arith.constant dense<0.000000e+00> : vector<96x640xf32>
    %31 = tpu.matmul %28, %30, %cst_32 {dimension_numbers = #tpu.dot_dimension_numbers<[1], [0], [0], [1], [0, 0, 1, 1], [], []>} : vector<96x384xbf16>, vector<384x640xbf16>, vector<96x640xf32> -> vector<96x640xf32>
    %32 = arith.addf %27, %31 : vector<96x640xf32>
    %c32_33 = arith.constant 32 : index
    %c0_34 = arith.constant 0 : index
    %33 = vector.load %arg11[%c32_33, %c0_34] : memref<128x384xbf16, #tpu.memory_space<vmem>>, vector<96x384xbf16>
    %c2_35 = arith.constant 2 : index
    %c0_36 = arith.constant 0 : index
    %c0_37 = arith.constant 0 : index
    %34 = vector.load %arg4[%c2_35, %c0_36, %c0_37] : memref<3x384x640xbf16, #tpu.memory_space<vmem>>, vector<1x384x640xbf16>
    %35 = vector.shape_cast %34 : vector<1x384x640xbf16> to vector<384x640xbf16>
    %cst_38 = arith.constant dense<0.000000e+00> : vector<96x640xf32>
    %36 = tpu.matmul %33, %35, %cst_38 {dimension_numbers = #tpu.dot_dimension_numbers<[1], [0], [0], [1], [0, 0, 1, 1], [], []>} : vector<96x384xbf16>, vector<384x640xbf16>, vector<96x640xf32> -> vector<96x640xf32>
    %37 = arith.addf %32, %36 : vector<96x640xf32>
    %c0_39 = arith.constant 0 : index
    %c0_40 = arith.constant 0 : index
    %38 = vector.load %arg5[%c0_39, %c0_40] : memref<1x640xf32, #tpu.memory_space<vmem>>, vector<1x640xf32>
    %39 = vector.broadcast %38 : vector<1x640xf32> to vector<96x640xf32>
    %40 = arith.addf %37, %39 : vector<96x640xf32>
    %cst_41 = arith.constant 0.000000e+00 : f32
    %41 = vector.broadcast %cst_41 : f32 to vector<96x640xf32>
    %42 = arith.maximumf %40, %41 : vector<96x640xf32>
    %43 = arith.truncf %42 : vector<96x640xf32> to vector<96x640xbf16>
    %c0_42 = arith.constant 0 : index
    %c0_43 = arith.constant 0 : index
    %44 = vector.load %arg12[%c0_42, %c0_43] : memref<96x640xbf16, #tpu.memory_space<vmem>>, vector<96x640xbf16>
    tpu.vector_store %arg12[%c0_42, %c0_43], %43 {strides = array<i32>} : memref<96x640xbf16, #tpu.memory_space<vmem>>, vector<96x640xbf16>,
    %c0_44 = arith.constant 0 : index
    %c0_45 = arith.constant 0 : index
    %45 = vector.load %arg12[%c0_44, %c0_45] : memref<96x640xbf16, #tpu.memory_space<vmem>>, vector<16x640xbf16>
    %c0_46 = arith.constant 0 : index
    %c0_47 = arith.constant 0 : index
    %c0_48 = arith.constant 0 : index
    %46 = vector.load %arg6[%c0_46, %c0_47, %c0_48] : memref<6x640x128xbf16, #tpu.memory_space<vmem>>, vector<1x640x128xbf16>
    %47 = vector.shape_cast %46 : vector<1x640x128xbf16> to vector<640x128xbf16>
    %cst_49 = arith.constant dense<0.000000e+00> : vector<16x128xf32>
    %48 = tpu.matmul %45, %47, %cst_49 {dimension_numbers = #tpu.dot_dimension_numbers<[1], [0], [0], [1], [0, 0, 1, 1], [], []>} : vector<16x640xbf16>, vector<640x128xbf16>, vector<16x128xf32> -> vector<16x128xf32>
    %c16_50 = arith.constant 16 : index
    %c0_51 = arith.constant 0 : index
    %49 = vector.load %arg12[%c16_50, %c0_51] : memref<96x640xbf16, #tpu.memory_space<vmem>>, vector<16x640xbf16>
    %c1_52 = arith.constant 1 : index
    %c0_53 = arith.constant 0 : index
    %c0_54 = arith.constant 0 : index
    %50 = vector.load %arg6[%c1_52, %c0_53, %c0_54] : memref<6x640x128xbf16, #tpu.memory_space<vmem>>, vector<1x640x128xbf16>
    %51 = vector.shape_cast %50 : vector<1x640x128xbf16> to vector<640x128xbf16>
    %cst_55 = arith.constant dense<0.000000e+00> : vector<16x128xf32>
    %52 = tpu.matmul %49, %51, %cst_55 {dimension_numbers = #tpu.dot_dimension_numbers<[1], [0], [0], [1], [0, 0, 1, 1], [], []>} : vector<16x640xbf16>, vector<640x128xbf16>, vector<16x128xf32> -> vector<16x128xf32>
    %53 = arith.addf %48, %52 : vector<16x128xf32>
    %c32_56 = arith.constant 32 : index
    %c0_57 = arith.constant 0 : index
    %54 = vector.load %arg12[%c32_56, %c0_57] : memref<96x640xbf16, #tpu.memory_space<vmem>>, vector<16x640xbf16>
    %c2_58 = arith.constant 2 : index
    %c0_59 = arith.constant 0 : index
    %c0_60 = arith.constant 0 : index
    %55 = vector.load %arg6[%c2_58, %c0_59, %c0_60] : memref<6x640x128xbf16, #tpu.memory_space<vmem>>, vector<1x640x128xbf16>
    %56 = vector.shape_cast %55 : vector<1x640x128xbf16> to vector<640x128xbf16>
    %cst_61 = arith.constant dense<0.000000e+00> : vector<16x128xf32>
    %57 = tpu.matmul %54, %56, %cst_61 {dimension_numbers = #tpu.dot_dimension_numbers<[1], [0], [0], [1], [0, 0, 1, 1], [], []>} : vector<16x640xbf16>, vector<640x128xbf16>, vector<16x128xf32> -> vector<16x128xf32>
    %58 = arith.addf %53, %57 : vector<16x128xf32>
    %c48 = arith.constant 48 : index
    %c0_62 = arith.constant 0 : index
    %59 = vector.load %arg12[%c48, %c0_62] : memref<96x640xbf16, #tpu.memory_space<vmem>>, vector<16x640xbf16>
    %c3 = arith.constant 3 : index
    %c0_63 = arith.constant 0 : index
    %c0_64 = arith.constant 0 : index
    %60 = vector.load %arg6[%c3, %c0_63, %c0_64] : memref<6x640x128xbf16, #tpu.memory_space<vmem>>, vector<1x640x128xbf16>
    %61 = vector.shape_cast %60 : vector<1x640x128xbf16> to vector<640x128xbf16>
    %cst_65 = arith.constant dense<0.000000e+00> : vector<16x128xf32>
    %62 = tpu.matmul %59, %61, %cst_65 {dimension_numbers = #tpu.dot_dimension_numbers<[1], [0], [0], [1], [0, 0, 1, 1], [], []>} : vector<16x640xbf16>, vector<640x128xbf16>, vector<16x128xf32> -> vector<16x128xf32>
    %63 = arith.addf %58, %62 : vector<16x128xf32>
    %c64 = arith.constant 64 : index
    %c0_66 = arith.constant 0 : index
    %64 = vector.load %arg12[%c64, %c0_66] : memref<96x640xbf16, #tpu.memory_space<vmem>>, vector<16x640xbf16>
    %c4 = arith.constant 4 : index
    %c0_67 = arith.constant 0 : index
    %c0_68 = arith.constant 0 : index
    %65 = vector.load %arg6[%c4, %c0_67, %c0_68] : memref<6x640x128xbf16, #tpu.memory_space<vmem>>, vector<1x640x128xbf16>
    %66 = vector.shape_cast %65 : vector<1x640x128xbf16> to vector<640x128xbf16>
    %cst_69 = arith.constant dense<0.000000e+00> : vector<16x128xf32>
    %67 = tpu.matmul %64, %66, %cst_69 {dimension_numbers = #tpu.dot_dimension_numbers<[1], [0], [0], [1], [0, 0, 1, 1], [], []>} : vector<16x640xbf16>, vector<640x128xbf16>, vector<16x128xf32> -> vector<16x128xf32>
    %68 = arith.addf %63, %67 : vector<16x128xf32>
    %c80 = arith.constant 80 : index
    %c0_70 = arith.constant 0 : index
    %69 = vector.load %arg12[%c80, %c0_70] : memref<96x640xbf16, #tpu.memory_space<vmem>>, vector<16x640xbf16>
    %c5 = arith.constant 5 : index
    %c0_71 = arith.constant 0 : index
    %c0_72 = arith.constant 0 : index
    %70 = vector.load %arg6[%c5, %c0_71, %c0_72] : memref<6x640x128xbf16, #tpu.memory_space<vmem>>, vector<1x640x128xbf16>
    %71 = vector.shape_cast %70 : vector<1x640x128xbf16> to vector<640x128xbf16>
    %cst_73 = arith.constant dense<0.000000e+00> : vector<16x128xf32>
    %72 = tpu.matmul %69, %71, %cst_73 {dimension_numbers = #tpu.dot_dimension_numbers<[1], [0], [0], [1], [0, 0, 1, 1], [], []>} : vector<16x640xbf16>, vector<640x128xbf16>, vector<16x128xf32> -> vector<16x128xf32>
    %73 = arith.addf %68, %72 : vector<16x128xf32>
    %c0_74 = arith.constant 0 : index
    %c0_75 = arith.constant 0 : index
    %74 = vector.load %arg7[%c0_74, %c0_75] : memref<1x128xf32, #tpu.memory_space<vmem>>, vector<1x128xf32>
    %75 = vector.broadcast %74 : vector<1x128xf32> to vector<16x128xf32>
    %76 = arith.addf %73, %75 : vector<16x128xf32>
    %cst_76 = arith.constant 0.000000e+00 : f32
    %77 = vector.broadcast %cst_76 : f32 to vector<16x128xf32>
    %78 = arith.maximumf %76, %77 : vector<16x128xf32>
    %79 = arith.truncf %78 : vector<16x128xf32> to vector<16x128xbf16>
    %c0_77 = arith.constant 0 : index
    %c0_78 = arith.constant 0 : index
    %80 = vector.load %arg8[%c0_77, %c0_78] : memref<128x128xbf16, #tpu.memory_space<vmem>>, vector<128x128xbf16>
    %cst_79 = arith.constant dense<0.000000e+00> : vector<16x128xf32>
    %81 = tpu.matmul %79, %80, %cst_79 {dimension_numbers = #tpu.dot_dimension_numbers<[1], [0], [0], [1], [0, 0, 1, 1], [], []>} : vector<16x128xbf16>, vector<128x128xbf16>, vector<16x128xf32> -> vector<16x128xf32>
    %c0_80 = arith.constant 0 : index
    %c0_81 = arith.constant 0 : index
    %82 = vector.load %arg9[%c0_80, %c0_81] : memref<1x128xf32, #tpu.memory_space<vmem>>, vector<1x128xf32>
    %83 = vector.broadcast %82 : vector<1x128xf32> to vector<16x128xf32>
    %84 = arith.addf %81, %83 : vector<16x128xf32>
    %c0_82 = arith.constant 0 : index
    %c0_83 = arith.constant 0 : index
    %85 = vector.load %arg10[%c0_82, %c0_83] : memref<16x128xf32, #tpu.memory_space<vmem>>, vector<16x128xf32>
    tpu.vector_store %arg10[%c0_82, %c0_83], %84 {strides = array<i32>} : memref<16x128xf32, #tpu.memory_space<vmem>>, vector<16x128xf32>,
    return
  }
  func.func @transform_0(%arg0: i32) -> (i32, i32) {
    %c0_i32 = arith.constant 0 : i32
    %c0_i32_0 = arith.constant 0 : i32
    return %arg0, %c0_i32 : i32, i32
  }
  func.func @transform_1(%arg0: i32) -> (i32, i32, i32) {
    %c0_i32 = arith.constant 0 : i32
    %c0_i32_0 = arith.constant 0 : i32
    %c0_i32_1 = arith.constant 0 : i32
    %c0_i32_2 = arith.constant 0 : i32
    return %c0_i32, %c0_i32_0, %c0_i32_1 : i32, i32, i32
  }
  func.func @transform_2(%arg0: i32) -> (i32, i32) {
    %c0_i32 = arith.constant 0 : i32
    %c0_i32_0 = arith.constant 0 : i32
    %c0_i32_1 = arith.constant 0 : i32
    return %c0_i32, %c0_i32_0 : i32, i32
  }
  func.func @transform_3(%arg0: i32) -> (i32, i32, i32) {
    %c0_i32 = arith.constant 0 : i32
    %c0_i32_0 = arith.constant 0 : i32
    %c0_i32_1 = arith.constant 0 : i32
    %c0_i32_2 = arith.constant 0 : i32
    return %c0_i32, %c0_i32_0, %c0_i32_1 : i32, i32, i32
  }
  func.func @transform_4(%arg0: i32) -> (i32, i32) {
    %c0_i32 = arith.constant 0 : i32
    %c0_i32_0 = arith.constant 0 : i32
    %c0_i32_1 = arith.constant 0 : i32
    return %c0_i32, %c0_i32_0 : i32, i32
  }
  func.func @transform_5(%arg0: i32) -> (i32, i32, i32) {
    %c0_i32 = arith.constant 0 : i32
    %c0_i32_0 = arith.constant 0 : i32
    %c0_i32_1 = arith.constant 0 : i32
    %c0_i32_2 = arith.constant 0 : i32
    return %c0_i32, %c0_i32_0, %c0_i32_1 : i32, i32, i32
  }
  func.func @transform_6(%arg0: i32) -> (i32, i32) {
    %c0_i32 = arith.constant 0 : i32
    %c0_i32_0 = arith.constant 0 : i32
    %c0_i32_1 = arith.constant 0 : i32
    return %c0_i32, %c0_i32_0 : i32, i32
  }
  func.func @transform_7(%arg0: i32) -> (i32, i32) {
    %c0_i32 = arith.constant 0 : i32
    %c0_i32_0 = arith.constant 0 : i32
    %c0_i32_1 = arith.constant 0 : i32
    return %c0_i32, %c0_i32_0 : i32, i32
  }
  func.func @transform_8(%arg0: i32) -> (i32, i32) {
    %c0_i32 = arith.constant 0 : i32
    %c0_i32_0 = arith.constant 0 : i32
    %c0_i32_1 = arith.constant 0 : i32
    return %c0_i32, %c0_i32_0 : i32, i32
  }
  func.func @transform_9(%arg0: i32) -> (i32, i32) {
    %c0_i32 = arith.constant 0 : i32
    %c0_i32_0 = arith.constant 0 : i32
    return %arg0, %c0_i32 : i32, i32
  }
}

</mosaic_0001>

<bundles_post_ra>
// kernel: dqn_forward.1
= control target key start
LH: loop header
LB: loop body
LE: loop exit
PB: predicated region body
PF: predicated region fallthrough
CT: control target
= control target key end

     0   :  { %14 = vsyncpa [#allocation5], 0  ;;  %s14431_s0 = inlined_call_operand.vmem [shape: bf16[128,128], index: 0, kind: input, shape index: {}]   ;;  %s14432_s1 = inlined_call_operand.hbm [shape: bf16[3,128,384], index: 1, kind: input, shape index: {}]   ;;  %s14433_s2 = inlined_call_operand.hbm [shape: f32[1,384], index: 2, kind: input, shape index: {}]   ;;  %s14434_s3 = inlined_call_operand.hbm [shape: bf16[3,384,640], index: 3, kind: input, shape index: {}]   ;;  %s14435_s4 = inlined_call_operand.hbm [shape: f32[1,640], index: 4, kind: input, shape index: {}]   ;;  %s14436_s5 = inlined_call_operand.hbm [shape: bf16[6,640,128], index: 5, kind: input, shape index: {}]   ;;  %s14437_s6 = inlined_call_operand.hbm [shape: f32[1,128], index: 6, kind: input, shape index: {}]   ;;  %s14438_s7 = inlined_call_operand.hbm [shape: bf16[128,128], index: 7, kind: input, shape index: {}]   ;;  %s14439_s8 = inlined_call_operand.hbm [shape: f32[1,128], index: 8, kind: input, shape index: {}]   ;;  %s14440_s9 = inlined_call_operand.vmem [shape: f32[16,128], index: 9, kind: output, shape index: {}]  }
   0x1   :  { %15 = vsyncpa [#allocation7], 0 }
   0x2   :  { %16 = vsyncpa [#allocation10], 0 }
   0x3   :  { %17 = vsyncpa [#allocation13], 0  ;;  %s39_s11 = sshll.u32 %s14433_s2, 4  ;;  %s40_s11 = int_to_ptr.hbm [resolvable:$true] %s39_s11 }
   0x4   :  { %18 = vsyncpa [#allocation16], 0  ;;  %s12521_s12 = smov [#allocation6]   ;;  %s63_s16 = sshll.u32 %s14435_s4, 4  ;;  %s64_s16 = int_to_ptr.hbm [resolvable:$true] %s63_s16 }
   0x5   :  { %s41_s13 = sshll.u32 %s12521_s12, 4  ;;  %s12522_s17 = smov [#allocation9]   ;;  %s42_s13 = int_to_ptr.vmem [resolvable:$true] %s41_s13 }
   0x6   :  { %44 = dma.hbm_to_vmem [thread:$0]  %s40_s11, 48, %s42_s13, [#allocation7]  }
   0x7   :  { %s65_s18 = sshll.u32 %s12522_s17, 4  ;;  %s87_s21 = sshll.u32 %s14437_s6, 4  ;;  %s66_s18 = int_to_ptr.vmem [resolvable:$true] %s65_s18  ;;  %s88_s21 = int_to_ptr.hbm [resolvable:$true] %s87_s21 }
   0x8   :  { %68 = dma.hbm_to_vmem [thread:$0]  %s64_s16, 80, %s66_s18, [#allocation10]  }
   0x9   :  { %s25_s23 = sshll.u32 %s14432_s1, 4  ;;  %s12523_s24 = smov [#allocation12]   ;;  %s26_s23 = int_to_ptr.hbm [resolvable:$true] %s25_s23 }
   0xa   :  { %s89_s25 = sshll.u32 %s12523_s24, 4  ;;  %s12524_s4 = smov [#allocation4]   ;;  %s90_s25 = int_to_ptr.vmem [resolvable:$true] %s89_s25 }
   0xb   :  { %92 = dma.hbm_to_vmem [thread:$0]  %s88_s21, 16, %s90_s25, [#allocation13]  }
   0xc   :  { %s27_s26 = sshll.u32 %s12524_s4, 4  ;;  %s12525_s27 = smov 192   ;;  %s28_s26 = int_to_ptr.vmem [resolvable:$true] %s27_s26 }
   0xd   :  { %s12526_s28 = smov 12   ;;  %s49_s30 = sshll.u32 %s14434_s3, 4  ;;  %s50_s30 = int_to_ptr.hbm [resolvable:$true] %s49_s30 }
   0xe   :  { %33 = dma.hbm_to_vmem [thread:$0]  %s26_s23, 9216, %s28_s26, [#allocation5], %s12525_s27, %s12525_s27, %s12526_s28  }
   0xf   :  { %s12527_s10 = smov [#allocation8]   ;;  %s73_s13 = sshll.u32 %s14436_s5, 4  ;;  %s74_s13 = int_to_ptr.hbm [resolvable:$true] %s73_s13 }
  0x10   :  { %s51_s11 = sshll.u32 %s12527_s10, 4  ;;  %s12528_s14 = smov 320   ;;  %s52_s11 = int_to_ptr.vmem [resolvable:$true] %s51_s11 }
  0x11   :  { %s12529_s15 = smov 20   ;;  %s12530_s16 = smov [#allocation11]  }
  0x12   :  { %57 = dma.hbm_to_vmem [thread:$0]  %s50_s30, 46080, %s52_s11, [#allocation7], %s12528_s14, %s12528_s14, %s12529_s15  }
  0x13   :  { %s75_s17 = sshll.u32 %s12530_s16, 4  ;;  %s12531_s18 = smov 64   ;;  %s76_s17 = int_to_ptr.vmem [resolvable:$true] %s75_s17 }
  0x14   :  { %s12532_s19 = smov 4   ;;  %s97_s21 = sshll.u32 %s14438_s7, 4  ;;  %s98_s21 = int_to_ptr.hbm [resolvable:$true] %s97_s21 }
  0x15   :  { %81 = dma.hbm_to_vmem [thread:$0]  %s74_s13, 30720, %s76_s17, [#allocation10], %s12531_s18, %s12531_s18, %s12532_s19  }
  0x16   :  { %s12533_s2 = smov [#allocation14]   ;;  %s111_s24 = sshll.u32 %s14439_s8, 4  ;;  %s112_s24 = int_to_ptr.hbm [resolvable:$true] %s111_s24 }
  0x17   :  { %s99_s22 = sshll.u32 %s12533_s2, 4  ;;  %s12534_s25 = smov [#allocation15]   ;;  %s100_s22 = int_to_ptr.vmem [resolvable:$true] %s99_s22 }
  0x18   :  { %105 = dma.hbm_to_vmem [thread:$0]  %s98_s21, 1024, %s100_s22, [#allocation13], %s12531_s18, %s12531_s18, %s12532_s19  }
  0x19   :  { %s113_s4 = sshll.u32 %s12534_s25, 4  ;;  %s114_s4 = int_to_ptr.vmem [resolvable:$true] %s113_s4 }
  0x1a   :  { %116 = dma.hbm_to_vmem [thread:$0]  %s112_s24, 16, %s114_s4, [#allocation16]  }
  0x1b   :  { %12511 = dma.done.wait [#allocation5], 9216  }
  0x1c   :  { %12512 = vsyncadd [#allocation5], 4294958080 }
  0x1d   :  { %12513 = dma.done.wait [#allocation7], 46128  }
  0x1e   :  { %12514 = vsyncadd [#allocation7], 4294921168 }
  0x1f   :  { %12515 = dma.done.wait [#allocation10], 30800  }
  0x20   :  { %12516 = vsyncadd [#allocation10], 4294936496 }
  0x21   :  { %12517 = dma.done.wait [#allocation13], 1040  }
  0x22   :  { %12518 = vsyncadd [#allocation13], 4294966256 }
  0x23   :  { %12519 = dma.done.wait [#allocation16], 16  }
  0x24   :  { %12520 = vsyncadd [#allocation16], 4294967280  ;;  %v8601_v0 = vld [vmem:[#allocation4 + $0x168] sm:$0xf]  ;;  %v11592_v1 = vld [vmem:[#allocation4 + $0x170] sm:$0xf0] }
  0x25   :  { %v11591_v2 = vld [vmem:[#allocation4 + $0x16c] sm:$0xf]  ;;  %v8602_v3 = vor.u32 %v11592_v1, %v8601_v0  ;;  %v8603_v4 = vld [vmem:[#allocation4 + $0x174] sm:$0xf0]  ;;  %v8609_v5 = vld [vmem:[#allocation4 + $0x170] sm:$0xf] }
  0x26   :  { %v11593_v6 = vld [vmem:[#allocation4 + $0x178] sm:$0xf0]  ;;  %v8606_v7 = vor.u32 %v11591_v2, %v8603_v4  ;;  %v8701_v9 = vld [vmem:[#allocation4 + $0xa8] sm:$0xf]  ;;  %v11567_v10 = vld [vmem:[#allocation4 + $0xb0] sm:$0xf0] }
  0x27   :  { %v8610_v8 = vor.u32 %v11593_v6, %v8609_v5  ;;  %v8589_v11 = vld [vmem:[#allocation4 + $0x150] sm:$0xf]  ;;  %393 = vmatpush.bf16.msra.mxu0 %v8602_v3  ;;  %v8702_v12 = vor.u32 %v11567_v10, %v8701_v9  ;;  %v11589_v13 = vld [vmem:[#allocation4 + $0x158] sm:$0xf0]  ;;  %v11588_v14 = vld [vmem:[#allocation4 + $0x154] sm:$0xf] }
  0x28   :  { %v8591_v15 = vld [vmem:[#allocation4 + $0x15c] sm:$0xf0]  ;;  %432 = vmatpush.bf16.msra.mxu1 %v8606_v7  ;;  %v8590_v16 = vor.u32 %v11589_v13, %v8589_v11  ;;  %v8597_v18 = vld [vmem:[#allocation4 + $0x158] sm:$0xf]  ;;  %v11590_v19 = vld [vmem:[#allocation4 + $0x160] sm:$0xf0] }
  0x29   :  { %471 = vmatpush.bf16.msra.mxu2 %v8610_v8  ;;  %v8594_v17 = vor.u32 %v11588_v14, %v8591_v15  ;;  %v8689_v20 = vld [vmem:[#allocation4 + $0x90] sm:$0xf]  ;;  %644 = vmatpush.bf16.msra.mxu3 %v8702_v12  ;;  %v8598_v21 = vor.u32 %v11590_v19, %v8597_v18  ;;  %v11564_v22 = vld [vmem:[#allocation4 + $0x98] sm:$0xf0]  ;;  %v8577_v23 = vld [vmem:[#allocation4 + $0x138] sm:$0xf] }
  0x2a   :  { %v11586_v24 = vld [vmem:[#allocation4 + $0x140] sm:$0xf0]  ;;  %v8690_v25 = vor.u32 %v11564_v22, %v8689_v20  ;;  %v11585_v26 = vld [vmem:[#allocation4 + $0x13c] sm:$0xf]  ;;  %v8579_v27 = vld [vmem:[#allocation4 + $0x144] sm:$0xf0] }
  0x2b   :  { %v8585_v28 = vld [vmem:[#allocation4 + $0x140] sm:$0xf]  ;;  %394 = vmatpush.bf16.msra.mxu0 %v8590_v16  ;;  %v8578_v29 = vor.u32 %v11586_v24, %v8577_v23  ;;  %v11587_v30 = vld [vmem:[#allocation4 + $0x148] sm:$0xf0]  ;;  %v8677_v31 = vld [vmem:[#allocation4 + $0x78] sm:$0xf]  ;;  %v8582_v33 = vor.u32 %v11585_v26, %v8579_v27 }
  0x2c   :  { %v11561_v32 = vld [vmem:[#allocation4 + $0x80] sm:$0xf0]  ;;  %433 = vmatpush.bf16.msra.mxu1 %v8594_v17  ;;  %v8586_v34 = vor.u32 %v11587_v30, %v8585_v28  ;;  %v8565_v35 = vld [vmem:[#allocation4 + $0x120] sm:$0xf]  ;;  %v11583_v36 = vld [vmem:[#allocation4 + $0x128] sm:$0xf0] }
  0x2d   :  { %472 = vmatpush.bf16.msra.mxu2 %v8598_v21  ;;  %v11582_v37 = vld [vmem:[#allocation4 + $0x124] sm:$0xf]  ;;  %645 = vmatpush.bf16.msra.mxu3 %v8690_v25  ;;  %v8678_v38 = vor.u32 %v11561_v32, %v8677_v31  ;;  %v8567_v39 = vld [vmem:[#allocation4 + $0x12c] sm:$0xf0]  ;;  %v8573_v40 = vld [vmem:[#allocation4 + $0x128] sm:$0xf]  ;;  %v8566_v44 = vor.u32 %v11583_v36, %v8565_v35 }
  0x2e   :  { %v11584_v41 = vld [vmem:[#allocation4 + $0x130] sm:$0xf0]  ;;  %v8665_v42 = vld [vmem:[#allocation4 + $0x60] sm:$0xf]  ;;  %v11558_v43 = vld [vmem:[#allocation4 + $0x68] sm:$0xf0]  ;;  %v8570_v45 = vor.u32 %v11582_v37, %v8567_v39 }
  0x2f   :  { %395 = vmatpush.bf16.msra.mxu0 %v8578_v29  ;;  %v8574_v46 = vor.u32 %v11584_v41, %v8573_v40  ;;  %v8553_v47 = vld [vmem:[#allocation4 + $0x108] sm:$0xf]  ;;  %v11580_v48 = vld [vmem:[#allocation4 + $0x110] sm:$0xf0]  ;;  %v11579_v49 = vld [vmem:[#allocation4 + $0x10c] sm:$0xf]  ;;  %v8666_v50 = vor.u32 %v11558_v43, %v8665_v42 }
  0x30   :  { %434 = vmatpush.bf16.msra.mxu1 %v8582_v33  ;;  %v8555_v51 = vld [vmem:[#allocation4 + $0x114] sm:$0xf0]  ;;  %v8561_v52 = vld [vmem:[#allocation4 + $0x110] sm:$0xf]  ;;  %v11581_v53 = vld [vmem:[#allocation4 + $0x118] sm:$0xf0]  ;;  %v8554_v56 = vor.u32 %v11580_v48, %v8553_v47 }
  0x31   :  { %473 = vmatpush.bf16.msra.mxu2 %v8586_v34  ;;  %646 = vmatpush.bf16.msra.mxu3 %v8678_v38  ;;  %v8653_v54 = vld [vmem:[#allocation4 + $0x48] sm:$0xf]  ;;  %v11555_v55 = vld [vmem:[#allocation4 + $0x50] sm:$0xf0]  ;;  %v8558_v57 = vor.u32 %v11579_v49, %v8555_v51  ;;  %v8562_v58 = vor.u32 %v11581_v53, %v8561_v52  ;;  %v8541_v59 = vld [vmem:[#allocation4 + $0xf0] sm:$0xf] }
  0x32   :  { %v11577_v60 = vld [vmem:[#allocation4 + $0xf8] sm:$0xf0]  ;;  %v11576_v61 = vld [vmem:[#allocation4 + $0xf4] sm:$0xf]  ;;  %v8654_v62 = vor.u32 %v11555_v55, %v8653_v54  ;;  %v8543_v63 = vld [vmem:[#allocation4 + $0xfc] sm:$0xf0] }
  0x33   :  { %396 = vmatpush.bf16.msra.mxu0 %v8566_v44  ;;  %v8549_v0 = vld [vmem:[#allocation4 + $0xf8] sm:$0xf]  ;;  %v11578_v1 = vld [vmem:[#allocation4 + $0x100] sm:$0xf0]  ;;  %v8641_v2 = vld [vmem:[#allocation4 + $0x30] sm:$0xf]  ;;  %v8542_v4 = vor.u32 %v11577_v60, %v8541_v59  ;;  %v8546_v5 = vor.u32 %v11576_v61, %v8543_v63 }
  0x34   :  { %435 = vmatpush.bf16.msra.mxu1 %v8570_v45  ;;  %v11552_v3 = vld [vmem:[#allocation4 + $0x38] sm:$0xf0]  ;;  %v8550_v6 = vor.u32 %v11578_v1, %v8549_v0  ;;  %v8529_v7 = vld [vmem:[#allocation4 + $0xd8] sm:$0xf]  ;;  %v11574_v8 = vld [vmem:[#allocation4 + $0xe0] sm:$0xf0] }
  0x35   :  { %474 = vmatpush.bf16.msra.mxu2 %v8574_v46  ;;  %647 = vmatpush.bf16.msra.mxu3 %v8666_v50  ;;  %v11573_v9 = vld [vmem:[#allocation4 + $0xdc] sm:$0xf]  ;;  %v8642_v10 = vor.u32 %v11552_v3, %v8641_v2  ;;  %v8531_v11 = vld [vmem:[#allocation4 + $0xe4] sm:$0xf0]  ;;  %v8537_v12 = vld [vmem:[#allocation4 + $0xe0] sm:$0xf]  ;;  %v8530_v16 = vor.u32 %v11574_v8, %v8529_v7 }
  0x36   :  { %v11575_v13 = vld [vmem:[#allocation4 + $0xe8] sm:$0xf0]  ;;  %v8629_v14 = vld [vmem:[#allocation4 + $0x18] sm:$0xf]  ;;  %v11549_v15 = vld [vmem:[#allocation4 + $0x20] sm:$0xf0]  ;;  %v8534_v17 = vor.u32 %v11573_v9, %v8531_v11 }
  0x37   :  { %397 = vmatpush.bf16.msra.mxu0 %v8554_v56  ;;  %v8538_v18 = vor.u32 %v11575_v13, %v8537_v12  ;;  %v8517_v19 = vld [vmem:[#allocation4 + $0xc0] sm:$0xf]  ;;  %v11571_v20 = vld [vmem:[#allocation4 + $0xc8] sm:$0xf0]  ;;  %v11570_v21 = vld [vmem:[#allocation4 + $0xc4] sm:$0xf]  ;;  %v8630_v22 = vor.u32 %v11549_v15, %v8629_v14 }
  0x38   :  { %436 = vmatpush.bf16.msra.mxu1 %v8558_v57  ;;  %v8519_v23 = vld [vmem:[#allocation4 + $0xcc] sm:$0xf0]  ;;  %v8525_v24 = vld [vmem:[#allocation4 + $0xc8] sm:$0xf]  ;;  %v11572_v25 = vld [vmem:[#allocation4 + $0xd0] sm:$0xf0]  ;;  %v8518_v28 = vor.u32 %v11571_v20, %v8517_v19 }
  0x39   :  { %475 = vmatpush.bf16.msra.mxu2 %v8562_v58  ;;  %648 = vmatpush.bf16.msra.mxu3 %v8654_v62  ;;  %v8617_v26 = vld [vmem:[#allocation4] sm:$0xf]  ;;  %v11546_v27 = vld [vmem:[#allocation4 + $0x8] sm:$0xf0]  ;;  %v8522_v29 = vor.u32 %v11570_v21, %v8519_v23  ;;  %v8526_v30 = vor.u32 %v11572_v25, %v8525_v24  ;;  %v12613_v32 = vld [vmem:[%s14431_s0 + $0x8] sm:$0xff] }
  0x3a   :  { %v8618_v31 = vor.u32 %v11546_v27, %v8617_v26  ;;  %v12618_v33 = vld [vmem:[%s14431_s0] sm:$0xff]  ;;  %v12627_v34 = vld [vmem:[%s14431_s0 + $0x10] sm:$0xff]  ;;  %v11566_v35 = vld [vmem:[#allocation4 + $0xac] sm:$0xf] }
  0x3b   :  { %398 = vmatpush.bf16.msra.mxu0 %v8542_v4  ;;  %v8703_v36 = vld [vmem:[#allocation4 + $0xb4] sm:$0xf0]  ;;  %v8821_v37 = vld [vmem:[#allocation4 + $0x228] sm:$0xf]  ;;  %v11622_v39 = vld [vmem:[#allocation4 + $0x230] sm:$0xf0] }
  0x3c   :  { %437 = vmatpush.bf16.msra.mxu1 %v8546_v5  ;;  %v8706_v38 = vor.u32 %v11566_v35, %v8703_v36  ;;  %v11621_v40 = vld [vmem:[#allocation4 + $0x22c] sm:$0xf]  ;;  %v8823_v41 = vld [vmem:[#allocation4 + $0x234] sm:$0xf0]  ;;  %v8822_v42 = vor.u32 %v11622_v39, %v8821_v37  ;;  %v11563_v44 = vld [vmem:[#allocation4 + $0x94] sm:$0xf] }
  0x3d   :  { %476 = vmatpush.bf16.msra.mxu2 %v8550_v6  ;;  %649 = vmatpush.bf16.msra.mxu3 %v8642_v10  ;;  %v8826_v43 = vor.u32 %v11621_v40, %v8823_v41  ;;  %v8691_v45 = vld [vmem:[#allocation4 + $0x9c] sm:$0xf0]  ;;  %v12636_v47 = vld [vmem:[%s14431_s0 + $0x18] sm:$0xff]  ;;  %v8709_v48 = vld [vmem:[#allocation4 + $0xb0] sm:$0xf] }
  0x3e   :  { %v8694_v46 = vor.u32 %v11563_v44, %v8691_v45  ;;  %v11568_v49 = vld [vmem:[#allocation4 + $0xb8] sm:$0xf0]  ;;  %v8809_v51 = vld [vmem:[#allocation4 + $0x210] sm:$0xf]  ;;  %v11618_v53 = vld [vmem:[#allocation4 + $0x214] sm:$0xf] }
  0x3f   :  { %399 = vmatpush.bf16.msra.mxu0 %v8530_v16  ;;  %v8710_v50 = vor.u32 %v11568_v49, %v8709_v48  ;;  %v11619_v52 = vld [vmem:[#allocation4 + $0x218] sm:$0xf0]  ;;  %v8811_v55 = vld [vmem:[#allocation4 + $0x21c] sm:$0xf0]  ;;  %v8697_v56 = vld [vmem:[#allocation4 + $0x98] sm:$0xf] }
  0x40   :  { %438 = vmatpush.bf16.msra.mxu1 %v8534_v17  ;;  %v8810_v54 = vor.u32 %v11619_v52, %v8809_v51  ;;  %v11565_v57 = vld [vmem:[#allocation4 + $0xa0] sm:$0xf0]  ;;  %v8814_v58 = vor.u32 %v11618_v53, %v8811_v55  ;;  %v11560_v60 = vld [vmem:[#allocation4 + $0x7c] sm:$0xf]  ;;  %v8679_v61 = vld [vmem:[#allocation4 + $0x84] sm:$0xf0] }
  0x41   :  { %477 = vmatpush.bf16.msra.mxu2 %v8538_v18  ;;  %650 = vmatpush.bf16.msra.mxu3 %v8630_v22  ;;  %v8698_v59 = vor.u32 %v11565_v57, %v8697_v56  ;;  %v8685_v62 = vld [vmem:[#allocation4 + $0x80] sm:$0xf]  ;;  %v8682_v63 = vor.u32 %v11560_v60, %v8679_v61  ;;  %v11562_v0 = vld [vmem:[#allocation4 + $0x88] sm:$0xf0]  ;;  %v8797_v1 = vld [vmem:[#allocation4 + $0x1f8] sm:$0xf] }
  0x42   :  { %v11616_v2 = vld [vmem:[#allocation4 + $0x200] sm:$0xf0]  ;;  %v11615_v4 = vld [vmem:[#allocation4 + $0x1fc] sm:$0xf]  ;;  %v8799_v5 = vld [vmem:[#allocation4 + $0x204] sm:$0xf0]  ;;  %v8686_v7 = vor.u32 %v11562_v0, %v8685_v62 }
  0x43   :  { %400 = vmatpush.bf16.msra.mxu0 %v8518_v28  ;;  %v8798_v3 = vor.u32 %v11616_v2, %v8797_v1  ;;  %v11557_v6 = vld [vmem:[#allocation4 + $0x64] sm:$0xf]  ;;  %v8802_v8 = vor.u32 %v11615_v4, %v8799_v5  ;;  %v8667_v9 = vld [vmem:[#allocation4 + $0x6c] sm:$0xf0]  ;;  %v8673_v10 = vld [vmem:[#allocation4 + $0x68] sm:$0xf] }
  0x44   :  { %439 = vmatpush.bf16.msra.mxu1 %v8522_v29  ;;  %v11559_v11 = vld [vmem:[#allocation4 + $0x70] sm:$0xf0]  ;;  %v8670_v12 = vor.u32 %v11557_v6, %v8667_v9  ;;  %v8785_v13 = vld [vmem:[#allocation4 + $0x1e0] sm:$0xf]  ;;  %v11613_v14 = vld [vmem:[#allocation4 + $0x1e8] sm:$0xf0] }
  0x45   :  { %478 = vmatpush.bf16.msra.mxu2 %v8526_v30  ;;  %651 = vmatpush.bf16.msra.mxu3 %v8618_v31  ;;  %v11612_v15 = vld [vmem:[#allocation4 + $0x1e4] sm:$0xf]  ;;  %v8786_v16 = vor.u32 %v11613_v14, %v8785_v13  ;;  %v8787_v17 = vld [vmem:[#allocation4 + $0x1ec] sm:$0xf0]  ;;  %v8674_v19 = vor.u32 %v11559_v11, %v8673_v10  ;;  %v11554_v21 = vld [vmem:[#allocation4 + $0x4c] sm:$0xf] }
  0x46   :  { %401 = vmatmul.bf16.vlgmr.msra.gmra.mxu0 %v12613_v32  ;;  %v8790_v18 = vor.u32 %v11612_v15, %v8787_v17  ;;  %v12645_v20 = vld [vmem:[%s14431_s0 + $0x20] sm:$0xff]  ;;  %v8655_v22 = vld [vmem:[#allocation4 + $0x54] sm:$0xf0]  ;;  %v11556_v25 = vld [vmem:[#allocation4 + $0x58] sm:$0xf0] }
  0x47   :  { %440 = vmatmul.bf16.vlgmr.msra.gmra.mxu1 %v12613_v32  ;;  %683 = vmatpush.bf16.msrb.mxu0 %v8706_v38  ;;  %v8661_v23 = vld [vmem:[#allocation4 + $0x50] sm:$0xf]  ;;  %v8658_v24 = vor.u32 %v11554_v21, %v8655_v22  ;;  %v8773_v26 = vld [vmem:[#allocation4 + $0x1c8] sm:$0xf]  ;;  %v11610_v27 = vld [vmem:[#allocation4 + $0x1d0] sm:$0xf0] }
  0x48   :  { %479 = vmatmul.bf16.vlgmr.msra.gmra.mxu2 %v12613_v32  ;;  %652 = vmatmul.bf16.vlgmr.msra.gmra.mxu3 %v12618_v33  ;;  %v8662_v28 = vor.u32 %v11556_v25, %v8661_v23  ;;  %v8774_v29 = vor.u32 %v11610_v27, %v8773_v26  ;;  %v11609_v30 = vld [vmem:[#allocation4 + $0x1cc] sm:$0xf]  ;;  %v8775_v31 = vld [vmem:[#allocation4 + $0x1d4] sm:$0xf0]  ;;  %v11551_v35 = vld [vmem:[#allocation4 + $0x34] sm:$0xf] }
  0x49   :  { %970 = vmatpush.bf16.msrb.mxu2 %v8822_v42  ;;  %1009 = vmatpush.bf16.msrb.mxu3 %v8826_v43  ;;  %v8778_v36 = vor.u32 %v11609_v30, %v8775_v31  ;;  %v8643_v37 = vld [vmem:[#allocation4 + $0x3c] sm:$0xf0]  ;;  %v8649_v38 = vld [vmem:[#allocation4 + $0x38] sm:$0xf]  ;;  %v11553_v39 = vld [vmem:[#allocation4 + $0x40] sm:$0xf0] }
  0x4a   :  { %722 = vmatpush.bf16.msrb.mxu1 %v8710_v50  ;;  %v8646_v40 = vor.u32 %v11551_v35, %v8643_v37  ;;  %v8650_v41 = vor.u32 %v11553_v39, %v8649_v38  ;;  %v8761_v42 = vld [vmem:[#allocation4 + $0x1b0] sm:$0xf]  ;;  %v11607_v43 = vld [vmem:[#allocation4 + $0x1b8] sm:$0xf0]  ;;  %v11606_v44 = vld [vmem:[#allocation4 + $0x1b4] sm:$0xf] }
  0x4b   :  { %684 = vmatpush.bf16.msrb.mxu0 %v8694_v46  ;;  %v8762_v45 = vor.u32 %v11607_v43, %v8761_v42  ;;  %v8763_v46 = vld [vmem:[#allocation4 + $0x1bc] sm:$0xf0]  ;;  %v11548_v48 = vld [vmem:[#allocation4 + $0x1c] sm:$0xf]  ;;  %v8631_v49 = vld [vmem:[#allocation4 + $0x24] sm:$0xf0] }
  0x4c   :  { %v8766_v50 = vor.u32 %v11606_v44, %v8763_v46  ;;  %v8637_v51 = vld [vmem:[#allocation4 + $0x20] sm:$0xf]  ;;  %v11550_v52 = vld [vmem:[#allocation4 + $0x28] sm:$0xf0]  ;;  %v8749_v53 = vld [vmem:[#allocation4 + $0x198] sm:$0xf] }
  0x4d   :  { %971 = vmatpush.bf16.msrb.mxu2 %v8810_v54  ;;  %1010 = vmatpush.bf16.msrb.mxu3 %v8814_v58  ;;  %v8634_v54 = vor.u32 %v11548_v48, %v8631_v49  ;;  %v11604_v55 = vld [vmem:[#allocation4 + $0x1a0] sm:$0xf0]  ;;  %v11603_v56 = vld [vmem:[#allocation4 + $0x19c] sm:$0xf]  ;;  %v8751_v57 = vld [vmem:[#allocation4 + $0x1a4] sm:$0xf0]  ;;  %v8638_v58 = vor.u32 %v11550_v52, %v8637_v51 }
  0x4e   :  { %723 = vmatpush.bf16.msrb.mxu1 %v8698_v59  ;;  %v8750_v59 = vor.u32 %v11604_v55, %v8749_v53  ;;  %v11545_v60 = vld [vmem:[#allocation4 + $0x4] sm:$0xf]  ;;  %v8619_v61 = vld [vmem:[#allocation4 + $0xc] sm:$0xf0]  ;;  %v8754_v62 = vor.u32 %v11603_v56, %v8751_v57  ;;  %v11547_v0 = vld [vmem:[#allocation4 + $0x10] sm:$0xf0] }
  0x4f   :  { %685 = vmatpush.bf16.msrb.mxu0 %v8682_v63  ;;  %v8625_v63 = vld [vmem:[#allocation4 + $0x8] sm:$0xf]  ;;  %v8622_v1 = vor.u32 %v11545_v60, %v8619_v61  ;;  %v8737_v2 = vld [vmem:[#allocation4 + $0x180] sm:$0xf]  ;;  %v12654_v4 = vld [vmem:[%s14431_s0 + $0x28] sm:$0xff] }
  0x50   :  { %v8626_v5 = vor.u32 %v11547_v0, %v8625_v63  ;;  %v11600_v6 = vld [vmem:[#allocation4 + $0x184] sm:$0xf]  ;;  %v8829_v13 = vld [vmem:[#allocation4 + $0x230] sm:$0xf]  ;;  %v11623_v14 = vld [vmem:[#allocation4 + $0x238] sm:$0xf0] }
  0x51   :  { %972 = vmatpush.bf16.msrb.mxu2 %v8798_v3  ;;  %1011 = vmatpush.bf16.msrb.mxu3 %v8802_v8  ;;  %v11601_v3 = vld [vmem:[#allocation4 + $0x188] sm:$0xf0]  ;;  %v11569_v10 = vld [vmem:[%s14431_s0 + $0x30] sm:$0xff]  ;;  %v8817_v17 = vld [vmem:[#allocation4 + $0x218] sm:$0xf] }
  0x52   :  { %724 = vmatpush.bf16.msrb.mxu1 %v8686_v7  ;;  %v8739_v7 = vld [vmem:[#allocation4 + $0x18c] sm:$0xf0]  ;;  %v8738_v8 = vor.u32 %v11601_v3, %v8737_v2  ;;  %v12667_v11 = vld [vmem:[%s14431_s0 + $0x10] sm:$0xff]  ;;  %v11617_v25 = vld [vmem:[#allocation4 + $0x208] sm:$0xf0] }
  0x53   :  { %686 = vmatpush.bf16.msrb.mxu0 %v8670_v12  ;;  %v8742_v9 = vor.u32 %v11600_v6, %v8739_v7  ;;  %v12676_v12 = vld [vmem:[%s14431_s0 + $0x18] sm:$0xff]  ;;  %v12704_v31 = vld [vmem:[%s14431_s0 + $0x28] sm:$0xff]  ;;  %v8781_v37 = vld [vmem:[#allocation4 + $0x1d0] sm:$0xf] }
  0x54   :  { %v11611_v38 = vld [vmem:[#allocation4 + $0x1d8] sm:$0xf0]  ;;  %v11608_v42 = vld [vmem:[#allocation4 + $0x1c0] sm:$0xf0]  ;;  %v8757_v48 = vld [vmem:[#allocation4 + $0x1a0] sm:$0xf] }
  0x55   :  { %973 = vmatpush.bf16.msrb.mxu2 %v8786_v16  ;;  %1012 = vmatpush.bf16.msrb.mxu3 %v8790_v18  ;;  %v12685_v16 = vld [vmem:[%s14431_s0 + $0x20] sm:$0xff]  ;;  %v11620_v18 = vld [vmem:[#allocation4 + $0x220] sm:$0xf0]  ;;  %v8782_v39 = vor.u32 %v11611_v38, %v8781_v37  ;;  %v11605_v49 = vld [vmem:[#allocation4 + $0x1a8] sm:$0xf0] }
  0x56   :  { %406 = vmatmul.bf16.gmra.mxu0 %v12627_v34  ;;  %725 = vmatpush.bf16.msrb.mxu1 %v8674_v19  ;;  %v8818_v19 = vor.u32 %v11620_v18, %v8817_v17  ;;  %v8745_v52 = vld [vmem:[#allocation4 + $0x188] sm:$0xf]  ;;  %v11602_v53 = vld [vmem:[#allocation4 + $0x190] sm:$0xf0]  ;;  %v12727_v56 = vld [vmem:[%s14431_s0 + $0x30] sm:$0xff] }
  0x57   :  { %445 = vmatmul.bf16.gmra.mxu1 %v12627_v34  ;;  %687 = vmatpush.bf16.msrb.mxu0 %v8658_v24  ;;  %v8805_v24 = vld [vmem:[#allocation4 + $0x200] sm:$0xf]  ;;  %v8746_v57 = vor.u32 %v11602_v53, %v8745_v52  ;;  %v12750_v2 = vld [vmem:[%s14431_s0 + $0x38] sm:$0xff]  ;;  %v11842_v17 = vld [vmem:[#allocation8 + $0x628] sm:$0xf0] }
  0x58   :  { %484 = vmatmul.bf16.gmra.mxu2 %v12627_v34  ;;  %657 = vmatmul.bf16.gmra.mxu3 %v12613_v32  ;;  %v8806_v26 = vor.u32 %v11617_v25, %v8805_v24  ;;  %v9025_v18 = vld [vmem:[#allocation8 + $0x4b0] sm:$0xf]  ;;  %v9145_v52 = vld [vmem:[#allocation8 + $0x5a0] sm:$0xf] }
  0x59   :  { %974 = vmatpush.bf16.msrb.mxu2 %v8774_v29  ;;  %1013 = vmatpush.bf16.msrb.mxu3 %v8778_v36 }
  0x5a   :  { %726 = vmatpush.bf16.msrb.mxu1 %v8662_v28  ;;  %v8793_v28 = vld [vmem:[#allocation4 + $0x1e8] sm:$0xf] }
  0x5b   :  { %688 = vmatpush.bf16.msrb.mxu0 %v8646_v40 }
  0x5d   :  { %975 = vmatpush.bf16.msrb.mxu2 %v8762_v45  ;;  %1014 = vmatpush.bf16.msrb.mxu3 %v8766_v50 }
  0x5e   :  { %727 = vmatpush.bf16.msrb.mxu1 %v8650_v41  ;;  %v8769_v41 = vld [vmem:[#allocation4 + $0x1b8] sm:$0xf] }
  0x5f   :  { %689 = vmatpush.bf16.msrb.mxu0 %v8634_v54  ;;  %v8770_v45 = vor.u32 %v11608_v42, %v8769_v41  ;;  %v11792_v41 = vld [vmem:[#allocation8 + $0x498] sm:$0xf0] }
  0x61   :  { %976 = vmatpush.bf16.msrb.mxu2 %v8750_v59  ;;  %1015 = vmatpush.bf16.msrb.mxu3 %v8754_v62 }
  0x62   :  { %728 = vmatpush.bf16.msrb.mxu1 %v8638_v58 }
  0x63   :  { %690 = vmatpush.bf16.msrb.mxu0 %v8622_v1 }
  0x65   :  { %977 = vmatpush.bf16.msrb.mxu2 %v8738_v8  ;;  %1016 = vmatpush.bf16.msrb.mxu3 %v8742_v9  ;;  %v9045_v9 = vld [vmem:[#allocation8 + $0x4d8] sm:$0xf] }
  0x66   :  { %411 = vmatmul.bf16.gmra.mxu0 %v12636_v47  ;;  %729 = vmatpush.bf16.msrb.mxu1 %v8626_v5 }
  0x67   :  { %450 = vmatmul.bf16.gmra.mxu1 %v12636_v47 }
  0x68   :  { %489 = vmatmul.bf16.gmra.mxu2 %v12636_v47  ;;  %662 = vmatmul.bf16.gmra.mxu3 %v12627_v34 }
  0x76   :  { %416 = vmatmul.bf16.gmra.mxu0 %v12645_v20 }
  0x77   :  { %455 = vmatmul.bf16.gmra.mxu1 %v12645_v20 }
  0x78   :  { %494 = vmatmul.bf16.gmra.mxu2 %v12645_v20  ;;  %667 = vmatmul.bf16.gmra.mxu3 %v12636_v47 }
  0x86   :  { %421 = vmatmul.bf16.gmra.mxu0 %v12654_v4 }
  0x87   :  { %460 = vmatmul.bf16.gmra.mxu1 %v12654_v4 }
  0x88   :  { %499 = vmatmul.bf16.gmra.mxu2 %v12654_v4  ;;  %672 = vmatmul.bf16.gmra.mxu3 %v12645_v20 }
  0x96   :  { %426 = vmatmul.bf16.gmra.mxu0 %v11569_v10 }
  0x97   :  { %465 = vmatmul.bf16.gmra.mxu1 %v11569_v10 }
  0x98   :  { %504 = vmatmul.bf16.gmra.mxu2 %v11569_v10  ;;  %677 = vmatmul.bf16.gmra.mxu3 %v12654_v4  ;;  %v11802_v10 = vld [vmem:[#allocation8 + $0x4e8] sm:$0xf0] }
  0xa6   :  { %691 = vmatmul.bf16.vlgmr.msrb.gmra.mxu0 %v12618_v33 }
  0xa7   :  { %730 = vmatmul.bf16.vlgmr.msrb.gmra.mxu1 %v12618_v33  ;;  %v8830_v33 = vor.u32 %v11623_v14, %v8829_v13  ;;  %v9046_v13 = vor.u32 %v11802_v10, %v9045_v9  ;;  %v8965_v9 = vld [vmem:[#allocation8 + $0x438] sm:$0xf]  ;;  %v11782_v10 = vld [vmem:[#allocation8 + $0x448] sm:$0xf0] }
  0xa8   :  { %978 = vmatmul.bf16.vlgmr.msrb.gmra.mxu2 %v12667_v11  ;;  %1017 = vmatmul.bf16.vlgmr.msrb.gmra.mxu3 %v12667_v11 }
  0xa9   :  { %1048 = vmatpush.bf16.msra.mxu0 %v8830_v33  ;;  %2296 = vmatpush.bf16.msra.mxu1 %v9046_v13  ;;  %v9125_v13 = vld [vmem:[#allocation8 + $0x578] sm:$0xf] }
  0xad   :  { %1049 = vmatpush.bf16.msra.mxu0 %v8818_v19  ;;  %v11797_v19 = vld [vmem:[#allocation8 + $0x4c0] sm:$0xf0] }
  0xae   :  { %v9026_v25 = vor.u32 %v11797_v19, %v9025_v18  ;;  %v8945_v18 = vld [vmem:[#allocation8 + $0x410] sm:$0xf]  ;;  %v11777_v19 = vld [vmem:[#allocation8 + $0x420] sm:$0xf0] }
  0xb0   :  { %2297 = vmatpush.bf16.msra.mxu1 %v9026_v25  ;;  %v8946_v25 = vor.u32 %v11777_v19, %v8945_v18  ;;  %v11800_v18 = vld [vmem:[#allocation8 + $0x4dc] sm:$0xf]  ;;  %v9047_v19 = vld [vmem:[#allocation8 + $0x4ec] sm:$0xf0] }
  0xb1   :  { %1050 = vmatpush.bf16.msra.mxu0 %v8806_v26  ;;  %v9185_v26 = vld [vmem:[#allocation8 + $0x5f0] sm:$0xf] }
  0xb6   :  { %696 = vmatmul.bf16.gmra.mxu0 %v12613_v32 }
  0xb7   :  { %735 = vmatmul.bf16.gmra.mxu1 %v12613_v32 }
  0xb8   :  { %983 = vmatmul.bf16.gmra.mxu2 %v12676_v12  ;;  %1022 = vmatmul.bf16.gmra.mxu3 %v12676_v12 }
  0xc3   :  { %v402_v15 = vpop.f32.mrf.mxu0 }
  0xc4   :  { %v12706_v36 = vpop.f32.mrf.mxu1 }
  0xc6   :  { %701 = vmatmul.bf16.gmra.mxu0 %v12627_v34 }
  0xc7   :  { %740 = vmatmul.bf16.gmra.mxu1 %v12627_v34  ;;  %v11614_v34 = vld [vmem:[#allocation4 + $0x1f0] sm:$0xf0] }
  0xc8   :  { %988 = vmatmul.bf16.gmra.mxu2 %v12685_v16  ;;  %1027 = vmatmul.bf16.gmra.mxu3 %v12685_v16  ;;  %v8794_v35 = vor.u32 %v11614_v34, %v8793_v28  ;;  %v11837_v28 = vld [vmem:[#allocation8 + $0x600] sm:$0xf0] }
  0xc9   :  { %v9186_v34 = vor.u32 %v11837_v28, %v9185_v26  ;;  %v11817_v26 = vld [vmem:[#allocation8 + $0x560] sm:$0xf0] }
  0xca   :  { %1051 = vmatpush.bf16.msra.mxu0 %v8794_v35 }
  0xcb   :  { %v12691_v32 = vpop.f32.mrf.mxu2  ;;  %v653_v21 = vpop.f32.mrf.mxu3 }
  0xcc   :  { %v12693_v22 = vpop.f32.mrf.mxu0  ;;  %v12695_v23 = vadd.f32 %v653_v21, %v402_v15  ;;  %v12718_v50 = vpop.f32.mrf.mxu1  ;;  %v9205_v15 = vld [vmem:[#allocation8 + $0x618] sm:$0xf] }
  0xcd   :  { %v9206_v21 = vor.u32 %v11842_v17, %v9205_v15  ;;  %v11822_v15 = vld [vmem:[#allocation8 + $0x588] sm:$0xf0] }
  0xce   :  { %1052 = vmatpush.bf16.msra.mxu0 %v8782_v39  ;;  %v9005_v39 = vld [vmem:[#allocation8 + $0x488] sm:$0xf]  ;;  %v9126_v17 = vor.u32 %v11822_v15, %v9125_v13 }
  0xcf   :  { %2335 = vmatpush.bf16.msra.mxu2 %v9206_v21  ;;  %v9006_v42 = vor.u32 %v11792_v41, %v9005_v39  ;;  %v9105_v21 = vld [vmem:[#allocation8 + $0x550] sm:$0xf] }
  0xd1   :  { %2298 = vmatpush.bf16.msra.mxu1 %v9006_v42 }
  0xd2   :  { %1053 = vmatpush.bf16.msra.mxu0 %v8770_v45  ;;  %v11832_v45 = vld [vmem:[#allocation8 + $0x5d8] sm:$0xf0] }
  0xd3   :  { %v12697_v27 = vpop.f32.mrf.mxu2  ;;  %v12699_v29 = vpop.f32.mrf.mxu3  ;;  %2336 = vmatpush.bf16.msra.mxu2 %v9186_v34 }
  0xd4   :  { %v407_v30 = vpop.f32.mrf.mxu0  ;;  %v12732_v58 = vpop.f32.mrf.mxu1 }
  0xd6   :  { %706 = vmatmul.bf16.gmra.mxu0 %v12636_v47 }
  0xd7   :  { %745 = vmatmul.bf16.gmra.mxu1 %v12636_v47  ;;  %v8758_v47 = vor.u32 %v11605_v49, %v8757_v48  ;;  %v8985_v49 = vld [vmem:[#allocation8 + $0x460] sm:$0xf] }
  0xd8   :  { %993 = vmatmul.bf16.gmra.mxu2 %v12704_v31  ;;  %1032 = vmatmul.bf16.gmra.mxu3 %v12704_v31 }
  0xd9   :  { %1054 = vmatpush.bf16.msra.mxu0 %v8758_v47  ;;  %v11787_v47 = vld [vmem:[#allocation8 + $0x470] sm:$0xf0] }
  0xda   :  { %v8986_v53 = vor.u32 %v11787_v47, %v8985_v49  ;;  %v11812_v49 = vld [vmem:[#allocation8 + $0x538] sm:$0xf0] }
  0xdb   :  { %v12712_v40 = vpop.f32.mrf.mxu2  ;;  %v658_v43 = vpop.f32.mrf.mxu3 }
  0xdc   :  { %v12714_v44 = vpop.f32.mrf.mxu0  ;;  %v12716_v46 = vadd.f32 %v658_v43, %v407_v30  ;;  %v12741_v63 = vpop.f32.mrf.mxu1  ;;  %v9165_v43 = vld [vmem:[#allocation8 + $0x5c8] sm:$0xf]  ;;  %2299 = vmatpush.bf16.msra.mxu1 %v8986_v53  ;;  %v11767_v53 = vld [vmem:[#allocation8 + $0x3d0] sm:$0xf0] }
  0xdd   :  { %1055 = vmatpush.bf16.msra.mxu0 %v8746_v57 }
  0xe3   :  { %v12720_v51 = vpop.f32.mrf.mxu2  ;;  %v12722_v54 = vpop.f32.mrf.mxu3 }
  0xe4   :  { %v412_v55 = vpop.f32.mrf.mxu0  ;;  %v12760_v7 = vpop.f32.mrf.mxu1 }
  0xe6   :  { %711 = vmatmul.bf16.gmra.mxu0 %v12645_v20 }
  0xe7   :  { %750 = vmatmul.bf16.gmra.mxu1 %v12645_v20 }
  0xe8   :  { %998 = vmatmul.bf16.gmra.mxu2 %v12727_v56  ;;  %1037 = vmatmul.bf16.gmra.mxu3 %v12727_v56 }
  0xeb   :  { %v12735_v59 = vpop.f32.mrf.mxu2  ;;  %v663_v60 = vpop.f32.mrf.mxu3 }
  0xec   :  { %v12737_v61 = vpop.f32.mrf.mxu0  ;;  %v12739_v62 = vadd.f32 %v663_v60, %v412_v55  ;;  %v12768_v24 = vpop.f32.mrf.mxu1  ;;  %v11827_v55 = vld [vmem:[#allocation8 + $0x5b0] sm:$0xf0] }
  0xed   :  { %v9146_v60 = vor.u32 %v11827_v55, %v9145_v52  ;;  %v8905_v52 = vld [vmem:[#allocation8 + $0x3c0] sm:$0xf] }
  0xee   :  { %v9065_v55 = vld [vmem:[#allocation8 + $0x500] sm:$0xf] }
  0xf3   :  { %v12743_v0 = vpop.f32.mrf.mxu2  ;;  %v12745_v1 = vpop.f32.mrf.mxu3 }
  0xf4   :  { %v417_v20 = vpop.f32.mrf.mxu0  ;;  %v12777_v48 = vpop.f32.mrf.mxu1 }
  0xf6   :  { %716 = vmatmul.bf16.gmra.mxu0 %v12654_v4 }
  0xf7   :  { %755 = vmatmul.bf16.gmra.mxu1 %v12654_v4 }
  0xf8   :  { %1003 = vmatmul.bf16.gmra.mxu2 %v12750_v2  ;;  %1042 = vmatmul.bf16.gmra.mxu3 %v12750_v2 }
  0xfb   :  { %v12756_v3 = vpop.f32.mrf.mxu2  ;;  %v668_v5 = vpop.f32.mrf.mxu3 }
  0xfc   :  { %v12758_v6 = vpop.f32.mrf.mxu0  ;;  %v12762_v8 = vadd.f32 %v668_v5, %v417_v20  ;;  %v12784_v28 = vpop.f32.mrf.mxu1 }
 0x103   :  { %v12764_v14 = vpop.f32.mrf.mxu2  ;;  %v12766_v4 = vpop.f32.mrf.mxu3 }
 0x104   :  { %v422_v33 = vpop.f32.mrf.mxu0  ;;  %v12796_v15 = vpop.f32.mrf.mxu1 }
 0x106   :  { %1056 = vmatmul.bf16.vlgmr.msra.gmra.mxu0 %v12667_v11  ;;  %v9166_v11 = vor.u32 %v11832_v45, %v9165_v43  ;;  %v11772_v43 = vld [vmem:[#allocation8 + $0x3f8] sm:$0xf0]  ;;  %v9085_v45 = vld [vmem:[#allocation8 + $0x528] sm:$0xf] }
 0x107   :  { %v9086_v47 = vor.u32 %v11812_v49, %v9085_v45 }
 0x108   :  { %2337 = vmatpush.bf16.msra.mxu2 %v9166_v11 }
 0x10b   :  { %v12771_v30 = vpop.f32.mrf.mxu2  ;;  %v673_v35 = vpop.f32.mrf.mxu3 }
 0x10c   :  { %v12773_v37 = vpop.f32.mrf.mxu0  ;;  %v12775_v38 = vadd.f32 %v673_v35, %v422_v33  ;;  %2338 = vmatpush.bf16.msra.mxu2 %v9146_v60  ;;  %v8966_v33 = vor.u32 %v11782_v10, %v8965_v9  ;;  %v9106_v35 = vor.u32 %v11817_v26, %v9105_v21  ;;  %v8906_v60 = vor.u32 %v11767_v53, %v8905_v52  ;;  %v11807_v9 = vld [vmem:[#allocation8 + $0x510] sm:$0xf0]  ;;  %v12810_v53 = vpop.f32.mrf.mxu1 }
 0x10d   :  { %v9066_v13 = vor.u32 %v11807_v9, %v9065_v55  ;;  %v9050_v21 = vor.u32 %v11800_v18, %v9047_v19  ;;  %v656_v18 = vadd.f32 %v12699_v29, %v12693_v22  ;;  %v11780_v22 = vld [vmem:[#allocation8 + $0x43c] sm:$0xf]  ;;  %v8967_v29 = vld [vmem:[#allocation8 + $0x44c] sm:$0xf0] }
 0x10e   :  { %2300 = vmatpush.bf16.msra.mxu1 %v8966_v33 }
 0x10f   :  { %2413 = vmatpush.bf16.msrb.mxu0 %v9050_v21 }
 0x110   :  { %2339 = vmatpush.bf16.msra.mxu2 %v9126_v17  ;;  %v12799_v17 = vld [vmem:[#allocation6] sm:$0x7] }
 0x112   :  { %2301 = vmatpush.bf16.msra.mxu1 %v8946_v25  ;;  %v12802_v25 = vperm.slane %v12799_v17, 0 }
 0x113   :  { %v12779_v57 = vpop.f32.mrf.mxu2  ;;  %v12781_v20 = vpop.f32.mrf.mxu3 }
 0x114   :  { %v427_v5 = vpop.f32.mrf.mxu0  ;;  %2340 = vmatpush.bf16.msra.mxu2 %v9106_v35 }
 0x116   :  { %1061 = vmatmul.bf16.gmra.mxu0 %v12676_v12  ;;  %v8925_v12 = vld [vmem:[#allocation8 + $0x3e8] sm:$0xf] }
 0x117   :  { %v8926_v11 = vor.u32 %v11772_v43, %v8925_v12  ;;  %v11795_v12 = vld [vmem:[#allocation8 + $0x4b4] sm:$0xf]  ;;  %v9027_v43 = vld [vmem:[#allocation8 + $0x4c4] sm:$0xf0] }
 0x118   :  { %2341 = vmatpush.bf16.msra.mxu2 %v9086_v47  ;;  %v9030_v49 = vor.u32 %v11795_v12, %v9027_v43 }
 0x119   :  { %2302 = vmatpush.bf16.msra.mxu1 %v8926_v11 }
 0x11a   :  { %2414 = vmatpush.bf16.msrb.mxu0 %v9030_v49 }
 0x11b   :  { %v12786_v34 = vpop.f32.mrf.mxu2  ;;  %v678_v39 = vpop.f32.mrf.mxu3 }
 0x11c   :  { %v12788_v41 = vpop.f32.mrf.mxu0  ;;  %v12790_v42 = vadd.f32 %v678_v39, %v427_v5  ;;  %2342 = vmatpush.bf16.msra.mxu2 %v9066_v13  ;;  %v12806_v39 = vperm.slane %v12799_v17, 1 }
 0x11d   :  { %2303 = vmatpush.bf16.msra.mxu1 %v8906_v60  ;;  %v9007_v60 = vld [vmem:[#allocation8 + $0x49c] sm:$0xf0] }
 0x123   :  { %v12792_v10 = vpop.f32.mrf.mxu2  ;;  %v12794_v33 = vpop.f32.mrf.mxu3 }
 0x124   :  { %v692_v5 = vpop.f32.mrf.mxu0 }
 0x125   :  { %v693_v26 = vadd.f32 %v692_v5, %v12706_v36  ;;  %v11790_v36 = vld [vmem:[#allocation8 + $0x48c] sm:$0xf] }
 0x126   :  { %1066 = vmatmul.bf16.gmra.mxu0 %v12685_v16  ;;  %v9010_v13 = vor.u32 %v11790_v36, %v9007_v60 }
 0x128   :  { %2415 = vmatpush.bf16.msrb.mxu0 %v9010_v13 }
 0x12b   :  { %v979_v35 = vpop.f32.mrf.mxu2  ;;  %v1018_v16 = vpop.f32.mrf.mxu3 }
 0x12c   :  { %v1087_v45 = vadd.f32 %v979_v35, %v12695_v23  ;;  %v694_v11 = vpop.f32.mrf.mxu0  ;;  %v1088_v47 = vadd.f32 %v1018_v16, %v693_v26  ;;  %v11785_v26 = vld [vmem:[#allocation8 + $0x464] sm:$0xf]  ;;  %v8987_v35 = vld [vmem:[#allocation8 + $0x474] sm:$0xf0] }
 0x12d   :  { %v695_v19 = vadd.f32 %v694_v11, %v12718_v50  ;;  %v8990_v16 = vor.u32 %v11785_v26, %v8987_v35  ;;  %v8970_v50 = vor.u32 %v11780_v22, %v8967_v29  ;;  %v12819_v11 = vpop.f32.mrf.mxu1 }
 0x12e   :  { %v1131_v52 = vadd.f32 %v12802_v25, %v1087_v45  ;;  %v1132_v55 = vadd.f32 %v12806_v39, %v1088_v47 }
 0x12f   :  { %2416 = vmatpush.bf16.msrb.mxu0 %v8990_v16  ;;  %v8927_v16 = vld [vmem:[#allocation8 + $0x3fc] sm:$0xf0] }
 0x130   :  { %v1167_v9 = vmax.f32 %v1131_v52, 0.0  ;;  %v1168_v5 = vmax.f32 %v1132_v55, 0.0 }
 0x132   :  { %v1211_v23 = vpack.c.bf16 %v1168_v5, %v1167_v9  ;;  %v11775_v5 = vld [vmem:[#allocation8 + $0x414] sm:$0xf] }
 0x133   :  { %v981_v21 = vpop.f32.mrf.mxu2  ;;  %v1020_v43 = vpop.f32.mrf.mxu3  ;;  %2417 = vmatpush.bf16.msrb.mxu0 %v8970_v50  ;;  %v11765_v50 = vld [vmem:[#allocation8 + $0x3c4] sm:$0xf] }
 0x134   :  { %v1090_v12 = vadd.f32 %v981_v21, %v656_v18  ;;  %v697_v45 = vpop.f32.mrf.mxu0  ;;  %1235 = vst [vmem:[#allocation2 + $0x18] sm:$0xff] %v1211_v23  ;;  %v1091_v49 = vadd.f32 %v1020_v43, %v695_v19  ;;  %v8947_v18 = vld [vmem:[#allocation8 + $0x424] sm:$0xf0]  ;;  %v11770_v43 = vld [vmem:[#allocation8 + $0x3ec] sm:$0xf] }
 0x135   :  { %v698_v9 = vadd.f32 %v697_v45, %v12732_v58  ;;  %v8950_v26 = vor.u32 %v11775_v5, %v8947_v18  ;;  %v661_v45 = vadd.f32 %v12722_v54, %v12714_v44 }
 0x136   :  { %v1134_v47 = vadd.f32 %v12802_v25, %v1090_v12  ;;  %v1135_v52 = vadd.f32 %v12806_v39, %v1091_v49  ;;  %1071 = vmatmul.bf16.gmra.mxu0 %v12704_v31 }
 0x137   :  { %2418 = vmatpush.bf16.msrb.mxu0 %v8950_v26 }
 0x138   :  { %v1170_v55 = vmax.f32 %v1134_v47, 0.0  ;;  %v1171_v36 = vmax.f32 %v1135_v52, 0.0  ;;  %v8930_v47 = vor.u32 %v11770_v43, %v8927_v16 }
 0x13a   :  { %v1213_v60 = vpack.c.bf16 %v1171_v36, %v1170_v55  ;;  %v8907_v36 = vld [vmem:[#allocation8 + $0x3d4] sm:$0xf0] }
 0x13b   :  { %v984_v13 = vpop.f32.mrf.mxu2  ;;  %v1023_v19 = vpop.f32.mrf.mxu3  ;;  %2419 = vmatpush.bf16.msrb.mxu0 %v8930_v47  ;;  %v11627_v52 = vld [vmem:[#allocation2 + $0x1c] sm:$0xf] }
 0x13c   :  { %v1093_v23 = vadd.f32 %v984_v13, %v12716_v46  ;;  %v699_v21 = vpop.f32.mrf.mxu0  ;;  %1237 = vst [vmem:[#allocation2 + $0x24] sm:$0xff] %v1213_v60  ;;  %v1094_v31 = vadd.f32 %v1023_v19, %v698_v9  ;;  %v12827_v46 = vpop.f32.mrf.mxu1  ;;  %v8833_v60 = vld [vmem:[#allocation2 + $0x18] sm:$0xf]  ;;  %v8910_v19 = vor.u32 %v11765_v50, %v8907_v36 }
 0x13d   :  { %v700_v29 = vadd.f32 %v699_v21, %v12741_v63 }
 0x13e   :  { %v1137_v35 = vadd.f32 %v12802_v25, %v1093_v23  ;;  %v1138_v12 = vadd.f32 %v12806_v39, %v1094_v31 }
 0x13f   :  { %2420 = vmatpush.bf16.msrb.mxu0 %v8910_v19 }
 0x140   :  { %v1173_v49 = vmax.f32 %v1137_v35, 0.0  ;;  %v1174_v58 = vmax.f32 %v1138_v12, 0.0 }
 0x142   :  { %v1215_v22 = vpack.c.bf16 %v1174_v58, %v1173_v49 }
 0x143   :  { %v986_v55 = vpop.f32.mrf.mxu2  ;;  %v8835_v9 = vld [vmem:[#allocation2 + $0x24] sm:$0xf0]  ;;  %v11628_v13 = vld [vmem:[#allocation2 + $0x20] sm:$0xf0]  ;;  %v1025_v18 = vpop.f32.mrf.mxu3 }
 0x144   :  { %v1096_v5 = vadd.f32 %v986_v55, %v661_v45  ;;  %v702_v23 = vpop.f32.mrf.mxu0  ;;  %v12830_v26 = vor.u32 %v11628_v13, %v8833_v60  ;;  %v12832_v44 = vor.u32 %v11627_v52, %v8835_v9  ;;  %1239 = vst [vmem:[#allocation2 + $0x30] sm:$0xff] %v1215_v22  ;;  %v1097_v54 = vadd.f32 %v1025_v18, %v700_v29  ;;  %v12841_v45 = vpop.f32.mrf.mxu1 }
 0x145   :  { %v703_v43 = vadd.f32 %v702_v23, %v12760_v7 }
 0x146   :  { %v1140_v31 = vadd.f32 %v12802_v25, %v1096_v5  ;;  %v1141_v63 = vadd.f32 %v12806_v39, %v1097_v54  ;;  %2304 = vmatmul.bf16.vlgmr.msra.gmra.mxu1 %v12830_v26  ;;  %2343 = vmatmul.bf16.vlgmr.msra.gmra.mxu2 %v12832_v44 }
 0x147   :  { %1076 = vmatmul.bf16.gmra.mxu0 %v12727_v56  ;;  %v666_v56 = vadd.f32 %v12745_v1, %v12737_v61 }
 0x148   :  { %v1176_v21 = vmax.f32 %v1140_v31, 0.0  ;;  %v1177_v35 = vmax.f32 %v1141_v63, 0.0 }
 0x14a   :  { %v1217_v12 = vpack.c.bf16 %v1177_v35, %v1176_v21 }
 0x14b   :  { %v989_v16 = vpop.f32.mrf.mxu2  ;;  %v1028_v47 = vpop.f32.mrf.mxu3  ;;  %v11630_v36 = vld [vmem:[#allocation2 + $0x34] sm:$0xf]  ;;  %v8845_v9 = vld [vmem:[#allocation2 + $0x30] sm:$0xf] }
 0x14c   :  { %v1099_v49 = vadd.f32 %v989_v16, %v12739_v62  ;;  %v704_v58 = vpop.f32.mrf.mxu0  ;;  %1241 = vst [vmem:[#allocation2 + $0x3c] sm:$0xff] %v1217_v12  ;;  %v1100_v52 = vadd.f32 %v1028_v47, %v703_v43  ;;  %v12853_v61 = vpop.f32.mrf.mxu1 }
 0x14d   :  { %v705_v60 = vadd.f32 %v704_v58, %v12768_v24 }
 0x14e   :  { %v1143_v22 = vadd.f32 %v12802_v25, %v1099_v49  ;;  %v1144_v29 = vadd.f32 %v12806_v39, %v1100_v52 }
 0x150   :  { %v1179_v55 = vmax.f32 %v1143_v22, 0.0  ;;  %v1180_v50 = vmax.f32 %v1144_v29, 0.0 }
 0x152   :  { %v1219_v7 = vpack.c.bf16 %v1180_v50, %v1179_v55  ;;  %v9365_v55 = vld [vmem:[#allocation8 + $0x758] sm:$0xf]  ;;  %v11882_v50 = vld [vmem:[#allocation8 + $0x768] sm:$0xf0] }
 0x153   :  { %v991_v62 = vpop.f32.mrf.mxu2  ;;  %v8847_v13 = vld [vmem:[#allocation2 + $0x3c] sm:$0xf0]  ;;  %v11631_v5 = vld [vmem:[#allocation2 + $0x38] sm:$0xf0]  ;;  %v1030_v23 = vpop.f32.mrf.mxu3 }
 0x154   :  { %v1102_v18 = vadd.f32 %v991_v62, %v666_v56  ;;  %v707_v19 = vpop.f32.mrf.mxu0  ;;  %v12848_v54 = vor.u32 %v11631_v5, %v8845_v9  ;;  %v12850_v31 = vor.u32 %v11630_v36, %v8847_v13  ;;  %1243 = vst [vmem:[#allocation2 + $0x48] sm:$0xff] %v1219_v7  ;;  %v1103_v63 = vadd.f32 %v1030_v23, %v705_v60  ;;  %v9345_v13 = vld [vmem:[#allocation8 + $0x730] sm:$0xf]  ;;  %v11877_v5 = vld [vmem:[#allocation8 + $0x740] sm:$0xf0] }
 0x155   :  { %v708_v43 = vadd.f32 %v707_v19, %v12777_v48  ;;  %v9366_v36 = vor.u32 %v11882_v50, %v9365_v55  ;;  %v671_v48 = vadd.f32 %v12766_v4, %v12758_v6  ;;  %v11840_v4 = vld [vmem:[#allocation8 + $0x61c] sm:$0xf] }
 0x156   :  { %v1146_v21 = vadd.f32 %v12802_v25, %v1102_v18  ;;  %v1147_v1 = vadd.f32 %v12806_v39, %v1103_v63  ;;  %2309 = vmatmul.bf16.gmra.mxu1 %v12848_v54  ;;  %2348 = vmatmul.bf16.gmra.mxu2 %v12850_v31 }
 0x157   :  { %1081 = vmatmul.bf16.gmra.mxu0 %v12750_v2  ;;  %v12863_v2 = vpop.f32.mrf.mxu1  ;;  %2374 = vmatpush.bf16.msra.mxu3 %v9366_v36  ;;  %v11835_v36 = vld [vmem:[#allocation8 + $0x5f4] sm:$0xf] }
 0x158   :  { %v1182_v24 = vmax.f32 %v1146_v21, 0.0  ;;  %v1183_v35 = vmax.f32 %v1147_v1, 0.0 }
 0x15a   :  { %v1221_v12 = vpack.c.bf16 %v1183_v35, %v1182_v24  ;;  %v9346_v24 = vor.u32 %v11877_v5, %v9345_v13 }
 0x15b   :  { %v994_v16 = vpop.f32.mrf.mxu2  ;;  %v1033_v47 = vpop.f32.mrf.mxu3  ;;  %v8857_v18 = vld [vmem:[#allocation2 + $0x48] sm:$0xf] }
 0x15c   :  { %v1105_v49 = vadd.f32 %v994_v16, %v12762_v8  ;;  %v709_v58 = vpop.f32.mrf.mxu0  ;;  %1245 = vst [vmem:[#allocation2 + $0x54] sm:$0xff] %v1221_v12  ;;  %v1106_v52 = vadd.f32 %v1033_v47, %v708_v43  ;;  %v11633_v8 = vld [vmem:[#allocation2 + $0x4c] sm:$0xf]  ;;  %v9207_v43 = vld [vmem:[#allocation8 + $0x62c] sm:$0xf0]  ;;  %2375 = vmatpush.bf16.msra.mxu3 %v9346_v24 }
 0x15d   :  { %v710_v62 = vadd.f32 %v709_v58, %v12784_v28  ;;  %v9210_v16 = vor.u32 %v11840_v4, %v9207_v43  ;;  %v9367_v47 = vld [vmem:[#allocation8 + $0x76c] sm:$0xf0]  ;;  %v11830_v43 = vld [vmem:[#allocation8 + $0x5cc] sm:$0xf] }
 0x15e   :  { %v1149_v22 = vadd.f32 %v12802_v25, %v1105_v49  ;;  %v1150_v29 = vadd.f32 %v12806_v39, %v1106_v52  ;;  %v11880_v49 = vld [vmem:[#allocation8 + $0x75c] sm:$0xf] }
 0x15f   :  { %v9370_v52 = vor.u32 %v11880_v49, %v9367_v47  ;;  %2452 = vmatpush.bf16.msrb.mxu1 %v9210_v16 }
 0x160   :  { %v1185_v56 = vmax.f32 %v1149_v22, 0.0  ;;  %v1186_v7 = vmax.f32 %v1150_v29, 0.0  ;;  %v9325_v22 = vld [vmem:[#allocation8 + $0x708] sm:$0xf]  ;;  %v11872_v29 = vld [vmem:[#allocation8 + $0x718] sm:$0xf0] }
 0x161   :  { %v9326_v50 = vor.u32 %v11872_v29, %v9325_v22  ;;  %2491 = vmatpush.bf16.msrb.mxu2 %v9370_v52  ;;  %v9285_v52 = vld [vmem:[#allocation8 + $0x6b8] sm:$0xf] }
 0x162   :  { %v1223_v60 = vpack.c.bf16 %v1186_v7, %v1185_v56  ;;  %v9187_v7 = vld [vmem:[#allocation8 + $0x604] sm:$0xf0] }
 0x163   :  { %v996_v9 = vpop.f32.mrf.mxu2  ;;  %v8859_v23 = vld [vmem:[#allocation2 + $0x54] sm:$0xf0]  ;;  %v11634_v19 = vld [vmem:[#allocation2 + $0x50] sm:$0xf0]  ;;  %v1035_v21 = vpop.f32.mrf.mxu3  ;;  %2376 = vmatpush.bf16.msra.mxu3 %v9326_v50 }
 0x164   :  { %v1108_v63 = vadd.f32 %v996_v9, %v671_v48  ;;  %v712_v1 = vpop.f32.mrf.mxu0  ;;  %v12868_v35 = vor.u32 %v11634_v19, %v8857_v18  ;;  %v12870_v12 = vor.u32 %v11633_v8, %v8859_v23  ;;  %1247 = vst [vmem:[#allocation2 + $0x60] sm:$0xff] %v1223_v60  ;;  %v1109_v6 = vadd.f32 %v1035_v21, %v710_v62  ;;  %v11875_v8 = vld [vmem:[#allocation8 + $0x734] sm:$0xf]  ;;  %v9347_v60 = vld [vmem:[#allocation8 + $0x744] sm:$0xf0]  ;;  %v12877_v62 = vpop.f32.mrf.mxu1 }
 0x165   :  { %v9190_v48 = vor.u32 %v11835_v36, %v9187_v7  ;;  %v713_v13 = vadd.f32 %v712_v1, %v12796_v15  ;;  %v9350_v18 = vor.u32 %v11875_v8, %v9347_v60  ;;  %v9305_v23 = vld [vmem:[#allocation8 + $0x6e0] sm:$0xf]  ;;  %v11867_v19 = vld [vmem:[#allocation8 + $0x6f0] sm:$0xf0]  ;;  %v11870_v15 = vld [vmem:[#allocation8 + $0x70c] sm:$0xf]  ;;  %v676_v36 = vadd.f32 %v12781_v20, %v12773_v37 }
 0x166   :  { %14456 = vst [vmem:[#allocation22_spill] sm:$0xff] %v12868_v35  ;;  %v1152_v28 = vadd.f32 %v12802_v25, %v1108_v63  ;;  %v1153_v58 = vadd.f32 %v12806_v39, %v1109_v6  ;;  %2314 = vmatmul.bf16.gmra.mxu1 %v12868_v35  ;;  %2353 = vmatmul.bf16.gmra.mxu2 %v12870_v12  ;;  %v9327_v1 = vld [vmem:[#allocation8 + $0x71c] sm:$0xf0]  ;;  %v11825_v50 = vld [vmem:[#allocation8 + $0x5a4] sm:$0xf] }
 0x167   :  { %2421 = vmatmul.bf16.vlgmr.msrb.gmra.mxu0 %v12830_v26  ;;  %2453 = vmatpush.bf16.msrb.mxu1 %v9190_v48  ;;  %v9306_v6 = vor.u32 %v11867_v19, %v9305_v23  ;;  %v11865_v48 = vld [vmem:[#allocation8 + $0x6e4] sm:$0xf]  ;;  %v9307_v8 = vld [vmem:[#allocation8 + $0x6f4] sm:$0xf0]  ;;  %v9265_v23 = vld [vmem:[#allocation8 + $0x690] sm:$0xf] }
 0x168   :  { %v1188_v55 = vmax.f32 %v1152_v28, 0.0  ;;  %v1189_v56 = vmax.f32 %v1153_v58, 0.0  ;;  %2492 = vmatpush.bf16.msrb.mxu2 %v9350_v18  ;;  %v9167_v28 = vld [vmem:[#allocation8 + $0x5dc] sm:$0xf0]  ;;  %v9330_v58 = vor.u32 %v11870_v15, %v9327_v1  ;;  %v9310_v18 = vor.u32 %v11865_v48, %v9307_v8  ;;  %v11857_v19 = vld [vmem:[#allocation8 + $0x6a0] sm:$0xf0] }
 0x169   :  { %2377 = vmatpush.bf16.msra.mxu3 %v9306_v6  ;;  %v9170_v49 = vor.u32 %v11830_v43, %v9167_v28  ;;  %v9266_v37 = vor.u32 %v11857_v19, %v9265_v23  ;;  %v11820_v15 = vld [vmem:[#allocation8 + $0x57c] sm:$0xf]  ;;  %v9107_v48 = vld [vmem:[#allocation8 + $0x564] sm:$0xf0]  ;;  %v9225_v19 = vld [vmem:[#allocation8 + $0x640] sm:$0xf] }
 0x16a   :  { %v1225_v9 = vpack.c.bf16 %v1189_v56, %v1188_v55  ;;  %v9147_v56 = vld [vmem:[#allocation8 + $0x5b4] sm:$0xf0] }
 0x16b   :  { %v999_v5 = vpop.f32.mrf.mxu2  ;;  %v1038_v21 = vpop.f32.mrf.mxu3  ;;  %2454 = vmatpush.bf16.msrb.mxu1 %v9170_v49  ;;  %v9150_v7 = vor.u32 %v11825_v50, %v9147_v56  ;;  %v11636_v60 = vld [vmem:[#allocation2 + $0x64] sm:$0xf] }
 0x16c   :  { %v1111_v63 = vadd.f32 %v999_v5, %v12775_v38  ;;  %v714_v24 = vpop.f32.mrf.mxu0  ;;  %1249 = vst [vmem:[#allocation2 + $0x6c] sm:$0xff] %v1225_v9  ;;  %v1112_v4 = vadd.f32 %v1038_v21, %v713_v13  ;;  %v11862_v38 = vld [vmem:[#allocation8 + $0x6c8] sm:$0xf0]  ;;  %2493 = vmatpush.bf16.msrb.mxu2 %v9330_v58  ;;  %v11860_v58 = vld [vmem:[#allocation8 + $0x6bc] sm:$0xf] }
 0x16d   :  { %v9286_v29 = vor.u32 %v11862_v38, %v9285_v52  ;;  %v715_v13 = vadd.f32 %v714_v24, %v12810_v53  ;;  %v9127_v53 = vld [vmem:[#allocation8 + $0x58c] sm:$0xf0]  ;;  %v12890_v24 = vpop.f32.mrf.mxu1 }
 0x16e   :  { %v1155_v16 = vadd.f32 %v12802_v25, %v1111_v63  ;;  %v1156_v47 = vadd.f32 %v12806_v39, %v1112_v4  ;;  %v8869_v63 = vld [vmem:[#allocation2 + $0x60] sm:$0xf]  ;;  %v9287_v52 = vld [vmem:[#allocation8 + $0x6cc] sm:$0xf0] }
 0x16f   :  { %2378 = vmatpush.bf16.msra.mxu3 %v9286_v29  ;;  %2455 = vmatpush.bf16.msrb.mxu1 %v9150_v7  ;;  %v9245_v29 = vld [vmem:[#allocation8 + $0x668] sm:$0xf]  ;;  %v11815_v7 = vld [vmem:[#allocation8 + $0x554] sm:$0xf] }
 0x170   :  { %v1191_v22 = vmax.f32 %v1155_v16, 0.0  ;;  %v1192_v55 = vmax.f32 %v1156_v47, 0.0  ;;  %2494 = vmatpush.bf16.msrb.mxu2 %v9310_v18  ;;  %v9130_v47 = vor.u32 %v11820_v15, %v9127_v53  ;;  %v9110_v8 = vor.u32 %v11815_v7, %v9107_v48  ;;  %v9087_v15 = vld [vmem:[#allocation8 + $0x53c] sm:$0xf0]  ;;  %v9227_v7 = vld [vmem:[#allocation8 + $0x654] sm:$0xf0] }
 0x172   :  { %v1227_v9 = vpack.c.bf16 %v1192_v55, %v1191_v22  ;;  %v9290_v22 = vor.u32 %v11860_v58, %v9287_v52  ;;  %v11852_v55 = vld [vmem:[#allocation8 + $0x678] sm:$0xf0] }
 0x173   :  { %v1001_v5 = vpop.f32.mrf.mxu2  ;;  %v8871_v21 = vld [vmem:[#allocation2 + $0x6c] sm:$0xf0]  ;;  %v11637_v6 = vld [vmem:[#allocation2 + $0x68] sm:$0xf0]  ;;  %v1040_v43 = vpop.f32.mrf.mxu3  ;;  %2379 = vmatpush.bf16.msra.mxu3 %v9266_v37  ;;  %2456 = vmatpush.bf16.msrb.mxu1 %v9130_v47  ;;  %v9246_v56 = vor.u32 %v11852_v55, %v9245_v29  ;;  %v681_v55 = vadd.f32 %v12794_v33, %v12788_v41 }
 0x174   :  { %v1114_v4 = vadd.f32 %v1001_v5, %v676_v36  ;;  %v717_v28 = vpop.f32.mrf.mxu0  ;;  %v12886_v20 = vor.u32 %v11637_v6, %v8869_v63  ;;  %v12888_v16 = vor.u32 %v11636_v60, %v8871_v21  ;;  %1251 = vst [vmem:[#allocation2 + $0x78] sm:$0xff] %v1227_v9  ;;  %v1115_v49 = vadd.f32 %v1040_v43, %v715_v13  ;;  %v11855_v60 = vld [vmem:[#allocation8 + $0x694] sm:$0xf]  ;;  %v9267_v9 = vld [vmem:[#allocation8 + $0x6a4] sm:$0xf0] }
 0x175   :  { %2495 = vmatpush.bf16.msrb.mxu2 %v9290_v22  ;;  %v718_v5 = vadd.f32 %v717_v28, %v12819_v11  ;;  %v9270_v23 = vor.u32 %v11855_v60, %v9267_v9  ;;  %v11847_v63 = vld [vmem:[#allocation8 + $0x650] sm:$0xf0]  ;;  %v11850_v11 = vld [vmem:[#allocation8 + $0x66c] sm:$0xf]  ;;  %v9247_v28 = vld [vmem:[#allocation8 + $0x67c] sm:$0xf0]  ;;  %v12901_v52 = vpop.f32.mrf.mxu1 }
 0x176   :  { %14457 = vst [vmem:[#allocation23_spill] sm:$0xff] %v12886_v20  ;;  %v1158_v1 = vadd.f32 %v12802_v25, %v1114_v4  ;;  %v1159_v38 = vadd.f32 %v12806_v39, %v1115_v49  ;;  %2319 = vmatmul.bf16.gmra.mxu1 %v12886_v20  ;;  %2358 = vmatmul.bf16.gmra.mxu2 %v12888_v16  ;;  %v11810_v49 = vld [vmem:[#allocation8 + $0x52c] sm:$0xf]  ;;  %v11805_v22 = vld [vmem:[#allocation8 + $0x504] sm:$0xf] }
 0x177   :  { %2426 = vmatmul.bf16.gmra.mxu0 %v12848_v54  ;;  %2380 = vmatpush.bf16.msra.mxu3 %v9246_v56  ;;  %v9226_v43 = vor.u32 %v11847_v63, %v9225_v19  ;;  %v9250_v58 = vor.u32 %v11850_v11, %v9247_v28  ;;  %v9067_v29 = vld [vmem:[#allocation8 + $0x514] sm:$0xf0] }
 0x178   :  { %v1194_v50 = vmax.f32 %v1158_v1, 0.0  ;;  %v1195_v36 = vmax.f32 %v1159_v38, 0.0  ;;  %2457 = vmatpush.bf16.msrb.mxu1 %v9110_v8  ;;  %v9090_v1 = vor.u32 %v11810_v49, %v9087_v15  ;;  %v9070_v56 = vor.u32 %v11805_v22, %v9067_v29 }
 0x179   :  { %2496 = vmatpush.bf16.msrb.mxu2 %v9270_v23 }
 0x17a   :  { %v1229_v13 = vpack.c.bf16 %v1195_v36, %v1194_v50  ;;  %v732_v50 = vadd.f32 %v12841_v45, %v12691_v32  ;;  %v11845_v36 = vld [vmem:[#allocation8 + $0x644] sm:$0xf] }
 0x17b   :  { %v1004_v18 = vpop.f32.mrf.mxu2  ;;  %v1043_v6 = vpop.f32.mrf.mxu3  ;;  %2381 = vmatpush.bf16.msra.mxu3 %v9226_v43  ;;  %v11639_v48 = vld [vmem:[#allocation2 + $0x7c] sm:$0xf]  ;;  %v9213_v43 = vld [vmem:[#allocation8 + $0x620] sm:$0xf] }
 0x17c   :  { %v1117_v21 = vadd.f32 %v1004_v18, %v12790_v42  ;;  %v719_v4 = vpop.f32.mrf.mxu0  ;;  %1253 = vst [vmem:[#allocation2 + $0x84] sm:$0xff] %v1229_v13  ;;  %v1118_v37 = vadd.f32 %v1043_v6, %v718_v5  ;;  %2458 = vmatpush.bf16.msrb.mxu1 %v9090_v1  ;;  %v12909_v13 = vperm.slane %v12799_v17, 2  ;;  %v9230_v5 = vor.u32 %v11845_v36, %v9227_v7  ;;  %v8881_v18 = vld [vmem:[#allocation2 + $0x78] sm:$0xf] }
 0x17d   :  { %2497 = vmatpush.bf16.msrb.mxu2 %v9250_v58  ;;  %v720_v60 = vadd.f32 %v719_v4, %v12827_v46  ;;  %v12921_v11 = vpop.f32.mrf.mxu1  ;;  %v11838_v58 = vld [vmem:[#allocation8 + $0x608] sm:$0xf0] }
 0x17e   :  { %v1161_v53 = vadd.f32 %v12802_v25, %v1117_v21  ;;  %v1162_v47 = vadd.f32 %v12806_v39, %v1118_v37  ;;  %v11843_v37 = vld [vmem:[#allocation8 + $0x630] sm:$0xf0] }
 0x17f   :  { %v9214_v15 = vor.u32 %v11843_v37, %v9213_v43  ;;  %v9113_v43 = vld [vmem:[#allocation8 + $0x558] sm:$0xf]  ;;  %v11818_v37 = vld [vmem:[#allocation8 + $0x568] sm:$0xf0] }
 0x180   :  { %v1197_v42 = vmax.f32 %v1161_v53, 0.0  ;;  %v1198_v38 = vmax.f32 %v1162_v47, 0.0  ;;  %2459 = vmatpush.bf16.msrb.mxu1 %v9070_v56  ;;  %v9193_v47 = vld [vmem:[#allocation8 + $0x5f8] sm:$0xf] }
 0x181   :  { %2498 = vmatpush.bf16.msrb.mxu2 %v9230_v5  ;;  %2569 = vmatpush.bf16.msra.mxu0 %v9214_v15 }
 0x182   :  { %v1231_v8 = vpack.c.bf16 %v1198_v38, %v1197_v42  ;;  %v9194_v38 = vor.u32 %v11838_v58, %v9193_v47  ;;  %v9093_v58 = vld [vmem:[#allocation8 + $0x530] sm:$0xf] }
 0x183   :  { %v1006_v9 = vpop.f32.mrf.mxu2  ;;  %v8883_v23 = vld [vmem:[#allocation2 + $0x84] sm:$0xf0]  ;;  %v11640_v19 = vld [vmem:[#allocation2 + $0x80] sm:$0xf0]  ;;  %v1045_v33 = vpop.f32.mrf.mxu3 }
 0x184   :  { %v1120_v41 = vadd.f32 %v1006_v9, %v681_v55  ;;  %v1057_v63 = vpop.f32.mrf.mxu0  ;;  %v12911_v32 = vor.u32 %v11640_v19, %v8881_v18  ;;  %v12913_v45 = vor.u32 %v11639_v48, %v8883_v23  ;;  %1255 = vst [vmem:[#allocation2 + $0x90] sm:$0xff] %v1231_v8  ;;  %v1121_v21 = vadd.f32 %v1045_v33, %v720_v60  ;;  %v9173_v55 = vld [vmem:[#allocation8 + $0x5d0] sm:$0xf]  ;;  %v9153_v48 = vld [vmem:[#allocation8 + $0x5a8] sm:$0xf] }
 0x185   :  { %v1089_v6 = vadd.f32 %v1057_v63, %v732_v50  ;;  %2570 = vmatpush.bf16.msra.mxu0 %v9194_v38  ;;  %v11833_v50 = vld [vmem:[#allocation8 + $0x5e0] sm:$0xf0]  ;;  %v11828_v8 = vld [vmem:[#allocation8 + $0x5b8] sm:$0xf0]  ;;  %v12928_v60 = vpop.f32.mrf.mxu1  ;;  %v742_v38 = vadd.f32 %v12890_v24, %v12735_v59  ;;  %v744_v59 = vadd.f32 %v12901_v52, %v12743_v0 }
 0x186   :  { %14458 = vst [vmem:[#allocation24_spill] sm:$0xff] %v12911_v32  ;;  %v1164_v46 = vadd.f32 %v12802_v25, %v1120_v41  ;;  %v1165_v17 = vadd.f32 %v12806_v39, %v1121_v21  ;;  %2324 = vmatmul.bf16.gmra.mxu1 %v12911_v32  ;;  %2363 = vmatmul.bf16.gmra.mxu2 %v12913_v45  ;;  %v11823_v21 = vld [vmem:[#allocation8 + $0x590] sm:$0xf0] }
 0x187   :  { %v1133_v4 = vadd.f32 %v12909_v13, %v1089_v6  ;;  %2431 = vmatmul.bf16.gmra.mxu0 %v12868_v35  ;;  %v734_v25 = vadd.f32 %v12853_v61, %v12697_v27  ;;  %v9174_v56 = vor.u32 %v11833_v50, %v9173_v55  ;;  %v737_v27 = vadd.f32 %v12863_v2, %v12712_v40  ;;  %v9133_v2 = vld [vmem:[#allocation8 + $0x580] sm:$0xf]  ;;  %v11808_v55 = vld [vmem:[#allocation8 + $0x518] sm:$0xf0] }
 0x188   :  { %v1200_v49 = vmax.f32 %v1164_v46, 0.0  ;;  %v1201_v53 = vmax.f32 %v1165_v17, 0.0  ;;  %v9154_v19 = vor.u32 %v11828_v8, %v9153_v48  ;;  %v9134_v6 = vor.u32 %v11823_v21, %v9133_v2 }
 0x189   :  { %v1169_v1 = vmax.f32 %v1133_v4, 0.0  ;;  %2571 = vmatpush.bf16.msra.mxu0 %v9174_v56  ;;  %v739_v17 = vadd.f32 %v12877_v62, %v12720_v51  ;;  %v11813_v51 = vld [vmem:[#allocation8 + $0x540] sm:$0xf0] }
 0x18a   :  { %v1233_v39 = vpack.c.bf16 %v1201_v53, %v1200_v49  ;;  %v9094_v62 = vor.u32 %v11813_v51, %v9093_v58  ;;  %v11883_v58 = vld [vmem:[#allocation8 + $0x770] sm:$0xf0] }
 0x18b   :  { %v1212_v28 = vpack.c.bf16 %v1169_v1, %v1169_v1  ;;  %v8893_v7 = vld [vmem:[#allocation2 + $0x90] sm:$0xf]  ;;  %v11762_v18 = vld [vmem:[#allocation2 + $0x94] sm:$0xf]  ;;  %v9114_v1 = vor.u32 %v11818_v37, %v9113_v43 }
 0x18c   :  { %v1059_v42 = vpop.f32.mrf.mxu0  ;;  %1257 = vst [vmem:[#allocation2 + $0x9c] sm:$0xff] %v1233_v39 }
 0x18d   :  { %v1092_v22 = vadd.f32 %v1059_v42, %v734_v25  ;;  %1236 = vst [vmem:[#allocation2 + $0x20] sm:$0xf] %v1212_v28  ;;  %2572 = vmatpush.bf16.msra.mxu0 %v9154_v19  ;;  %v12942_v28 = vpop.f32.mrf.mxu1 }
 0x18f   :  { %v1136_v29 = vadd.f32 %v12909_v13, %v1092_v22 }
 0x191   :  { %v1172_v36 = vmax.f32 %v1136_v29, 0.0  ;;  %2573 = vmatpush.bf16.msra.mxu0 %v9134_v6  ;;  %v9073_v29 = vld [vmem:[#allocation8 + $0x508] sm:$0xf] }
 0x192   :  { %v9074_v56 = vor.u32 %v11808_v55, %v9073_v29 }
 0x193   :  { %v1214_v61 = vpack.c.bf16 %v1172_v36, %v1172_v36  ;;  %v11763_v5 = vld [vmem:[#allocation2 + $0x98] sm:$0xf0]  ;;  %v8895_v23 = vld [vmem:[#allocation2 + $0x9c] sm:$0xf0] }
 0x194   :  { %v1062_v9 = vpop.f32.mrf.mxu0  ;;  %v12930_v33 = vor.u32 %v11763_v5, %v8893_v7  ;;  %v12932_v63 = vor.u32 %v11762_v18, %v8895_v23  ;;  %v8841_v49 = vld [vmem:[#allocation2 + $0x20] sm:$0xf] }
 0x195   :  { %1238 = vst [vmem:[#allocation2 + $0x2c] sm:$0xf] %v1214_v61  ;;  %v1095_v41 = vadd.f32 %v1062_v9, %v737_v27  ;;  %2574 = vmatpush.bf16.msra.mxu0 %v9114_v1  ;;  %v12951_v61 = vpop.f32.mrf.mxu1  ;;  %v9373_v1 = vld [vmem:[#allocation8 + $0x760] sm:$0xf] }
 0x196   :  { %2329 = vmatmul.bf16.gmra.mxu1 %v12930_v33  ;;  %2368 = vmatmul.bf16.gmra.mxu2 %v12932_v63 }
 0x197   :  { %v1139_v40 = vadd.f32 %v12909_v13, %v1095_v41  ;;  %2436 = vmatmul.bf16.gmra.mxu0 %v12886_v20 }
 0x199   :  { %v1175_v46 = vmax.f32 %v1139_v40, 0.0  ;;  %2575 = vmatpush.bf16.msra.mxu0 %v9094_v62  ;;  %v747_v40 = vadd.f32 %v12921_v11, %v12756_v3  ;;  %v9033_v62 = vld [vmem:[#allocation8 + $0x4b8] sm:$0xf] }
 0x19b   :  { %v1216_v4 = vpack.c.bf16 %v1175_v46, %v1175_v46  ;;  %v749_v46 = vadd.f32 %v12928_v60, %v12764_v14  ;;  %v9374_v14 = vor.u32 %v11883_v58, %v9373_v1  ;;  %v11791_v1 = vld [vmem:[#allocation8 + $0x494] sm:$0xf]  ;;  %v9015_v58 = vld [vmem:[#allocation8 + $0x4a4] sm:$0xf0] }
 0x19c   :  { %v11629_v15 = vld [vmem:[#allocation2 + $0x28] sm:$0xf0]  ;;  %v1064_v53 = vpop.f32.mrf.mxu0 }
 0x19d   :  { %v12940_v25 = vor.u32 %v11629_v15, %v8841_v49  ;;  %1240 = vst [vmem:[#allocation2 + $0x38] sm:$0xf] %v1216_v4  ;;  %v1098_v39 = vadd.f32 %v1064_v53, %v739_v17  ;;  %2576 = vmatpush.bf16.msra.mxu0 %v9074_v56  ;;  %v12960_v41 = vpop.f32.mrf.mxu1  ;;  %v9053_v15 = vld [vmem:[#allocation8 + $0x4e0] sm:$0xf]  ;;  %v11803_v53 = vld [vmem:[#allocation8 + $0x4f0] sm:$0xf0]  ;;  %2608 = vmatpush.bf16.msra.mxu1 %v9374_v14 }
 0x19e   :  { %v9055_v56 = vld [vmem:[#allocation8 + $0x4f4] sm:$0xf0]  ;;  %v9018_v14 = vor.u32 %v11791_v1, %v9015_v58 }
 0x19f   :  { %v1142_v47 = vadd.f32 %v12909_v13, %v1098_v39  ;;  %2382 = vmatmul.bf16.vlgmr.msra.gmra.mxu3 %v12940_v25 }
 0x1a1   :  { %v1178_v42 = vmax.f32 %v1142_v47, 0.0  ;;  %v9054_v47 = vor.u32 %v11803_v53, %v9053_v15  ;;  %v9333_v15 = vld [vmem:[#allocation8 + $0x710] sm:$0xf]  ;;  %v11873_v53 = vld [vmem:[#allocation8 + $0x720] sm:$0xf0] }
 0x1a3   :  { %v1218_v22 = vpack.c.bf16 %v1178_v42, %v1178_v42  ;;  %2530 = vmatpush.bf16.msrb.mxu3 %v9054_v47  ;;  %v11798_v42 = vld [vmem:[#allocation8 + $0x4c8] sm:$0xf0]  ;;  %v9334_v47 = vor.u32 %v11873_v53, %v9333_v15  ;;  %v8955_v15 = vld [vmem:[#allocation8 + $0x42c] sm:$0xf0] }
 0x1a4   :  { %v1067_v50 = vpop.f32.mrf.mxu0  ;;  %v8853_v48 = vld [vmem:[#allocation2 + $0x38] sm:$0xf]  ;;  %v9034_v29 = vor.u32 %v11798_v42, %v9033_v62  ;;  %v9313_v62 = vld [vmem:[#allocation8 + $0x6e8] sm:$0xf]  ;;  %v11868_v42 = vld [vmem:[#allocation8 + $0x6f8] sm:$0xf0] }
 0x1a5   :  { %1242 = vst [vmem:[#allocation2 + $0x44] sm:$0xf] %v1218_v22  ;;  %v1101_v36 = vadd.f32 %v1067_v50, %v742_v38  ;;  %v12970_v4 = vpop.f32.mrf.mxu1  ;;  %v752_v38 = vadd.f32 %v12942_v28, %v12771_v30  ;;  %v11801_v50 = vld [vmem:[#allocation8 + $0x4e4] sm:$0xf] }
 0x1a6   :  { %2460 = vmatmul.bf16.vlgmr.msrb.gmra.mxu1 %v12832_v44  ;;  %2499 = vmatmul.bf16.vlgmr.msrb.gmra.mxu2 %v12940_v25  ;;  %v11793_v28 = vld [vmem:[#allocation8 + $0x4a0] sm:$0xf0]  ;;  %v759_v58 = vadd.f32 %v12970_v4, %v12792_v10  ;;  %v9233_v4 = vld [vmem:[#allocation8 + $0x648] sm:$0xf] }
 0x1a7   :  { %v1145_v27 = vadd.f32 %v12909_v13, %v1101_v36  ;;  %2441 = vmatmul.bf16.gmra.mxu0 %v12911_v32  ;;  %2531 = vmatpush.bf16.msrb.mxu3 %v9034_v29 }
 0x1a9   :  { %v1181_v7 = vmax.f32 %v1145_v27, 0.0  ;;  %v9058_v27 = vor.u32 %v11801_v50, %v9055_v56  ;;  %v8995_v50 = vld [vmem:[#allocation8 + $0x47c] sm:$0xf0] }
 0x1ab   :  { %v1220_v24 = vpack.c.bf16 %v1181_v7, %v1181_v7  ;;  %v9353_v7 = vld [vmem:[#allocation8 + $0x738] sm:$0xf]  ;;  %2647 = vmatpush.bf16.msra.mxu2 %v9058_v27 }
 0x1ac   :  { %v11632_v8 = vld [vmem:[#allocation2 + $0x40] sm:$0xf0]  ;;  %v1069_v9 = vpop.f32.mrf.mxu0  ;;  %v8953_v27 = vld [vmem:[#allocation8 + $0x418] sm:$0xf] }
 0x1ad   :  { %v12956_v5 = vor.u32 %v11632_v8, %v8853_v48  ;;  %1244 = vst [vmem:[#allocation2 + $0x50] sm:$0xf] %v1220_v24  ;;  %v1104_v18 = vadd.f32 %v1069_v9, %v744_v59  ;;  %v11878_v59 = vld [vmem:[#allocation8 + $0x748] sm:$0xf0]  ;;  %v9013_v24 = vld [vmem:[#allocation8 + $0x490] sm:$0xf] }
 0x1ae   :  { %v9354_v30 = vor.u32 %v11878_v59, %v9353_v7  ;;  %v9014_v8 = vor.u32 %v11793_v28, %v9013_v24  ;;  %v11796_v9 = vld [vmem:[#allocation8 + $0x4bc] sm:$0xf]  ;;  %v11778_v7 = vld [vmem:[#allocation8 + $0x428] sm:$0xf0]  ;;  %v757_v59 = vadd.f32 %v12960_v41, %v12786_v34  ;;  %v8933_v34 = vld [vmem:[#allocation8 + $0x3f0] sm:$0xf] }
 0x1af   :  { %v1148_v23 = vadd.f32 %v12909_v13, %v1104_v18  ;;  %2387 = vmatmul.bf16.gmra.mxu3 %v12956_v5  ;;  %v9035_v18 = vld [vmem:[#allocation8 + $0x4cc] sm:$0xf0]  ;;  %v11773_v41 = vld [vmem:[#allocation8 + $0x400] sm:$0xf0] }
 0x1b0   :  { %2609 = vmatpush.bf16.msra.mxu1 %v9354_v30  ;;  %2532 = vmatpush.bf16.msrb.mxu3 %v9014_v8  ;;  %v8954_v30 = vor.u32 %v11778_v7, %v8953_v27  ;;  %v9293_v8 = vld [vmem:[#allocation8 + $0x6c0] sm:$0xf]  ;;  %v11848_v7 = vld [vmem:[#allocation8 + $0x658] sm:$0xf0] }
 0x1b1   :  { %v1184_v19 = vmax.f32 %v1148_v23, 0.0 }
 0x1b3   :  { %v1222_v2 = vpack.c.bf16 %v1184_v19, %v1184_v19 }
 0x1b4   :  { %v1072_v0 = vpop.f32.mrf.mxu0  ;;  %v8865_v3 = vld [vmem:[#allocation2 + $0x50] sm:$0xf]  ;;  %2610 = vmatpush.bf16.msra.mxu1 %v9334_v47 }
 0x1b5   :  { %1246 = vst [vmem:[#allocation2 + $0x5c] sm:$0xf] %v1222_v2  ;;  %v1107_v52 = vadd.f32 %v1072_v0, %v747_v40  ;;  %v9038_v40 = vor.u32 %v11796_v9, %v9035_v18  ;;  %v8993_v0 = vld [vmem:[#allocation8 + $0x468] sm:$0xf]  ;;  %v11863_v9 = vld [vmem:[#allocation8 + $0x6d0] sm:$0xf0] }
 0x1b6   :  { %2465 = vmatmul.bf16.gmra.mxu1 %v12850_v31  ;;  %2504 = vmatmul.bf16.gmra.mxu2 %v12956_v5  ;;  %v11768_v47 = vld [vmem:[#allocation8 + $0x3d8] sm:$0xf0] }
 0x1b7   :  { %v1151_v21 = vadd.f32 %v12909_v13, %v1107_v52  ;;  %2446 = vmatmul.bf16.gmra.mxu0 %v12930_v33  ;;  %v11788_v52 = vld [vmem:[#allocation8 + $0x478] sm:$0xf0]  ;;  %2648 = vmatpush.bf16.msra.mxu2 %v9038_v40  ;;  %v8975_v40 = vld [vmem:[#allocation8 + $0x454] sm:$0xf0] }
 0x1b9   :  { %v1187_v6 = vmax.f32 %v1151_v21, 0.0  ;;  %v754_v21 = vadd.f32 %v12951_v61, %v12779_v57  ;;  %v8973_v57 = vld [vmem:[#allocation8 + $0x440] sm:$0xf]  ;;  %v11783_v61 = vld [vmem:[#allocation8 + $0x450] sm:$0xf0] }
 0x1bb   :  { %v1224_v17 = vpack.c.bf16 %v1187_v6, %v1187_v6  ;;  %2649 = vmatpush.bf16.msra.mxu2 %v9018_v14 }
 0x1bc   :  { %v11635_v11 = vld [vmem:[#allocation2 + $0x58] sm:$0xf0]  ;;  %v1074_v43 = vpop.f32.mrf.mxu0 }
 0x1bd   :  { %v12972_v37 = vor.u32 %v11635_v11, %v8865_v3  ;;  %1248 = vst [vmem:[#allocation2 + $0x68] sm:$0xf] %v1224_v17  ;;  %v1110_v49 = vadd.f32 %v1074_v43, %v749_v46  ;;  %v8994_v11 = vor.u32 %v11788_v52, %v8993_v0 }
 0x1bf   :  { %v1154_v39 = vadd.f32 %v12909_v13, %v1110_v49  ;;  %2392 = vmatmul.bf16.gmra.mxu3 %v12972_v37 }
 0x1c0   :  { %2533 = vmatpush.bf16.msrb.mxu3 %v8994_v11 }
 0x1c1   :  { %v1190_v60 = vmax.f32 %v1154_v39, 0.0 }
 0x1c3   :  { %v1226_v51 = vpack.c.bf16 %v1190_v60, %v1190_v60  ;;  %v2305_v22 = vpop.f32.mrf.mxu1 }
 0x1c4   :  { %v1077_v55 = vpop.f32.mrf.mxu0  ;;  %v8877_v6 = vld [vmem:[#allocation2 + $0x68] sm:$0xf] }
 0x1c5   :  { %1250 = vst [vmem:[#allocation2 + $0x74] sm:$0xf] %v1226_v51  ;;  %v1113_v36 = vadd.f32 %v1077_v55, %v752_v38  ;;  %v8974_v51 = vor.u32 %v11783_v61, %v8973_v57  ;;  %v11786_v38 = vld [vmem:[#allocation8 + $0x46c] sm:$0xf]  ;;  %v9314_v55 = vor.u32 %v11868_v42, %v9313_v62  ;;  %v9253_v42 = vld [vmem:[#allocation8 + $0x670] sm:$0xf] }
 0x1c6   :  { %2470 = vmatmul.bf16.gmra.mxu1 %v12870_v12  ;;  %2509 = vmatmul.bf16.gmra.mxu2 %v12972_v37 }
 0x1c7   :  { %v1157_v48 = vadd.f32 %v12909_v13, %v1113_v36  ;;  %2577 = vmatmul.bf16.vlgmr.msra.gmra.mxu0 %v12832_v44  ;;  %v8998_v36 = vor.u32 %v11786_v38, %v8995_v50  ;;  %2534 = vmatpush.bf16.msrb.mxu3 %v8974_v51  ;;  %v11853_v38 = vld [vmem:[#allocation8 + $0x680] sm:$0xf0]  ;;  %v11771_v50 = vld [vmem:[#allocation8 + $0x3f4] sm:$0xf] }
 0x1c8   :  { %2611 = vmatpush.bf16.msra.mxu1 %v9314_v55  ;;  %v9254_v55 = vor.u32 %v11853_v38, %v9253_v42  ;;  %v9295_v42 = vld [vmem:[#allocation8 + $0x6d4] sm:$0xf0] }
 0x1c9   :  { %v1193_v23 = vmax.f32 %v1157_v48, 0.0  ;;  %v2344_v19 = vpop.f32.mrf.mxu2  ;;  %2650 = vmatpush.bf16.msra.mxu2 %v8998_v36  ;;  %v8935_v36 = vld [vmem:[#allocation8 + $0x404] sm:$0xf0] }
 0x1ca   :  { %v12982_v2 = vadd.f32 %v2344_v19, %v2305_v22  ;;  %v11781_v19 = vld [vmem:[#allocation8 + $0x444] sm:$0xf]  ;;  %v8938_v27 = vor.u32 %v11771_v50, %v8935_v36  ;;  %v11856_v50 = vld [vmem:[#allocation8 + $0x69c] sm:$0xf]  ;;  %v9275_v36 = vld [vmem:[#allocation8 + $0x6ac] sm:$0xf0] }
 0x1cb   :  { %v1228_v17 = vpack.c.bf16 %v1193_v23, %v1193_v23  ;;  %v2307_v3 = vpop.f32.mrf.mxu1  ;;  %v9294_v23 = vor.u32 %v11863_v9, %v9293_v8  ;;  %v8978_v0 = vor.u32 %v11781_v19, %v8975_v40  ;;  %2535 = vmatpush.bf16.msrb.mxu3 %v8954_v30  ;;  %v9234_v30 = vor.u32 %v11848_v7, %v9233_v4  ;;  %v9375_v40 = vld [vmem:[#allocation8 + $0x774] sm:$0xf0]  ;;  %v11851_v7 = vld [vmem:[#allocation8 + $0x674] sm:$0xf] }
 0x1cc   :  { %v11638_v46 = vld [vmem:[#allocation2 + $0x70] sm:$0xf0]  ;;  %v1079_v49 = vpop.f32.mrf.mxu0 }
 0x1cd   :  { %v12986_v43 = vor.u32 %v11638_v46, %v8877_v6  ;;  %1252 = vst [vmem:[#allocation2 + $0x80] sm:$0xf] %v1228_v17  ;;  %v1116_v39 = vadd.f32 %v1079_v49, %v754_v21  ;;  %v8934_v21 = vor.u32 %v11773_v41, %v8933_v34  ;;  %2612 = vmatpush.bf16.msra.mxu1 %v9294_v23  ;;  %v9273_v6 = vld [vmem:[#allocation8 + $0x698] sm:$0xf]  ;;  %v11858_v46 = vld [vmem:[#allocation8 + $0x6a8] sm:$0xf0] }
 0x1ce   :  { %2651 = vmatpush.bf16.msra.mxu2 %v8978_v0  ;;  %v11776_v17 = vld [vmem:[#allocation8 + $0x41c] sm:$0xf]  ;;  %v9274_v49 = vor.u32 %v11858_v46, %v9273_v6 }
 0x1cf   :  { %2397 = vmatmul.bf16.gmra.mxu3 %v12986_v43  ;;  %v1160_v60 = vadd.f32 %v12909_v13, %v1116_v39  ;;  %v8958_v1 = vor.u32 %v11776_v17, %v8955_v15  ;;  %v8913_v39 = vld [vmem:[#allocation8 + $0x3c8] sm:$0xf]  ;;  %v11871_v15 = vld [vmem:[#allocation8 + $0x714] sm:$0xf] }
 0x1d0   :  { %2536 = vmatpush.bf16.msrb.mxu3 %v8934_v21  ;;  %v8914_v62 = vor.u32 %v11768_v47, %v8913_v39  ;;  %v9355_v21 = vld [vmem:[#allocation8 + $0x74c] sm:$0xf0] }
 0x1d1   :  { %v1196_v22 = vmax.f32 %v1160_v60, 0.0  ;;  %v2346_v29 = vpop.f32.mrf.mxu2  ;;  %2613 = vmatpush.bf16.msra.mxu1 %v9274_v49 }
 0x1d2   :  { %v12990_v56 = vadd.f32 %v2346_v29, %v2307_v3  ;;  %2652 = vmatpush.bf16.msra.mxu2 %v8958_v1  ;;  %v9335_v1 = vld [vmem:[#allocation8 + $0x724] sm:$0xf0] }
 0x1d3   :  { %v1230_v24 = vpack.c.bf16 %v1196_v22, %v1196_v22  ;;  %v2310_v48 = vpop.f32.mrf.mxu1  ;;  %v9338_v39 = vor.u32 %v11871_v15, %v9335_v1  ;;  %v9215_v15 = vld [vmem:[#allocation8 + $0x634] sm:$0xf0] }
 0x1d4   :  { %v1082_v28 = vpop.f32.mrf.mxu0  ;;  %v8889_v14 = vld [vmem:[#allocation2 + $0x80] sm:$0xf]  ;;  %2537 = vmatpush.bf16.msrb.mxu3 %v8914_v62  ;;  %v11861_v62 = vld [vmem:[#allocation8 + $0x6c4] sm:$0xf] }
 0x1d5   :  { %1254 = vst [vmem:[#allocation2 + $0x8c] sm:$0xf] %v1230_v24  ;;  %v1119_v18 = vadd.f32 %v1082_v28, %v757_v59  ;;  %2614 = vmatpush.bf16.msra.mxu1 %v9254_v55  ;;  %v11766_v59 = vld [vmem:[#allocation8 + $0x3cc] sm:$0xf]  ;;  %v8915_v28 = vld [vmem:[#allocation8 + $0x3dc] sm:$0xf0]  ;;  %v9298_v38 = vor.u32 %v11861_v62, %v9295_v42 }
 0x1d6   :  { %2475 = vmatmul.bf16.gmra.mxu1 %v12888_v16  ;;  %2514 = vmatmul.bf16.gmra.mxu2 %v12986_v43  ;;  %v8918_v9 = vor.u32 %v11766_v59, %v8915_v28  ;;  %v9255_v59 = vld [vmem:[#allocation8 + $0x684] sm:$0xf0]  ;;  %v11846_v28 = vld [vmem:[#allocation8 + $0x64c] sm:$0xf]  ;;  %v11836_v62 = vld [vmem:[#allocation8 + $0x5fc] sm:$0xf] }
 0x1d7   :  { %v1163_v52 = vadd.f32 %v12909_v13, %v1119_v18  ;;  %2582 = vmatmul.bf16.gmra.mxu0 %v12850_v31  ;;  %2653 = vmatpush.bf16.msra.mxu2 %v8938_v27 }
 0x1d9   :  { %v1199_v3 = vmax.f32 %v1163_v52, 0.0  ;;  %v2349_v11 = vpop.f32.mrf.mxu2  ;;  %2615 = vmatpush.bf16.msra.mxu1 %v9234_v30  ;;  %v11876_v52 = vld [vmem:[#allocation8 + $0x73c] sm:$0xf] }
 0x1da   :  { %v12998_v53 = vadd.f32 %v2349_v11, %v2310_v48  ;;  %v9358_v46 = vor.u32 %v11876_v52, %v9355_v21 }
 0x1db   :  { %v1232_v57 = vpack.c.bf16 %v1199_v3, %v1199_v3  ;;  %v2312_v61 = vpop.f32.mrf.mxu1  ;;  %2654 = vmatpush.bf16.msra.mxu2 %v8918_v9  ;;  %v9235_v9 = vld [vmem:[#allocation8 + $0x65c] sm:$0xf0] }
 0x1dc   :  { %v11641_v60 = vld [vmem:[#allocation2 + $0x88] sm:$0xf0]  ;;  %v1084_v51 = vpop.f32.mrf.mxu0 }
 0x1dd   :  { %v13002_v22 = vor.u32 %v11641_v60, %v8889_v14  ;;  %1256 = vst [vmem:[#allocation2 + $0x98] sm:$0xf] %v1232_v57  ;;  %v1122_v29 = vadd.f32 %v1084_v51, %v759_v58  ;;  %v11866_v14 = vld [vmem:[#allocation8 + $0x6ec] sm:$0xf]  ;;  %v9315_v57 = vld [vmem:[#allocation8 + $0x6fc] sm:$0xf0] }
 0x1de   :  { %v9318_v60 = vor.u32 %v11866_v14, %v9315_v57 }
 0x1df   :  { %v1166_v10 = vadd.f32 %v12909_v13, %v1122_v29  ;;  %2402 = vmatmul.bf16.gmra.mxu3 %v13002_v22  ;;  %v11881_v13 = vld [vmem:[#allocation8 + $0x764] sm:$0xf] }
 0x1e0   :  { %v9378_v0 = vor.u32 %v11881_v13, %v9375_v40 }
 0x1e1   :  { %v1202_v24 = vmax.f32 %v1166_v10, 0.0  ;;  %v2351_v48 = vpop.f32.mrf.mxu2  ;;  %v9278_v10 = vor.u32 %v11856_v50, %v9275_v36 }
 0x1e2   :  { %v13006_v8 = vadd.f32 %v2351_v48, %v2312_v61  ;;  %2725 = vmatpush.bf16.msrb.mxu0 %v9378_v0 }
 0x1e3   :  { %v1234_v18 = vpack.c.bf16 %v1202_v24, %v1202_v24  ;;  %v2315_v23 = vpop.f32.mrf.mxu1  ;;  %v9258_v24 = vor.u32 %v11851_v7, %v9255_v59 }
 0x1e4   :  { %v13008_v19 = vpop.f32.mrf.mxu0  ;;  %v8901_v3 = vld [vmem:[#allocation2 + $0x98] sm:$0xf] }
 0x1e5   :  { %1258 = vst [vmem:[#allocation2 + $0xa4] sm:$0xf] %v1234_v18 }
 0x1e6   :  { %2480 = vmatmul.bf16.gmra.mxu1 %v12913_v45  ;;  %2519 = vmatmul.bf16.gmra.mxu2 %v13002_v22 }
 0x1e7   :  { %2587 = vmatmul.bf16.gmra.mxu0 %v12870_v12 }
 0x1e8   :  { %2726 = vmatpush.bf16.msrb.mxu0 %v9358_v46 }
 0x1e9   :  { %v2354_v34 = vpop.f32.mrf.mxu2 }
 0x1ea   :  { %v13013_v41 = vadd.f32 %v2354_v34, %v2315_v23  ;;  %v9238_v23 = vor.u32 %v11846_v28, %v9235_v9  ;;  %v11844_v28 = vld [vmem:[#allocation8 + $0x638] sm:$0xf0] }
 0x1eb   :  { %v2317_v6 = vpop.f32.mrf.mxu1 }
 0x1ec   :  { %v13015_v17 = vpop.f32.mrf.mxu0  ;;  %v11764_v11 = vld [vmem:[#allocation2 + $0xa0] sm:$0xf0]  ;;  %2727 = vmatpush.bf16.msrb.mxu0 %v9338_v39 }
 0x1ed   :  { %v13017_v49 = vor.u32 %v11764_v11, %v8901_v3  ;;  %v11841_v11 = vld [vmem:[#allocation8 + $0x624] sm:$0xf] }
 0x1ee   :  { %v9218_v1 = vor.u32 %v11841_v11, %v9215_v15 }
 0x1ef   :  { %2407 = vmatmul.bf16.gmra.mxu3 %v13017_v49 }
 0x1f0   :  { %2728 = vmatpush.bf16.msrb.mxu0 %v9318_v60  ;;  %2686 = vmatpush.bf16.msra.mxu3 %v9218_v1  ;;  %v11804_v60 = vld [vmem:[#allocation8 + $0x4f8] sm:$0xf0] }
 0x1f1   :  { %v2356_v47 = vpop.f32.mrf.mxu2 }
 0x1f2   :  { %v13020_v58 = vadd.f32 %v2356_v47, %v2317_v6 }
 0x1f3   :  { %v2320_v61 = vpop.f32.mrf.mxu1 }
 0x1f4   :  { %v13022_v51 = vpop.f32.mrf.mxu0  ;;  %2729 = vmatpush.bf16.msrb.mxu0 %v9298_v38  ;;  %v9195_v38 = vld [vmem:[#allocation8 + $0x60c] sm:$0xf0] }
 0x1f6   :  { %2485 = vmatmul.bf16.gmra.mxu1 %v12932_v63  ;;  %2524 = vmatmul.bf16.gmra.mxu2 %v13017_v49 }
 0x1f7   :  { %2592 = vmatmul.bf16.gmra.mxu0 %v12888_v16 }
 0x1f8   :  { %2730 = vmatpush.bf16.msrb.mxu0 %v9278_v10 }
 0x1f9   :  { %v2359_v29 = vpop.f32.mrf.mxu2 }
 0x1fa   :  { %v13027_v55 = vadd.f32 %v2359_v29, %v2320_v61  ;;  %v9061_v61 = vld [vmem:[#allocation8 + $0x4e8] sm:$0xf]  ;;  %v9198_v29 = vor.u32 %v11836_v62, %v9195_v38 }
 0x1fb   :  { %v2322_v27 = vpop.f32.mrf.mxu1  ;;  %v9062_v42 = vor.u32 %v11804_v60, %v9061_v61  ;;  %v11826_v61 = vld [vmem:[#allocation8 + $0x5ac] sm:$0xf]  ;;  %v9155_v60 = vld [vmem:[#allocation8 + $0x5bc] sm:$0xf0] }
 0x1fc   :  { %v13029_v4 = vpop.f32.mrf.mxu0  ;;  %2731 = vmatpush.bf16.msrb.mxu0 %v9258_v24  ;;  %2687 = vmatpush.bf16.msra.mxu3 %v9198_v29 }
 0x1fd   :  { %2764 = vmatpush.bf16.msrb.mxu1 %v9062_v42  ;;  %v9158_v42 = vor.u32 %v11826_v61, %v9155_v60  ;;  %v9115_v61 = vld [vmem:[#allocation8 + $0x56c] sm:$0xf0] }
 0x1ff   :  { %2538 = vmatmul.bf16.vlgmr.msrb.gmra.mxu3 %v12830_v26 }
 0x200   :  { %2732 = vmatpush.bf16.msrb.mxu0 %v9238_v23  ;;  %v11799_v23 = vld [vmem:[#allocation8 + $0x4d0] sm:$0xf0] }
 0x201   :  { %v2361_v48 = vpop.f32.mrf.mxu2 }
 0x202   :  { %v13032_v30 = vadd.f32 %v2361_v48, %v2322_v27  ;;  %v9221_v48 = vld [vmem:[#allocation8 + $0x628] sm:$0xf] }
 0x203   :  { %v2325_v18 = vpop.f32.mrf.mxu1  ;;  %v9222_v9 = vor.u32 %v11844_v28, %v9221_v48  ;;  %v11834_v28 = vld [vmem:[#allocation8 + $0x5e8] sm:$0xf0] }
 0x204   :  { %v13034_v13 = vpop.f32.mrf.mxu0 }
 0x205   :  { %2803 = vmatpush.bf16.msrb.mxu2 %v9222_v9  ;;  %v11821_v9 = vld [vmem:[#allocation8 + $0x584] sm:$0xf] }
 0x206   :  { %2616 = vmatmul.bf16.vlgmr.msra.gmra.mxu1 %v12940_v25  ;;  %2655 = vmatmul.bf16.vlgmr.msra.gmra.mxu2 %v12830_v26 }
 0x207   :  { %2597 = vmatmul.bf16.gmra.mxu0 %v12913_v45 }
 0x209   :  { %v2364_v40 = vpop.f32.mrf.mxu2 }
 0x20a   :  { %v13039_v0 = vadd.f32 %v2364_v40, %v2325_v18  ;;  %v9041_v18 = vld [vmem:[#allocation8 + $0x4c0] sm:$0xf]  ;;  %v11831_v40 = vld [vmem:[#allocation8 + $0x5d4] sm:$0xf] }
 0x20b   :  { %v2327_v34 = vpop.f32.mrf.mxu1 }
 0x20c   :  { %v13041_v52 = vpop.f32.mrf.mxu0 }
 0x20f   :  { %2543 = vmatmul.bf16.gmra.mxu3 %v12848_v54 }
 0x211   :  { %v2366_v21 = vpop.f32.mrf.mxu2 }
 0x212   :  { %v13044_v6 = vadd.f32 %v2366_v21, %v2327_v34  ;;  %v9042_v34 = vor.u32 %v11799_v23, %v9041_v18  ;;  %v9001_v23 = vld [vmem:[#allocation8 + $0x470] sm:$0xf] }
 0x213   :  { %v2330_v46 = vpop.f32.mrf.mxu1 }
 0x214   :  { %v13046_v3 = vpop.f32.mrf.mxu0  ;;  %2765 = vmatpush.bf16.msrb.mxu1 %v9042_v34  ;;  %v9161_v34 = vld [vmem:[#allocation8 + $0x5b0] sm:$0xf] }
 0x216   :  { %2621 = vmatmul.bf16.gmra.mxu1 %v12956_v5  ;;  %2660 = vmatmul.bf16.gmra.mxu2 %v12848_v54 }
 0x217   :  { %2602 = vmatmul.bf16.gmra.mxu0 %v12932_v63 }
 0x219   :  { %v2369_v39 = vpop.f32.mrf.mxu2 }
 0x21a   :  { %v13051_v47 = vadd.f32 %v2369_v39, %v2330_v46  ;;  %v9201_v46 = vld [vmem:[#allocation8 + $0x600] sm:$0xf] }
 0x21b   :  { %v2332_v14 = vpop.f32.mrf.mxu1 }
 0x21c   :  { %v13053_v57 = vpop.f32.mrf.mxu0 }
 0x21f   :  { %2548 = vmatmul.bf16.gmra.mxu3 %v12868_v35 }
 0x221   :  { %v2371_v50 = vpop.f32.mrf.mxu2 }
 0x222   :  { %v2383_v36 = vpop.f32.mrf.mxu3  ;;  %v13056_v27 = vadd.f32 %v2371_v50, %v2332_v14  ;;  %v9021_v50 = vld [vmem:[#allocation8 + $0x498] sm:$0xf] }
 0x223   :  { %v13059_v10 = vadd.f32 %v2383_v36, %v12982_v2  ;;  %v2461_v7 = vpop.f32.mrf.mxu1  ;;  %v9175_v2 = vld [vmem:[#allocation8 + $0x5e4] sm:$0xf0]  ;;  %v11794_v36 = vld [vmem:[#allocation8 + $0x4a8] sm:$0xf0] }
 0x224   :  { %v2462_v59 = vadd.f32 %v2461_v7, %v13008_v19  ;;  %v13062_v24 = vpop.f32.mrf.mxu0  ;;  %v9178_v21 = vor.u32 %v11831_v40, %v9175_v2  ;;  %v11839_v19 = vld [vmem:[#allocation8 + $0x610] sm:$0xf0]  ;;  %v9181_v7 = vld [vmem:[#allocation8 + $0x5d8] sm:$0xf]  ;;  %v9022_v48 = vor.u32 %v11794_v36, %v9021_v50  ;;  %v11789_v40 = vld [vmem:[#allocation8 + $0x480] sm:$0xf0] }
 0x225   :  { %v9202_v1 = vor.u32 %v11839_v19, %v9201_v46  ;;  %v11829_v46 = vld [vmem:[#allocation8 + $0x5c0] sm:$0xf0]  ;;  %v8981_v36 = vld [vmem:[#allocation8 + $0x448] sm:$0xf] }
 0x226   :  { %2626 = vmatmul.bf16.gmra.mxu1 %v12972_v37  ;;  %2665 = vmatmul.bf16.gmra.mxu2 %v12868_v35 }
 0x227   :  { %2733 = vmatmul.bf16.vlgmr.msrb.gmra.mxu0 %v12940_v25  ;;  %2688 = vmatpush.bf16.msra.mxu3 %v9178_v21  ;;  %v9002_v21 = vor.u32 %v11789_v40, %v9001_v23  ;;  %v9121_v23 = vld [vmem:[#allocation8 + $0x560] sm:$0xf] }
 0x228   :  { %2804 = vmatpush.bf16.msrb.mxu2 %v9202_v1  ;;  %2766 = vmatpush.bf16.msrb.mxu1 %v9022_v48  ;;  %v11816_v1 = vld [vmem:[#allocation8 + $0x55c] sm:$0xf]  ;;  %v9141_v48 = vld [vmem:[#allocation8 + $0x588] sm:$0xf] }
 0x229   :  { %v2500_v11 = vpop.f32.mrf.mxu2 }
 0x22a   :  { %v2385_v15 = vpop.f32.mrf.mxu3  ;;  %v13067_v39 = vadd.f32 %v2500_v11, %v2462_v59  ;;  %v9182_v59 = vor.u32 %v11834_v28, %v9181_v7  ;;  %v11784_v7 = vld [vmem:[#allocation8 + $0x458] sm:$0xf0] }
 0x22b   :  { %v13070_v14 = vadd.f32 %v2385_v15, %v12990_v56  ;;  %v2463_v62 = vpop.f32.mrf.mxu1  ;;  %2689 = vmatpush.bf16.msra.mxu3 %v9158_v42  ;;  %v9135_v56 = vld [vmem:[#allocation8 + $0x594] sm:$0xf0]  ;;  %v9162_v15 = vor.u32 %v11829_v46, %v9161_v34  ;;  %v11824_v28 = vld [vmem:[#allocation8 + $0x598] sm:$0xf0] }
 0x22c   :  { %14459 = vst [vmem:[#allocation25_spill] sm:$0xff] %v13067_v39  ;;  %v2464_v38 = vadd.f32 %v2463_v62, %v13015_v17  ;;  %v13073_v29 = vpop.f32.mrf.mxu0  ;;  %v9138_v18 = vor.u32 %v11821_v9, %v9135_v56  ;;  %2805 = vmatpush.bf16.msrb.mxu2 %v9182_v59  ;;  %2767 = vmatpush.bf16.msrb.mxu1 %v9002_v21  ;;  %v11811_v59 = vld [vmem:[#allocation8 + $0x534] sm:$0xf]  ;;  %v9095_v9 = vld [vmem:[#allocation8 + $0x544] sm:$0xf0] }
 0x22d   :  { %v9118_v62 = vor.u32 %v11816_v1, %v9115_v61  ;;  %v9098_v56 = vor.u32 %v11811_v59, %v9095_v9  ;;  %v11806_v1 = vld [vmem:[#allocation8 + $0x50c] sm:$0xf]  ;;  %v9075_v61 = vld [vmem:[#allocation8 + $0x51c] sm:$0xf0]  ;;  %v11769_v9 = vld [vmem:[#allocation8 + $0x3e0] sm:$0xf0] }
 0x22f   :  { %2553 = vmatmul.bf16.gmra.mxu3 %v12886_v20 }
 0x230   :  { %2690 = vmatpush.bf16.msra.mxu3 %v9138_v18  ;;  %2806 = vmatpush.bf16.msrb.mxu2 %v9162_v15  ;;  %v11779_v18 = vld [vmem:[#allocation8 + $0x430] sm:$0xf0] }
 0x231   :  { %v2502_v17 = vpop.f32.mrf.mxu2 }
 0x232   :  { %v2388_v2 = vpop.f32.mrf.mxu3  ;;  %v13076_v19 = vadd.f32 %v2502_v17, %v2464_v38  ;;  %v8982_v38 = vor.u32 %v11784_v7, %v8981_v36  ;;  %v9078_v7 = vor.u32 %v11806_v1, %v9075_v61  ;;  %v9537_v61 = vld [vmem:[#allocation8 + $0x118] sm:$0xf] }
 0x233   :  { %v13079_v11 = vadd.f32 %v2388_v2, %v12998_v53  ;;  %v2466_v60 = vpop.f32.mrf.mxu1  ;;  %v9142_v53 = vor.u32 %v11824_v28, %v9141_v48  ;;  %v11819_v2 = vld [vmem:[#allocation8 + $0x570] sm:$0xf0]  ;;  %v8941_v48 = vld [vmem:[#allocation8 + $0x3f8] sm:$0xf] }
 0x234   :  { %14460 = vst [vmem:[#allocation26_spill] sm:$0xff] %v13076_v19  ;;  %v2467_v42 = vadd.f32 %v2466_v60, %v13022_v51  ;;  %v13082_v50 = vpop.f32.mrf.mxu0  ;;  %2691 = vmatpush.bf16.msra.mxu3 %v9118_v62  ;;  %2768 = vmatpush.bf16.msrb.mxu1 %v8982_v38  ;;  %v8961_v51 = vld [vmem:[#allocation8 + $0x420] sm:$0xf]  ;;  %v9122_v15 = vor.u32 %v11819_v2, %v9121_v23  ;;  %v11774_v38 = vld [vmem:[#allocation8 + $0x408] sm:$0xf0] }
 0x235   :  { %2807 = vmatpush.bf16.msrb.mxu2 %v9142_v53  ;;  %v8962_v17 = vor.u32 %v11779_v18, %v8961_v51  ;;  %v9101_v28 = vld [vmem:[#allocation8 + $0x538] sm:$0xf]  ;;  %v11814_v53 = vld [vmem:[#allocation8 + $0x548] sm:$0xf0]  ;;  %v11809_v23 = vld [vmem:[#allocation8 + $0x520] sm:$0xf0] }
 0x236   :  { %2631 = vmatmul.bf16.gmra.mxu1 %v12986_v43  ;;  %2670 = vmatmul.bf16.gmra.mxu2 %v12886_v20  ;;  %v9102_v59 = vor.u32 %v11814_v53, %v9101_v28  ;;  %v11674_v28 = vld [vmem:[#allocation8 + $0x100] sm:$0xf0] }
 0x237   :  { %2738 = vmatmul.bf16.gmra.mxu0 %v12956_v5 }
 0x238   :  { %2692 = vmatpush.bf16.msra.mxu3 %v9098_v56  ;;  %2769 = vmatpush.bf16.msrb.mxu1 %v8962_v17  ;;  %v9081_v56 = vld [vmem:[#allocation8 + $0x510] sm:$0xf] }
 0x239   :  { %v2505_v40 = vpop.f32.mrf.mxu2  ;;  %2808 = vmatpush.bf16.msrb.mxu2 %v9122_v15  ;;  %v9082_v17 = vor.u32 %v11809_v23, %v9081_v56  ;;  %v11669_v56 = vld [vmem:[#allocation8 + $0xd8] sm:$0xf0] }
 0x23a   :  { %v2390_v34 = vpop.f32.mrf.mxu3  ;;  %v13087_v21 = vadd.f32 %v2505_v40, %v2467_v42  ;;  %v8942_v42 = vor.u32 %v11774_v38, %v8941_v48  ;;  %v9517_v38 = vld [vmem:[#allocation8 + $0xf0] sm:$0xf] }
 0x23b   :  { %v13090_v46 = vadd.f32 %v2390_v34, %v13006_v8  ;;  %v2468_v60 = vpop.f32.mrf.mxu1  ;;  %v8921_v8 = vld [vmem:[#allocation8 + $0x3d0] sm:$0xf]  ;;  %v9518_v53 = vor.u32 %v11674_v28, %v9517_v38 }
 0x23c   :  { %14461 = vst [vmem:[#allocation27_spill] sm:$0xff] %v13087_v21  ;;  %v2469_v62 = vadd.f32 %v2468_v60, %v13029_v4  ;;  %v13093_v36 = vpop.f32.mrf.mxu0  ;;  %2693 = vmatpush.bf16.msra.mxu3 %v9078_v7  ;;  %2770 = vmatpush.bf16.msrb.mxu1 %v8942_v42  ;;  %v8922_v18 = vor.u32 %v11769_v9, %v8921_v8  ;;  %v11679_v60 = vld [vmem:[#allocation8 + $0x128] sm:$0xf0]  ;;  %v9497_v9 = vld [vmem:[#allocation8 + $0xc8] sm:$0xf] }
 0x23d   :  { %2809 = vmatpush.bf16.msrb.mxu2 %v9102_v59 }
 0x23f   :  { %2558 = vmatmul.bf16.gmra.mxu3 %v12911_v32 }
 0x240   :  { %2771 = vmatpush.bf16.msrb.mxu1 %v8922_v18 }
 0x241   :  { %v2507_v51 = vpop.f32.mrf.mxu2  ;;  %2810 = vmatpush.bf16.msrb.mxu2 %v9082_v17  ;;  %v9477_v17 = vld [vmem:[#allocation8 + $0xa0] sm:$0xf] }
 0x242   :  { %v2393_v4 = vpop.f32.mrf.mxu3  ;;  %v13096_v40 = vadd.f32 %v2507_v51, %v2469_v62  ;;  %v9538_v62 = vor.u32 %v11679_v60, %v9537_v61  ;;  %v9498_v51 = vor.u32 %v11669_v56, %v9497_v9 }
 0x243   :  { %v13099_v34 = vadd.f32 %v2393_v4, %v13013_v41  ;;  %v2471_v2 = vpop.f32.mrf.mxu1 }
 0x244   :  { %14462 = vst [vmem:[#allocation28_spill] sm:$0xff] %v13096_v40  ;;  %v2472_v15 = vadd.f32 %v2471_v2, %v13034_v13  ;;  %v13102_v1 = vpop.f32.mrf.mxu0  ;;  %3521 = vmatpush.bf16.msra.mxu0 %v9538_v62  ;;  %v11664_v2 = vld [vmem:[#allocation8 + $0xb0] sm:$0xf0]  ;;  %v9457_v62 = vld [vmem:[#allocation8 + $0x78] sm:$0xf] }
 0x246   :  { %2636 = vmatmul.bf16.gmra.mxu1 %v13002_v22  ;;  %2675 = vmatmul.bf16.gmra.mxu2 %v12911_v32 }
 0x247   :  { %2743 = vmatmul.bf16.gmra.mxu0 %v12972_v37 }
 0x248   :  { %3522 = vmatpush.bf16.msra.mxu0 %v9518_v53  ;;  %v11654_v53 = vld [vmem:[#allocation8 + $0x60] sm:$0xf0] }
 0x249   :  { %v2510_v7 = vpop.f32.mrf.mxu2 }
 0x24a   :  { %v2395_v41 = vpop.f32.mrf.mxu3  ;;  %v13107_v48 = vadd.f32 %v2510_v7, %v2472_v15  ;;  %v11659_v7 = vld [vmem:[#allocation8 + $0x88] sm:$0xf0] }
 0x24b   :  { %v13110_v13 = vadd.f32 %v2395_v41, %v13020_v58  ;;  %v2473_v42 = vpop.f32.mrf.mxu1  ;;  %v9458_v41 = vor.u32 %v11659_v7, %v9457_v62 }
 0x24c   :  { %14463 = vst [vmem:[#allocation29_spill] sm:$0xff] %v13107_v48  ;;  %v2474_v59 = vadd.f32 %v2473_v42, %v13041_v52  ;;  %v13113_v8 = vpop.f32.mrf.mxu0  ;;  %3523 = vmatpush.bf16.msra.mxu0 %v9498_v51  ;;  %v9478_v52 = vor.u32 %v11664_v2, %v9477_v17  ;;  %v12535_v17 = vmov 0   ;;  %v11744_v48 = vld [vmem:[#allocation8 + $0x330] sm:$0xf0] }
 0x24d   :  { %1203 = vst [vmem:[#allocation2] sm:$0xff] %v12535_v17 }
 0x24e   :  { %1205 = vst [vmem:[#allocation2 + $0xc] sm:$0xff] %v12535_v17 }
 0x24f   :  { %2563 = vmatmul.bf16.gmra.mxu3 %v12930_v33  ;;  %1204 = vst [vmem:[#allocation2 + $0x8] sm:$0xf] %v12535_v17 }
 0x250   :  { %3524 = vmatpush.bf16.msra.mxu0 %v9478_v52  ;;  %1206 = vst [vmem:[#allocation2 + $0x14] sm:$0xf] %v12535_v17 }
 0x251   :  { %v2512_v4 = vpop.f32.mrf.mxu2  ;;  %1207 = vst [vmem:[#allocation2 + $0xa8] sm:$0xff] %v12535_v17 }
 0x252   :  { %v2398_v18 = vpop.f32.mrf.mxu3  ;;  %v13116_v23 = vadd.f32 %v2512_v4, %v2474_v59  ;;  %v9417_v4 = vld [vmem:[#allocation8 + $0x28] sm:$0xf]  ;;  %1208 = vst [vmem:[#allocation2 + $0xb0] sm:$0xf] %v12535_v17 }
 0x253   :  { %v13119_v58 = vadd.f32 %v2398_v18, %v13027_v55  ;;  %v2476_v15 = vpop.f32.mrf.mxu1  ;;  %v11649_v18 = vld [vmem:[#allocation8 + $0x38] sm:$0xf0]  ;;  %1209 = vst [vmem:[#allocation2 + $0xb4] sm:$0xff] %v12535_v17 }
 0x254   :  { %14464 = vst [vmem:[#allocation30_spill] sm:$0xff] %v13116_v23  ;;  %v2477_v61 = vadd.f32 %v2476_v15, %v13046_v3  ;;  %v13122_v60 = vpop.f32.mrf.mxu0  ;;  %3525 = vmatpush.bf16.msra.mxu0 %v9458_v41  ;;  %v9437_v3 = vld [vmem:[#allocation8 + $0x50] sm:$0xf]  ;;  %v9418_v2 = vor.u32 %v11649_v18, %v9417_v4  ;;  %v11749_v23 = vld [vmem:[#allocation8 + $0x358] sm:$0xf0] }
 0x255   :  { %v9438_v9 = vor.u32 %v11654_v53, %v9437_v3  ;;  %1210 = vst [vmem:[#allocation2 + $0xbc] sm:$0xf] %v12535_v17 }
 0x256   :  { %2641 = vmatmul.bf16.gmra.mxu1 %v13017_v49  ;;  %2680 = vmatmul.bf16.gmra.mxu2 %v12930_v33 }
 0x257   :  { %2748 = vmatmul.bf16.gmra.mxu0 %v12986_v43 }
 0x258   :  { %3526 = vmatpush.bf16.msra.mxu0 %v9438_v9 }
 0x259   :  { %v2515_v55 = vpop.f32.mrf.mxu2 }
 0x25a   :  { %v2400_v38 = vpop.f32.mrf.mxu3  ;;  %v13127_v28 = vadd.f32 %v2515_v55, %v2477_v61  ;;  %v9397_v61 = vld [vmem:[#allocation8] sm:$0xf] }
 0x25b   :  { %v13130_v42 = vadd.f32 %v2400_v38, %v13032_v30  ;;  %v2478_v59 = vpop.f32.mrf.mxu1 }
 0x25c   :  { %14465 = vst [vmem:[#allocation31_spill] sm:$0xff] %v13127_v28  ;;  %v2479_v56 = vadd.f32 %v2478_v59, %v13053_v57  ;;  %v13133_v51 = vpop.f32.mrf.mxu0  ;;  %3527 = vmatpush.bf16.msra.mxu0 %v9418_v2  ;;  %v11644_v57 = vld [vmem:[#allocation8 + $0x10] sm:$0xf0] }
 0x25d   :  { %v9398_v41 = vor.u32 %v11644_v57, %v9397_v61  ;;  %v11884_v57 = vld [vmem:[#allocation8 + $0x778] sm:$0xf0] }
 0x25f   :  { %2694 = vmatmul.bf16.vlgmr.msra.gmra.mxu3 %v12832_v44 }
 0x260   :  { %3528 = vmatpush.bf16.msra.mxu0 %v9398_v41 }
 0x261   :  { %v2517_v30 = vpop.f32.mrf.mxu2 }
 0x262   :  { %v13136_v15 = vadd.f32 %v2517_v30, %v2479_v56  ;;  %v2403_v52 = vpop.f32.mrf.mxu3 }
 0x263   :  { %v13139_v62 = vadd.f32 %v2403_v52, %v13039_v0  ;;  %v2481_v7 = vpop.f32.mrf.mxu1 }
 0x264   :  { %14466 = vst [vmem:[#allocation32_spill] sm:$0xff] %v13136_v15  ;;  %v2482_v55 = vadd.f32 %v2481_v7, %v13062_v24  ;;  %v13142_v38 = vpop.f32.mrf.mxu0 }
 0x266   :  { %2772 = vmatmul.bf16.vlgmr.msrb.gmra.mxu1 %v12830_v26  ;;  %2811 = vmatmul.bf16.vlgmr.msrb.gmra.mxu2 %v12832_v44 }
 0x267   :  { %2753 = vmatmul.bf16.gmra.mxu0 %v13002_v22 }
 0x269   :  { %v2520_v3 = vpop.f32.mrf.mxu2 }
 0x26a   :  { %v13147_v53 = vadd.f32 %v2520_v3, %v2482_v55  ;;  %v2405_v0 = vpop.f32.mrf.mxu3 }
 0x26b   :  { %v13150_v59 = vadd.f32 %v2405_v0, %v13044_v6  ;;  %v2483_v9 = vpop.f32.mrf.mxu1  ;;  %v9381_v6 = vld [vmem:[#allocation8 + $0x768] sm:$0xf] }
 0x26c   :  { %14467 = vst [vmem:[#allocation33_spill] sm:$0xff] %v13147_v53  ;;  %v2484_v24 = vadd.f32 %v2483_v9, %v13073_v29  ;;  %v13153_v56 = vpop.f32.mrf.mxu0  ;;  %v9382_v29 = vor.u32 %v11884_v57, %v9381_v6  ;;  %v9697_v9 = vld [vmem:[#allocation8 + $0x258] sm:$0xf]  ;;  %v9385_v57 = vld [vmem:[#allocation2] sm:$0xf] }
 0x26e   :  { %2842 = vmatpush.bf16.msrb.mxu3 %v9382_v29 }
 0x26f   :  { %2699 = vmatmul.bf16.gmra.mxu3 %v12850_v31 }
 0x271   :  { %v2522_v4 = vpop.f32.mrf.mxu2 }
 0x272   :  { %v13156_v18 = vadd.f32 %v2522_v4, %v2484_v24  ;;  %v2408_v17 = vpop.f32.mrf.mxu3  ;;  %v11719_v24 = vld [vmem:[#allocation8 + $0x268] sm:$0xf0]  ;;  %v9361_v4 = vld [vmem:[#allocation8 + $0x740] sm:$0xf] }
 0x273   :  { %v13159_v2 = vadd.f32 %v2408_v17, %v13051_v47  ;;  %v2486_v30 = vpop.f32.mrf.mxu1  ;;  %v9698_v17 = vor.u32 %v11719_v24, %v9697_v9  ;;  %v9857_v9 = vld [vmem:[#allocation8 + $0x398] sm:$0xf]  ;;  %v11759_v24 = vld [vmem:[#allocation8 + $0x3a8] sm:$0xf0] }
 0x274   :  { %14468 = vst [vmem:[#allocation34_spill] sm:$0xff] %v13156_v18  ;;  %v2487_v52 = vadd.f32 %v2486_v30, %v13082_v50  ;;  %v13162_v61 = vpop.f32.mrf.mxu0  ;;  %v11879_v30 = vld [vmem:[#allocation8 + $0x750] sm:$0xf0] }
 0x275   :  { %14469 = vst [vmem:[#allocation35_spill] sm:$0xff] %v13159_v2  ;;  %v9362_v6 = vor.u32 %v11879_v30, %v9361_v4  ;;  %3560 = vmatpush.bf16.msra.mxu1 %v9698_v17  ;;  %v9858_v4 = vor.u32 %v11759_v24, %v9857_v9  ;;  %v9677_v17 = vld [vmem:[#allocation8 + $0x230] sm:$0xf]  ;;  %v9341_v30 = vld [vmem:[#allocation8 + $0x718] sm:$0xf] }
 0x276   :  { %2777 = vmatmul.bf16.gmra.mxu1 %v12848_v54  ;;  %2816 = vmatmul.bf16.gmra.mxu2 %v12850_v31  ;;  %v9321_v9 = vld [vmem:[#allocation8 + $0x6f0] sm:$0xf]  ;;  %v11869_v24 = vld [vmem:[#allocation8 + $0x700] sm:$0xf0] }
 0x277   :  { %2758 = vmatmul.bf16.gmra.mxu0 %v13017_v49  ;;  %2843 = vmatpush.bf16.msrb.mxu3 %v9362_v6  ;;  %v11874_v6 = vld [vmem:[#allocation8 + $0x728] sm:$0xf0]  ;;  %v9322_v15 = vor.u32 %v11869_v24, %v9321_v9 }
 0x278   :  { %3599 = vmatpush.bf16.msra.mxu2 %v9858_v4  ;;  %v9657_v4 = vld [vmem:[#allocation8 + $0x208] sm:$0xf] }
 0x279   :  { %v2525_v7 = vpop.f32.mrf.mxu2 }
 0x27a   :  { %v13167_v41 = vadd.f32 %v2525_v7, %v2487_v52  ;;  %v2410_v47 = vpop.f32.mrf.mxu3  ;;  %v11625_v52 = vld [vmem:[#allocation2 + $0x8] sm:$0xf0] }
 0x27b   :  { %v13170_v55 = vadd.f32 %v2410_v47, %v13056_v27  ;;  %v2488_v50 = vpop.f32.mrf.mxu1 }
 0x27c   :  { %14470 = vst [vmem:[#allocation36_spill] sm:$0xff] %v13167_v41  ;;  %v2489_v3 = vadd.f32 %v2488_v50, %v13093_v36  ;;  %v13173_v0 = vpop.f32.mrf.mxu0  ;;  %v13179_v50 = vor.u32 %v11625_v52, %v9385_v57  ;;  %v9342_v57 = vor.u32 %v11874_v6, %v9341_v30  ;;  %v9837_v52 = vld [vmem:[#allocation8 + $0x370] sm:$0xf] }
 0x27d   :  { %14471 = vst [vmem:[#allocation37_spill] sm:$0xff] %v13170_v55 }
 0x27e   :  { %2844 = vmatpush.bf16.msrb.mxu3 %v9342_v57  ;;  %v11864_v57 = vld [vmem:[#allocation8 + $0x6d8] sm:$0xf0] }
 0x27f   :  { %2704 = vmatmul.bf16.gmra.mxu3 %v12870_v12 }
 0x281   :  { %v2527_v29 = vpop.f32.mrf.mxu2 }
 0x282   :  { %v13176_v27 = vadd.f32 %v2527_v29, %v2489_v3  ;;  %v2539_v7 = vpop.f32.mrf.mxu3  ;;  %v11714_v3 = vld [vmem:[#allocation8 + $0x240] sm:$0xf0]  ;;  %2845 = vmatpush.bf16.msrb.mxu3 %v9322_v15  ;;  %v11859_v15 = vld [vmem:[#allocation8 + $0x6b0] sm:$0xf0] }
 0x283   :  { %v2579_v36 = vadd.f32 %v13102_v1, %v2539_v7  ;;  %v2617_v47 = vpop.f32.mrf.mxu1  ;;  %v9678_v1 = vor.u32 %v11714_v3, %v9677_v17  ;;  %v11754_v29 = vld [vmem:[#allocation8 + $0x380] sm:$0xf0]  ;;  %v11709_v17 = vld [vmem:[#allocation8 + $0x218] sm:$0xf0]  ;;  %v9817_v3 = vld [vmem:[#allocation8 + $0x348] sm:$0xf] }
 0x284   :  { %14472 = vst [vmem:[#allocation38_spill] sm:$0xff] %v13176_v27  ;;  %v13181_v41 = vpop.f32.mrf.mxu0  ;;  %v9658_v6 = vor.u32 %v11709_v17, %v9657_v4  ;;  %v9281_v4 = vld [vmem:[#allocation8 + $0x6a0] sm:$0xf] }
 0x285   :  { %v13183_v18 = vadd.f32 %v2617_v47, %v2579_v36  ;;  %3561 = vmatpush.bf16.msra.mxu1 %v9678_v1  ;;  %v9838_v36 = vor.u32 %v11754_v29, %v9837_v52  ;;  %v9818_v1 = vor.u32 %v11749_v23, %v9817_v3  ;;  %v9301_v52 = vld [vmem:[#allocation8 + $0x6c8] sm:$0xf]  ;;  %v9637_v29 = vld [vmem:[#allocation8 + $0x1e0] sm:$0xf]  ;;  %v9282_v3 = vor.u32 %v11859_v15, %v9281_v4 }
 0x286   :  { %2782 = vmatmul.bf16.gmra.mxu1 %v12868_v35  ;;  %2821 = vmatmul.bf16.gmra.mxu2 %v12870_v12 }
 0x287   :  { %14473 = vst [vmem:[#allocation39_spill] sm:$0xff] %v13183_v18  ;;  %3529 = vmatmul.bf16.vlgmr.msra.gmra.mxu0 %v13179_v50  ;;  %3600 = vmatpush.bf16.msra.mxu2 %v9838_v36  ;;  %v11704_v36 = vld [vmem:[#allocation8 + $0x1f0] sm:$0xf0] }
 0x288   :  { %v9638_v24 = vor.u32 %v11704_v36, %v9637_v29  ;;  %v11739_v36 = vld [vmem:[#allocation8 + $0x308] sm:$0xf0] }
 0x289   :  { %v13188_v7 = vpop.f32.mrf.mxu2  ;;  %3562 = vmatpush.bf16.msra.mxu1 %v9658_v6 }
 0x28a   :  { %v2541_v47 = vpop.f32.mrf.mxu3 }
 0x28b   :  { %v2581_v27 = vadd.f32 %v13113_v8, %v2541_v47  ;;  %v2619_v53 = vpop.f32.mrf.mxu1  ;;  %v9302_v8 = vor.u32 %v11864_v57, %v9301_v52  ;;  %3601 = vmatpush.bf16.msra.mxu2 %v9818_v1  ;;  %v9797_v47 = vld [vmem:[#allocation8 + $0x320] sm:$0xf]  ;;  %v9617_v1 = vld [vmem:[#allocation8 + $0x1b8] sm:$0xf]  ;;  %v11699_v52 = vld [vmem:[#allocation8 + $0x1c8] sm:$0xf0] }
 0x28c   :  { %v13191_v28 = vpop.f32.mrf.mxu0  ;;  %v9777_v57 = vld [vmem:[#allocation8 + $0x2f8] sm:$0xf]  ;;  %v9618_v29 = vor.u32 %v11699_v52, %v9617_v1  ;;  %v9241_v52 = vld [vmem:[#allocation8 + $0x650] sm:$0xf] }
 0x28d   :  { %v13193_v30 = vadd.f32 %v2619_v53, %v2581_v27  ;;  %2846 = vmatpush.bf16.msrb.mxu3 %v9302_v8  ;;  %v9798_v27 = vor.u32 %v11744_v48, %v9797_v47  ;;  %3563 = vmatpush.bf16.msra.mxu1 %v9638_v24  ;;  %v9778_v48 = vor.u32 %v11739_v36, %v9777_v57  ;;  %v9261_v8 = vld [vmem:[#allocation8 + $0x678] sm:$0xf]  ;;  %v9597_v24 = vld [vmem:[#allocation8 + $0x190] sm:$0xf] }
 0x28f   :  { %14474 = vst [vmem:[#allocation40_spill] sm:$0xff] %v13193_v30  ;;  %2709 = vmatmul.bf16.gmra.mxu3 %v12888_v16  ;;  %3602 = vmatpush.bf16.msra.mxu2 %v9798_v27  ;;  %v9757_v27 = vld [vmem:[#allocation8 + $0x2d0] sm:$0xf] }
 0x291   :  { %v13196_v9 = vpop.f32.mrf.mxu2  ;;  %2847 = vmatpush.bf16.msrb.mxu3 %v9282_v3  ;;  %3564 = vmatpush.bf16.msra.mxu1 %v9618_v29  ;;  %v9577_v29 = vld [vmem:[#allocation8 + $0x168] sm:$0xf] }
 0x292   :  { %v2544_v53 = vpop.f32.mrf.mxu3 }
 0x293   :  { %v2584_v23 = vadd.f32 %v13122_v60, %v2544_v53  ;;  %v2622_v17 = vpop.f32.mrf.mxu1  ;;  %v11854_v60 = vld [vmem:[#allocation8 + $0x688] sm:$0xf0]  ;;  %3603 = vmatpush.bf16.msra.mxu2 %v9778_v48  ;;  %v11694_v53 = vld [vmem:[#allocation8 + $0x1a0] sm:$0xf0]  ;;  %v11689_v48 = vld [vmem:[#allocation8 + $0x178] sm:$0xf0] }
 0x294   :  { %v13199_v6 = vpop.f32.mrf.mxu0  ;;  %v9262_v47 = vor.u32 %v11854_v60, %v9261_v8  ;;  %v9598_v15 = vor.u32 %v11694_v53, %v9597_v24  ;;  %v9737_v8 = vld [vmem:[#allocation8 + $0x2a8] sm:$0xf]  ;;  %v9578_v24 = vor.u32 %v11689_v48, %v9577_v29  ;;  %v11729_v53 = vld [vmem:[#allocation8 + $0x2b8] sm:$0xf0]  ;;  %v9699_v48 = vld [vmem:[#allocation8 + $0x26c] sm:$0xf0] }
 0x295   :  { %v13201_v40 = vadd.f32 %v2622_v17, %v2584_v23  ;;  %v11734_v23 = vld [vmem:[#allocation8 + $0x2e0] sm:$0xf0]  ;;  %v9738_v30 = vor.u32 %v11729_v53, %v9737_v8  ;;  %v9679_v53 = vld [vmem:[#allocation8 + $0x244] sm:$0xf0] }
 0x296   :  { %2787 = vmatmul.bf16.gmra.mxu1 %v12886_v20  ;;  %2826 = vmatmul.bf16.gmra.mxu2 %v12888_v16  ;;  %v9758_v1 = vor.u32 %v11734_v23, %v9757_v27  ;;  %v11684_v27 = vld [vmem:[#allocation8 + $0x150] sm:$0xf0] }
 0x297   :  { %14475 = vst [vmem:[#allocation41_spill] sm:$0xff] %v13201_v40  ;;  %3534 = vmatmul.bf16.gmra.mxu0 %v12830_v26  ;;  %v11849_v40 = vld [vmem:[#allocation8 + $0x660] sm:$0xf0]  ;;  %2848 = vmatpush.bf16.msrb.mxu3 %v9262_v47  ;;  %v9717_v47 = vld [vmem:[#allocation8 + $0x280] sm:$0xf] }
 0x298   :  { %3565 = vmatpush.bf16.msra.mxu1 %v9598_v15  ;;  %3604 = vmatpush.bf16.msra.mxu2 %v9758_v1  ;;  %v9242_v3 = vor.u32 %v11849_v40, %v9241_v52  ;;  %v11724_v40 = vld [vmem:[#allocation8 + $0x290] sm:$0xf0] }
 0x299   :  { %v13206_v4 = vpop.f32.mrf.mxu2  ;;  %v9718_v1 = vor.u32 %v11724_v40, %v9717_v47 }
 0x29a   :  { %v2546_v17 = vpop.f32.mrf.mxu3 }
 0x29b   :  { %v2586_v57 = vadd.f32 %v13133_v51, %v2546_v17  ;;  %v2624_v36 = vpop.f32.mrf.mxu1  ;;  %2849 = vmatpush.bf16.msrb.mxu3 %v9242_v3  ;;  %v9557_v51 = vld [vmem:[#allocation8 + $0x140] sm:$0xf]  ;;  %v11717_v3 = vld [vmem:[#allocation8 + $0x25c] sm:$0xf] }
 0x29c   :  { %v13209_v21 = vpop.f32.mrf.mxu0  ;;  %3566 = vmatpush.bf16.msra.mxu1 %v9578_v24  ;;  %3605 = vmatpush.bf16.msra.mxu2 %v9738_v30  ;;  %v9558_v15 = vor.u32 %v11684_v27, %v9557_v51  ;;  %v9702_v30 = vor.u32 %v11717_v3, %v9699_v48  ;;  %v11712_v24 = vld [vmem:[#allocation8 + $0x234] sm:$0xf]  ;;  %v11702_v48 = vld [vmem:[#allocation8 + $0x1e4] sm:$0xf] }
 0x29d   :  { %v13211_v60 = vadd.f32 %v2624_v36, %v2586_v57  ;;  %v9682_v47 = vor.u32 %v11712_v24, %v9679_v53 }
 0x29e   :  { %3677 = vmatpush.bf16.msrb.mxu0 %v9702_v30  ;;  %v9639_v30 = vld [vmem:[#allocation8 + $0x1f4] sm:$0xf0] }
 0x29f   :  { %14476 = vst [vmem:[#allocation42_spill] sm:$0xff] %v13211_v60  ;;  %2714 = vmatmul.bf16.gmra.mxu3 %v12913_v45  ;;  %v9642_v24 = vor.u32 %v11702_v48, %v9639_v30 }
 0x2a0   :  { %3567 = vmatpush.bf16.msra.mxu1 %v9558_v15  ;;  %3606 = vmatpush.bf16.msra.mxu2 %v9718_v1  ;;  %v9659_v1 = vld [vmem:[#allocation8 + $0x21c] sm:$0xf0] }
 0x2a1   :  { %v13214_v23 = vpop.f32.mrf.mxu2 }
 0x2a2   :  { %v2549_v17 = vpop.f32.mrf.mxu3  ;;  %3678 = vmatpush.bf16.msrb.mxu0 %v9682_v47  ;;  %v9619_v47 = vld [vmem:[#allocation8 + $0x1cc] sm:$0xf0] }
 0x2a3   :  { %v2589_v52 = vadd.f32 %v13142_v38, %v2549_v17  ;;  %v2627_v57 = vpop.f32.mrf.mxu1  ;;  %v11707_v17 = vld [vmem:[#allocation8 + $0x20c] sm:$0xf] }
 0x2a4   :  { %v13217_v36 = vpop.f32.mrf.mxu0 }
 0x2a5   :  { %v13219_v29 = vadd.f32 %v2627_v57, %v2589_v52  ;;  %v9662_v52 = vor.u32 %v11707_v17, %v9659_v1 }
 0x2a6   :  { %2792 = vmatmul.bf16.gmra.mxu1 %v12911_v32  ;;  %2831 = vmatmul.bf16.gmra.mxu2 %v12913_v45 }
 0x2a7   :  { %14477 = vst [vmem:[#allocation43_spill] sm:$0xff] %v13219_v29  ;;  %3539 = vmatmul.bf16.gmra.mxu0 %v12848_v54 }
 0x2a8   :  { %3679 = vmatpush.bf16.msrb.mxu0 %v9662_v52  ;;  %v11692_v52 = vld [vmem:[#allocation8 + $0x194] sm:$0xf] }
 0x2a9   :  { %v13224_v8 = vpop.f32.mrf.mxu2 }
 0x2aa   :  { %v2551_v38 = vpop.f32.mrf.mxu3 }
 0x2ab   :  { %v2591_v51 = vadd.f32 %v13153_v56, %v2551_v38  ;;  %v2629_v27 = vpop.f32.mrf.mxu1 }
 0x2ac   :  { %v13227_v15 = vpop.f32.mrf.mxu0  ;;  %3680 = vmatpush.bf16.msrb.mxu0 %v9642_v24  ;;  %v11687_v24 = vld [vmem:[#allocation8 + $0x16c] sm:$0xf] }
 0x2ad   :  { %v13229_v40 = vadd.f32 %v2629_v27, %v2591_v51  ;;  %v11697_v27 = vld [vmem:[#allocation8 + $0x1bc] sm:$0xf] }
 0x2ae   :  { %v9622_v17 = vor.u32 %v11697_v27, %v9619_v47  ;;  %v9387_v27 = vld [vmem:[#allocation2 + $0xc] sm:$0xf0]  ;;  %v9393_v47 = vld [vmem:[#allocation2 + $0x8] sm:$0xf] }
 0x2af   :  { %14478 = vst [vmem:[#allocation44_spill] sm:$0xff] %v13229_v40  ;;  %2719 = vmatmul.bf16.gmra.mxu3 %v12932_v63 }
 0x2b0   :  { %3681 = vmatpush.bf16.msrb.mxu0 %v9622_v17  ;;  %v11626_v17 = vld [vmem:[#allocation2 + $0x10] sm:$0xf0] }
 0x2b1   :  { %v13232_v57 = vpop.f32.mrf.mxu2 }
 0x2b2   :  { %v2554_v3 = vpop.f32.mrf.mxu3 }
 0x2b3   :  { %v2594_v56 = vadd.f32 %v13162_v61, %v2554_v3  ;;  %v2632_v38 = vpop.f32.mrf.mxu1  ;;  %v9599_v3 = vld [vmem:[#allocation8 + $0x1a4] sm:$0xf0] }
 0x2b4   :  { %v13235_v53 = vpop.f32.mrf.mxu0 }
 0x2b5   :  { %v13237_v51 = vadd.f32 %v2632_v38, %v2594_v56  ;;  %v9602_v56 = vor.u32 %v11692_v52, %v9599_v3  ;;  %v13254_v52 = vor.u32 %v11626_v17, %v9393_v47  ;;  %v11682_v3 = vld [vmem:[#allocation8 + $0x144] sm:$0xf] }
 0x2b6   :  { %2797 = vmatmul.bf16.gmra.mxu1 %v12930_v33  ;;  %2836 = vmatmul.bf16.gmra.mxu2 %v12932_v63  ;;  %v11624_v63 = vld [vmem:[#allocation2 + $0x4] sm:$0xf] }
 0x2b7   :  { %14479 = vst [vmem:[#allocation45_spill] sm:$0xff] %v13237_v51  ;;  %3544 = vmatmul.bf16.gmra.mxu0 %v12868_v35  ;;  %v9579_v51 = vld [vmem:[#allocation8 + $0x17c] sm:$0xf0]  ;;  %v11670_v35 = vld [vmem:[#allocation8 + $0xe0] sm:$0xf0] }
 0x2b8   :  { %3682 = vmatpush.bf16.msrb.mxu0 %v9602_v56  ;;  %v9582_v40 = vor.u32 %v11687_v24, %v9579_v51 }
 0x2b9   :  { %v13242_v1 = vpop.f32.mrf.mxu2 }
 0x2ba   :  { %v2556_v61 = vpop.f32.mrf.mxu3 }
 0x2bb   :  { %v2596_v48 = vadd.f32 %v13173_v0, %v2556_v61  ;;  %v2634_v30 = vpop.f32.mrf.mxu1  ;;  %v13252_v61 = vor.u32 %v11624_v63, %v9387_v27 }
 0x2bc   :  { %v13245_v38 = vpop.f32.mrf.mxu0  ;;  %3683 = vmatpush.bf16.msrb.mxu0 %v9582_v40 }
 0x2bd   :  { %v13247_v33 = vadd.f32 %v2634_v30, %v2596_v48  ;;  %14481 = vst [vmem:[#allocation47_spill] sm:$0xff] %v13252_v61  ;;  %v9559_v48 = vld [vmem:[#allocation8 + $0x154] sm:$0xf0] }
 0x2bf   :  { %14480 = vst [vmem:[#allocation46_spill] sm:$0xff] %v13247_v33  ;;  %2850 = vmatmul.bf16.vlgmr.msrb.gmra.mxu3 %v12940_v25  ;;  %v9562_v33 = vor.u32 %v11682_v3, %v9559_v48  ;;  %v11677_v3 = vld [vmem:[#allocation8 + $0x11c] sm:$0xf]  ;;  %v9539_v48 = vld [vmem:[#allocation8 + $0x12c] sm:$0xf0] }
 0x2c1   :  { %v13250_v29 = vpop.f32.mrf.mxu2  ;;  %3684 = vmatpush.bf16.msrb.mxu0 %v9562_v33 }
 0x2c2   :  { %v2559_v0 = vpop.f32.mrf.mxu3 }
 0x2c3   :  { %v2599_v30 = vadd.f32 %v13181_v41, %v2559_v0  ;;  %v2637_v56 = vpop.f32.mrf.mxu1 }
 0x2c4   :  { %v13257_v60 = vpop.f32.mrf.mxu0 }
 0x2c5   :  { %v13259_v19 = vadd.f32 %v2637_v56, %v2599_v30  ;;  %v9542_v56 = vor.u32 %v11677_v3, %v9539_v48 }
 0x2c6   :  { %3568 = vmatmul.bf16.vlgmr.msra.gmra.mxu1 %v13252_v61  ;;  %3607 = vmatmul.bf16.vlgmr.msra.gmra.mxu2 %v13254_v52 }
 0x2c7   :  { %14482 = vst [vmem:[#allocation48_spill] sm:$0xff] %v13259_v19  ;;  %3549 = vmatmul.bf16.gmra.mxu0 %v12886_v20  ;;  %3638 = vmatpush.bf16.msra.mxu3 %v9542_v56  ;;  %v11680_v20 = vld [vmem:[#allocation8 + $0x130] sm:$0xf0] }
 0x2c9   :  { %v13264_v40 = vpop.f32.mrf.mxu2 }
 0x2ca   :  { %v2561_v51 = vpop.f32.mrf.mxu3 }
 0x2cb   :  { %v2601_v63 = vadd.f32 %v13191_v28, %v2561_v51  ;;  %v2639_v24 = vpop.f32.mrf.mxu1 }
 0x2cc   :  { %v13267_v41 = vpop.f32.mrf.mxu0 }
 0x2cd   :  { %v13269_v27 = vadd.f32 %v2639_v24, %v2601_v63  ;;  %v11757_v24 = vld [vmem:[#allocation8 + $0x39c] sm:$0xf] }
 0x2cf   :  { %14483 = vst [vmem:[#allocation49_spill] sm:$0xff] %v13269_v27  ;;  %2855 = vmatmul.bf16.gmra.mxu3 %v12956_v5 }
 0x2d1   :  { %v13272_v47 = vpop.f32.mrf.mxu2 }
 0x2d2   :  { %v2564_v33 = vpop.f32.mrf.mxu3 }
 0x2d3   :  { %v2604_v17 = vadd.f32 %v13199_v6, %v2564_v33  ;;  %v2642_v0 = vpop.f32.mrf.mxu1  ;;  %v9859_v33 = vld [vmem:[#allocation8 + $0x3ac] sm:$0xf0] }
 0x2d4   :  { %v13275_v30 = vpop.f32.mrf.mxu0  ;;  %v9862_v3 = vor.u32 %v11757_v24, %v9859_v33 }
 0x2d5   :  { %v13277_v19 = vadd.f32 %v2642_v0, %v2604_v17  ;;  %v11672_v17 = vld [vmem:[#allocation8 + $0xf4] sm:$0xf]  ;;  %v9519_v0 = vld [vmem:[#allocation8 + $0x104] sm:$0xf0] }
 0x2d6   :  { %3573 = vmatmul.bf16.gmra.mxu1 %v12832_v44  ;;  %3612 = vmatmul.bf16.gmra.mxu2 %v12940_v25 }
 0x2d7   :  { %14484 = vst [vmem:[#allocation50_spill] sm:$0xff] %v13277_v19  ;;  %3554 = vmatmul.bf16.gmra.mxu0 %v12911_v32  ;;  %v9522_v19 = vor.u32 %v11672_v17, %v9519_v0  ;;  %3716 = vmatpush.bf16.msrb.mxu1 %v9862_v3  ;;  %v9545_v32 = vld [vmem:[#allocation8 + $0x120] sm:$0xf]  ;;  %v9525_v17 = vld [vmem:[#allocation8 + $0xf8] sm:$0xf] }
 0x2d8   :  { %v9546_v24 = vor.u32 %v11680_v20, %v9545_v32  ;;  %v11675_v0 = vld [vmem:[#allocation8 + $0x108] sm:$0xf0] }
 0x2d9   :  { %v13282_v28 = vpop.f32.mrf.mxu2  ;;  %3639 = vmatpush.bf16.msra.mxu3 %v9522_v19  ;;  %v9839_v19 = vld [vmem:[#allocation8 + $0x384] sm:$0xf0]  ;;  %v9526_v20 = vor.u32 %v11675_v0, %v9525_v17  ;;  %v9799_v17 = vld [vmem:[#allocation8 + $0x334] sm:$0xf0] }
 0x2da   :  { %v2566_v51 = vpop.f32.mrf.mxu3  ;;  %3755 = vmatpush.bf16.msrb.mxu2 %v9546_v24  ;;  %v11747_v24 = vld [vmem:[#allocation8 + $0x34c] sm:$0xf]  ;;  %v9485_v0 = vld [vmem:[#allocation8 + $0xa8] sm:$0xf] }
 0x2db   :  { %v2606_v6 = vadd.f32 %v13209_v21, %v2566_v51  ;;  %v2644_v63 = vpop.f32.mrf.mxu1 }
 0x2dc   :  { %v13285_v27 = vpop.f32.mrf.mxu0 }
 0x2dd   :  { %v13287_v48 = vadd.f32 %v2644_v63, %v2606_v6  ;;  %v11752_v6 = vld [vmem:[#allocation8 + $0x374] sm:$0xf]  ;;  %v11667_v63 = vld [vmem:[#allocation8 + $0xcc] sm:$0xf] }
 0x2de   :  { %v9842_v3 = vor.u32 %v11752_v6, %v9839_v19  ;;  %3756 = vmatpush.bf16.msrb.mxu2 %v9526_v20  ;;  %v9819_v19 = vld [vmem:[#allocation8 + $0x35c] sm:$0xf0] }
 0x2df   :  { %14485 = vst [vmem:[#allocation51_spill] sm:$0xff] %v13287_v48  ;;  %2860 = vmatmul.bf16.gmra.mxu3 %v12972_v37 }
 0x2e0   :  { %3717 = vmatpush.bf16.msrb.mxu1 %v9842_v3 }
 0x2e1   :  { %v13290_v56 = vpop.f32.mrf.mxu2 }
 0x2e2   :  { %v2695_v18 = vpop.f32.mrf.mxu3 }
 0x2e3   :  { %v2696_v21 = vadd.f32 %v2695_v18, %v13188_v7  ;;  %v2773_v51 = vpop.f32.mrf.mxu1  ;;  %v9499_v18 = vld [vmem:[#allocation8 + $0xdc] sm:$0xf0] }
 0x2e4   :  { %v13293_v39 = vpop.f32.mrf.mxu0  ;;  %v9502_v7 = vor.u32 %v11667_v63, %v9499_v18  ;;  %v9505_v63 = vld [vmem:[#allocation8 + $0xd0] sm:$0xf]  ;;  %v9822_v18 = vor.u32 %v11747_v24, %v9819_v19 }
 0x2e5   :  { %v13296_v33 = vadd.f32 %v13217_v36, %v2696_v21  ;;  %v11662_v21 = vld [vmem:[#allocation8 + $0xa4] sm:$0xf] }
 0x2e6   :  { %3578 = vmatmul.bf16.gmra.mxu1 %v12850_v31  ;;  %3617 = vmatmul.bf16.gmra.mxu2 %v12956_v5 }
 0x2e7   :  { %14486 = vst [vmem:[#allocation52_spill] sm:$0xff] %v13296_v33  ;;  %3685 = vmatmul.bf16.vlgmr.msrb.gmra.mxu0 %v13252_v61  ;;  %3640 = vmatpush.bf16.msra.mxu3 %v9502_v7  ;;  %v9479_v33 = vld [vmem:[#allocation8 + $0xb4] sm:$0xf0]  ;;  %v9459_v7 = vld [vmem:[#allocation8 + $0x8c] sm:$0xf0] }
 0x2e8   :  { %v9482_v61 = vor.u32 %v11662_v21, %v9479_v33  ;;  %3718 = vmatpush.bf16.msrb.mxu1 %v9822_v18  ;;  %v11742_v33 = vld [vmem:[#allocation8 + $0x324] sm:$0xf]  ;;  %v11665_v21 = vld [vmem:[#allocation8 + $0xb8] sm:$0xf0] }
 0x2e9   :  { %v2812_v48 = vpop.f32.mrf.mxu2 }
 0x2ea   :  { %v13301_v32 = vadd.f32 %v2812_v48, %v2773_v51  ;;  %v2697_v36 = vpop.f32.mrf.mxu3  ;;  %v9506_v48 = vor.u32 %v11670_v35, %v9505_v63  ;;  %v11657_v51 = vld [vmem:[#allocation8 + $0x7c] sm:$0xf]  ;;  %v9439_v35 = vld [vmem:[#allocation8 + $0x64] sm:$0xf0] }
 0x2eb   :  { %v2698_v55 = vadd.f32 %v2697_v36, %v13196_v9  ;;  %v2775_v2 = vpop.f32.mrf.mxu1  ;;  %3641 = vmatpush.bf16.msra.mxu3 %v9482_v61  ;;  %v9462_v9 = vor.u32 %v11657_v51, %v9459_v7  ;;  %v9802_v36 = vor.u32 %v11742_v33, %v9799_v17  ;;  %v9779_v7 = vld [vmem:[#allocation8 + $0x30c] sm:$0xf0]  ;;  %v11660_v17 = vld [vmem:[#allocation8 + $0x90] sm:$0xf0] }
 0x2ec   :  { %v13304_v6 = vpop.f32.mrf.mxu0  ;;  %3757 = vmatpush.bf16.msrb.mxu2 %v9506_v48  ;;  %v11737_v48 = vld [vmem:[#allocation8 + $0x2fc] sm:$0xf] }
 0x2ed   :  { %v13307_v3 = vadd.f32 %v13227_v15, %v2698_v55  ;;  %v9486_v55 = vor.u32 %v11665_v21, %v9485_v0  ;;  %v11652_v15 = vld [vmem:[#allocation8 + $0x54] sm:$0xf]  ;;  %3719 = vmatpush.bf16.msrb.mxu1 %v9802_v36  ;;  %v9782_v33 = vor.u32 %v11737_v48, %v9779_v7  ;;  %v9419_v0 = vld [vmem:[#allocation8 + $0x3c] sm:$0xf0]  ;;  %v9759_v21 = vld [vmem:[#allocation8 + $0x2e4] sm:$0xf0] }
 0x2ee   :  { %v9442_v18 = vor.u32 %v11652_v15, %v9439_v35  ;;  %v11732_v36 = vld [vmem:[#allocation8 + $0x2d4] sm:$0xf]  ;;  %v11642_v7 = vld [vmem:[#allocation8 + $0x4] sm:$0xf] }
 0x2ef   :  { %14487 = vst [vmem:[#allocation53_spill] sm:$0xff] %v13307_v3  ;;  %2865 = vmatmul.bf16.gmra.mxu3 %v12986_v43  ;;  %v9465_v3 = vld [vmem:[#allocation8 + $0x80] sm:$0xf]  ;;  %v9762_v15 = vor.u32 %v11732_v36, %v9759_v21  ;;  %v11650_v21 = vld [vmem:[#allocation8 + $0x40] sm:$0xf0] }
 0x2f0   :  { %3642 = vmatpush.bf16.msra.mxu3 %v9462_v9  ;;  %3758 = vmatpush.bf16.msrb.mxu2 %v9486_v55  ;;  %v9466_v9 = vor.u32 %v11660_v17, %v9465_v3  ;;  %v9399_v3 = vld [vmem:[#allocation8 + $0x14] sm:$0xf0] }
 0x2f1   :  { %v2814_v20 = vpop.f32.mrf.mxu2  ;;  %3720 = vmatpush.bf16.msrb.mxu1 %v9782_v33  ;;  %v9402_v33 = vor.u32 %v11642_v7, %v9399_v3 }
 0x2f2   :  { %v13310_v24 = vadd.f32 %v2814_v20, %v2775_v2  ;;  %v2700_v19 = vpop.f32.mrf.mxu3 }
 0x2f3   :  { %v2701_v61 = vadd.f32 %v2700_v19, %v13206_v4  ;;  %v2778_v63 = vpop.f32.mrf.mxu1  ;;  %v11647_v4 = vld [vmem:[#allocation8 + $0x2c] sm:$0xf]  ;;  %v9445_v19 = vld [vmem:[#allocation8 + $0x58] sm:$0xf] }
 0x2f4   :  { %v13313_v51 = vpop.f32.mrf.mxu0  ;;  %3643 = vmatpush.bf16.msra.mxu3 %v9442_v18  ;;  %v9422_v20 = vor.u32 %v11647_v4, %v9419_v0  ;;  %3759 = vmatpush.bf16.msrb.mxu2 %v9466_v9  ;;  %v11727_v9 = vld [vmem:[#allocation8 + $0x2ac] sm:$0xf]  ;;  %v9739_v4 = vld [vmem:[#allocation8 + $0x2bc] sm:$0xf0]  ;;  %v9425_v0 = vld [vmem:[#allocation8 + $0x30] sm:$0xf] }
 0x2f5   :  { %v13316_v2 = vadd.f32 %v13235_v53, %v2701_v61  ;;  %v11655_v53 = vld [vmem:[#allocation8 + $0x68] sm:$0xf0]  ;;  %3721 = vmatpush.bf16.msrb.mxu1 %v9762_v15  ;;  %v9742_v36 = vor.u32 %v11727_v9, %v9739_v4 }
 0x2f6   :  { %3583 = vmatmul.bf16.gmra.mxu1 %v12870_v12  ;;  %3622 = vmatmul.bf16.gmra.mxu2 %v12972_v37  ;;  %v9446_v48 = vor.u32 %v11655_v53, %v9445_v19  ;;  %v9426_v19 = vor.u32 %v11650_v21, %v9425_v0  ;;  %v11760_v0 = vld [vmem:[#allocation8 + $0x3b0] sm:$0xf0] }
 0x2f7   :  { %14488 = vst [vmem:[#allocation54_spill] sm:$0xff] %v13316_v2  ;;  %3690 = vmatmul.bf16.gmra.mxu0 %v12832_v44 }
 0x2f8   :  { %3644 = vmatpush.bf16.msra.mxu3 %v9422_v20  ;;  %3760 = vmatpush.bf16.msrb.mxu2 %v9446_v48  ;;  %v9719_v20 = vld [vmem:[#allocation8 + $0x294] sm:$0xf0] }
 0x2f9   :  { %v2817_v55 = vpop.f32.mrf.mxu2  ;;  %3722 = vmatpush.bf16.msrb.mxu1 %v9742_v36 }
 0x2fa   :  { %v13321_v35 = vadd.f32 %v2817_v55, %v2778_v63  ;;  %v2702_v61 = vpop.f32.mrf.mxu3  ;;  %v9405_v55 = vld [vmem:[#allocation8 + $0x8] sm:$0xf] }
 0x2fb   :  { %v2703_v17 = vadd.f32 %v2702_v61, %v13214_v23  ;;  %v2780_v2 = vpop.f32.mrf.mxu1  ;;  %v11722_v23 = vld [vmem:[#allocation8 + $0x284] sm:$0xf]  ;;  %v11645_v61 = vld [vmem:[#allocation8 + $0x18] sm:$0xf0] }
 0x2fc   :  { %v13324_v18 = vpop.f32.mrf.mxu0  ;;  %3645 = vmatpush.bf16.msra.mxu3 %v9402_v33  ;;  %3761 = vmatpush.bf16.msrb.mxu2 %v9426_v19  ;;  %v9722_v15 = vor.u32 %v11722_v23, %v9719_v20  ;;  %v9406_v3 = vor.u32 %v11645_v61, %v9405_v55  ;;  %v11755_v23 = vld [vmem:[#allocation8 + $0x388] sm:$0xf0] }
 0x2fd   :  { %v13327_v63 = vadd.f32 %v13245_v38, %v2703_v17 }
 0x2fe   :  { %3723 = vmatpush.bf16.msrb.mxu1 %v9722_v15 }
 0x2ff   :  { %2870 = vmatmul.bf16.gmra.mxu3 %v13002_v22 }
 0x300   :  { %3762 = vmatpush.bf16.msrb.mxu2 %v9406_v3  ;;  %v11750_v3 = vld [vmem:[#allocation8 + $0x360] sm:$0xf0] }
 0x301   :  { %v2819_v53 = vpop.f32.mrf.mxu2 }
 0x302   :  { %v13330_v48 = vadd.f32 %v2819_v53, %v2780_v2  ;;  %v2705_v7 = vpop.f32.mrf.mxu3  ;;  %v9865_v2 = vld [vmem:[#allocation8 + $0x3a0] sm:$0xf] }
 0x303   :  { %v2706_v9 = vadd.f32 %v2705_v7, %v13224_v8  ;;  %v2783_v38 = vpop.f32.mrf.mxu1  ;;  %v9866_v36 = vor.u32 %v11760_v0, %v9865_v2  ;;  %v9825_v7 = vld [vmem:[#allocation8 + $0x350] sm:$0xf]  ;;  %v9805_v2 = vld [vmem:[#allocation8 + $0x328] sm:$0xf]  ;;  %v11745_v0 = vld [vmem:[#allocation8 + $0x338] sm:$0xf0] }
 0x304   :  { %v3530_v17 = vpop.f32.mrf.mxu0 }
 0x305   :  { %v13334_v4 = vadd.f32 %v3530_v17, %v13059_v10  ;;  %v13337_v33 = vadd.f32 %v13257_v60, %v2706_v9  ;;  %3833 = vmatpush.bf16.msra.mxu0 %v9866_v36  ;;  %v9845_v10 = vld [vmem:[#allocation8 + $0x378] sm:$0xf]  ;;  %v9826_v9 = vor.u32 %v11750_v3, %v9825_v7 }
 0x306   :  { %3588 = vmatmul.bf16.gmra.mxu1 %v12888_v16  ;;  %3627 = vmatmul.bf16.gmra.mxu2 %v12986_v43  ;;  %v9846_v55 = vor.u32 %v11755_v23, %v9845_v10  ;;  %v11740_v23 = vld [vmem:[#allocation8 + $0x310] sm:$0xf0] }
 0x307   :  { %3695 = vmatmul.bf16.gmra.mxu0 %v12850_v31 }
 0x309   :  { %v2822_v8 = vpop.f32.mrf.mxu2  ;;  %3834 = vmatpush.bf16.msra.mxu0 %v9846_v55 }
 0x30a   :  { %v13342_v21 = vadd.f32 %v2822_v8, %v2783_v38  ;;  %v2707_v19 = vpop.f32.mrf.mxu3  ;;  %v9806_v8 = vor.u32 %v11745_v0, %v9805_v2  ;;  %v9745_v2 = vld [vmem:[#allocation8 + $0x2b0] sm:$0xf]  ;;  %v11730_v0 = vld [vmem:[#allocation8 + $0x2c0] sm:$0xf0] }
 0x30b   :  { %v2708_v20 = vadd.f32 %v2707_v19, %v13232_v57  ;;  %v2785_v60 = vpop.f32.mrf.mxu1 }
 0x30c   :  { %v3532_v53 = vpop.f32.mrf.mxu0 }
 0x30d   :  { %v13346_v15 = vadd.f32 %v3532_v53, %v13070_v14  ;;  %v13349_v61 = vadd.f32 %v13267_v41, %v2708_v20  ;;  %3835 = vmatpush.bf16.msra.mxu0 %v9826_v9  ;;  %v11735_v53 = vld [vmem:[#allocation8 + $0x2e8] sm:$0xf0] }
 0x30f   :  { %2875 = vmatmul.bf16.gmra.mxu3 %v13017_v49  ;;  %v9785_v49 = vld [vmem:[#allocation8 + $0x300] sm:$0xf] }
 0x310   :  { %v9786_v20 = vor.u32 %v11740_v23, %v9785_v49  ;;  %v11725_v49 = vld [vmem:[#allocation8 + $0x298] sm:$0xf0] }
 0x311   :  { %v2824_v38 = vpop.f32.mrf.mxu2  ;;  %3836 = vmatpush.bf16.msra.mxu0 %v9806_v8 }
 0x312   :  { %v13352_v17 = vadd.f32 %v2824_v38, %v2785_v60  ;;  %v2710_v57 = vpop.f32.mrf.mxu3 }
 0x313   :  { %v2711_v36 = vadd.f32 %v2710_v57, %v13242_v1  ;;  %v2788_v14 = vpop.f32.mrf.mxu1 }
 0x314   :  { %v3535_v19 = vpop.f32.mrf.mxu0 }
 0x315   :  { %v13356_v41 = vadd.f32 %v3535_v19, %v13079_v11  ;;  %v13359_v10 = vadd.f32 %v13275_v30, %v2711_v36  ;;  %3837 = vmatpush.bf16.msra.mxu0 %v9786_v20  ;;  %v9765_v11 = vld [vmem:[#allocation8 + $0x2d8] sm:$0xf]  ;;  %v9746_v36 = vor.u32 %v11730_v0, %v9745_v2  ;;  %v9725_v19 = vld [vmem:[#allocation8 + $0x288] sm:$0xf] }
 0x316   :  { %3593 = vmatmul.bf16.gmra.mxu1 %v12913_v45  ;;  %3632 = vmatmul.bf16.gmra.mxu2 %v13002_v22  ;;  %v9766_v3 = vor.u32 %v11735_v53, %v9765_v11  ;;  %v9726_v20 = vor.u32 %v11725_v49, %v9725_v19  ;;  %v9705_v19 = vld [vmem:[#allocation8 + $0x260] sm:$0xf] }
 0x317   :  { %3700 = vmatmul.bf16.gmra.mxu0 %v12870_v12 }
 0x319   :  { %v2827_v1 = vpop.f32.mrf.mxu2  ;;  %3838 = vmatpush.bf16.msra.mxu0 %v9766_v3 }
 0x31a   :  { %v13364_v60 = vadd.f32 %v2827_v1, %v2788_v14  ;;  %v2712_v55 = vpop.f32.mrf.mxu3 }
 0x31b   :  { %v2713_v7 = vadd.f32 %v2712_v55, %v13250_v29  ;;  %v2790_v30 = vpop.f32.mrf.mxu1 }
 0x31c   :  { %v3537_v9 = vpop.f32.mrf.mxu0 }
 0x31d   :  { %v13368_v38 = vadd.f32 %v3537_v9, %v13090_v46  ;;  %v13371_v57 = vadd.f32 %v13285_v27, %v2713_v7  ;;  %3839 = vmatpush.bf16.msra.mxu0 %v9746_v36 }
 0x31f   :  { %3646 = vmatmul.bf16.vlgmr.msra.gmra.mxu3 %v13179_v50 }
 0x321   :  { %v2829_v14 = vpop.f32.mrf.mxu2  ;;  %3840 = vmatpush.bf16.msra.mxu0 %v9726_v20 }
 0x322   :  { %v13374_v8 = vadd.f32 %v2829_v14, %v2790_v30  ;;  %v2715_v29 = vpop.f32.mrf.mxu3 }
 0x323   :  { %v2716_v23 = vadd.f32 %v2715_v29, %v13264_v40  ;;  %v2793_v46 = vpop.f32.mrf.mxu1 }
 0x324   :  { %v3540_v1 = vpop.f32.mrf.mxu0 }
 0x325   :  { %v13378_v27 = vadd.f32 %v3540_v1, %v13099_v34  ;;  %v13381_v55 = vadd.f32 %v13293_v39, %v2716_v23 }
 0x326   :  { %3724 = vmatmul.bf16.vlgmr.msrb.gmra.mxu1 %v13254_v52  ;;  %3763 = vmatmul.bf16.vlgmr.msrb.gmra.mxu2 %v13179_v50 }
 0x327   :  { %3705 = vmatmul.bf16.gmra.mxu0 %v12888_v16 }
 0x329   :  { %v2832_v11 = vpop.f32.mrf.mxu2 }
 0x32a   :  { %v13386_v53 = vadd.f32 %v2832_v11, %v2793_v46  ;;  %v2717_v40 = vpop.f32.mrf.mxu3  ;;  %v11678_v11 = vld [vmem:[#allocation8 + $0x124] sm:$0xf] }
 0x32b   :  { %v2718_v7 = vadd.f32 %v2717_v40, %v13272_v47  ;;  %v2795_v30 = vpop.f32.mrf.mxu1  ;;  %v11720_v47 = vld [vmem:[#allocation8 + $0x270] sm:$0xf0]  ;;  %v9547_v40 = vld [vmem:[#allocation8 + $0x134] sm:$0xf0] }
 0x32c   :  { %v3542_v3 = vpop.f32.mrf.mxu0 }
 0x32d   :  { %v13390_v34 = vadd.f32 %v3542_v3, %v13110_v13  ;;  %v13393_v39 = vadd.f32 %v13304_v6, %v2718_v7  ;;  %v9706_v13 = vor.u32 %v11720_v47, %v9705_v19  ;;  %v9550_v7 = vor.u32 %v11678_v11, %v9547_v40  ;;  %v11715_v3 = vld [vmem:[#allocation8 + $0x248] sm:$0xf0]  ;;  %v11710_v11 = vld [vmem:[#allocation8 + $0x220] sm:$0xf0]  ;;  %v11713_v40 = vld [vmem:[#allocation8 + $0x23c] sm:$0xf] }
 0x32f   :  { %3651 = vmatmul.bf16.gmra.mxu3 %v12830_v26  ;;  %3872 = vmatpush.bf16.msra.mxu1 %v9550_v7  ;;  %v9687_v7 = vld [vmem:[#allocation8 + $0x24c] sm:$0xf0] }
 0x330   :  { %3794 = vmatpush.bf16.msrb.mxu3 %v9706_v13  ;;  %v11718_v13 = vld [vmem:[#allocation8 + $0x264] sm:$0xf] }
 0x331   :  { %v2834_v9 = vpop.f32.mrf.mxu2 }
 0x332   :  { %v13396_v2 = vadd.f32 %v2834_v9, %v2795_v30  ;;  %v2720_v0 = vpop.f32.mrf.mxu3  ;;  %v9685_v30 = vld [vmem:[#allocation8 + $0x238] sm:$0xf] }
 0x333   :  { %v2721_v36 = vadd.f32 %v2720_v0, %v13282_v28  ;;  %v2798_v14 = vpop.f32.mrf.mxu1  ;;  %v9686_v0 = vor.u32 %v11715_v3, %v9685_v30 }
 0x334   :  { %v3545_v29 = vpop.f32.mrf.mxu0 }
 0x335   :  { %v13400_v49 = vadd.f32 %v3545_v29, %v13119_v58  ;;  %v13403_v23 = vadd.f32 %v13313_v51, %v2721_v36  ;;  %3795 = vmatpush.bf16.msrb.mxu3 %v9686_v0 }
 0x336   :  { %3729 = vmatmul.bf16.gmra.mxu1 %v12940_v25  ;;  %3768 = vmatmul.bf16.gmra.mxu2 %v12830_v26 }
 0x337   :  { %3710 = vmatmul.bf16.gmra.mxu0 %v12913_v45 }
 0x339   :  { %v2837_v6 = vpop.f32.mrf.mxu2 }
 0x33a   :  { %v13408_v28 = vadd.f32 %v2837_v6, %v2798_v14  ;;  %v2722_v46 = vpop.f32.mrf.mxu3  ;;  %v9707_v6 = vld [vmem:[#allocation8 + $0x274] sm:$0xf0] }
 0x33b   :  { %v2723_v20 = vadd.f32 %v2722_v46, %v13290_v56  ;;  %v2800_v1 = vpop.f32.mrf.mxu1  ;;  %v9710_v46 = vor.u32 %v11718_v13, %v9707_v6 }
 0x33c   :  { %v3547_v58 = vpop.f32.mrf.mxu0 }
 0x33d   :  { %v13412_v51 = vadd.f32 %v3547_v58, %v13130_v42  ;;  %v13415_v9 = vadd.f32 %v13324_v18, %v2723_v20  ;;  %v11673_v20 = vld [vmem:[#allocation8 + $0xfc] sm:$0xf]  ;;  %v9665_v58 = vld [vmem:[#allocation8 + $0x210] sm:$0xf]  ;;  %3911 = vmatpush.bf16.msra.mxu2 %v9710_v46 }
 0x33f   :  { %3656 = vmatmul.bf16.gmra.mxu3 %v12848_v54 }
 0x341   :  { %v2839_v36 = vpop.f32.mrf.mxu2 }
 0x342   :  { %v13418_v56 = vadd.f32 %v2839_v36, %v2800_v1  ;;  %v2851_v14 = vpop.f32.mrf.mxu3  ;;  %v9527_v1 = vld [vmem:[#allocation8 + $0x10c] sm:$0xf0]  ;;  %v9645_v36 = vld [vmem:[#allocation8 + $0x1e8] sm:$0xf] }
 0x343   :  { %v13421_v29 = vadd.f32 %v2851_v14, %v13301_v32  ;;  %v3569_v42 = vpop.f32.mrf.mxu1  ;;  %v9530_v32 = vor.u32 %v11673_v20, %v9527_v1  ;;  %v11705_v14 = vld [vmem:[#allocation8 + $0x1f8] sm:$0xf0]  ;;  %v11668_v20 = vld [vmem:[#allocation8 + $0xd4] sm:$0xf]  ;;  %v9507_v1 = vld [vmem:[#allocation8 + $0xe4] sm:$0xf0] }
 0x344   :  { %v3570_v19 = vadd.f32 %v3569_v42, %v13334_v4  ;;  %v3550_v47 = vpop.f32.mrf.mxu0  ;;  %v9666_v4 = vor.u32 %v11710_v11, %v9665_v58  ;;  %v9646_v13 = vor.u32 %v11705_v14, %v9645_v36  ;;  %v11708_v58 = vld [vmem:[#allocation8 + $0x214] sm:$0xf]  ;;  %v9667_v11 = vld [vmem:[#allocation8 + $0x224] sm:$0xf0] }
 0x345   :  { %v13425_v18 = vadd.f32 %v3550_v47, %v13139_v62  ;;  %3873 = vmatpush.bf16.msra.mxu1 %v9530_v32  ;;  %v9690_v62 = vor.u32 %v11713_v40, %v9687_v7  ;;  %v9625_v40 = vld [vmem:[#allocation8 + $0x1c0] sm:$0xf]  ;;  %v11700_v7 = vld [vmem:[#allocation8 + $0x1d0] sm:$0xf0] }
 0x346   :  { %3734 = vmatmul.bf16.gmra.mxu1 %v12956_v5  ;;  %3773 = vmatmul.bf16.gmra.mxu2 %v12848_v54 }
 0x347   :  { %3841 = vmatmul.bf16.vlgmr.msra.gmra.mxu0 %v13254_v52  ;;  %3796 = vmatpush.bf16.msrb.mxu3 %v9666_v4  ;;  %v9670_v4 = vor.u32 %v11708_v58, %v9667_v11 }
 0x348   :  { %3912 = vmatpush.bf16.msra.mxu2 %v9690_v62  ;;  %v11663_v62 = vld [vmem:[#allocation8 + $0xac] sm:$0xf] }
 0x349   :  { %v3608_v30 = vpop.f32.mrf.mxu2 }
 0x34a   :  { %v13430_v3 = vadd.f32 %v3608_v30, %v3570_v19  ;;  %v2853_v0 = vpop.f32.mrf.mxu3  ;;  %v9510_v19 = vor.u32 %v11668_v20, %v9507_v1  ;;  %v9626_v30 = vor.u32 %v11700_v7, %v9625_v40  ;;  %v11695_v20 = vld [vmem:[#allocation8 + $0x1a8] sm:$0xf0]  ;;  %v11658_v40 = vld [vmem:[#allocation8 + $0x84] sm:$0xf]  ;;  %v9467_v7 = vld [vmem:[#allocation8 + $0x94] sm:$0xf0] }
 0x34b   :  { %v13433_v42 = vadd.f32 %v2853_v0, %v13310_v24  ;;  %v3571_v47 = vpop.f32.mrf.mxu1  ;;  %3797 = vmatpush.bf16.msrb.mxu3 %v9646_v13  ;;  %v14490_v24 = vld [vmem:[#allocation22_spill] sm:$0xff]  ;;  %v9605_v13 = vld [vmem:[#allocation8 + $0x198] sm:$0xf] }
 0x34c   :  { %14489 = vst [vmem:[#allocation55_spill] sm:$0xff] %v13430_v3  ;;  %v3572_v6 = vadd.f32 %v3571_v47, %v13346_v15  ;;  %v3552_v46 = vpop.f32.mrf.mxu0  ;;  %3874 = vmatpush.bf16.msra.mxu1 %v9510_v19  ;;  %3913 = vmatpush.bf16.msra.mxu2 %v9670_v4  ;;  %v9487_v15 = vld [vmem:[#allocation8 + $0xbc] sm:$0xf0]  ;;  %v11703_v0 = vld [vmem:[#allocation8 + $0x1ec] sm:$0xf]  ;;  %v9606_v19 = vor.u32 %v11695_v20, %v9605_v13 }
 0x34d   :  { %v13437_v32 = vadd.f32 %v3552_v46, %v13150_v59  ;;  %v9490_v14 = vor.u32 %v11663_v62, %v9487_v15  ;;  %v9647_v47 = vld [vmem:[#allocation8 + $0x1fc] sm:$0xf0]  ;;  %v11698_v62 = vld [vmem:[#allocation8 + $0x1c4] sm:$0xf] }
 0x34e   :  { %v9650_v46 = vor.u32 %v11703_v0, %v9647_v47  ;;  %v9627_v0 = vld [vmem:[#allocation8 + $0x1d4] sm:$0xf0]  ;;  %v11653_v47 = vld [vmem:[#allocation8 + $0x5c] sm:$0xf] }
 0x34f   :  { %3661 = vmatmul.bf16.gmra.mxu3 %v14490_v24 }
 0x350   :  { %3798 = vmatpush.bf16.msrb.mxu3 %v9626_v30  ;;  %3875 = vmatpush.bf16.msra.mxu1 %v9490_v14  ;;  %v9470_v30 = vor.u32 %v11658_v40, %v9467_v7  ;;  %v11690_v14 = vld [vmem:[#allocation8 + $0x180] sm:$0xf0] }
 0x351   :  { %v3610_v36 = vpop.f32.mrf.mxu2  ;;  %3914 = vmatpush.bf16.msra.mxu2 %v9650_v46  ;;  %v11693_v46 = vld [vmem:[#allocation8 + $0x19c] sm:$0xf] }
 0x352   :  { %v13440_v3 = vadd.f32 %v3610_v36, %v3572_v6  ;;  %v2856_v59 = vpop.f32.mrf.mxu3  ;;  %v14492_v6 = vld [vmem:[#allocation35_spill] sm:$0xff] }
 0x353   :  { %v13443_v1 = vadd.f32 %v2856_v59, %v13321_v35  ;;  %v3574_v58 = vpop.f32.mrf.mxu1  ;;  %v9630_v35 = vor.u32 %v11698_v62, %v9627_v0  ;;  %v9585_v36 = vld [vmem:[#allocation8 + $0x170] sm:$0xf]  ;;  %v11685_v62 = vld [vmem:[#allocation8 + $0x158] sm:$0xf0] }
 0x354   :  { %14491 = vst [vmem:[#allocation22_spill] sm:$0xff] %v13440_v3  ;;  %v3575_v11 = vadd.f32 %v3574_v58, %v13356_v41  ;;  %v3555_v4 = vpop.f32.mrf.mxu0  ;;  %3799 = vmatpush.bf16.msrb.mxu3 %v9606_v19  ;;  %v9586_v41 = vor.u32 %v11690_v14, %v9585_v36  ;;  %3876 = vmatpush.bf16.msra.mxu1 %v9470_v30  ;;  %v9447_v59 = vld [vmem:[#allocation8 + $0x6c] sm:$0xf0]  ;;  %v11648_v36 = vld [vmem:[#allocation8 + $0x34] sm:$0xf] }
 0x355   :  { %v13447_v15 = vadd.f32 %v3555_v4, %v14492_v6  ;;  %3915 = vmatpush.bf16.msra.mxu2 %v9630_v35  ;;  %v9450_v20 = vor.u32 %v11653_v47, %v9447_v59  ;;  %v9607_v58 = vld [vmem:[#allocation8 + $0x1ac] sm:$0xf0]  ;;  %v9565_v6 = vld [vmem:[#allocation8 + $0x148] sm:$0xf]  ;;  %v11688_v47 = vld [vmem:[#allocation8 + $0x174] sm:$0xf] }
 0x356   :  { %3739 = vmatmul.bf16.gmra.mxu1 %v12972_v37  ;;  %3778 = vmatmul.bf16.gmra.mxu2 %v14490_v24  ;;  %v9610_v7 = vor.u32 %v11693_v46, %v9607_v58  ;;  %v9566_v35 = vor.u32 %v11685_v62, %v9565_v6  ;;  %v9427_v14 = vld [vmem:[#allocation8 + $0x44] sm:$0xf0] }
 0x357   :  { %3846 = vmatmul.bf16.gmra.mxu0 %v12940_v25  ;;  %v9430_v46 = vor.u32 %v11648_v36, %v9427_v14 }
 0x358   :  { %3800 = vmatpush.bf16.msrb.mxu3 %v9586_v41  ;;  %3877 = vmatpush.bf16.msra.mxu1 %v9450_v20  ;;  %v9407_v41 = vld [vmem:[#allocation8 + $0x1c] sm:$0xf0] }
 0x359   :  { %v3613_v13 = vpop.f32.mrf.mxu2  ;;  %3916 = vmatpush.bf16.msra.mxu2 %v9610_v7 }
 0x35a   :  { %v13452_v4 = vadd.f32 %v3613_v13, %v3575_v11  ;;  %v2858_v40 = vpop.f32.mrf.mxu3  ;;  %v14494_v11 = vld [vmem:[#allocation37_spill] sm:$0xff] }
 0x35b   :  { %v13455_v0 = vadd.f32 %v2858_v40, %v13330_v48  ;;  %v3576_v3 = vpop.f32.mrf.mxu1  ;;  %v9587_v13 = vld [vmem:[#allocation8 + $0x184] sm:$0xf0]  ;;  %v11643_v48 = vld [vmem:[#allocation8 + $0xc] sm:$0xf]  ;;  %v9567_v40 = vld [vmem:[#allocation8 + $0x15c] sm:$0xf0] }
 0x35c   :  { %14493 = vst [vmem:[#allocation35_spill] sm:$0xff] %v13452_v4  ;;  %v3577_v19 = vadd.f32 %v3576_v3, %v13368_v38  ;;  %v3557_v30 = vpop.f32.mrf.mxu0  ;;  %v9590_v58 = vor.u32 %v11688_v47, %v9587_v13  ;;  %v14495_v4 = vld [vmem:[#allocation23_spill] sm:$0xff]  ;;  %3801 = vmatpush.bf16.msrb.mxu3 %v9566_v35  ;;  %3878 = vmatpush.bf16.msra.mxu1 %v9430_v46  ;;  %v11683_v38 = vld [vmem:[#allocation8 + $0x14c] sm:$0xf]  ;;  %v9553_v35 = vld [vmem:[#allocation8 + $0x128] sm:$0xf] }
 0x35d   :  { %v13459_v59 = vadd.f32 %v3557_v30, %v14494_v11  ;;  %v9410_v20 = vor.u32 %v11643_v48, %v9407_v41  ;;  %v9570_v62 = vor.u32 %v11683_v38, %v9567_v40  ;;  %v11681_v11 = vld [vmem:[#allocation8 + $0x138] sm:$0xf0]  ;;  %v9513_v40 = vld [vmem:[#allocation8 + $0xd8] sm:$0xf] }
 0x35e   :  { %3917 = vmatpush.bf16.msra.mxu2 %v9590_v58  ;;  %v9533_v58 = vld [vmem:[#allocation8 + $0x100] sm:$0xf] }
 0x35f   :  { %3666 = vmatmul.bf16.gmra.mxu3 %v14495_v4 }
 0x360   :  { %3879 = vmatpush.bf16.msra.mxu1 %v9410_v20 }
 0x361   :  { %v3615_v3 = vpop.f32.mrf.mxu2 }
 0x362   :  { %v13462_v7 = vadd.f32 %v3615_v3, %v3577_v19  ;;  %v2861_v6 = vpop.f32.mrf.mxu3  ;;  %3918 = vmatpush.bf16.msra.mxu2 %v9570_v62  ;;  %v9554_v19 = vor.u32 %v11681_v11, %v9553_v35  ;;  %v14498_v62 = vld [vmem:[#allocation24_spill] sm:$0xff] }
 0x363   :  { %v13465_v30 = vadd.f32 %v2861_v6, %v13342_v21  ;;  %v3579_v36 = vpop.f32.mrf.mxu1  ;;  %v11671_v6 = vld [vmem:[#allocation8 + $0xe8] sm:$0xf0] }
 0x364   :  { %14496 = vst [vmem:[#allocation37_spill] sm:$0xff] %v13462_v7  ;;  %v3580_v14 = vadd.f32 %v3579_v36, %v13378_v27  ;;  %v13468_v47 = vpop.f32.mrf.mxu0  ;;  %3989 = vmatpush.bf16.msrb.mxu0 %v9554_v19  ;;  %v11676_v27 = vld [vmem:[#allocation8 + $0x110] sm:$0xf0]  ;;  %v9514_v36 = vor.u32 %v11671_v6, %v9513_v40  ;;  %v9493_v19 = vld [vmem:[#allocation8 + $0xb0] sm:$0xf] }
 0x365   :  { %v9534_v38 = vor.u32 %v11676_v27, %v9533_v58 }
 0x366   :  { %3744 = vmatmul.bf16.gmra.mxu1 %v12986_v43  ;;  %3783 = vmatmul.bf16.gmra.mxu2 %v14495_v4 }
 0x367   :  { %3851 = vmatmul.bf16.gmra.mxu0 %v12956_v5 }
 0x368   :  { %3990 = vmatpush.bf16.msrb.mxu0 %v9534_v38  ;;  %v11661_v38 = vld [vmem:[#allocation8 + $0x98] sm:$0xf0] }
 0x369   :  { %v3618_v46 = vpop.f32.mrf.mxu2 }
 0x36a   :  { %v13473_v21 = vadd.f32 %v3618_v46, %v3580_v14  ;;  %v2863_v13 = vpop.f32.mrf.mxu3 }
 0x36b   :  { %v13476_v48 = vadd.f32 %v2863_v13, %v13352_v17  ;;  %v3581_v41 = vpop.f32.mrf.mxu1  ;;  %v11666_v17 = vld [vmem:[#allocation8 + $0xc0] sm:$0xf0] }
 0x36c   :  { %14497 = vst [vmem:[#allocation23_spill] sm:$0xff] %v13473_v21  ;;  %v3582_v3 = vadd.f32 %v3581_v41, %v13390_v34  ;;  %v13479_v20 = vpop.f32.mrf.mxu0  ;;  %3991 = vmatpush.bf16.msrb.mxu0 %v9514_v36  ;;  %v9494_v34 = vor.u32 %v11666_v17, %v9493_v19  ;;  %v9473_v41 = vld [vmem:[#allocation8 + $0x88] sm:$0xf]  ;;  %v9453_v36 = vld [vmem:[#allocation8 + $0x60] sm:$0xf] }
 0x36d   :  { %v11761_v21 = vld [vmem:[#allocation8 + $0x3b8] sm:$0xf0] }
 0x36f   :  { %3671 = vmatmul.bf16.gmra.mxu3 %v14498_v62 }
 0x370   :  { %3992 = vmatpush.bf16.msrb.mxu0 %v9494_v34  ;;  %v9433_v34 = vld [vmem:[#allocation8 + $0x38] sm:$0xf] }
 0x371   :  { %v3620_v14 = vpop.f32.mrf.mxu2 }
 0x372   :  { %v13482_v35 = vadd.f32 %v3620_v14, %v3582_v3  ;;  %v2866_v11 = vpop.f32.mrf.mxu3  ;;  %v9474_v3 = vor.u32 %v11661_v38, %v9473_v41  ;;  %v11656_v14 = vld [vmem:[#allocation8 + $0x70] sm:$0xf0] }
 0x373   :  { %v13485_v46 = vadd.f32 %v2866_v11, %v13364_v60  ;;  %v3584_v13 = vpop.f32.mrf.mxu1  ;;  %v9454_v19 = vor.u32 %v11656_v14, %v9453_v36  ;;  %v14501_v41 = vld [vmem:[#allocation47_spill] sm:$0xff] }
 0x374   :  { %14499 = vst [vmem:[#allocation24_spill] sm:$0xff] %v13482_v35  ;;  %v3585_v58 = vadd.f32 %v3584_v13, %v13400_v49  ;;  %v13488_v27 = vpop.f32.mrf.mxu0  ;;  %3993 = vmatpush.bf16.msrb.mxu0 %v9474_v3  ;;  %v11651_v35 = vld [vmem:[#allocation8 + $0x48] sm:$0xf0] }
 0x375   :  { %v9434_v38 = vor.u32 %v11651_v35, %v9433_v34 }
 0x376   :  { %3749 = vmatmul.bf16.gmra.mxu1 %v13002_v22  ;;  %3788 = vmatmul.bf16.gmra.mxu2 %v14498_v62 }
 0x377   :  { %3856 = vmatmul.bf16.gmra.mxu0 %v12972_v37 }
 0x378   :  { %3994 = vmatpush.bf16.msrb.mxu0 %v9454_v19 }
 0x379   :  { %v3623_v40 = vpop.f32.mrf.mxu2 }
 0x37a   :  { %v13493_v60 = vadd.f32 %v3623_v40, %v3585_v58  ;;  %v2868_v6 = vpop.f32.mrf.mxu3 }
 0x37b   :  { %v13496_v49 = vadd.f32 %v2868_v6, %v13374_v8  ;;  %v3586_v11 = vpop.f32.mrf.mxu1  ;;  %v11646_v8 = vld [vmem:[#allocation8 + $0x20] sm:$0xf0] }
 0x37c   :  { %14500 = vst [vmem:[#allocation56_spill] sm:$0xff] %v13493_v60  ;;  %v3587_v17 = vadd.f32 %v3586_v11, %v13412_v51  ;;  %v13499_v13 = vpop.f32.mrf.mxu0  ;;  %3995 = vmatpush.bf16.msrb.mxu0 %v9434_v38  ;;  %v9413_v60 = vld [vmem:[#allocation8 + $0x10] sm:$0xf] }
 0x37d   :  { %v9414_v51 = vor.u32 %v11646_v8, %v9413_v60 }
 0x37f   :  { %3802 = vmatmul.bf16.vlgmr.msrb.gmra.mxu3 %v14501_v41 }
 0x380   :  { %3996 = vmatpush.bf16.msrb.mxu0 %v9414_v51 }
 0x381   :  { %v3625_v58 = vpop.f32.mrf.mxu2 }
 0x382   :  { %v13502_v3 = vadd.f32 %v3625_v58, %v3587_v17  ;;  %v2871_v40 = vpop.f32.mrf.mxu3 }
 0x383   :  { %v13505_v6 = vadd.f32 %v2871_v40, %v13386_v53  ;;  %v3589_v36 = vpop.f32.mrf.mxu1 }
 0x384   :  { %14502 = vst [vmem:[#allocation47_spill] sm:$0xff] %v13502_v3  ;;  %v3590_v14 = vadd.f32 %v3589_v36, %v13425_v18  ;;  %v13508_v11 = vpop.f32.mrf.mxu0 }
 0x385   :  { %14503 = vst [vmem:[#allocation57_spill] sm:$0xff] %v13505_v6 }
 0x386   :  { %3880 = vmatmul.bf16.vlgmr.msra.gmra.mxu1 %v13179_v50  ;;  %3919 = vmatmul.bf16.vlgmr.msra.gmra.mxu2 %v14501_v41 }
 0x387   :  { %3861 = vmatmul.bf16.gmra.mxu0 %v12986_v43 }
 0x389   :  { %v3628_v35 = vpop.f32.mrf.mxu2 }
 0x38a   :  { %v13513_v19 = vadd.f32 %v3628_v35, %v3590_v14  ;;  %v2873_v17 = vpop.f32.mrf.mxu3 }
 0x38b   :  { %v13516_v53 = vadd.f32 %v2873_v17, %v13396_v2  ;;  %v3591_v34 = vpop.f32.mrf.mxu1  ;;  %v11758_v2 = vld [vmem:[#allocation8 + $0x3a4] sm:$0xf] }
 0x38c   :  { %14504 = vst [vmem:[#allocation58_spill] sm:$0xff] %v13513_v19  ;;  %v3592_v60 = vadd.f32 %v3591_v34, %v13437_v32  ;;  %v13519_v18 = vpop.f32.mrf.mxu0  ;;  %v9867_v32 = vld [vmem:[#allocation8 + $0x3b4] sm:$0xf0]  ;;  %v11753_v19 = vld [vmem:[#allocation8 + $0x37c] sm:$0xf] }
 0x38d   :  { %14505 = vst [vmem:[#allocation59_spill] sm:$0xff] %v13516_v53  ;;  %v9870_v35 = vor.u32 %v11758_v2, %v9867_v32  ;;  %v9847_v2 = vld [vmem:[#allocation8 + $0x38c] sm:$0xf0] }
 0x38f   :  { %3807 = vmatmul.bf16.gmra.mxu3 %v12832_v44 }
 0x390   :  { %3950 = vmatpush.bf16.msra.mxu3 %v9870_v35 }
 0x391   :  { %v3630_v38 = vpop.f32.mrf.mxu2 }
 0x392   :  { %v13522_v58 = vadd.f32 %v3630_v38, %v3592_v60  ;;  %v2876_v40 = vpop.f32.mrf.mxu3 }
 0x393   :  { %v13525_v8 = vadd.f32 %v2876_v40, %v13408_v28  ;;  %v3594_v36 = vpop.f32.mrf.mxu1 }
 0x394   :  { %14506 = vst [vmem:[#allocation60_spill] sm:$0xff] %v13522_v58  ;;  %v3595_v51 = vadd.f32 %v3594_v36, %v13447_v15  ;;  %v13528_v14 = vpop.f32.mrf.mxu0  ;;  %v9713_v36 = vld [vmem:[#allocation8 + $0x268] sm:$0xf]  ;;  %v11721_v58 = vld [vmem:[#allocation8 + $0x278] sm:$0xf0] }
 0x395   :  { %14507 = vst [vmem:[#allocation61_spill] sm:$0xff] %v13525_v8  ;;  %v9714_v3 = vor.u32 %v11721_v58, %v9713_v36  ;;  %v9827_v58 = vld [vmem:[#allocation8 + $0x364] sm:$0xf0]  ;;  %v11716_v36 = vld [vmem:[#allocation8 + $0x250] sm:$0xf0] }
 0x396   :  { %3885 = vmatmul.bf16.gmra.mxu1 %v12830_v26  ;;  %3924 = vmatmul.bf16.gmra.mxu2 %v12832_v44 }
 0x397   :  { %3866 = vmatmul.bf16.gmra.mxu0 %v13002_v22  ;;  %4028 = vmatpush.bf16.msrb.mxu1 %v9714_v3  ;;  %v9693_v3 = vld [vmem:[#allocation8 + $0x240] sm:$0xf] }
 0x399   :  { %v3633_v17 = vpop.f32.mrf.mxu2 }
 0x39a   :  { %v13533_v34 = vadd.f32 %v3633_v17, %v3595_v51  ;;  %v2878_v60 = vpop.f32.mrf.mxu3  ;;  %v9850_v51 = vor.u32 %v11753_v19, %v9847_v2  ;;  %v11748_v19 = vld [vmem:[#allocation8 + $0x354] sm:$0xf] }
 0x39b   :  { %v13536_v28 = vadd.f32 %v2878_v60, %v13418_v56  ;;  %v3596_v15 = vpop.f32.mrf.mxu1  ;;  %v14511_v56 = vld [vmem:[#allocation25_spill] sm:$0xff]  ;;  %v9830_v2 = vor.u32 %v11748_v19, %v9827_v58  ;;  %v9673_v19 = vld [vmem:[#allocation8 + $0x218] sm:$0xf]  ;;  %v11711_v58 = vld [vmem:[#allocation8 + $0x228] sm:$0xf0] }
 0x39c   :  { %14508 = vst [vmem:[#allocation62_spill] sm:$0xff] %v13533_v34  ;;  %v3597_v38 = vadd.f32 %v3596_v15, %v13459_v59  ;;  %v13539_v40 = vpop.f32.mrf.mxu0  ;;  %3951 = vmatpush.bf16.msra.mxu3 %v9850_v51  ;;  %v9873_v15 = vld [vmem:[#allocation8 + $0x3a8] sm:$0xf]  ;;  %v9853_v51 = vld [vmem:[#allocation8 + $0x380] sm:$0xf] }
 0x39d   :  { %14509 = vst [vmem:[#allocation63_spill] sm:$0xff] %v13536_v28  ;;  %v9874_v28 = vor.u32 %v11761_v21, %v9873_v15  ;;  %v14513_v21 = vld [vmem:[#allocation39_spill] sm:$0xff] }
 0x39f   :  { %3812 = vmatmul.bf16.gmra.mxu3 %v12850_v31  ;;  %4067 = vmatpush.bf16.msrb.mxu2 %v9874_v28 }
 0x3a0   :  { %3952 = vmatpush.bf16.msra.mxu3 %v9830_v2  ;;  %v9674_v2 = vor.u32 %v11711_v58, %v9673_v19 }
 0x3a1   :  { %v3635_v32 = vpop.f32.mrf.mxu2 }
 0x3a2   :  { %v13542_v17 = vadd.f32 %v3635_v32, %v3597_v38  ;;  %v3647_v35 = vpop.f32.mrf.mxu3  ;;  %v9694_v32 = vor.u32 %v11716_v36, %v9693_v3  ;;  %v9833_v3 = vld [vmem:[#allocation8 + $0x358] sm:$0xf] }
 0x3a3   :  { %v3648_v60 = vadd.f32 %v3647_v35, %v14511_v56  ;;  %v3725_v34 = vpop.f32.mrf.mxu1  ;;  %v11756_v35 = vld [vmem:[#allocation8 + $0x390] sm:$0xf0] }
 0x3a4   :  { %14510 = vst [vmem:[#allocation64_spill] sm:$0xff] %v13542_v17  ;;  %v13545_v59 = vpop.f32.mrf.mxu0  ;;  %4029 = vmatpush.bf16.msrb.mxu1 %v9694_v32  ;;  %v11743_v17 = vld [vmem:[#allocation8 + $0x32c] sm:$0xf]  ;;  %v9787_v32 = vld [vmem:[#allocation8 + $0x314] sm:$0xf0] }
 0x3a5   :  { %v3687_v7 = vadd.f32 %v13468_v47, %v3648_v60  ;;  %v9854_v47 = vor.u32 %v11756_v35, %v9853_v51  ;;  %v11751_v51 = vld [vmem:[#allocation8 + $0x368] sm:$0xf0] }
 0x3a6   :  { %3890 = vmatmul.bf16.gmra.mxu1 %v12848_v54  ;;  %3929 = vmatmul.bf16.gmra.mxu2 %v12850_v31  ;;  %v9834_v35 = vor.u32 %v11751_v51, %v9833_v3  ;;  %v11733_v3 = vld [vmem:[#allocation8 + $0x2dc] sm:$0xf] }
 0x3a7   :  { %v13550_v38 = vadd.f32 %v3725_v34, %v3687_v7  ;;  %3997 = vmatmul.bf16.vlgmr.msrb.gmra.mxu0 %v13179_v50  ;;  %v9807_v7 = vld [vmem:[#allocation8 + $0x33c] sm:$0xf0]  ;;  %v14514_v34 = vld [vmem:[#allocation26_spill] sm:$0xff]  ;;  %4068 = vmatpush.bf16.msrb.mxu2 %v9854_v47 }
 0x3a8   :  { %v9810_v8 = vor.u32 %v11743_v17, %v9807_v7  ;;  %4030 = vmatpush.bf16.msrb.mxu1 %v9674_v2  ;;  %v9653_v17 = vld [vmem:[#allocation8 + $0x1f0] sm:$0xf] }
 0x3a9   :  { %14512 = vst [vmem:[#allocation25_spill] sm:$0xff] %v13550_v38  ;;  %v3764_v56 = vpop.f32.mrf.mxu2  ;;  %v9813_v7 = vld [vmem:[#allocation8 + $0x330] sm:$0xf] }
 0x3aa   :  { %v13554_v60 = vadd.f32 %v3764_v56, %v14513_v21  ;;  %v3649_v15 = vpop.f32.mrf.mxu3  ;;  %3953 = vmatpush.bf16.msra.mxu3 %v9810_v8  ;;  %v11738_v56 = vld [vmem:[#allocation8 + $0x304] sm:$0xf]  ;;  %v14516_v8 = vld [vmem:[#allocation40_spill] sm:$0xff] }
 0x3ab   :  { %v3650_v38 = vadd.f32 %v3649_v15, %v14514_v34  ;;  %v3727_v50 = vpop.f32.mrf.mxu1  ;;  %v9790_v47 = vor.u32 %v11738_v56, %v9787_v32  ;;  %4069 = vmatpush.bf16.msrb.mxu2 %v9834_v35  ;;  %v11706_v15 = vld [vmem:[#allocation8 + $0x200] sm:$0xf0]  ;;  %v9633_v56 = vld [vmem:[#allocation8 + $0x1c8] sm:$0xf]  ;;  %v11701_v32 = vld [vmem:[#allocation8 + $0x1d8] sm:$0xf0] }
 0x3ac   :  { %v13557_v28 = vpop.f32.mrf.mxu0  ;;  %v9654_v53 = vor.u32 %v11706_v15, %v9653_v17  ;;  %v9634_v15 = vor.u32 %v11701_v32, %v9633_v56 }
 0x3ad   :  { %v3689_v36 = vadd.f32 %v13479_v20, %v3650_v38  ;;  %v11746_v20 = vld [vmem:[#allocation8 + $0x340] sm:$0xf0] }
 0x3ae   :  { %3954 = vmatpush.bf16.msra.mxu3 %v9790_v47  ;;  %v9814_v58 = vor.u32 %v11746_v20, %v9813_v7  ;;  %4031 = vmatpush.bf16.msrb.mxu1 %v9654_v53  ;;  %v9793_v47 = vld [vmem:[#allocation8 + $0x308] sm:$0xf]  ;;  %v11728_v20 = vld [vmem:[#allocation8 + $0x2b4] sm:$0xf] }
 0x3af   :  { %v13560_v21 = vadd.f32 %v3727_v50, %v3689_v36  ;;  %3817 = vmatmul.bf16.gmra.mxu3 %v12870_v12  ;;  %v9767_v50 = vld [vmem:[#allocation8 + $0x2ec] sm:$0xf0] }
 0x3b0   :  { %v14517_v36 = vld [vmem:[#allocation27_spill] sm:$0xff]  ;;  %v9770_v2 = vor.u32 %v11733_v3, %v9767_v50  ;;  %4070 = vmatpush.bf16.msrb.mxu2 %v9814_v58  ;;  %v9613_v58 = vld [vmem:[#allocation8 + $0x1a0] sm:$0xf] }
 0x3b1   :  { %14515 = vst [vmem:[#allocation39_spill] sm:$0xff] %v13560_v21  ;;  %v3766_v34 = vpop.f32.mrf.mxu2  ;;  %v11696_v3 = vld [vmem:[#allocation8 + $0x1b0] sm:$0xf0] }
 0x3b2   :  { %v13564_v38 = vadd.f32 %v3766_v34, %v14516_v8  ;;  %v3652_v19 = vpop.f32.mrf.mxu3  ;;  %3955 = vmatpush.bf16.msra.mxu3 %v9770_v2  ;;  %v11741_v34 = vld [vmem:[#allocation8 + $0x318] sm:$0xf0]  ;;  %v9747_v8 = vld [vmem:[#allocation8 + $0x2c4] sm:$0xf0]  ;;  %4032 = vmatpush.bf16.msrb.mxu1 %v9634_v15 }
 0x3b3   :  { %v3653_v51 = vadd.f32 %v3652_v19, %v14517_v36  ;;  %v3730_v21 = vpop.f32.mrf.mxu1  ;;  %v9794_v7 = vor.u32 %v11741_v34, %v9793_v47  ;;  %v9750_v19 = vor.u32 %v11728_v20, %v9747_v8  ;;  %v9614_v36 = vor.u32 %v11696_v3, %v9613_v58  ;;  %v14519_v2 = vld [vmem:[#allocation41_spill] sm:$0xff]  ;;  %v11723_v34 = vld [vmem:[#allocation8 + $0x28c] sm:$0xf]  ;;  %v9593_v20 = vld [vmem:[#allocation8 + $0x178] sm:$0xf] }
 0x3b4   :  { %v13567_v35 = vpop.f32.mrf.mxu0  ;;  %v11691_v8 = vld [vmem:[#allocation8 + $0x188] sm:$0xf0] }
 0x3b5   :  { %v3692_v17 = vadd.f32 %v13488_v27, %v3653_v51  ;;  %4071 = vmatpush.bf16.msrb.mxu2 %v9794_v7  ;;  %v9773_v27 = vld [vmem:[#allocation8 + $0x2e0] sm:$0xf]  ;;  %v11736_v51 = vld [vmem:[#allocation8 + $0x2f0] sm:$0xf0]  ;;  %v9594_v3 = vor.u32 %v11691_v8, %v9593_v20 }
 0x3b6   :  { %3895 = vmatmul.bf16.gmra.mxu1 %v14490_v24  ;;  %3934 = vmatmul.bf16.gmra.mxu2 %v12870_v12  ;;  %v9774_v47 = vor.u32 %v11736_v51, %v9773_v27  ;;  %v11686_v51 = vld [vmem:[#allocation8 + $0x160] sm:$0xf0] }
 0x3b7   :  { %v13572_v53 = vadd.f32 %v3730_v21, %v3692_v17  ;;  %4002 = vmatmul.bf16.gmra.mxu0 %v12830_v26  ;;  %3956 = vmatpush.bf16.msra.mxu3 %v9750_v19  ;;  %v9727_v21 = vld [vmem:[#allocation8 + $0x29c] sm:$0xf0]  ;;  %v9753_v19 = vld [vmem:[#allocation8 + $0x2b8] sm:$0xf] }
 0x3b8   :  { %v14520_v17 = vld [vmem:[#allocation28_spill] sm:$0xff]  ;;  %4033 = vmatpush.bf16.msrb.mxu1 %v9614_v36  ;;  %v9730_v15 = vor.u32 %v11723_v34, %v9727_v21  ;;  %v9573_v36 = vld [vmem:[#allocation8 + $0x150] sm:$0xf]  ;;  %v11726_v21 = vld [vmem:[#allocation8 + $0x2a0] sm:$0xf0] }
 0x3b9   :  { %14518 = vst [vmem:[#allocation26_spill] sm:$0xff] %v13572_v53  ;;  %v3769_v50 = vpop.f32.mrf.mxu2  ;;  %4072 = vmatpush.bf16.msrb.mxu2 %v9774_v47  ;;  %v9574_v47 = vor.u32 %v11686_v51, %v9573_v36  ;;  %v14525_v51 = vld [vmem:[#allocation43_spill] sm:$0xff] }
 0x3ba   :  { %v13576_v56 = vadd.f32 %v3769_v50, %v14519_v2  ;;  %v3654_v32 = vpop.f32.mrf.mxu3  ;;  %v11731_v50 = vld [vmem:[#allocation8 + $0x2c8] sm:$0xf0] }
 0x3bb   :  { %v3655_v53 = vadd.f32 %v3654_v32, %v14520_v17  ;;  %v3732_v26 = vpop.f32.mrf.mxu1  ;;  %3957 = vmatpush.bf16.msra.mxu3 %v9730_v15  ;;  %v9754_v2 = vor.u32 %v11731_v50, %v9753_v19  ;;  %v9733_v32 = vld [vmem:[#allocation8 + $0x290] sm:$0xf]  ;;  %v14523_v15 = vld [vmem:[#allocation29_spill] sm:$0xff] }
 0x3bc   :  { %v13579_v7 = vpop.f32.mrf.mxu0  ;;  %4034 = vmatpush.bf16.msrb.mxu1 %v9594_v3  ;;  %v14522_v17 = vld [vmem:[#allocation42_spill] sm:$0xff] }
 0x3bd   :  { %v3694_v58 = vadd.f32 %v13499_v13, %v3655_v53  ;;  %4073 = vmatpush.bf16.msrb.mxu2 %v9754_v2  ;;  %v9734_v53 = vor.u32 %v11726_v21, %v9733_v32  ;;  %v11980_v3 = vld [vmem:[#allocation8 + $0x9e8] sm:$0xf0]  ;;  %v11975_v21 = vld [vmem:[#allocation8 + $0x9c0] sm:$0xf0] }
 0x3bf   :  { %v13582_v27 = vadd.f32 %v3732_v26, %v3694_v58  ;;  %3822 = vmatmul.bf16.gmra.mxu3 %v12888_v16  ;;  %v10249_v58 = vld [vmem:[#allocation8 + $0x9d8] sm:$0xf] }
 0x3c0   :  { %4035 = vmatpush.bf16.msrb.mxu1 %v9574_v47  ;;  %v10250_v2 = vor.u32 %v11980_v3, %v10249_v58  ;;  %v10229_v47 = vld [vmem:[#allocation8 + $0x9b0] sm:$0xf] }
 0x3c1   :  { %14521 = vst [vmem:[#allocation40_spill] sm:$0xff] %v13582_v27  ;;  %v3771_v34 = vpop.f32.mrf.mxu2  ;;  %4074 = vmatpush.bf16.msrb.mxu2 %v9734_v53  ;;  %v10230_v53 = vor.u32 %v11975_v21, %v10229_v47  ;;  %v11965_v47 = vld [vmem:[#allocation8 + $0x970] sm:$0xf0] }
 0x3c2   :  { %v13586_v6 = vadd.f32 %v3771_v34, %v14522_v17  ;;  %v3657_v13 = vpop.f32.mrf.mxu3  ;;  %5034 = vmatpush.bf16.msra.mxu0 %v10250_v2  ;;  %v14528_v2 = vld [vmem:[#allocation44_spill] sm:$0xff]  ;;  %v14529_v21 = vld [vmem:[#allocation31_spill] sm:$0xff] }
 0x3c3   :  { %v3658_v20 = vadd.f32 %v3657_v13, %v14523_v15  ;;  %v3735_v8 = vpop.f32.mrf.mxu1 }
 0x3c4   :  { %v13589_v26 = vpop.f32.mrf.mxu0 }
 0x3c5   :  { %v3697_v19 = vadd.f32 %v13508_v11, %v3658_v20  ;;  %v14526_v11 = vld [vmem:[#allocation30_spill] sm:$0xff] }
 0x3c6   :  { %3900 = vmatmul.bf16.gmra.mxu1 %v14495_v4  ;;  %3939 = vmatmul.bf16.gmra.mxu2 %v12888_v16 }
 0x3c7   :  { %v13594_v50 = vadd.f32 %v3735_v8, %v3697_v19  ;;  %4007 = vmatmul.bf16.gmra.mxu0 %v12848_v54  ;;  %v10209_v8 = vld [vmem:[#allocation8 + $0x988] sm:$0xf]  ;;  %v11970_v54 = vld [vmem:[#allocation8 + $0x998] sm:$0xf0] }
 0x3c8   :  { %5035 = vmatpush.bf16.msra.mxu0 %v10230_v53  ;;  %v10210_v58 = vor.u32 %v11970_v54, %v10209_v8  ;;  %v10169_v53 = vld [vmem:[#allocation8 + $0x938] sm:$0xf] }
 0x3c9   :  { %14524 = vst [vmem:[#allocation27_spill] sm:$0xff] %v13594_v50  ;;  %v3774_v36 = vpop.f32.mrf.mxu2 }
 0x3ca   :  { %v13598_v32 = vadd.f32 %v3774_v36, %v14525_v51  ;;  %v3659_v34 = vpop.f32.mrf.mxu3 }
 0x3cb   :  { %v3660_v17 = vadd.f32 %v3659_v34, %v14526_v11  ;;  %v3737_v13 = vpop.f32.mrf.mxu1  ;;  %v10189_v34 = vld [vmem:[#allocation8 + $0x960] sm:$0xf] }
 0x3cc   :  { %v13601_v15 = vpop.f32.mrf.mxu0  ;;  %5036 = vmatpush.bf16.msra.mxu0 %v10210_v58 }
 0x3cd   :  { %v3699_v20 = vadd.f32 %v13519_v18, %v3660_v17  ;;  %v10190_v18 = vor.u32 %v11965_v47, %v10189_v34  ;;  %v10149_v34 = vld [vmem:[#allocation8 + $0x910] sm:$0xf]  ;;  %v14532_v47 = vld [vmem:[#allocation32_spill] sm:$0xff] }
 0x3cf   :  { %v13604_v19 = vadd.f32 %v3737_v13, %v3699_v20  ;;  %3827 = vmatmul.bf16.gmra.mxu3 %v12913_v45  ;;  %v11960_v20 = vld [vmem:[#allocation8 + $0x948] sm:$0xf0] }
 0x3d0   :  { %5037 = vmatpush.bf16.msra.mxu0 %v10190_v18  ;;  %v10170_v54 = vor.u32 %v11960_v20, %v10169_v53 }
 0x3d1   :  { %14527 = vst [vmem:[#allocation41_spill] sm:$0xff] %v13604_v19  ;;  %v3776_v3 = vpop.f32.mrf.mxu2 }
 0x3d2   :  { %v13608_v36 = vadd.f32 %v3776_v3, %v14528_v2  ;;  %v3662_v51 = vpop.f32.mrf.mxu3  ;;  %v14531_v3 = vld [vmem:[#allocation45_spill] sm:$0xff] }
 0x3d3   :  { %v3663_v11 = vadd.f32 %v3662_v51, %v14529_v21  ;;  %v3740_v50 = vpop.f32.mrf.mxu1 }
 0x3d4   :  { %v13611_v17 = vpop.f32.mrf.mxu0  ;;  %5038 = vmatpush.bf16.msra.mxu0 %v10170_v54 }
 0x3d5   :  { %v3702_v13 = vadd.f32 %v13528_v14, %v3663_v11  ;;  %v11955_v14 = vld [vmem:[#allocation8 + $0x920] sm:$0xf0] }
 0x3d6   :  { %3905 = vmatmul.bf16.gmra.mxu1 %v14498_v62  ;;  %3944 = vmatmul.bf16.gmra.mxu2 %v12913_v45  ;;  %v10150_v18 = vor.u32 %v11955_v14, %v10149_v34  ;;  %v11945_v34 = vld [vmem:[#allocation8 + $0x8d0] sm:$0xf0]  ;;  %v14535_v14 = vld [vmem:[#allocation33_spill] sm:$0xff] }
 0x3d7   :  { %v13616_v8 = vadd.f32 %v3740_v50, %v3702_v13  ;;  %4012 = vmatmul.bf16.gmra.mxu0 %v14490_v24  ;;  %v10129_v13 = vld [vmem:[#allocation8 + $0x8e8] sm:$0xf]  ;;  %v11950_v24 = vld [vmem:[#allocation8 + $0x8f8] sm:$0xf0] }
 0x3d8   :  { %5039 = vmatpush.bf16.msra.mxu0 %v10150_v18  ;;  %v10130_v20 = vor.u32 %v11950_v24, %v10129_v13  ;;  %v14537_v13 = vld [vmem:[#allocation48_spill] sm:$0xff] }
 0x3d9   :  { %14530 = vst [vmem:[#allocation28_spill] sm:$0xff] %v13616_v8  ;;  %v3779_v58 = vpop.f32.mrf.mxu2 }
 0x3da   :  { %v13620_v2 = vadd.f32 %v3779_v58, %v14531_v3  ;;  %v3664_v51 = vpop.f32.mrf.mxu3  ;;  %v14534_v58 = vld [vmem:[#allocation46_spill] sm:$0xff] }
 0x3db   :  { %v3665_v21 = vadd.f32 %v3664_v51, %v14532_v47  ;;  %v3742_v11 = vpop.f32.mrf.mxu1  ;;  %v10109_v47 = vld [vmem:[#allocation8 + $0x8c0] sm:$0xf] }
 0x3dc   :  { %v13623_v19 = vpop.f32.mrf.mxu0  ;;  %5040 = vmatpush.bf16.msra.mxu0 %v10130_v20 }
 0x3dd   :  { %v3704_v50 = vadd.f32 %v13539_v40, %v3665_v21  ;;  %v10110_v40 = vor.u32 %v11945_v34, %v10109_v47  ;;  %v14541_v34 = vld [vmem:[#allocation36_spill] sm:$0xff] }
 0x3df   :  { %v13626_v53 = vadd.f32 %v3742_v11, %v3704_v50  ;;  %3958 = vmatmul.bf16.vlgmr.msra.gmra.mxu3 %v13254_v52 }
 0x3e0   :  { %5041 = vmatpush.bf16.msra.mxu0 %v10110_v40 }
 0x3e1   :  { %14533 = vst [vmem:[#allocation42_spill] sm:$0xff] %v13626_v53  ;;  %v3781_v54 = vpop.f32.mrf.mxu2 }
 0x3e2   :  { %v13630_v3 = vadd.f32 %v3781_v54, %v14534_v58  ;;  %v3667_v51 = vpop.f32.mrf.mxu3  ;;  %v14538_v54 = vld [vmem:[#allocation34_spill] sm:$0xff] }
 0x3e3   :  { %v3668_v8 = vadd.f32 %v3667_v51, %v14535_v14  ;;  %v3745_v27 = vpop.f32.mrf.mxu1 }
 0x3e4   :  { %v13633_v21 = vpop.f32.mrf.mxu0 }
 0x3e5   :  { %v3707_v11 = vadd.f32 %v13545_v59, %v3668_v8 }
 0x3e6   :  { %4036 = vmatmul.bf16.vlgmr.msrb.gmra.mxu1 %v14501_v41  ;;  %4075 = vmatmul.bf16.vlgmr.msrb.gmra.mxu2 %v13254_v52  ;;  %v14540_v41 = vld [vmem:[#allocation49_spill] sm:$0xff] }
 0x3e7   :  { %v13638_v18 = vadd.f32 %v3745_v27, %v3707_v11  ;;  %4017 = vmatmul.bf16.gmra.mxu0 %v14495_v4 }
 0x3e9   :  { %14536 = vst [vmem:[#allocation29_spill] sm:$0xff] %v13638_v18  ;;  %v3784_v50 = vpop.f32.mrf.mxu2  ;;  %v10051_v18 = vld [vmem:[#allocation8 + $0x85c] sm:$0xf0] }
 0x3ea   :  { %v13642_v24 = vadd.f32 %v3784_v50, %v14537_v13  ;;  %v3669_v20 = vpop.f32.mrf.mxu3  ;;  %v10089_v13 = vld [vmem:[#allocation8 + $0x898] sm:$0xf] }
 0x3eb   :  { %v3670_v58 = vadd.f32 %v3669_v20, %v14538_v54  ;;  %v3747_v51 = vpop.f32.mrf.mxu1  ;;  %v11940_v20 = vld [vmem:[#allocation8 + $0x8a8] sm:$0xf0] }
 0x3ec   :  { %v13645_v47 = vpop.f32.mrf.mxu0 }
 0x3ed   :  { %v3709_v59 = vadd.f32 %v13557_v28, %v3670_v58  ;;  %v10090_v28 = vor.u32 %v11940_v20, %v10089_v13  ;;  %v10069_v13 = vld [vmem:[#allocation8 + $0x870] sm:$0xf] }
 0x3ef   :  { %v13648_v8 = vadd.f32 %v3747_v51, %v3709_v59  ;;  %3963 = vmatmul.bf16.gmra.mxu3 %v12940_v25  ;;  %v14543_v51 = vld [vmem:[#allocation50_spill] sm:$0xff] }
 0x3f0   :  { %4995 = vmatpush.bf16.msrb.mxu3 %v10090_v28 }
 0x3f1   :  { %14539 = vst [vmem:[#allocation43_spill] sm:$0xff] %v13648_v8  ;;  %v3786_v52 = vpop.f32.mrf.mxu2 }
 0x3f2   :  { %v13652_v27 = vadd.f32 %v3786_v52, %v14540_v41  ;;  %v3672_v4 = vpop.f32.mrf.mxu3  ;;  %v14544_v41 = vld [vmem:[#allocation38_spill] sm:$0xff] }
 0x3f3   :  { %v3673_v14 = vadd.f32 %v3672_v4, %v14541_v34  ;;  %v3750_v40 = vpop.f32.mrf.mxu1 }
 0x3f4   :  { %v13655_v11 = vpop.f32.mrf.mxu0 }
 0x3f5   :  { %v3712_v50 = vadd.f32 %v13567_v35, %v3673_v14  ;;  %v10409_v14 = vld [vmem:[#allocation8 + $0xb18] sm:$0xf] }
 0x3f6   :  { %4041 = vmatmul.bf16.gmra.mxu1 %v12832_v44  ;;  %4080 = vmatmul.bf16.gmra.mxu2 %v12940_v25  ;;  %v12020_v25 = vld [vmem:[#allocation8 + $0xb28] sm:$0xf0] }
 0x3f7   :  { %v13660_v54 = vadd.f32 %v3750_v40, %v3712_v50  ;;  %4022 = vmatmul.bf16.gmra.mxu0 %v14498_v62  ;;  %v10410_v40 = vor.u32 %v12020_v25, %v10409_v14  ;;  %v11935_v50 = vld [vmem:[#allocation8 + $0x880] sm:$0xf0] }
 0x3f8   :  { %v10070_v62 = vor.u32 %v11935_v50, %v10069_v13  ;;  %v11938_v13 = vld [vmem:[#allocation8 + $0x89c] sm:$0xf]  ;;  %v10389_v50 = vld [vmem:[#allocation8 + $0xaf0] sm:$0xf] }
 0x3f9   :  { %14542 = vst [vmem:[#allocation30_spill] sm:$0xff] %v13660_v54  ;;  %v3789_v58 = vpop.f32.mrf.mxu2  ;;  %5073 = vmatpush.bf16.msra.mxu1 %v10410_v40  ;;  %v14547_v54 = vld [vmem:[#allocation52_spill] sm:$0xff]  ;;  %v10091_v40 = vld [vmem:[#allocation8 + $0x8ac] sm:$0xf0] }
 0x3fa   :  { %v13664_v59 = vadd.f32 %v3789_v58, %v14543_v51  ;;  %v3674_v52 = vpop.f32.mrf.mxu3  ;;  %4996 = vmatpush.bf16.msrb.mxu3 %v10070_v62  ;;  %v14546_v58 = vld [vmem:[#allocation51_spill] sm:$0xff]  ;;  %v12015_v62 = vld [vmem:[#allocation8 + $0xb00] sm:$0xf0] }
 0x3fb   :  { %v3675_v4 = vadd.f32 %v3674_v52, %v14544_v41  ;;  %v3752_v35 = vpop.f32.mrf.mxu1  ;;  %v9879_v41 = vld [vmem:[#allocation2 + $0x3c] sm:$0xf0] }
 0x3fc   :  { %v13667_v34 = vpop.f32.mrf.mxu0 }
 0x3fd   :  { %v3714_v44 = vadd.f32 %v13579_v7, %v3675_v4 }
 0x3ff   :  { %v13670_v20 = vadd.f32 %v3752_v35, %v3714_v44  ;;  %3968 = vmatmul.bf16.gmra.mxu3 %v12956_v5  ;;  %v11885_v35 = vld [vmem:[#allocation2 + $0x34] sm:$0xf] }
 0x400   :  { %v13683_v25 = vor.u32 %v11885_v35, %v9879_v41  ;;  %v10071_v35 = vld [vmem:[#allocation8 + $0x884] sm:$0xf0] }
 0x401   :  { %14545 = vst [vmem:[#allocation44_spill] sm:$0xff] %v13670_v20  ;;  %v3791_v28 = vpop.f32.mrf.mxu2 }
 0x402   :  { %v13674_v51 = vadd.f32 %v3791_v28, %v14546_v58  ;;  %v3803_v52 = vpop.f32.mrf.mxu3  ;;  %v10049_v28 = vld [vmem:[#allocation8 + $0x848] sm:$0xf]  ;;  %v11930_v58 = vld [vmem:[#allocation8 + $0x858] sm:$0xf0] }
 0x403   :  { %v3804_v7 = vadd.f32 %v3803_v52, %v13554_v60  ;;  %v3881_v4 = vpop.f32.mrf.mxu1  ;;  %v10094_v60 = vor.u32 %v11938_v13, %v10091_v40  ;;  %v14549_v13 = vld [vmem:[#allocation53_spill] sm:$0xff] }
 0x404   :  { %v3882_v8 = vadd.f32 %v3881_v4, %v14547_v54  ;;  %v13678_v14 = vpop.f32.mrf.mxu0  ;;  %v10390_v54 = vor.u32 %v12015_v62, %v10389_v50  ;;  %v11933_v4 = vld [vmem:[#allocation8 + $0x874] sm:$0xf]  ;;  %v10029_v50 = vld [vmem:[#allocation8 + $0x820] sm:$0xf] }
 0x405   :  { %v13681_v44 = vadd.f32 %v13589_v26, %v3804_v7  ;;  %5112 = vmatpush.bf16.msra.mxu2 %v10094_v60  ;;  %v10050_v26 = vor.u32 %v11930_v58, %v10049_v28  ;;  %v11925_v62 = vld [vmem:[#allocation8 + $0x830] sm:$0xf0]  ;;  %v12010_v28 = vld [vmem:[#allocation8 + $0xad8] sm:$0xf0]  ;;  %v11928_v58 = vld [vmem:[#allocation8 + $0x84c] sm:$0xf] }
 0x406   :  { %4046 = vmatmul.bf16.gmra.mxu1 %v12850_v31  ;;  %4085 = vmatmul.bf16.gmra.mxu2 %v12956_v5 }
 0x407   :  { %14548 = vst [vmem:[#allocation31_spill] sm:$0xff] %v13681_v44  ;;  %5042 = vmatmul.bf16.vlgmr.msra.gmra.mxu0 %v13683_v25  ;;  %5074 = vmatpush.bf16.msra.mxu1 %v10390_v54  ;;  %v10074_v44 = vor.u32 %v11933_v4, %v10071_v35  ;;  %v10369_v54 = vld [vmem:[#allocation8 + $0xac8] sm:$0xf]  ;;  %v9891_v35 = vld [vmem:[#allocation2 + $0x54] sm:$0xf0] }
 0x408   :  { %4997 = vmatpush.bf16.msrb.mxu3 %v10050_v26  ;;  %v10009_v26 = vld [vmem:[#allocation8 + $0x7f8] sm:$0xf] }
 0x409   :  { %v3920_v52 = vpop.f32.mrf.mxu2  ;;  %5113 = vmatpush.bf16.msra.mxu2 %v10074_v44 }
 0x40a   :  { %v13688_v41 = vadd.f32 %v3920_v52, %v3882_v8  ;;  %v3805_v7 = vpop.f32.mrf.mxu3  ;;  %v10030_v8 = vor.u32 %v11925_v62, %v10029_v50  ;;  %v10370_v52 = vor.u32 %v12010_v28, %v10369_v54  ;;  %v11923_v50 = vld [vmem:[#allocation8 + $0x824] sm:$0xf] }
 0x40b   :  { %v3806_v31 = vadd.f32 %v3805_v7, %v13564_v38  ;;  %v3883_v5 = vpop.f32.mrf.mxu1  ;;  %v10054_v38 = vor.u32 %v11928_v58, %v10051_v18  ;;  %v11920_v7 = vld [vmem:[#allocation8 + $0x808] sm:$0xf0] }
 0x40c   :  { %v3884_v40 = vadd.f32 %v3883_v5, %v14549_v13  ;;  %v13692_v20 = vpop.f32.mrf.mxu0  ;;  %4998 = vmatpush.bf16.msrb.mxu3 %v10030_v8  ;;  %5075 = vmatpush.bf16.msra.mxu1 %v10370_v52  ;;  %v10010_v5 = vor.u32 %v11920_v7, %v10009_v26  ;;  %v12005_v13 = vld [vmem:[#allocation8 + $0xab0] sm:$0xf0]  ;;  %v14551_v18 = vld [vmem:[#allocation54_spill] sm:$0xff]  ;;  %v11888_v52 = vld [vmem:[#allocation2 + $0x4c] sm:$0xf] }
 0x40d   :  { %v13695_v60 = vadd.f32 %v13601_v15, %v3806_v31  ;;  %5114 = vmatpush.bf16.msra.mxu2 %v10054_v38  ;;  %v10349_v31 = vld [vmem:[#allocation8 + $0xaa0] sm:$0xf]  ;;  %v9989_v38 = vld [vmem:[#allocation8 + $0x7d0] sm:$0xf]  ;;  %v11915_v26 = vld [vmem:[#allocation8 + $0x7e0] sm:$0xf0]  ;;  %v13707_v7 = vor.u32 %v11888_v52, %v9891_v35 }
 0x40e   :  { %v10350_v28 = vor.u32 %v12005_v13, %v10349_v31  ;;  %v11918_v31 = vld [vmem:[#allocation8 + $0x7fc] sm:$0xf] }
 0x40f   :  { %14550 = vst [vmem:[#allocation45_spill] sm:$0xff] %v13695_v60  ;;  %3973 = vmatmul.bf16.gmra.mxu3 %v12972_v37  ;;  %v10031_v60 = vld [vmem:[#allocation8 + $0x834] sm:$0xf0] }
 0x410   :  { %4999 = vmatpush.bf16.msrb.mxu3 %v10010_v5  ;;  %v10034_v53 = vor.u32 %v11923_v50, %v10031_v60  ;;  %5076 = vmatpush.bf16.msra.mxu1 %v10350_v28  ;;  %v10011_v5 = vld [vmem:[#allocation8 + $0x80c] sm:$0xf0]  ;;  %v11910_v50 = vld [vmem:[#allocation8 + $0x7b8] sm:$0xf0] }
 0x411   :  { %v3922_v4 = vpop.f32.mrf.mxu2  ;;  %v10014_v13 = vor.u32 %v11918_v31, %v10011_v5  ;;  %v10309_v28 = vld [vmem:[#allocation8 + $0xa50] sm:$0xf]  ;;  %v9949_v31 = vld [vmem:[#allocation8 + $0x780] sm:$0xf] }
 0x412   :  { %v13698_v15 = vadd.f32 %v3922_v4, %v3884_v40  ;;  %v3808_v44 = vpop.f32.mrf.mxu3  ;;  %v9990_v4 = vor.u32 %v11915_v26, %v9989_v38  ;;  %5115 = vmatpush.bf16.msra.mxu2 %v10034_v53  ;;  %v9991_v26 = vld [vmem:[#allocation8 + $0x7e4] sm:$0xf0] }
 0x413   :  { %v3809_v62 = vadd.f32 %v3808_v44, %v13576_v56  ;;  %v3886_v54 = vpop.f32.mrf.mxu1  ;;  %v10329_v56 = vld [vmem:[#allocation8 + $0xa78] sm:$0xf]  ;;  %v12000_v44 = vld [vmem:[#allocation8 + $0xa88] sm:$0xf0] }
 0x414   :  { %v3887_v8 = vadd.f32 %v3886_v54, %v14551_v18  ;;  %v13702_v58 = vpop.f32.mrf.mxu0  ;;  %v10330_v60 = vor.u32 %v12000_v44, %v10329_v56  ;;  %5000 = vmatpush.bf16.msrb.mxu3 %v9990_v4  ;;  %v11913_v18 = vld [vmem:[#allocation8 + $0x7d4] sm:$0xf] }
 0x415   :  { %v13705_v40 = vadd.f32 %v13611_v17, %v3809_v62  ;;  %v9969_v17 = vld [vmem:[#allocation8 + $0x7a8] sm:$0xf]  ;;  %v9994_v44 = vor.u32 %v11913_v18, %v9991_v26  ;;  %v11985_v18 = vld [vmem:[#allocation8 + $0xa10] sm:$0xf0] }
 0x416   :  { %4051 = vmatmul.bf16.gmra.mxu1 %v12870_v12  ;;  %4090 = vmatmul.bf16.gmra.mxu2 %v12972_v37  ;;  %v9970_v62 = vor.u32 %v11910_v50, %v9969_v17  ;;  %v11995_v37 = vld [vmem:[#allocation8 + $0xa60] sm:$0xf0]  ;;  %v10289_v17 = vld [vmem:[#allocation8 + $0xa28] sm:$0xf]  ;;  %v11990_v50 = vld [vmem:[#allocation8 + $0xa38] sm:$0xf0] }
 0x417   :  { %14552 = vst [vmem:[#allocation32_spill] sm:$0xff] %v13705_v40  ;;  %5047 = vmatmul.bf16.gmra.mxu0 %v13707_v7  ;;  %5077 = vmatpush.bf16.msra.mxu1 %v10330_v60  ;;  %v10310_v53 = vor.u32 %v11995_v37, %v10309_v28  ;;  %v11905_v60 = vld [vmem:[#allocation8 + $0x790] sm:$0xf0] }
 0x418   :  { %5116 = vmatpush.bf16.msra.mxu2 %v10014_v13  ;;  %5001 = vmatpush.bf16.msrb.mxu3 %v9970_v62  ;;  %v9950_v5 = vor.u32 %v11905_v60, %v9949_v31  ;;  %v9971_v13 = vld [vmem:[#allocation8 + $0x7bc] sm:$0xf0]  ;;  %v9903_v62 = vld [vmem:[#allocation2 + $0x6c] sm:$0xf0]  ;;  %v9951_v31 = vld [vmem:[#allocation8 + $0x794] sm:$0xf0] }
 0x419   :  { %v3925_v35 = vpop.f32.mrf.mxu2 }
 0x41a   :  { %v13712_v54 = vadd.f32 %v3925_v35, %v3887_v8  ;;  %v3810_v12 = vpop.f32.mrf.mxu3  ;;  %v10290_v35 = vor.u32 %v11990_v50, %v10289_v17  ;;  %v11891_v17 = vld [vmem:[#allocation2 + $0x64] sm:$0xf] }
 0x41b   :  { %v3811_v52 = vadd.f32 %v3810_v12, %v13586_v6  ;;  %v3888_v38 = vpop.f32.mrf.mxu1  ;;  %5078 = vmatpush.bf16.msra.mxu1 %v10310_v53  ;;  %v11908_v6 = vld [vmem:[#allocation8 + $0x7ac] sm:$0xf] }
 0x41c   :  { %v3889_v4 = vadd.f32 %v3888_v38, %v13327_v63  ;;  %v13716_v56 = vpop.f32.mrf.mxu0  ;;  %5117 = vmatpush.bf16.msra.mxu2 %v9994_v44  ;;  %v9974_v63 = vor.u32 %v11908_v6, %v9971_v13  ;;  %5002 = vmatpush.bf16.msrb.mxu3 %v9950_v5  ;;  %v13732_v6 = vor.u32 %v11891_v17, %v9903_v62 }
 0x41d   :  { %v13719_v8 = vadd.f32 %v13623_v19, %v3811_v52  ;;  %v10269_v19 = vld [vmem:[#allocation8 + $0xa00] sm:$0xf]  ;;  %v11903_v52 = vld [vmem:[#allocation8 + $0x784] sm:$0xf] }
 0x41e   :  { %v10270_v26 = vor.u32 %v11985_v18, %v10269_v19  ;;  %v9954_v5 = vor.u32 %v11903_v52, %v9951_v31  ;;  %v10391_v19 = vld [vmem:[#allocation8 + $0xb04] sm:$0xf0] }
 0x41f   :  { %14553 = vst [vmem:[#allocation46_spill] sm:$0xff] %v13719_v8  ;;  %3978 = vmatmul.bf16.gmra.mxu3 %v12986_v43  ;;  %5079 = vmatpush.bf16.msra.mxu1 %v10290_v35  ;;  %v11937_v8 = vld [vmem:[#allocation8 + $0x890] sm:$0xf0] }
 0x420   :  { %5118 = vmatpush.bf16.msra.mxu2 %v9974_v63 }
 0x421   :  { %v3927_v12 = vpop.f32.mrf.mxu2 }
 0x422   :  { %v13722_v28 = vadd.f32 %v3927_v12, %v3889_v4  ;;  %v3813_v37 = vpop.f32.mrf.mxu3 }
 0x423   :  { %v3814_v38 = vadd.f32 %v3813_v37, %v13598_v32  ;;  %v3891_v53 = vpop.f32.mrf.mxu1  ;;  %5080 = vmatpush.bf16.msra.mxu1 %v10270_v26  ;;  %v10411_v32 = vld [vmem:[#allocation8 + $0xb2c] sm:$0xf0] }
 0x424   :  { %v3892_v60 = vadd.f32 %v3891_v53, %v13337_v33  ;;  %v3998_v44 = vpop.f32.mrf.mxu0  ;;  %5119 = vmatpush.bf16.msra.mxu2 %v9954_v5  ;;  %v12018_v33 = vld [vmem:[#allocation8 + $0xb1c] sm:$0xf]  ;;  %v10371_v53 = vld [vmem:[#allocation8 + $0xadc] sm:$0xf0]  ;;  %v11894_v5 = vld [vmem:[#allocation2 + $0x7c] sm:$0xf] }
 0x425   :  { %v13727_v50 = vadd.f32 %v13633_v21, %v3814_v38  ;;  %v13730_v4 = vadd.f32 %v3998_v44, %v13421_v29  ;;  %v10414_v13 = vor.u32 %v12018_v33, %v10411_v32  ;;  %v12008_v38 = vld [vmem:[#allocation8 + $0xacc] sm:$0xf]  ;;  %v12003_v33 = vld [vmem:[#allocation8 + $0xaa4] sm:$0xf]  ;;  %v10351_v32 = vld [vmem:[#allocation8 + $0xab4] sm:$0xf0] }
 0x426   :  { %4056 = vmatmul.bf16.gmra.mxu1 %v12888_v16  ;;  %4095 = vmatmul.bf16.gmra.mxu2 %v12986_v43  ;;  %v12013_v16 = vld [vmem:[#allocation8 + $0xaf4] sm:$0xf]  ;;  %v10374_v26 = vor.u32 %v12008_v38, %v10371_v53  ;;  %v10311_v53 = vld [vmem:[#allocation8 + $0xa64] sm:$0xf0] }
 0x427   :  { %14554 = vst [vmem:[#allocation33_spill] sm:$0xff] %v13727_v50  ;;  %5052 = vmatmul.bf16.gmra.mxu0 %v13732_v6  ;;  %v10394_v52 = vor.u32 %v12013_v16, %v10391_v19  ;;  %v11886_v16 = vld [vmem:[#allocation2 + $0x38] sm:$0xf0]  ;;  %v14606_v50 = vld [vmem:[#allocation64_spill] sm:$0xff] }
 0x428   :  { %5190 = vmatpush.bf16.msrb.mxu0 %v10414_v13 }
 0x429   :  { %v3930_v35 = vpop.f32.mrf.mxu2 }
 0x42a   :  { %v13737_v63 = vadd.f32 %v3930_v35, %v3892_v60  ;;  %v3815_v21 = vpop.f32.mrf.mxu3  ;;  %v9915_v60 = vld [vmem:[#allocation2 + $0x84] sm:$0xf0] }
 0x42b   :  { %v3816_v29 = vadd.f32 %v3815_v21, %v13608_v36  ;;  %v3893_v12 = vpop.f32.mrf.mxu1  ;;  %v13758_v21 = vor.u32 %v11894_v5, %v9915_v60  ;;  %v9927_v5 = vld [vmem:[#allocation2 + $0x9c] sm:$0xf0] }
 0x42c   :  { %v3894_v62 = vadd.f32 %v3893_v12, %v13349_v61  ;;  %v4000_v37 = vpop.f32.mrf.mxu0  ;;  %5191 = vmatpush.bf16.msrb.mxu0 %v10394_v52 }
 0x42d   :  { %v13742_v43 = vadd.f32 %v13645_v47, %v3816_v29  ;;  %v13745_v18 = vadd.f32 %v4000_v37, %v13433_v42  ;;  %v10354_v29 = vor.u32 %v12003_v33, %v10351_v32 }
 0x42f   :  { %14555 = vst [vmem:[#allocation48_spill] sm:$0xff] %v13742_v43  ;;  %3983 = vmatmul.bf16.gmra.mxu3 %v13002_v22 }
 0x430   :  { %5192 = vmatpush.bf16.msrb.mxu0 %v10374_v26 }
 0x431   :  { %v3932_v36 = vpop.f32.mrf.mxu2 }
 0x432   :  { %v13748_v31 = vadd.f32 %v3932_v36, %v3894_v62  ;;  %v3818_v61 = vpop.f32.mrf.mxu3 }
 0x433   :  { %v3819_v44 = vadd.f32 %v3818_v61, %v13620_v2  ;;  %v3896_v17 = vpop.f32.mrf.mxu1  ;;  %v10331_v2 = vld [vmem:[#allocation8 + $0xa8c] sm:$0xf0] }
 0x434   :  { %v3897_v47 = vadd.f32 %v3896_v17, %v13359_v10  ;;  %v4003_v42 = vpop.f32.mrf.mxu0  ;;  %5193 = vmatpush.bf16.msrb.mxu0 %v10354_v29  ;;  %v11998_v10 = vld [vmem:[#allocation8 + $0xa7c] sm:$0xf]  ;;  %v10291_v17 = vld [vmem:[#allocation8 + $0xa3c] sm:$0xf0] }
 0x435   :  { %v13753_v35 = vadd.f32 %v13655_v11, %v3819_v44  ;;  %v13756_v13 = vadd.f32 %v4003_v42, %v13443_v1  ;;  %v10334_v62 = vor.u32 %v11998_v10, %v10331_v2  ;;  %v11887_v44 = vld [vmem:[#allocation2 + $0x40] sm:$0xf0] }
 0x436   :  { %4061 = vmatmul.bf16.gmra.mxu1 %v12913_v45  ;;  %4100 = vmatmul.bf16.gmra.mxu2 %v13002_v22  ;;  %v9877_v45 = vld [vmem:[#allocation2 + $0x30] sm:$0xf]  ;;  %v11993_v22 = vld [vmem:[#allocation8 + $0xa54] sm:$0xf] }
 0x437   :  { %14556 = vst [vmem:[#allocation34_spill] sm:$0xff] %v13753_v35  ;;  %5057 = vmatmul.bf16.gmra.mxu0 %v13758_v21  ;;  %v13773_v61 = vor.u32 %v11886_v16, %v9877_v45  ;;  %v10314_v60 = vor.u32 %v11993_v22, %v10311_v53 }
 0x438   :  { %5194 = vmatpush.bf16.msrb.mxu0 %v10334_v62 }
 0x439   :  { %v3935_v12 = vpop.f32.mrf.mxu2 }
 0x43a   :  { %v13763_v37 = vadd.f32 %v3935_v12, %v3897_v47  ;;  %v3820_v11 = vpop.f32.mrf.mxu3  ;;  %v11897_v12 = vld [vmem:[#allocation2 + $0x94] sm:$0xf] }
 0x43b   :  { %v3821_v1 = vadd.f32 %v3820_v11, %v13630_v3  ;;  %v3898_v19 = vpop.f32.mrf.mxu1  ;;  %v13788_v16 = vor.u32 %v11897_v12, %v9927_v5  ;;  %v11978_v12 = vld [vmem:[#allocation8 + $0x9dc] sm:$0xf] }
 0x43c   :  { %v3899_v52 = vadd.f32 %v3898_v19, %v13371_v57  ;;  %v4005_v38 = vpop.f32.mrf.mxu0  ;;  %5195 = vmatpush.bf16.msrb.mxu0 %v10314_v60  ;;  %v11988_v57 = vld [vmem:[#allocation8 + $0xa2c] sm:$0xf]  ;;  %v10271_v19 = vld [vmem:[#allocation8 + $0xa14] sm:$0xf0]  ;;  %v9889_v60 = vld [vmem:[#allocation2 + $0x48] sm:$0xf] }
 0x43d   :  { %v13768_v36 = vadd.f32 %v13667_v34, %v3821_v1  ;;  %v13771_v26 = vadd.f32 %v4005_v38, %v13455_v0  ;;  %v10294_v33 = vor.u32 %v11988_v57, %v10291_v17  ;;  %v9885_v0 = vld [vmem:[#allocation2 + $0x38] sm:$0xf]  ;;  %v11889_v38 = vld [vmem:[#allocation2 + $0x50] sm:$0xf0]  ;;  %v11900_v17 = vld [vmem:[#allocation2 + $0xac] sm:$0xf] }
 0x43e   :  { %v13780_v2 = vor.u32 %v11887_v44, %v9885_v0  ;;  %v11983_v1 = vld [vmem:[#allocation8 + $0xa04] sm:$0xf]  ;;  %v13803_v57 = vor.u32 %v11889_v38, %v9889_v60  ;;  %v9897_v0 = vld [vmem:[#allocation2 + $0x50] sm:$0xf]  ;;  %v11892_v38 = vld [vmem:[#allocation2 + $0x68] sm:$0xf0] }
 0x43f   :  { %14557 = vst [vmem:[#allocation49_spill] sm:$0xff] %v13768_v36  ;;  %5003 = vmatmul.bf16.vlgmr.msrb.gmra.mxu3 %v13773_v61  ;;  %v11941_v60 = vld [vmem:[#allocation8 + $0x8b0] sm:$0xf0]  ;;  %v14598_v36 = vld [vmem:[#allocation37_spill] sm:$0xff] }
 0x440   :  { %5196 = vmatpush.bf16.msrb.mxu0 %v10294_v33  ;;  %v11890_v33 = vld [vmem:[#allocation2 + $0x58] sm:$0xf0] }
 0x441   :  { %v3937_v3 = vpop.f32.mrf.mxu2 }
 0x442   :  { %v13776_v47 = vadd.f32 %v3937_v3, %v3899_v52  ;;  %v3823_v42 = vpop.f32.mrf.mxu3 }
 0x443   :  { %v3824_v34 = vadd.f32 %v3823_v42, %v13642_v24  ;;  %v3901_v32 = vpop.f32.mrf.mxu1  ;;  %v9939_v42 = vld [vmem:[#allocation2 + $0xb4] sm:$0xf0] }
 0x444   :  { %v3902_v29 = vadd.f32 %v3901_v32, %v13381_v55  ;;  %v4008_v10 = vpop.f32.mrf.mxu0  ;;  %v10274_v55 = vor.u32 %v11983_v1, %v10271_v19  ;;  %v10251_v1 = vld [vmem:[#allocation8 + $0x9ec] sm:$0xf0] }
 0x445   :  { %v13783_v62 = vadd.f32 %v13678_v14, %v3824_v34  ;;  %v13786_v11 = vadd.f32 %v4008_v10, %v13465_v30  ;;  %v13812_v10 = vor.u32 %v11890_v33, %v9897_v0 }
 0x446   :  { %5081 = vmatmul.bf16.vlgmr.msra.gmra.mxu1 %v13780_v2  ;;  %5120 = vmatmul.bf16.vlgmr.msra.gmra.mxu2 %v13773_v61 }
 0x447   :  { %14558 = vst [vmem:[#allocation36_spill] sm:$0xff] %v13783_v62  ;;  %5062 = vmatmul.bf16.gmra.mxu0 %v13788_v16 }
 0x448   :  { %5197 = vmatpush.bf16.msrb.mxu0 %v10274_v55 }
 0x449   :  { %v3940_v24 = vpop.f32.mrf.mxu2 }
 0x44a   :  { %v13793_v52 = vadd.f32 %v3940_v24, %v3902_v29  ;;  %v3825_v14 = vpop.f32.mrf.mxu3  ;;  %v10254_v24 = vor.u32 %v11978_v12, %v10251_v1 }
 0x44b   :  { %v3826_v30 = vadd.f32 %v3825_v14, %v13652_v27  ;;  %v3903_v45 = vpop.f32.mrf.mxu1 }
 0x44c   :  { %v3904_v22 = vadd.f32 %v3903_v45, %v13393_v39  ;;  %v4010_v53 = vpop.f32.mrf.mxu0  ;;  %5151 = vmatpush.bf16.msra.mxu3 %v10254_v24 }
 0x44d   :  { %v13798_v3 = vadd.f32 %v13692_v20, %v3826_v30  ;;  %v13801_v44 = vadd.f32 %v4010_v53, %v13476_v48  ;;  %v13809_v20 = vor.u32 %v11900_v17, %v9939_v42  ;;  %v10097_v53 = vld [vmem:[#allocation8 + $0x8a0] sm:$0xf] }
 0x44e   :  { %v10098_v33 = vor.u32 %v11941_v60, %v10097_v53  ;;  %v10211_v53 = vld [vmem:[#allocation8 + $0x99c] sm:$0xf0] }
 0x44f   :  { %14559 = vst [vmem:[#allocation50_spill] sm:$0xff] %v13798_v3  ;;  %5008 = vmatmul.bf16.gmra.mxu3 %v13803_v57  ;;  %v11951_v3 = vld [vmem:[#allocation8 + $0x900] sm:$0xf0] }
 0x450   :  { %5229 = vmatpush.bf16.msrb.mxu1 %v10098_v33 }
 0x451   :  { %v3942_v5 = vpop.f32.mrf.mxu2 }
 0x452   :  { %v13806_v27 = vadd.f32 %v3942_v5, %v3904_v22  ;;  %v3828_v34 = vpop.f32.mrf.mxu3  ;;  %v9901_v22 = vld [vmem:[#allocation2 + $0x60] sm:$0xf] }
 0x453   :  { %v3829_v39 = vadd.f32 %v3828_v34, %v13664_v59  ;;  %v3906_v32 = vpop.f32.mrf.mxu1  ;;  %v13833_v5 = vor.u32 %v11892_v38, %v9901_v22  ;;  %v11973_v34 = vld [vmem:[#allocation8 + $0x9b4] sm:$0xf]  ;;  %v10077_v38 = vld [vmem:[#allocation8 + $0x878] sm:$0xf] }
 0x454   :  { %v3907_v48 = vadd.f32 %v3906_v32, %v13403_v23  ;;  %v4013_v29 = vpop.f32.mrf.mxu0 }
 0x455   :  { %v13815_v19 = vadd.f32 %v13702_v58, %v3829_v39  ;;  %v13818_v55 = vadd.f32 %v4013_v29, %v13485_v46  ;;  %14562 = vst [vmem:[#allocation52_spill] sm:$0xff] %v13833_v5  ;;  %v10231_v39 = vld [vmem:[#allocation8 + $0x9c4] sm:$0xf0]  ;;  %v9909_v29 = vld [vmem:[#allocation2 + $0x68] sm:$0xf] }
 0x456   :  { %5086 = vmatmul.bf16.gmra.mxu1 %v13812_v10  ;;  %5125 = vmatmul.bf16.gmra.mxu2 %v13803_v57  ;;  %v10234_v32 = vor.u32 %v11973_v34, %v10231_v39  ;;  %v11895_v34 = vld [vmem:[#allocation2 + $0x80] sm:$0xf0] }
 0x457   :  { %14560 = vst [vmem:[#allocation38_spill] sm:$0xff] %v13815_v19  ;;  %5067 = vmatmul.bf16.gmra.mxu0 %v13809_v20  ;;  %v10137_v19 = vld [vmem:[#allocation8 + $0x8f0] sm:$0xf] }
 0x458   :  { %5152 = vmatpush.bf16.msra.mxu3 %v10234_v32 }
 0x459   :  { %v3945_v23 = vpop.f32.mrf.mxu2 }
 0x45a   :  { %v13823_v59 = vadd.f32 %v3945_v23, %v3907_v48  ;;  %v3830_v14 = vpop.f32.mrf.mxu3  ;;  %v14565_v23 = vld [vmem:[#allocation57_spill] sm:$0xff] }
 0x45b   :  { %v3831_v30 = vadd.f32 %v3830_v14, %v13674_v51  ;;  %v3908_v58 = vpop.f32.mrf.mxu1  ;;  %v11893_v51 = vld [vmem:[#allocation2 + $0x70] sm:$0xf0] }
 0x45c   :  { %v3909_v45 = vadd.f32 %v3908_v58, %v13415_v9  ;;  %v4015_v46 = vpop.f32.mrf.mxu0  ;;  %v13842_v24 = vor.u32 %v11893_v51, %v9909_v29  ;;  %v10257_v58 = vld [vmem:[#allocation8 + $0x9e0] sm:$0xf]  ;;  %v9913_v51 = vld [vmem:[#allocation2 + $0x78] sm:$0xf] }
 0x45d   :  { %v13828_v17 = vadd.f32 %v13716_v56, %v3831_v30  ;;  %v13831_v42 = vadd.f32 %v4015_v46, %v13496_v49  ;;  %v11936_v30 = vld [vmem:[#allocation8 + $0x888] sm:$0xf0] }
 0x45e   :  { %14564 = vst [vmem:[#allocation54_spill] sm:$0xff] %v13842_v24 }
 0x45f   :  { %14561 = vst [vmem:[#allocation51_spill] sm:$0xff] %v13828_v17  ;;  %5013 = vmatmul.bf16.gmra.mxu3 %v13833_v5 }
 0x461   :  { %v3947_v9 = vpop.f32.mrf.mxu2 }
 0x462   :  { %v13836_v0 = vadd.f32 %v3947_v9, %v3909_v45  ;;  %v3959_v48 = vpop.f32.mrf.mxu3  ;;  %v11981_v45 = vld [vmem:[#allocation8 + $0x9f0] sm:$0xf0] }
 0x463   :  { %v13839_v56 = vadd.f32 %v3959_v48, %v13688_v41  ;;  %v4037_v49 = vpop.f32.mrf.mxu1  ;;  %v10078_v41 = vor.u32 %v11936_v30, %v10077_v38  ;;  %v10258_v46 = vor.u32 %v11981_v45, %v10257_v58  ;;  %v10237_v48 = vld [vmem:[#allocation8 + $0x9b8] sm:$0xf]  ;;  %v11963_v38 = vld [vmem:[#allocation8 + $0x964] sm:$0xf]  ;;  %v13859_v45 = vor.u32 %v11895_v34, %v9913_v51  ;;  %v9921_v34 = vld [vmem:[#allocation2 + $0x80] sm:$0xf] }
 0x464   :  { %v4038_v12 = vadd.f32 %v4037_v49, %v13730_v4  ;;  %v4018_v1 = vpop.f32.mrf.mxu0  ;;  %v11968_v4 = vld [vmem:[#allocation8 + $0x98c] sm:$0xf]  ;;  %v10191_v30 = vld [vmem:[#allocation8 + $0x974] sm:$0xf0] }
 0x465   :  { %14563 = vst [vmem:[#allocation53_spill] sm:$0xff] %v13839_v56  ;;  %v13845_v14 = vadd.f32 %v4018_v1, %v14565_v23  ;;  %5230 = vmatpush.bf16.msrb.mxu1 %v10078_v41  ;;  %5268 = vmatpush.bf16.msrb.mxu2 %v10258_v46  ;;  %v10214_v39 = vor.u32 %v11968_v4, %v10211_v53  ;;  %v11976_v49 = vld [vmem:[#allocation8 + $0x9c8] sm:$0xf0]  ;;  %v14568_v58 = vld [vmem:[#allocation59_spill] sm:$0xff]  ;;  %v11971_v4 = vld [vmem:[#allocation8 + $0x9a0] sm:$0xf0] }
 0x466   :  { %5091 = vmatmul.bf16.gmra.mxu1 %v13842_v24  ;;  %5130 = vmatmul.bf16.gmra.mxu2 %v13833_v5  ;;  %v10238_v23 = vor.u32 %v11976_v49, %v10237_v48  ;;  %14569 = vst [vmem:[#allocation59_spill] sm:$0xff] %v13859_v45  ;;  %v10194_v46 = vor.u32 %v11963_v38, %v10191_v30  ;;  %v10171_v48 = vld [vmem:[#allocation8 + $0x94c] sm:$0xf0]  ;;  %v10037_v30 = vld [vmem:[#allocation8 + $0x828] sm:$0xf] }
 0x467   :  { %5198 = vmatmul.bf16.vlgmr.msrb.gmra.mxu0 %v13780_v2  ;;  %5153 = vmatpush.bf16.msra.mxu3 %v10214_v39  ;;  %v11896_v39 = vld [vmem:[#allocation2 + $0x88] sm:$0xf0] }
 0x468   :  { %v10065_v56 = vld [vmem:[#allocation8 + $0x858] sm:$0xf] }
 0x469   :  { %v4076_v22 = vpop.f32.mrf.mxu2  ;;  %5269 = vmatpush.bf16.msrb.mxu2 %v10238_v23 }
 0x46a   :  { %v13850_v60 = vadd.f32 %v4076_v22, %v4038_v12  ;;  %v3961_v33 = vpop.f32.mrf.mxu3  ;;  %v10057_v12 = vld [vmem:[#allocation8 + $0x850] sm:$0xf] }
 0x46b   :  { %v13853_v32 = vadd.f32 %v3961_v33, %v13698_v15  ;;  %v4039_v9 = vpop.f32.mrf.mxu1  ;;  %v11931_v15 = vld [vmem:[#allocation8 + $0x860] sm:$0xf0]  ;;  %v10217_v22 = vld [vmem:[#allocation8 + $0x990] sm:$0xf]  ;;  %5154 = vmatpush.bf16.msra.mxu3 %v10194_v46 }
 0x46c   :  { %14566 = vst [vmem:[#allocation57_spill] sm:$0xff] %v13850_v60  ;;  %v4040_v29 = vadd.f32 %v4039_v9, %v13745_v18  ;;  %v4020_v1 = vpop.f32.mrf.mxu0  ;;  %v10058_v53 = vor.u32 %v11931_v15, %v10057_v12  ;;  %v10218_v33 = vor.u32 %v11971_v4, %v10217_v22  ;;  %v11958_v9 = vld [vmem:[#allocation8 + $0x93c] sm:$0xf]  ;;  %v13868_v22 = vor.u32 %v11896_v39, %v9921_v34  ;;  %v11961_v34 = vld [vmem:[#allocation8 + $0x950] sm:$0xf0] }
 0x46d   :  { %14567 = vst [vmem:[#allocation65_spill] sm:$0xff] %v13853_v32  ;;  %v13857_v41 = vadd.f32 %v4020_v1, %v14568_v58  ;;  %v10174_v51 = vor.u32 %v11958_v9, %v10171_v48  ;;  %v11926_v12 = vld [vmem:[#allocation8 + $0x838] sm:$0xf0]  ;;  %v10197_v58 = vld [vmem:[#allocation8 + $0x968] sm:$0xf] }
 0x46e   :  { %5231 = vmatpush.bf16.msrb.mxu1 %v10058_v53  ;;  %5270 = vmatpush.bf16.msrb.mxu2 %v10218_v33  ;;  %v10038_v4 = vor.u32 %v11926_v12, %v10037_v30  ;;  %v11953_v53 = vld [vmem:[#allocation8 + $0x914] sm:$0xf]  ;;  %v10017_v48 = vld [vmem:[#allocation8 + $0x800] sm:$0xf] }
 0x46f   :  { %5018 = vmatmul.bf16.gmra.mxu3 %v13859_v45  ;;  %v10131_v30 = vld [vmem:[#allocation8 + $0x8fc] sm:$0xf0] }
 0x470   :  { %5155 = vmatpush.bf16.msra.mxu3 %v10174_v51 }
 0x471   :  { %v4078_v18 = vpop.f32.mrf.mxu2 }
 0x472   :  { %v13862_v49 = vadd.f32 %v4078_v18, %v4040_v29  ;;  %v3964_v1 = vpop.f32.mrf.mxu3  ;;  %v11966_v29 = vld [vmem:[#allocation8 + $0x978] sm:$0xf0]  ;;  %v10151_v18 = vld [vmem:[#allocation8 + $0x924] sm:$0xf0]  ;;  %5232 = vmatpush.bf16.msrb.mxu1 %v10038_v4  ;;  %v9997_v4 = vld [vmem:[#allocation8 + $0x7d8] sm:$0xf] }
 0x473   :  { %v13865_v38 = vadd.f32 %v3964_v1, %v13712_v54  ;;  %v4042_v23 = vpop.f32.mrf.mxu1  ;;  %v10198_v9 = vor.u32 %v11966_v29, %v10197_v58  ;;  %v10154_v54 = vor.u32 %v11953_v53, %v10151_v18  ;;  %v11921_v1 = vld [vmem:[#allocation8 + $0x810] sm:$0xf0]  ;;  %v11898_v29 = vld [vmem:[#allocation2 + $0x98] sm:$0xf0] }
 0x474   :  { %14570 = vst [vmem:[#allocation66_spill] sm:$0xff] %v13862_v49  ;;  %v4043_v46 = vadd.f32 %v4042_v23, %v13756_v13  ;;  %v4023_v15 = vpop.f32.mrf.mxu0  ;;  %v14572_v49 = vld [vmem:[#allocation61_spill] sm:$0xff]  ;;  %v10018_v39 = vor.u32 %v11921_v1, %v10017_v48  ;;  %v11916_v48 = vld [vmem:[#allocation8 + $0x7e8] sm:$0xf0]  ;;  %v10157_v1 = vld [vmem:[#allocation8 + $0x918] sm:$0xf] }
 0x475   :  { %14571 = vst [vmem:[#allocation67_spill] sm:$0xff] %v13865_v38  ;;  %v13871_v33 = vadd.f32 %v4023_v15, %v14572_v49  ;;  %v10177_v13 = vld [vmem:[#allocation8 + $0x940] sm:$0xf]  ;;  %5271 = vmatpush.bf16.msrb.mxu2 %v10198_v9  ;;  %5156 = vmatpush.bf16.msra.mxu3 %v10154_v54  ;;  %v11948_v49 = vld [vmem:[#allocation8 + $0x8ec] sm:$0xf] }
 0x476   :  { %5096 = vmatmul.bf16.gmra.mxu1 %v13868_v22  ;;  %5135 = vmatmul.bf16.gmra.mxu2 %v13859_v45  ;;  %v10178_v51 = vor.u32 %v11961_v34, %v10177_v13  ;;  %v9925_v15 = vld [vmem:[#allocation2 + $0x90] sm:$0xf]  ;;  %v10134_v53 = vor.u32 %v11948_v49, %v10131_v30  ;;  %v9998_v13 = vor.u32 %v11916_v48, %v9997_v4  ;;  %v11943_v34 = vld [vmem:[#allocation8 + $0x8c4] sm:$0xf] }
 0x477   :  { %5203 = vmatmul.bf16.gmra.mxu0 %v13812_v10  ;;  %5233 = vmatpush.bf16.msrb.mxu1 %v10018_v39  ;;  %v13885_v49 = vor.u32 %v11898_v29, %v9925_v15  ;;  %v9977_v39 = vld [vmem:[#allocation8 + $0x7b0] sm:$0xf]  ;;  %v9933_v15 = vld [vmem:[#allocation2 + $0x98] sm:$0xf] }
 0x479   :  { %v4081_v23 = vpop.f32.mrf.mxu2  ;;  %5272 = vmatpush.bf16.msrb.mxu2 %v10178_v51  ;;  %5157 = vmatpush.bf16.msra.mxu3 %v10134_v53  ;;  %v11899_v53 = vld [vmem:[#allocation2 + $0xa0] sm:$0xf0] }
 0x47a   :  { %v13876_v12 = vadd.f32 %v4081_v23, %v4043_v46  ;;  %v3966_v58 = vpop.f32.mrf.mxu3  ;;  %v11956_v46 = vld [vmem:[#allocation8 + $0x928] sm:$0xf0]  ;;  %v10111_v23 = vld [vmem:[#allocation8 + $0x8d4] sm:$0xf0] }
 0x47b   :  { %v13879_v18 = vadd.f32 %v3966_v58, %v13722_v28  ;;  %v4044_v60 = vpop.f32.mrf.mxu1  ;;  %v10158_v28 = vor.u32 %v11956_v46, %v10157_v1  ;;  %v10114_v30 = vor.u32 %v11943_v34, %v10111_v23  ;;  %v11911_v58 = vld [vmem:[#allocation8 + $0x7c0] sm:$0xf0]  ;;  %5234 = vmatpush.bf16.msrb.mxu1 %v9998_v13  ;;  %v9957_v1 = vld [vmem:[#allocation8 + $0x788] sm:$0xf]  ;;  %v13896_v23 = vor.u32 %v11899_v53, %v9933_v15 }
 0x47c   :  { %14573 = vst [vmem:[#allocation61_spill] sm:$0xff] %v13876_v12  ;;  %v4045_v9 = vadd.f32 %v4044_v60, %v13771_v26  ;;  %v4025_v54 = vpop.f32.mrf.mxu0  ;;  %v14575_v12 = vld [vmem:[#allocation63_spill] sm:$0xff]  ;;  %v9978_v26 = vor.u32 %v11911_v58, %v9977_v39  ;;  %v10138_v60 = vor.u32 %v11951_v3, %v10137_v19  ;;  %v10117_v46 = vld [vmem:[#allocation8 + $0x8c8] sm:$0xf]  ;;  %v11946_v19 = vld [vmem:[#allocation8 + $0x8d8] sm:$0xf0] }
 0x47d   :  { %14574 = vst [vmem:[#allocation68_spill] sm:$0xff] %v13879_v18  ;;  %v13883_v17 = vadd.f32 %v4025_v54, %v14575_v12  ;;  %5273 = vmatpush.bf16.msrb.mxu2 %v10158_v28  ;;  %5158 = vmatpush.bf16.msra.mxu3 %v10114_v30  ;;  %v11906_v54 = vld [vmem:[#allocation8 + $0x798] sm:$0xf0]  ;;  %v11901_v28 = vld [vmem:[#allocation2 + $0xb0] sm:$0xf0] }
 0x47e   :  { %14576 = vst [vmem:[#allocation63_spill] sm:$0xff] %v13885_v49  ;;  %v9958_v3 = vor.u32 %v11906_v54, %v9957_v1  ;;  %v10099_v39 = vld [vmem:[#allocation8 + $0x8b4] sm:$0xf0]  ;;  %v11934_v1 = vld [vmem:[#allocation8 + $0x87c] sm:$0xf] }
 0x47f   :  { %5023 = vmatmul.bf16.gmra.mxu3 %v13885_v49  ;;  %5235 = vmatpush.bf16.msrb.mxu1 %v9978_v26  ;;  %v10079_v54 = vld [vmem:[#allocation8 + $0x88c] sm:$0xf0]  ;;  %v11942_v18 = vld [vmem:[#allocation8 + $0x8b8] sm:$0xf0] }
 0x481   :  { %v4083_v51 = vpop.f32.mrf.mxu2  ;;  %5274 = vmatpush.bf16.msrb.mxu2 %v10138_v60 }
 0x482   :  { %v13888_v4 = vadd.f32 %v4083_v51, %v4045_v9  ;;  %v3969_v12 = vpop.f32.mrf.mxu3  ;;  %v10118_v9 = vor.u32 %v11946_v19, %v10117_v46  ;;  %v10082_v46 = vor.u32 %v11934_v1, %v10079_v54  ;;  %v10039_v1 = vld [vmem:[#allocation8 + $0x83c] sm:$0xf0] }
 0x483   :  { %v13891_v29 = vadd.f32 %v3969_v12, %v13737_v63  ;;  %v4047_v48 = vpop.f32.mrf.mxu1  ;;  %5236 = vmatpush.bf16.msrb.mxu1 %v9958_v3  ;;  %v9937_v63 = vld [vmem:[#allocation2 + $0xa8] sm:$0xf]  ;;  %v11902_v3 = vld [vmem:[#allocation2 + $0xb8] sm:$0xf0] }
 0x484   :  { %14577 = vst [vmem:[#allocation69_spill] sm:$0xff] %v13888_v4  ;;  %v4048_v13 = vadd.f32 %v4047_v48, %v13786_v11  ;;  %v13894_v34 = vpop.f32.mrf.mxu0  ;;  %v11939_v11 = vld [vmem:[#allocation8 + $0x8a4] sm:$0xf]  ;;  %v13906_v12 = vor.u32 %v11901_v28, %v9937_v63  ;;  %v12006_v4 = vld [vmem:[#allocation8 + $0xab8] sm:$0xf0] }
 0x485   :  { %14578 = vst [vmem:[#allocation70_spill] sm:$0xff] %v13891_v29  ;;  %5275 = vmatpush.bf16.msrb.mxu2 %v10118_v9  ;;  %v10102_v60 = vor.u32 %v11939_v11, %v10099_v39  ;;  %v11929_v9 = vld [vmem:[#allocation8 + $0x854] sm:$0xf] }
 0x486   :  { %5101 = vmatmul.bf16.gmra.mxu1 %v13896_v23  ;;  %5140 = vmatmul.bf16.gmra.mxu2 %v13885_v49  ;;  %14581 = vst [vmem:[#allocation73_spill] sm:$0xff] %v13906_v12 }
 0x487   :  { %5208 = vmatmul.bf16.gmra.mxu0 %v13842_v24 }
 0x488   :  { %5346 = vmatpush.bf16.msra.mxu0 %v10102_v60 }
 0x489   :  { %v4086_v30 = vpop.f32.mrf.mxu2 }
 0x48a   :  { %v13901_v58 = vadd.f32 %v4086_v30, %v4048_v13  ;;  %v3971_v26 = vpop.f32.mrf.mxu3  ;;  %v9945_v13 = vld [vmem:[#allocation2 + $0xb0] sm:$0xf] }
 0x48b   :  { %v13904_v51 = vadd.f32 %v3971_v26, %v13748_v31  ;;  %v4049_v53 = vpop.f32.mrf.mxu1  ;;  %v10059_v31 = vld [vmem:[#allocation8 + $0x864] sm:$0xf0]  ;;  %v13914_v28 = vor.u32 %v11902_v3, %v9945_v13 }
 0x48c   :  { %14579 = vst [vmem:[#allocation71_spill] sm:$0xff] %v13901_v58  ;;  %v4050_v15 = vadd.f32 %v4049_v53, %v13801_v44  ;;  %v13909_v48 = vpop.f32.mrf.mxu0  ;;  %5347 = vmatpush.bf16.msra.mxu0 %v10082_v46  ;;  %v10062_v44 = vor.u32 %v11929_v9, %v10059_v31  ;;  %v11924_v53 = vld [vmem:[#allocation8 + $0x82c] sm:$0xf]  ;;  %v11919_v46 = vld [vmem:[#allocation8 + $0x804] sm:$0xf] }
 0x48d   :  { %14580 = vst [vmem:[#allocation72_spill] sm:$0xff] %v13904_v51  ;;  %v10042_v54 = vor.u32 %v11924_v53, %v10039_v1  ;;  %v10399_v58 = vld [vmem:[#allocation8 + $0xb0c] sm:$0xf0]  ;;  %v10145_v51 = vld [vmem:[#allocation8 + $0x8f8] sm:$0xf] }
 0x48f   :  { %5028 = vmatmul.bf16.gmra.mxu3 %v13906_v12 }
 0x490   :  { %5348 = vmatpush.bf16.msra.mxu0 %v10062_v44  ;;  %v11914_v44 = vld [vmem:[#allocation8 + $0x7dc] sm:$0xf] }
 0x491   :  { %v4088_v19 = vpop.f32.mrf.mxu2 }
 0x492   :  { %v13912_v30 = vadd.f32 %v4088_v19, %v4050_v15  ;;  %v3974_v63 = vpop.f32.mrf.mxu3 }
 0x493   :  { %v13917_v11 = vadd.f32 %v3974_v63, %v13763_v37  ;;  %v4052_v39 = vpop.f32.mrf.mxu1  ;;  %v10019_v37 = vld [vmem:[#allocation8 + $0x814] sm:$0xf0] }
 0x494   :  { %14582 = vst [vmem:[#allocation74_spill] sm:$0xff] %v13912_v30  ;;  %v4053_v26 = vadd.f32 %v4052_v39, %v13818_v55  ;;  %v13920_v60 = vpop.f32.mrf.mxu0  ;;  %5349 = vmatpush.bf16.msra.mxu0 %v10042_v54  ;;  %v10022_v55 = vor.u32 %v11919_v46, %v10019_v37  ;;  %v9999_v39 = vld [vmem:[#allocation8 + $0x7ec] sm:$0xf0]  ;;  %v9979_v54 = vld [vmem:[#allocation8 + $0x7c4] sm:$0xf0] }
 0x495   :  { %14583 = vst [vmem:[#allocation75_spill] sm:$0xff] %v13917_v11  ;;  %v10002_v53 = vor.u32 %v11914_v44, %v9999_v39  ;;  %v9959_v44 = vld [vmem:[#allocation8 + $0x79c] sm:$0xf0] }
 0x496   :  { %5106 = vmatmul.bf16.gmra.mxu1 %v13914_v28  ;;  %5145 = vmatmul.bf16.gmra.mxu2 %v13906_v12 }
 0x497   :  { %5213 = vmatmul.bf16.gmra.mxu0 %v13868_v22 }
 0x498   :  { %5350 = vmatpush.bf16.msra.mxu0 %v10022_v55 }
 0x499   :  { %v4091_v15 = vpop.f32.mrf.mxu2 }
 0x49a   :  { %v13925_v13 = vadd.f32 %v4091_v15, %v4053_v26  ;;  %v3976_v3 = vpop.f32.mrf.mxu3  ;;  %v11909_v26 = vld [vmem:[#allocation8 + $0x7b4] sm:$0xf] }
 0x49b   :  { %v13928_v19 = vadd.f32 %v3976_v3, %v13776_v47  ;;  %v4054_v9 = vpop.f32.mrf.mxu1  ;;  %v9982_v47 = vor.u32 %v11909_v26, %v9979_v54 }
 0x49c   :  { %14584 = vst [vmem:[#allocation76_spill] sm:$0xff] %v13925_v13  ;;  %v4055_v31 = vadd.f32 %v4054_v9, %v13831_v42  ;;  %v13931_v63 = vpop.f32.mrf.mxu0  ;;  %5351 = vmatpush.bf16.msra.mxu0 %v10002_v53  ;;  %v11904_v9 = vld [vmem:[#allocation8 + $0x78c] sm:$0xf] }
 0x49d   :  { %14585 = vst [vmem:[#allocation77_spill] sm:$0xff] %v13928_v19  ;;  %v9962_v39 = vor.u32 %v11904_v9, %v9959_v44 }
 0x49f   :  { %5159 = vmatmul.bf16.vlgmr.msra.gmra.mxu3 %v13683_v25 }
 0x4a0   :  { %5352 = vmatpush.bf16.msra.mxu0 %v9982_v47 }
 0x4a1   :  { %v4093_v1 = vpop.f32.mrf.mxu2 }
 0x4a2   :  { %v13934_v15 = vadd.f32 %v4093_v1, %v4055_v31  ;;  %v3979_v46 = vpop.f32.mrf.mxu3 }
 0x4a3   :  { %v13937_v37 = vadd.f32 %v3979_v46, %v13793_v52  ;;  %v4057_v42 = vpop.f32.mrf.mxu1 }
 0x4a4   :  { %14586 = vst [vmem:[#allocation78_spill] sm:$0xff] %v13934_v15  ;;  %v4058_v3 = vadd.f32 %v4057_v42, %v13845_v14  ;;  %v13940_v55 = vpop.f32.mrf.mxu0  ;;  %5353 = vmatpush.bf16.msra.mxu0 %v9962_v39 }
 0x4a5   :  { %14587 = vst [vmem:[#allocation79_spill] sm:$0xff] %v13937_v37 }
 0x4a6   :  { %5237 = vmatmul.bf16.vlgmr.msrb.gmra.mxu1 %v13773_v61  ;;  %5276 = vmatmul.bf16.vlgmr.msrb.gmra.mxu2 %v13683_v25 }
 0x4a7   :  { %5218 = vmatmul.bf16.gmra.mxu0 %v13896_v23 }
 0x4a9   :  { %v4096_v31 = vpop.f32.mrf.mxu2 }
 0x4aa   :  { %v13945_v53 = vadd.f32 %v4096_v31, %v4058_v3  ;;  %v3981_v52 = vpop.f32.mrf.mxu3 }
 0x4ab   :  { %v13948_v1 = vadd.f32 %v3981_v52, %v13806_v27  ;;  %v4059_v14 = vpop.f32.mrf.mxu1 }
 0x4ac   :  { %14588 = vst [vmem:[#allocation80_spill] sm:$0xff] %v13945_v53  ;;  %v4060_v26 = vadd.f32 %v4059_v14, %v13857_v41  ;;  %v13951_v54 = vpop.f32.mrf.mxu0  ;;  %v10417_v14 = vld [vmem:[#allocation8 + $0xb20] sm:$0xf]  ;;  %v10397_v53 = vld [vmem:[#allocation8 + $0xaf8] sm:$0xf] }
 0x4ad   :  { %14589 = vst [vmem:[#allocation81_spill] sm:$0xff] %v13948_v1 }
 0x4af   :  { %5164 = vmatmul.bf16.gmra.mxu3 %v13707_v7 }
 0x4b1   :  { %v4098_v46 = vpop.f32.mrf.mxu2 }
 0x4b2   :  { %v13954_v47 = vadd.f32 %v4098_v46, %v4060_v26  ;;  %v3984_v42 = vpop.f32.mrf.mxu3  ;;  %v12021_v26 = vld [vmem:[#allocation8 + $0xb30] sm:$0xf0] }
 0x4b3   :  { %v13957_v9 = vadd.f32 %v3984_v42, %v13823_v59  ;;  %v4062_v3 = vpop.f32.mrf.mxu1  ;;  %v10418_v42 = vor.u32 %v12021_v26, %v10417_v14  ;;  %v14595_v14 = vld [vmem:[#allocation55_spill] sm:$0xff] }
 0x4b4   :  { %14590 = vst [vmem:[#allocation82_spill] sm:$0xff] %v13954_v47  ;;  %v4063_v44 = vadd.f32 %v4062_v3, %v13871_v33  ;;  %v13960_v39 = vpop.f32.mrf.mxu0 }
 0x4b5   :  { %14591 = vst [vmem:[#allocation83_spill] sm:$0xff] %v13957_v9  ;;  %5307 = vmatpush.bf16.msrb.mxu3 %v10418_v42  ;;  %v14596_v9 = vld [vmem:[#allocation22_spill] sm:$0xff] }
 0x4b6   :  { %5242 = vmatmul.bf16.gmra.mxu1 %v13803_v57  ;;  %5281 = vmatmul.bf16.gmra.mxu2 %v13707_v7 }
 0x4b7   :  { %5223 = vmatmul.bf16.gmra.mxu0 %v13914_v28 }
 0x4b9   :  { %v4101_v27 = vpop.f32.mrf.mxu2 }
 0x4ba   :  { %v13965_v41 = vadd.f32 %v4101_v27, %v4063_v44  ;;  %v3986_v31 = vpop.f32.mrf.mxu3 }
 0x4bb   :  { %v13968_v52 = vadd.f32 %v3986_v31, %v13836_v0  ;;  %v4064_v59 = vpop.f32.mrf.mxu1  ;;  %v11979_v0 = vld [vmem:[#allocation8 + $0x9e4] sm:$0xf]  ;;  %v10259_v31 = vld [vmem:[#allocation8 + $0x9f4] sm:$0xf0] }
 0x4bc   :  { %14592 = vst [vmem:[#allocation84_spill] sm:$0xff] %v13965_v41  ;;  %v4065_v33 = vadd.f32 %v4064_v59, %v13883_v17  ;;  %v13971_v46 = vpop.f32.mrf.mxu0  ;;  %v10262_v13 = vor.u32 %v11979_v0, %v10259_v31  ;;  %v12016_v17 = vld [vmem:[#allocation8 + $0xb08] sm:$0xf0]  ;;  %v12011_v0 = vld [vmem:[#allocation8 + $0xae0] sm:$0xf0] }
 0x4bd   :  { %14593 = vst [vmem:[#allocation85_spill] sm:$0xff] %v13968_v52  ;;  %v10398_v30 = vor.u32 %v12016_v17, %v10397_v53  ;;  %v11974_v17 = vld [vmem:[#allocation8 + $0x9bc] sm:$0xf] }
 0x4be   :  { %5385 = vmatpush.bf16.msra.mxu1 %v10262_v13  ;;  %v12014_v13 = vld [vmem:[#allocation8 + $0xafc] sm:$0xf] }
 0x4bf   :  { %5169 = vmatmul.bf16.gmra.mxu3 %v13732_v6 }
 0x4c0   :  { %5308 = vmatpush.bf16.msrb.mxu3 %v10398_v30 }
 0x4c1   :  { %v4103_v3 = vpop.f32.mrf.mxu2 }
 0x4c2   :  { %v13974_v47 = vadd.f32 %v4103_v3, %v4065_v33  ;;  %v5004_v44 = vpop.f32.mrf.mxu3  ;;  %v10419_v33 = vld [vmem:[#allocation8 + $0xb34] sm:$0xf0] }
 0x4c3   :  { %v5044_v27 = vadd.f32 %v13894_v34, %v5004_v44  ;;  %v5082_v41 = vpop.f32.mrf.mxu1  ;;  %v12019_v34 = vld [vmem:[#allocation8 + $0xb24] sm:$0xf]  ;;  %v10377_v44 = vld [vmem:[#allocation8 + $0xad0] sm:$0xf] }
 0x4c4   :  { %14594 = vst [vmem:[#allocation86_spill] sm:$0xff] %v13974_v47  ;;  %v13977_v15 = vpop.f32.mrf.mxu0  ;;  %v10422_v42 = vor.u32 %v12019_v34, %v10419_v33  ;;  %v10378_v53 = vor.u32 %v12011_v0, %v10377_v44  ;;  %v10402_v34 = vor.u32 %v12014_v13, %v10399_v58  ;;  %v10357_v33 = vld [vmem:[#allocation8 + $0xaa8] sm:$0xf]  ;;  %v12009_v0 = vld [vmem:[#allocation8 + $0xad4] sm:$0xf] }
 0x4c5   :  { %v5083_v59 = vadd.f32 %v5082_v41, %v5044_v27  ;;  %v10358_v52 = vor.u32 %v12006_v4, %v10357_v33  ;;  %v10219_v44 = vld [vmem:[#allocation8 + $0x9a4] sm:$0xf0]  ;;  %v10337_v58 = vld [vmem:[#allocation8 + $0xa80] sm:$0xf]  ;;  %v11964_v13 = vld [vmem:[#allocation8 + $0x96c] sm:$0xf] }
 0x4c6   :  { %5247 = vmatmul.bf16.gmra.mxu1 %v13833_v5  ;;  %5286 = vmatmul.bf16.gmra.mxu2 %v13732_v6  ;;  %v12004_v33 = vld [vmem:[#allocation8 + $0xaac] sm:$0xf] }
 0x4c7   :  { %v13982_v26 = vadd.f32 %v5083_v59, %v14595_v14  ;;  %5354 = vmatmul.bf16.vlgmr.msra.gmra.mxu0 %v13773_v61  ;;  %5424 = vmatpush.bf16.msra.mxu2 %v10422_v42  ;;  %v10239_v59 = vld [vmem:[#allocation8 + $0x9cc] sm:$0xf0] }
 0x4c8   :  { %v10242_v47 = vor.u32 %v11974_v17, %v10239_v59  ;;  %5309 = vmatpush.bf16.msrb.mxu3 %v10378_v53  ;;  %v10379_v53 = vld [vmem:[#allocation8 + $0xae4] sm:$0xf0] }
 0x4c9   :  { %v13985_v3 = vpop.f32.mrf.mxu2 }
 0x4ca   :  { %v5006_v41 = vpop.f32.mrf.mxu3  ;;  %5386 = vmatpush.bf16.msra.mxu1 %v10242_v47 }
 0x4cb   :  { %v5046_v27 = vadd.f32 %v13909_v48, %v5006_v41  ;;  %v5084_v31 = vpop.f32.mrf.mxu1  ;;  %5425 = vmatpush.bf16.msra.mxu2 %v10402_v34  ;;  %v11969_v48 = vld [vmem:[#allocation8 + $0x994] sm:$0xf] }
 0x4cc   :  { %v13988_v14 = vpop.f32.mrf.mxu0  ;;  %5310 = vmatpush.bf16.msrb.mxu3 %v10358_v52  ;;  %v10222_v41 = vor.u32 %v11969_v48, %v10219_v44  ;;  %v10359_v48 = vld [vmem:[#allocation8 + $0xabc] sm:$0xf0] }
 0x4cd   :  { %v5085_v30 = vadd.f32 %v5084_v31, %v5046_v27  ;;  %v10382_v27 = vor.u32 %v12009_v0, %v10379_v53  ;;  %v12001_v31 = vld [vmem:[#allocation8 + $0xa90] sm:$0xf0]  ;;  %v10362_v1 = vor.u32 %v12004_v33, %v10359_v48  ;;  %v10317_v0 = vld [vmem:[#allocation8 + $0xa58] sm:$0xf]  ;;  %v11996_v53 = vld [vmem:[#allocation8 + $0xa68] sm:$0xf0] }
 0x4ce   :  { %5387 = vmatpush.bf16.msra.mxu1 %v10222_v41  ;;  %v10338_v4 = vor.u32 %v12001_v31, %v10337_v58  ;;  %v10318_v41 = vor.u32 %v11996_v53, %v10317_v0  ;;  %v10179_v31 = vld [vmem:[#allocation8 + $0x954] sm:$0xf0]  ;;  %v11991_v33 = vld [vmem:[#allocation8 + $0xa40] sm:$0xf0] }
 0x4cf   :  { %v13991_v42 = vadd.f32 %v5085_v30, %v14596_v9  ;;  %5174 = vmatmul.bf16.gmra.mxu3 %v13758_v21  ;;  %5426 = vmatpush.bf16.msra.mxu2 %v10382_v27  ;;  %v10199_v30 = vld [vmem:[#allocation8 + $0x97c] sm:$0xf0]  ;;  %v11959_v27 = vld [vmem:[#allocation8 + $0x944] sm:$0xf] }
 0x4d0   :  { %5311 = vmatpush.bf16.msrb.mxu3 %v10338_v4  ;;  %v10202_v52 = vor.u32 %v11964_v13, %v10199_v30  ;;  %v10182_v4 = vor.u32 %v11959_v27, %v10179_v31  ;;  %v10297_v30 = vld [vmem:[#allocation8 + $0xa30] sm:$0xf] }
 0x4d1   :  { %v13994_v17 = vpop.f32.mrf.mxu2  ;;  %v10298_v0 = vor.u32 %v11991_v33, %v10297_v30  ;;  %v10319_v27 = vld [vmem:[#allocation8 + $0xa6c] sm:$0xf0]  ;;  %v11989_v33 = vld [vmem:[#allocation8 + $0xa34] sm:$0xf] }
 0x4d2   :  { %v5009_v59 = vpop.f32.mrf.mxu3  ;;  %5388 = vmatpush.bf16.msra.mxu1 %v10202_v52  ;;  %v10159_v52 = vld [vmem:[#allocation8 + $0x92c] sm:$0xf0] }
 0x4d3   :  { %v5049_v47 = vadd.f32 %v13920_v60, %v5009_v59  ;;  %v5087_v9 = vpop.f32.mrf.mxu1  ;;  %v14597_v60 = vld [vmem:[#allocation35_spill] sm:$0xff]  ;;  %v11999_v59 = vld [vmem:[#allocation8 + $0xa84] sm:$0xf]  ;;  %5427 = vmatpush.bf16.msra.mxu2 %v10362_v1 }
 0x4d4   :  { %v13997_v34 = vpop.f32.mrf.mxu0  ;;  %5312 = vmatpush.bf16.msrb.mxu3 %v10318_v41  ;;  %v11994_v41 = vld [vmem:[#allocation8 + $0xa5c] sm:$0xf] }
 0x4d5   :  { %v5088_v44 = vadd.f32 %v5087_v9, %v5049_v47  ;;  %v10339_v47 = vld [vmem:[#allocation8 + $0xa94] sm:$0xf0]  ;;  %v10322_v62 = vor.u32 %v11994_v41, %v10319_v27  ;;  %v10119_v41 = vld [vmem:[#allocation8 + $0x8dc] sm:$0xf0] }
 0x4d6   :  { %5252 = vmatmul.bf16.gmra.mxu1 %v13859_v45  ;;  %5291 = vmatmul.bf16.gmra.mxu2 %v13758_v21  ;;  %v10342_v13 = vor.u32 %v11999_v59, %v10339_v47  ;;  %v10277_v59 = vld [vmem:[#allocation8 + $0xa08] sm:$0xf]  ;;  %v11986_v47 = vld [vmem:[#allocation8 + $0xa18] sm:$0xf0] }
 0x4d7   :  { %v14002_v58 = vadd.f32 %v5088_v44, %v14597_v60  ;;  %5359 = vmatmul.bf16.gmra.mxu0 %v13803_v57  ;;  %5389 = vmatpush.bf16.msra.mxu1 %v10182_v4  ;;  %v11954_v60 = vld [vmem:[#allocation8 + $0x91c] sm:$0xf]  ;;  %v10278_v19 = vor.u32 %v11986_v47, %v10277_v59  ;;  %v10139_v4 = vld [vmem:[#allocation8 + $0x904] sm:$0xf0]  ;;  %v10279_v59 = vld [vmem:[#allocation8 + $0xa1c] sm:$0xf0] }
 0x4d8   :  { %5428 = vmatpush.bf16.msra.mxu2 %v10342_v13  ;;  %5313 = vmatpush.bf16.msrb.mxu3 %v10298_v0  ;;  %v10162_v1 = vor.u32 %v11954_v60, %v10159_v52  ;;  %v14599_v47 = vld [vmem:[#allocation23_spill] sm:$0xff] }
 0x4d9   :  { %v14005_v9 = vpop.f32.mrf.mxu2 }
 0x4da   :  { %v5011_v48 = vpop.f32.mrf.mxu3 }
 0x4db   :  { %v5051_v44 = vadd.f32 %v13931_v63, %v5011_v48  ;;  %v5089_v53 = vpop.f32.mrf.mxu1  ;;  %5390 = vmatpush.bf16.msra.mxu1 %v10162_v1  ;;  %v11949_v63 = vld [vmem:[#allocation8 + $0x8f4] sm:$0xf]  ;;  %v10299_v48 = vld [vmem:[#allocation8 + $0xa44] sm:$0xf0] }
 0x4dc   :  { %v14008_v37 = vpop.f32.mrf.mxu0  ;;  %5429 = vmatpush.bf16.msra.mxu2 %v10322_v62  ;;  %5314 = vmatpush.bf16.msrb.mxu3 %v10278_v19  ;;  %v10142_v13 = vor.u32 %v11949_v63, %v10139_v4  ;;  %v10265_v4 = vld [vmem:[#allocation8 + $0x9e8] sm:$0xf] }
 0x4dd   :  { %v5090_v31 = vadd.f32 %v5089_v53, %v5051_v44  ;;  %v10302_v44 = vor.u32 %v11989_v33, %v10299_v48  ;;  %v11982_v33 = vld [vmem:[#allocation8 + $0x9f8] sm:$0xf0] }
 0x4de   :  { %v10266_v48 = vor.u32 %v11982_v33, %v10265_v4 }
 0x4df   :  { %v14011_v30 = vadd.f32 %v5090_v31, %v14598_v36  ;;  %5179 = vmatmul.bf16.gmra.mxu3 %v13788_v16  ;;  %5391 = vmatpush.bf16.msra.mxu1 %v10142_v13  ;;  %v11944_v36 = vld [vmem:[#allocation8 + $0x8cc] sm:$0xf] }
 0x4e0   :  { %5430 = vmatpush.bf16.msra.mxu2 %v10302_v44  ;;  %v10122_v1 = vor.u32 %v11944_v36, %v10119_v41  ;;  %v11984_v31 = vld [vmem:[#allocation8 + $0xa0c] sm:$0xf]  ;;  %5502 = vmatpush.bf16.msrb.mxu0 %v10266_v48  ;;  %v10245_v36 = vld [vmem:[#allocation8 + $0x9c0] sm:$0xf]  ;;  %v11977_v41 = vld [vmem:[#allocation8 + $0x9d0] sm:$0xf0] }
 0x4e1   :  { %v14014_v0 = vpop.f32.mrf.mxu2  ;;  %v10282_v19 = vor.u32 %v11984_v31, %v10279_v59  ;;  %v10246_v31 = vor.u32 %v11977_v41, %v10245_v36  ;;  %v14600_v59 = vld [vmem:[#allocation24_spill] sm:$0xff]  ;;  %v11967_v36 = vld [vmem:[#allocation8 + $0x980] sm:$0xf0] }
 0x4e2   :  { %v5014_v53 = vpop.f32.mrf.mxu3  ;;  %v14601_v41 = vld [vmem:[#allocation56_spill] sm:$0xff] }
 0x4e3   :  { %v5054_v60 = vadd.f32 %v13940_v55, %v5014_v53  ;;  %v5092_v52 = vpop.f32.mrf.mxu1  ;;  %5392 = vmatpush.bf16.msra.mxu1 %v10122_v1 }
 0x4e4   :  { %v14017_v27 = vpop.f32.mrf.mxu0  ;;  %5431 = vmatpush.bf16.msra.mxu2 %v10282_v19  ;;  %5503 = vmatpush.bf16.msrb.mxu0 %v10246_v31  ;;  %v10225_v19 = vld [vmem:[#allocation8 + $0x998] sm:$0xf] }
 0x4e5   :  { %v5093_v62 = vadd.f32 %v5092_v52, %v5054_v60 }
 0x4e6   :  { %5257 = vmatmul.bf16.gmra.mxu1 %v13885_v49  ;;  %5296 = vmatmul.bf16.gmra.mxu2 %v13788_v16 }
 0x4e7   :  { %v14022_v63 = vadd.f32 %v5093_v62, %v14599_v47  ;;  %5364 = vmatmul.bf16.gmra.mxu0 %v13833_v5  ;;  %v11972_v47 = vld [vmem:[#allocation8 + $0x9a8] sm:$0xf0]  ;;  %v10405_v5 = vld [vmem:[#allocation8 + $0xb00] sm:$0xf] }
 0x4e9   :  { %v14025_v55 = vpop.f32.mrf.mxu2 }
 0x4ea   :  { %v5016_v13 = vpop.f32.mrf.mxu3 }
 0x4eb   :  { %v5056_v44 = vadd.f32 %v13951_v54, %v5016_v13  ;;  %v5094_v53 = vpop.f32.mrf.mxu1  ;;  %v10226_v54 = vor.u32 %v11972_v47, %v10225_v19  ;;  %v11962_v19 = vld [vmem:[#allocation8 + $0x958] sm:$0xf0] }
 0x4ec   :  { %v14028_v60 = vpop.f32.mrf.mxu0 }
 0x4ed   :  { %v5095_v52 = vadd.f32 %v5094_v53, %v5056_v44  ;;  %5504 = vmatpush.bf16.msrb.mxu0 %v10226_v54  ;;  %v10205_v53 = vld [vmem:[#allocation8 + $0x970] sm:$0xf] }
 0x4ef   :  { %v14031_v62 = vadd.f32 %v5095_v52, %v14600_v59  ;;  %5184 = vmatmul.bf16.gmra.mxu3 %v13809_v20  ;;  %v10206_v52 = vor.u32 %v11967_v36, %v10205_v53  ;;  %v10165_v53 = vld [vmem:[#allocation8 + $0x920] sm:$0xf]  ;;  %v11957_v36 = vld [vmem:[#allocation8 + $0x930] sm:$0xf0] }
 0x4f1   :  { %v14034_v1 = vpop.f32.mrf.mxu2  ;;  %5505 = vmatpush.bf16.msrb.mxu0 %v10206_v52 }
 0x4f2   :  { %v5019_v4 = vpop.f32.mrf.mxu3 }
 0x4f3   :  { %v5059_v33 = vadd.f32 %v13960_v39, %v5019_v4  ;;  %v5097_v13 = vpop.f32.mrf.mxu1  ;;  %v10185_v39 = vld [vmem:[#allocation8 + $0x948] sm:$0xf] }
 0x4f4   :  { %v14037_v48 = vpop.f32.mrf.mxu0  ;;  %v10186_v4 = vor.u32 %v11962_v19, %v10185_v39  ;;  %v11952_v39 = vld [vmem:[#allocation8 + $0x908] sm:$0xf0] }
 0x4f5   :  { %v5098_v44 = vadd.f32 %v5097_v13, %v5059_v33 }
 0x4f6   :  { %5262 = vmatmul.bf16.gmra.mxu1 %v13906_v12  ;;  %5301 = vmatmul.bf16.gmra.mxu2 %v13809_v20 }
 0x4f7   :  { %v14042_v31 = vadd.f32 %v5098_v44, %v14601_v41  ;;  %5369 = vmatmul.bf16.gmra.mxu0 %v13859_v45  ;;  %v10166_v44 = vor.u32 %v11957_v36, %v10165_v53  ;;  %v14602_v41 = vld [vmem:[#allocation47_spill] sm:$0xff]  ;;  %v11947_v53 = vld [vmem:[#allocation8 + $0x8e0] sm:$0xf0]  ;;  %v14603_v36 = vld [vmem:[#allocation58_spill] sm:$0xff] }
 0x4f8   :  { %5506 = vmatpush.bf16.msrb.mxu0 %v10186_v4 }
 0x4f9   :  { %v14045_v59 = vpop.f32.mrf.mxu2 }
 0x4fa   :  { %v5021_v47 = vpop.f32.mrf.mxu3 }
 0x4fb   :  { %v5061_v54 = vadd.f32 %v13971_v46, %v5021_v47  ;;  %v5099_v33 = vpop.f32.mrf.mxu1  ;;  %v10146_v46 = vor.u32 %v11952_v39, %v10145_v51 }
 0x4fc   :  { %v14048_v13 = vpop.f32.mrf.mxu0  ;;  %5507 = vmatpush.bf16.msrb.mxu0 %v10166_v44 }
 0x4fd   :  { %v5100_v11 = vadd.f32 %v5099_v33, %v5061_v54  ;;  %v10125_v33 = vld [vmem:[#allocation8 + $0x8d0] sm:$0xf] }
 0x4ff   :  { %v14051_v35 = vadd.f32 %v5100_v11, %v14602_v41  ;;  %5315 = vmatmul.bf16.vlgmr.msrb.gmra.mxu3 %v13780_v2  ;;  %v10126_v11 = vor.u32 %v11947_v53, %v10125_v33 }
 0x500   :  { %5508 = vmatpush.bf16.msrb.mxu0 %v10146_v46  ;;  %v14604_v46 = vld [vmem:[#allocation60_spill] sm:$0xff] }
 0x501   :  { %v14054_v52 = vpop.f32.mrf.mxu2 }
 0x502   :  { %v5024_v19 = vpop.f32.mrf.mxu3 }
 0x503   :  { %v5064_v47 = vadd.f32 %v13977_v15, %v5024_v19  ;;  %v5102_v43 = vpop.f32.mrf.mxu1 }
 0x504   :  { %v14057_v4 = vpop.f32.mrf.mxu0  ;;  %5509 = vmatpush.bf16.msrb.mxu0 %v10126_v11 }
 0x505   :  { %v5103_v54 = vadd.f32 %v5102_v43, %v5064_v47 }
 0x506   :  { %5393 = vmatmul.bf16.vlgmr.msra.gmra.mxu1 %v13683_v25  ;;  %5432 = vmatmul.bf16.vlgmr.msra.gmra.mxu2 %v13780_v2 }
 0x507   :  { %v14062_v44 = vadd.f32 %v5103_v54, %v14603_v36  ;;  %5374 = vmatmul.bf16.gmra.mxu0 %v13885_v49 }
 0x509   :  { %v14065_v51 = vpop.f32.mrf.mxu2 }
 0x50a   :  { %v5026_v15 = vpop.f32.mrf.mxu3 }
 0x50b   :  { %v5066_v41 = vadd.f32 %v13988_v14, %v5026_v15  ;;  %v5104_v39 = vpop.f32.mrf.mxu1  ;;  %v14605_v14 = vld [vmem:[#allocation62_spill] sm:$0xff] }
 0x50c   :  { %v14068_v43 = vpop.f32.mrf.mxu0 }
 0x50d   :  { %v5105_v19 = vadd.f32 %v5104_v39, %v5066_v41 }
 0x50f   :  { %v14071_v47 = vadd.f32 %v5105_v19, %v14604_v46  ;;  %5320 = vmatmul.bf16.gmra.mxu3 %v13812_v10 }
 0x511   :  { %v14074_v33 = vpop.f32.mrf.mxu2 }
 0x512   :  { %v5029_v54 = vpop.f32.mrf.mxu3 }
 0x513   :  { %v5069_v53 = vadd.f32 %v13997_v34, %v5029_v54  ;;  %v5107_v11 = vpop.f32.mrf.mxu1 }
 0x514   :  { %v14077_v36 = vpop.f32.mrf.mxu0 }
 0x515   :  { %v5108_v29 = vadd.f32 %v5107_v11, %v5069_v53  ;;  %v10105_v11 = vld [vmem:[#allocation8 + $0x8a8] sm:$0xf] }
 0x516   :  { %5398 = vmatmul.bf16.gmra.mxu1 %v13707_v7  ;;  %5437 = vmatmul.bf16.gmra.mxu2 %v13812_v10 }
 0x517   :  { %v14082_v15 = vadd.f32 %v5108_v29, %v14605_v14  ;;  %5379 = vmatmul.bf16.gmra.mxu0 %v13906_v12  ;;  %v14094_v29 = vld [vmem:[#allocation9] sm:$0x1f]  ;;  %v10106_v14 = vor.u32 %v11942_v18, %v10105_v11 }
 0x518   :  { %14608 = vst [vmem:[#allocation22_spill] sm:$0xff] %v14094_v29 }
 0x519   :  { %v14085_v41 = vpop.f32.mrf.mxu2  ;;  %5463 = vmatpush.bf16.msra.mxu3 %v10106_v14  ;;  %v14610_v14 = vld [vmem:[#allocation25_spill] sm:$0xff] }
 0x51a   :  { %v5031_v39 = vpop.f32.mrf.mxu3 }
 0x51b   :  { %v5071_v19 = vadd.f32 %v14008_v37, %v5031_v39  ;;  %v5109_v46 = vpop.f32.mrf.mxu1  ;;  %v14099_v37 = vperm.slane %v14094_v29, 0 }
 0x51c   :  { %v14088_v54 = vpop.f32.mrf.mxu0 }
 0x51d   :  { %v5110_v34 = vadd.f32 %v5109_v46, %v5071_v19  ;;  %v14104_v46 = vperm.slane %v14094_v29, 1  ;;  %v5652_v11 = vadd.f32 %v14099_v37, %v13982_v26  ;;  %v11932_v29 = vld [vmem:[#allocation8 + $0x868] sm:$0xf0] }
 0x51e   :  { %v10066_v26 = vor.u32 %v11932_v29, %v10065_v56  ;;  %v5657_v56 = vadd.f32 %v14099_v37, %v13991_v42  ;;  %v10385_v29 = vld [vmem:[#allocation8 + $0xad8] sm:$0xf] }
 0x51f   :  { %v14091_v53 = vadd.f32 %v5110_v34, %v14606_v50  ;;  %5325 = vmatmul.bf16.gmra.mxu3 %v13842_v24  ;;  %v10085_v34 = vld [vmem:[#allocation8 + $0x880] sm:$0xf] }
 0x520   :  { %v10086_v18 = vor.u32 %v11937_v8, %v10085_v34 }
 0x521   :  { %14607 = vst [vmem:[#allocation55_spill] sm:$0xff] %v14091_v53  ;;  %v14096_v12 = vpop.f32.mrf.mxu2 }
 0x522   :  { %14609 = vst [vmem:[#allocation35_spill] sm:$0xff] %v14096_v12  ;;  %v5160_v49 = vpop.f32.mrf.mxu3  ;;  %5464 = vmatpush.bf16.msra.mxu3 %v10086_v18  ;;  %v10045_v12 = vld [vmem:[#allocation8 + $0x830] sm:$0xf] }
 0x523   :  { %v5161_v39 = vadd.f32 %v5160_v49, %v13985_v3  ;;  %v5238_v19 = vpop.f32.mrf.mxu1  ;;  %v10425_v49 = vld [vmem:[#allocation8 + $0xb28] sm:$0xf]  ;;  %v12022_v3 = vld [vmem:[#allocation8 + $0xb38] sm:$0xf0] }
 0x524   :  { %v14111_v40 = vpop.f32.mrf.mxu0 }
 0x525   :  { %v5200_v50 = vadd.f32 %v14017_v27, %v5161_v39  ;;  %v10426_v27 = vor.u32 %v12022_v3, %v10425_v49  ;;  %v12080_v39 = vld [vmem:[#allocation11 + $0x178] sm:$0xff]  ;;  %v12017_v49 = vld [vmem:[#allocation8 + $0xb10] sm:$0xf0] }
 0x526   :  { %5403 = vmatmul.bf16.gmra.mxu1 %v13732_v6  ;;  %5442 = vmatmul.bf16.gmra.mxu2 %v13842_v24  ;;  %v10406_v18 = vor.u32 %v12017_v49, %v10405_v5  ;;  %v12079_v3 = vld [vmem:[#allocation11 + $0x170] sm:$0xff]  ;;  %v12012_v5 = vld [vmem:[#allocation8 + $0xae8] sm:$0xf0] }
 0x527   :  { %v5581_v38 = vadd.f32 %v5200_v50, %v14610_v14  ;;  %5510 = vmatmul.bf16.vlgmr.msrb.gmra.mxu0 %v13683_v25  ;;  %5541 = vmatpush.bf16.msrb.mxu1 %v10426_v27  ;;  %v5712_v50 = vmax.f32 %v5652_v11, 0.0  ;;  %v10386_v11 = vor.u32 %v12012_v5, %v10385_v29  ;;  %v12078_v27 = vld [vmem:[#allocation11 + $0x168] sm:$0xff]  ;;  %v10005_v29 = vld [vmem:[#allocation8 + $0x7e0] sm:$0xf] }
 0x528   :  { %6283 = vmatpush.bf16.msrb.mxu2 %v12080_v39  ;;  %5465 = vmatpush.bf16.msra.mxu3 %v10066_v26  ;;  %v10025_v26 = vld [vmem:[#allocation8 + $0x808] sm:$0xf] }
 0x529   :  { %v5653_v32 = vadd.f32 %v14104_v46, %v5581_v38  ;;  %v5277_v45 = vpop.f32.mrf.mxu2 }
 0x52a   :  { %v14115_v8 = vadd.f32 %v5277_v45, %v5238_v19  ;;  %v5162_v34 = vpop.f32.mrf.mxu3  ;;  %v11927_v45 = vld [vmem:[#allocation8 + $0x840] sm:$0xf0] }
 0x52b   :  { %v5713_v14 = vmax.f32 %v5653_v32, 0.0  ;;  %v5163_v25 = vadd.f32 %v5162_v34, %v13994_v17  ;;  %v5240_v24 = vpop.f32.mrf.mxu1  ;;  %5542 = vmatpush.bf16.msrb.mxu1 %v10406_v18  ;;  %v10046_v19 = vor.u32 %v11927_v45, %v10045_v12  ;;  %v14611_v32 = vld [vmem:[#allocation39_spill] sm:$0xff]  ;;  %v11922_v12 = vld [vmem:[#allocation8 + $0x818] sm:$0xf0] }
 0x52c   :  { %6284 = vmatpush.bf16.msrb.mxu2 %v12079_v3  ;;  %v14124_v39 = vpop.f32.mrf.mxu0  ;;  %v10365_v3 = vld [vmem:[#allocation8 + $0xab0] sm:$0xf] }
 0x52d   :  { %v5772_v38 = vpack.c.bf16 %v5713_v14, %v5712_v50  ;;  %v5202_v53 = vadd.f32 %v14028_v60, %v5163_v25  ;;  %5466 = vmatpush.bf16.msra.mxu3 %v10046_v19  ;;  %v5717_v14 = vmax.f32 %v5657_v56, 0.0  ;;  %v12077_v19 = vld [vmem:[#allocation11 + $0x160] sm:$0xff]  ;;  %v5662_v56 = vadd.f32 %v14099_v37, %v14002_v58 }
 0x52f   :  { %5808 = vst [vmem:[#allocation3] sm:$0xff] %v5772_v38  ;;  %v5586_v17 = vadd.f32 %v5202_v53, %v14611_v32  ;;  %5330 = vmatmul.bf16.gmra.mxu3 %v13868_v22  ;;  %5543 = vmatpush.bf16.msrb.mxu1 %v10386_v11  ;;  %v10026_v53 = vor.u32 %v11922_v12, %v10025_v26  ;;  %v12007_v38 = vld [vmem:[#allocation8 + $0xac0] sm:$0xf0] }
 0x530   :  { %6285 = vmatpush.bf16.msrb.mxu2 %v12078_v27  ;;  %v10366_v45 = vor.u32 %v12007_v38, %v10365_v3  ;;  %v10345_v27 = vld [vmem:[#allocation8 + $0xa88] sm:$0xf] }
 0x531   :  { %v5658_v60 = vadd.f32 %v14104_v46, %v5586_v17  ;;  %v5279_v34 = vpop.f32.mrf.mxu2  ;;  %5467 = vmatpush.bf16.msra.mxu3 %v10026_v53  ;;  %v11912_v53 = vld [vmem:[#allocation8 + $0x7c8] sm:$0xf0] }
 0x532   :  { %v14126_v50 = vadd.f32 %v5279_v34, %v5240_v24  ;;  %v5165_v42 = vpop.f32.mrf.mxu3  ;;  %v11917_v24 = vld [vmem:[#allocation8 + $0x7f0] sm:$0xf0]  ;;  %v12076_v34 = vld [vmem:[#allocation11 + $0x158] sm:$0xff] }
 0x533   :  { %v5718_v25 = vmax.f32 %v5658_v60, 0.0  ;;  %v5166_v49 = vadd.f32 %v5165_v42, %v14005_v9  ;;  %v5243_v18 = vpop.f32.mrf.mxu1  ;;  %v10006_v5 = vor.u32 %v11917_v24, %v10005_v29  ;;  %v14612_v9 = vld [vmem:[#allocation26_spill] sm:$0xff]  ;;  %5544 = vmatpush.bf16.msrb.mxu1 %v10366_v45  ;;  %v12002_v60 = vld [vmem:[#allocation8 + $0xa98] sm:$0xf0]  ;;  %v9985_v42 = vld [vmem:[#allocation8 + $0x7b8] sm:$0xf] }
 0x534   :  { %6286 = vmatpush.bf16.msrb.mxu2 %v12077_v19  ;;  %v14139_v38 = vpop.f32.mrf.mxu0  ;;  %v10325_v19 = vld [vmem:[#allocation8 + $0xa60] sm:$0xf]  ;;  %v12075_v29 = vld [vmem:[#allocation11 + $0x150] sm:$0xff] }
 0x535   :  { %v5775_v32 = vpack.c.bf16 %v5718_v25, %v5717_v14  ;;  %v5205_v17 = vadd.f32 %v14037_v48, %v5166_v49  ;;  %5468 = vmatpush.bf16.msra.mxu3 %v10006_v5  ;;  %v10346_v48 = vor.u32 %v12002_v60, %v10345_v27  ;;  %v9986_v25 = vor.u32 %v11912_v53, %v9985_v42  ;;  %v12043_v5 = vld [vmem:[#allocation11 + $0x78] sm:$0xff]  ;;  %v12042_v53 = vld [vmem:[#allocation11 + $0x70] sm:$0xff] }
 0x536   :  { %5408 = vmatmul.bf16.gmra.mxu1 %v13758_v21  ;;  %5447 = vmatmul.bf16.gmra.mxu2 %v13868_v22  ;;  %v5722_v49 = vmax.f32 %v5662_v56, 0.0  ;;  %v11907_v56 = vld [vmem:[#allocation8 + $0x7a0] sm:$0xf0]  ;;  %v5667_v27 = vadd.f32 %v14099_v37, %v14011_v30 }
 0x537   :  { %5811 = vst [vmem:[#allocation3 + $0x14] sm:$0xff] %v5775_v32  ;;  %v5591_v11 = vadd.f32 %v5205_v17, %v14612_v9  ;;  %5515 = vmatmul.bf16.gmra.mxu0 %v13707_v7  ;;  %5545 = vmatpush.bf16.msrb.mxu1 %v10346_v48  ;;  %v11997_v32 = vld [vmem:[#allocation8 + $0xa70] sm:$0xf0]  ;;  %v9965_v9 = vld [vmem:[#allocation8 + $0x790] sm:$0xf] }
 0x538   :  { %6287 = vmatpush.bf16.msrb.mxu2 %v12076_v34  ;;  %v10326_v17 = vor.u32 %v11997_v32, %v10325_v19  ;;  %v10305_v48 = vld [vmem:[#allocation8 + $0xa38] sm:$0xf]  ;;  %v11992_v34 = vld [vmem:[#allocation8 + $0xa48] sm:$0xf0]  ;;  %6633 = vmatpush.bf16.msra.mxu0 %v12043_v5  ;;  %v5727_v30 = vmax.f32 %v5667_v27, 0.0 }
 0x539   :  { %v5663_v26 = vadd.f32 %v14104_v46, %v5591_v11  ;;  %v5282_v12 = vpop.f32.mrf.mxu2  ;;  %5469 = vmatpush.bf16.msra.mxu3 %v9986_v25  ;;  %v9966_v11 = vor.u32 %v11907_v56, %v9965_v9  ;;  %v11987_v19 = vld [vmem:[#allocation8 + $0xa20] sm:$0xf0]  ;;  %v12041_v5 = vld [vmem:[#allocation11 + $0x68] sm:$0xff] }
 0x53a   :  { %v14137_v14 = vadd.f32 %v5282_v12, %v5243_v18  ;;  %v5167_v58 = vpop.f32.mrf.mxu3  ;;  %v12074_v12 = vld [vmem:[#allocation11 + $0x148] sm:$0xff] }
 0x53b   :  { %v5723_v3 = vmax.f32 %v5663_v26, 0.0  ;;  %v5168_v7 = vadd.f32 %v5167_v58, %v14014_v0  ;;  %v14142_v45 = vpop.f32.mrf.mxu1  ;;  %v14613_v0 = vld [vmem:[#allocation40_spill] sm:$0xff]  ;;  %5546 = vmatpush.bf16.msrb.mxu1 %v10326_v17  ;;  %v10306_v26 = vor.u32 %v11992_v34, %v10305_v48  ;;  %v12073_v17 = vld [vmem:[#allocation11 + $0x140] sm:$0xff]  ;;  %v14614_v9 = vld [vmem:[#allocation27_spill] sm:$0xff] }
 0x53c   :  { %6288 = vmatpush.bf16.msrb.mxu2 %v12075_v29  ;;  %6634 = vmatpush.bf16.msra.mxu0 %v12042_v53  ;;  %v5677_v53 = vadd.f32 %v14099_v37, %v14031_v62 }
 0x53d   :  { %v5778_v24 = vpack.c.bf16 %v5723_v3, %v5722_v49  ;;  %v5207_v18 = vadd.f32 %v14048_v13, %v5168_v7  ;;  %5470 = vmatpush.bf16.msra.mxu3 %v9966_v11  ;;  %v10285_v7 = vld [vmem:[#allocation8 + $0xa10] sm:$0xf] }
 0x53e   :  { %v10286_v32 = vor.u32 %v11987_v19, %v10285_v7  ;;  %v5737_v19 = vmax.f32 %v5677_v53, 0.0  ;;  %v14617_v53 = vld [vmem:[#allocation42_spill] sm:$0xff] }
 0x53f   :  { %5814 = vst [vmem:[#allocation3 + $0x28] sm:$0xff] %v5778_v24  ;;  %v5596_v60 = vadd.f32 %v5207_v18, %v14613_v0  ;;  %5335 = vmatmul.bf16.gmra.mxu3 %v13896_v23  ;;  %5547 = vmatpush.bf16.msrb.mxu1 %v10306_v26  ;;  %v14153_v24 = vpop.f32.mrf.mxu0 }
 0x540   :  { %6289 = vmatpush.bf16.msrb.mxu2 %v12074_v12  ;;  %6635 = vmatpush.bf16.msra.mxu0 %v12041_v5  ;;  %v5682_v5 = vadd.f32 %v14099_v37, %v14042_v31 }
 0x541   :  { %v5668_v13 = vadd.f32 %v14104_v46, %v5596_v60  ;;  %v14150_v42 = vpop.f32.mrf.mxu2 }
 0x542   :  { %v5170_v58 = vpop.f32.mrf.mxu3 }
 0x543   :  { %v5728_v25 = vmax.f32 %v5668_v13, 0.0  ;;  %v5171_v49 = vadd.f32 %v5170_v58, %v14025_v55  ;;  %v5248_v3 = vpop.f32.mrf.mxu1  ;;  %v5672_v55 = vadd.f32 %v14099_v37, %v14022_v63  ;;  %5548 = vmatpush.bf16.msrb.mxu1 %v10286_v32  ;;  %v12039_v13 = vld [vmem:[#allocation11 + $0x58] sm:$0xff] }
 0x544   :  { %6290 = vmatpush.bf16.msrb.mxu2 %v12073_v17 }
 0x545   :  { %v5781_v29 = vpack.c.bf16 %v5728_v25, %v5727_v30  ;;  %v5210_v18 = vadd.f32 %v14057_v4, %v5171_v49  ;;  %v12040_v4 = vld [vmem:[#allocation11 + $0x60] sm:$0xff]  ;;  %v5732_v48 = vmax.f32 %v5672_v55, 0.0  ;;  %v14616_v55 = vld [vmem:[#allocation28_spill] sm:$0xff] }
 0x546   :  { %5413 = vmatmul.bf16.gmra.mxu1 %v13788_v16  ;;  %5452 = vmatmul.bf16.gmra.mxu2 %v13896_v23  ;;  %v14615_v30 = vld [vmem:[#allocation41_spill] sm:$0xff] }
 0x547   :  { %5817 = vst [vmem:[#allocation3 + $0x3c] sm:$0xff] %v5781_v29  ;;  %v5601_v56 = vadd.f32 %v5210_v18, %v14614_v9  ;;  %5520 = vmatmul.bf16.gmra.mxu0 %v13732_v6  ;;  %v14171_v58 = vpop.f32.mrf.mxu0  ;;  %v12037_v18 = vld [vmem:[#allocation11 + $0x48] sm:$0xff] }
 0x548   :  { %6636 = vmatpush.bf16.msra.mxu0 %v12040_v4 }
 0x549   :  { %v5673_v11 = vadd.f32 %v14104_v46, %v5601_v56  ;;  %v5287_v27 = vpop.f32.mrf.mxu2 }
 0x54a   :  { %v14163_v0 = vadd.f32 %v5287_v27, %v5248_v3  ;;  %v5172_v60 = vpop.f32.mrf.mxu3  ;;  %v12038_v3 = vld [vmem:[#allocation11 + $0x50] sm:$0xff] }
 0x54b   :  { %v5733_v34 = vmax.f32 %v5673_v11, 0.0  ;;  %v5173_v26 = vadd.f32 %v5172_v60, %v14034_v1  ;;  %v14166_v63 = vpop.f32.mrf.mxu1  ;;  %v12125_v60 = vld [vmem:[#allocation11 + $0x2b8] sm:$0xff] }
 0x54c   :  { %6637 = vmatpush.bf16.msra.mxu0 %v12039_v13  ;;  %v5687_v13 = vadd.f32 %v14099_v37, %v14051_v35 }
 0x54d   :  { %v5784_v12 = vpack.c.bf16 %v5733_v34, %v5732_v48  ;;  %v5212_v6 = vadd.f32 %v14068_v43, %v5173_v26  ;;  %v5742_v48 = vmax.f32 %v5682_v5, 0.0  ;;  %v5692_v5 = vadd.f32 %v14099_v37, %v14062_v44 }
 0x54f   :  { %5820 = vst [vmem:[#allocation3 + $0x50] sm:$0xff] %v5784_v12  ;;  %v5606_v25 = vadd.f32 %v5212_v6, %v14615_v30  ;;  %5340 = vmatmul.bf16.gmra.mxu3 %v13914_v28  ;;  %v12124_v6 = vld [vmem:[#allocation11 + $0x2b0] sm:$0xff] }
 0x550   :  { %6638 = vmatpush.bf16.msra.mxu0 %v12038_v3 }
 0x551   :  { %v5678_v1 = vadd.f32 %v14104_v46, %v5606_v25  ;;  %v14176_v49 = vpop.f32.mrf.mxu2 }
 0x552   :  { %v5175_v7 = vpop.f32.mrf.mxu3 }
 0x553   :  { %v5738_v43 = vmax.f32 %v5678_v1, 0.0  ;;  %v5176_v32 = vadd.f32 %v5175_v7, %v14045_v59  ;;  %v5253_v17 = vpop.f32.mrf.mxu1  ;;  %v14186_v59 = vpop.f32.mrf.mxu0  ;;  %v12123_v7 = vld [vmem:[#allocation11 + $0x2a8] sm:$0xff] }
 0x554   :  { %6639 = vmatpush.bf16.msra.mxu0 %v12037_v18  ;;  %v12122_v18 = vld [vmem:[#allocation11 + $0x2a0] sm:$0xff] }
 0x555   :  { %v5787_v62 = vpack.c.bf16 %v5738_v43, %v5737_v19  ;;  %v5215_v29 = vadd.f32 %v14077_v36, %v5176_v32  ;;  %v12036_v36 = vld [vmem:[#allocation11 + $0x40] sm:$0xff]  ;;  %v5747_v19 = vmax.f32 %v5687_v13, 0.0  ;;  %v5697_v13 = vadd.f32 %v14099_v37, %v14071_v47 }
 0x556   :  { %5418 = vmatmul.bf16.gmra.mxu1 %v13809_v20  ;;  %5457 = vmatmul.bf16.gmra.mxu2 %v13914_v28 }
 0x557   :  { %5823 = vst [vmem:[#allocation3 + $0x64] sm:$0xff] %v5787_v62  ;;  %v5611_v9 = vadd.f32 %v5215_v29, %v14616_v55  ;;  %5525 = vmatmul.bf16.gmra.mxu0 %v13758_v21  ;;  %v14618_v55 = vld [vmem:[#allocation29_spill] sm:$0xff] }
 0x558   :  { %6640 = vmatpush.bf16.msra.mxu0 %v12036_v36 }
 0x559   :  { %v5683_v56 = vadd.f32 %v14104_v46, %v5611_v9  ;;  %v5292_v11 = vpop.f32.mrf.mxu2 }
 0x55a   :  { %v14189_v27 = vadd.f32 %v5292_v11, %v5253_v17  ;;  %v5177_v4 = vpop.f32.mrf.mxu3  ;;  %v10429_v17 = vld [vmem:[#allocation3 + $0x28] sm:$0xf] }
 0x55b   :  { %v5743_v34 = vmax.f32 %v5683_v56, 0.0  ;;  %v5178_v31 = vadd.f32 %v5177_v4, %v14054_v52  ;;  %v14192_v26 = vpop.f32.mrf.mxu1  ;;  %v12070_v52 = vld [vmem:[#allocation3 + $0x38] sm:$0xf0]  ;;  %v5752_v4 = vmax.f32 %v5692_v5, 0.0 }
 0x55c   :  { %7042 = vmatpush.bf16.msrb.mxu0 %v12125_v60  ;;  %v10430_v62 = vor.u32 %v12070_v52, %v10429_v17  ;;  %v14620_v5 = vld [vmem:[#allocation30_spill] sm:$0xff] }
 0x55d   :  { %v5790_v12 = vpack.c.bf16 %v5743_v34, %v5742_v48  ;;  %v5217_v21 = vadd.f32 %v14088_v54, %v5178_v31  ;;  %v14202_v54 = vpop.f32.mrf.mxu0  ;;  %v12087_v34 = vld [vmem:[#allocation11 + $0x1b0] sm:$0xff] }
 0x55f   :  { %5826 = vst [vmem:[#allocation3 + $0x78] sm:$0xff] %v5790_v12  ;;  %v5616_v30 = vadd.f32 %v5217_v21, %v14617_v53  ;;  %5471 = vmatmul.bf16.vlgmr.msra.gmra.mxu3 %v13773_v61  ;;  %v12051_v21 = vld [vmem:[#allocation11 + $0xb8] sm:$0xff]  ;;  %v14619_v53 = vld [vmem:[#allocation43_spill] sm:$0xff] }
 0x560   :  { %7043 = vmatpush.bf16.msrb.mxu0 %v12124_v6  ;;  %v12120_v6 = vld [vmem:[#allocation11 + $0x290] sm:$0xff]  ;;  %6647 = vmatpush.bf16.msra.mxu1 %v12051_v21 }
 0x561   :  { %v5688_v25 = vadd.f32 %v14104_v46, %v5616_v30  ;;  %v14200_v1 = vpop.f32.mrf.mxu2  ;;  %v14622_v21 = vld [vmem:[#allocation55_spill] sm:$0xff] }
 0x562   :  { %v5180_v3 = vpop.f32.mrf.mxu3 }
 0x563   :  { %v5748_v43 = vmax.f32 %v5688_v25, 0.0  ;;  %v5181_v32 = vadd.f32 %v5180_v3, %v14065_v51  ;;  %v5258_v35 = vpop.f32.mrf.mxu1  ;;  %v12088_v51 = vld [vmem:[#allocation11 + $0x1b8] sm:$0xff]  ;;  %v12050_v3 = vld [vmem:[#allocation11 + $0xb0] sm:$0xff] }
 0x564   :  { %7044 = vmatpush.bf16.msrb.mxu0 %v12123_v7  ;;  %6297 = vmatpush.bf16.msrb.mxu3 %v12088_v51  ;;  %v12119_v7 = vld [vmem:[#allocation11 + $0x288] sm:$0xff] }
 0x565   :  { %v5793_v29 = vpack.c.bf16 %v5748_v43, %v5747_v19  ;;  %v5220_v61 = vadd.f32 %v14111_v40, %v5181_v32  ;;  %v14217_v31 = vpop.f32.mrf.mxu0  ;;  %v5757_v19 = vmax.f32 %v5697_v13, 0.0  ;;  %6648 = vmatpush.bf16.msra.mxu1 %v12050_v3  ;;  %v14623_v13 = vld [vmem:[#allocation44_spill] sm:$0xff] }
 0x566   :  { %5549 = vmatmul.bf16.vlgmr.msrb.gmra.mxu1 %v13780_v2  ;;  %6291 = vmatmul.bf16.vlgmr.msrb.gmra.mxu2 %v10430_v62  ;;  %v12121_v2 = vld [vmem:[#allocation11 + $0x298] sm:$0xff]  ;;  %v12049_v62 = vld [vmem:[#allocation11 + $0xa8] sm:$0xff] }
 0x567   :  { %5829 = vst [vmem:[#allocation3 + $0x8c] sm:$0xff] %v5793_v29  ;;  %v5621_v9 = vadd.f32 %v5220_v61, %v14618_v55  ;;  %5530 = vmatmul.bf16.gmra.mxu0 %v13788_v16  ;;  %v12118_v29 = vld [vmem:[#allocation11 + $0x280] sm:$0xff]  ;;  %v5702_v61 = vadd.f32 %v14099_v37, %v14082_v15  ;;  %v12084_v55 = vld [vmem:[#allocation11 + $0x198] sm:$0xff] }
 0x568   :  { %7045 = vmatpush.bf16.msrb.mxu0 %v12122_v18  ;;  %6298 = vmatpush.bf16.msrb.mxu3 %v12087_v34  ;;  %v12048_v15 = vld [vmem:[#allocation11 + $0xa0] sm:$0xff] }
 0x569   :  { %v5693_v56 = vadd.f32 %v14104_v46, %v5621_v9  ;;  %v5297_v11 = vpop.f32.mrf.mxu2  ;;  %6649 = vmatpush.bf16.msra.mxu1 %v12049_v62  ;;  %v12096_v9 = vld [vmem:[#allocation11 + $0x1f8] sm:$0xff]  ;;  %v12093_v62 = vld [vmem:[#allocation11 + $0x1e0] sm:$0xff] }
 0x56a   :  { %v14212_v40 = vadd.f32 %v5297_v11, %v5258_v35  ;;  %v5182_v36 = vpop.f32.mrf.mxu3  ;;  %v12085_v35 = vld [vmem:[#allocation11 + $0x1a0] sm:$0xff]  ;;  %6311 = vmatpush.bf16.msra.mxu2 %v12096_v9  ;;  %v5762_v11 = vmax.f32 %v5702_v61, 0.0  ;;  %v12045_v9 = vld [vmem:[#allocation11 + $0x88] sm:$0xff] }
 0x56b   :  { %v5753_v60 = vmax.f32 %v5693_v56, 0.0  ;;  %v5183_v48 = vadd.f32 %v5182_v36, %v14074_v33  ;;  %v14215_v44 = vpop.f32.mrf.mxu1  ;;  %v12086_v33 = vld [vmem:[#allocation11 + $0x1a8] sm:$0xff] }
 0x56c   :  { %7046 = vmatpush.bf16.msrb.mxu0 %v12121_v2  ;;  %6299 = vmatpush.bf16.msrb.mxu3 %v12086_v33  ;;  %v14621_v2 = vld [vmem:[#allocation35_spill] sm:$0xff] }
 0x56d   :  { %v5796_v16 = vpack.c.bf16 %v5753_v60, %v5752_v4  ;;  %v5222_v12 = vadd.f32 %v14124_v39, %v5183_v48  ;;  %v14232_v18 = vpop.f32.mrf.mxu0  ;;  %6650 = vmatpush.bf16.msra.mxu1 %v12048_v15  ;;  %v12095_v48 = vld [vmem:[#allocation11 + $0x1f0] sm:$0xff]  ;;  %v12082_v33 = vld [vmem:[#allocation11 + $0x188] sm:$0xff] }
 0x56e   :  { %6312 = vmatpush.bf16.msra.mxu2 %v12095_v48  ;;  %v12103_v15 = vld [vmem:[#allocation11 + $0x230] sm:$0xff] }
 0x56f   :  { %5832 = vst [vmem:[#allocation3 + $0xa0] sm:$0xff] %v5796_v16  ;;  %v5626_v30 = vadd.f32 %v5222_v12, %v14619_v53  ;;  %5476 = vmatmul.bf16.gmra.mxu3 %v13803_v57  ;;  %v12047_v12 = vld [vmem:[#allocation11 + $0x98] sm:$0xff] }
 0x570   :  { %7047 = vmatpush.bf16.msrb.mxu0 %v12120_v6  ;;  %6300 = vmatpush.bf16.msrb.mxu3 %v12085_v35  ;;  %v5707_v6 = vadd.f32 %v14099_v37, %v14622_v21  ;;  %v14628_v21 = vld [vmem:[#allocation53_spill] sm:$0xff] }
 0x571   :  { %v5698_v25 = vadd.f32 %v14104_v46, %v5626_v30  ;;  %v14225_v52 = vpop.f32.mrf.mxu2  ;;  %v14624_v30 = vld [vmem:[#allocation52_spill] sm:$0xff]  ;;  %6651 = vmatpush.bf16.msra.mxu1 %v12047_v12 }
 0x572   :  { %v5185_v39 = vpop.f32.mrf.mxu3  ;;  %v5767_v37 = vmax.f32 %v5707_v6, 0.0  ;;  %v12133_v12 = vld [vmem:[#allocation11 + $0x2f8] sm:$0xff] }
 0x573   :  { %v5758_v43 = vmax.f32 %v5698_v25, 0.0  ;;  %v5186_v47 = vadd.f32 %v5185_v39, %v14085_v41  ;;  %v5263_v32 = vpop.f32.mrf.mxu1  ;;  %v12094_v25 = vld [vmem:[#allocation11 + $0x1e8] sm:$0xff] }
 0x574   :  { %7048 = vmatpush.bf16.msrb.mxu0 %v12119_v7  ;;  %6301 = vmatpush.bf16.msrb.mxu3 %v12084_v55  ;;  %v14626_v55 = vld [vmem:[#allocation54_spill] sm:$0xff] }
 0x575   :  { %v5799_v17 = vpack.c.bf16 %v5758_v43, %v5757_v19  ;;  %v5225_v57 = vadd.f32 %v14139_v38, %v5186_v47  ;;  %v14247_v39 = vpop.f32.mrf.mxu0  ;;  %v10611_v19 = vld [vmem:[#allocation3 + $0x14] sm:$0xf0]  ;;  %6313 = vmatpush.bf16.msra.mxu2 %v12094_v25  ;;  %v12046_v43 = vld [vmem:[#allocation11 + $0x90] sm:$0xff] }
 0x576   :  { %5554 = vmatmul.bf16.gmra.mxu1 %v13812_v10 }
 0x577   :  { %5835 = vst [vmem:[#allocation3 + $0xb4] sm:$0xff] %v5799_v17  ;;  %v5631_v41 = vadd.f32 %v5225_v57, %v14620_v5  ;;  %5535 = vmatmul.bf16.gmra.mxu0 %v13809_v20  ;;  %v12083_v20 = vld [vmem:[#allocation11 + $0x190] sm:$0xff]  ;;  %v12081_v17 = vld [vmem:[#allocation11 + $0x180] sm:$0xff]  ;;  %v12023_v57 = vld [vmem:[#allocation3 + $0x4] sm:$0xf]  ;;  %6652 = vmatpush.bf16.msra.mxu1 %v12046_v43 }
 0x578   :  { %7049 = vmatpush.bf16.msrb.mxu0 %v12118_v29  ;;  %6302 = vmatpush.bf16.msrb.mxu3 %v12083_v20  ;;  %v12104_v29 = vld [vmem:[#allocation11 + $0x238] sm:$0xff]  ;;  %v14625_v5 = vld [vmem:[#allocation31_spill] sm:$0xff]  ;;  %v12044_v20 = vld [vmem:[#allocation11 + $0x80] sm:$0xff] }
 0x579   :  { %v5703_v38 = vadd.f32 %v14104_v46, %v5631_v41  ;;  %v5302_v51 = vpop.f32.mrf.mxu2  ;;  %v10614_v41 = vor.u32 %v12023_v57, %v10611_v19  ;;  %6314 = vmatpush.bf16.msra.mxu2 %v12093_v62  ;;  %v12115_v62 = vld [vmem:[#allocation3 + $0x60] sm:$0xf0] }
 0x57a   :  { %v14237_v10 = vadd.f32 %v5302_v51, %v5263_v32  ;;  %v5187_v56 = vpop.f32.mrf.mxu3 }
 0x57b   :  { %v5763_v36 = vmax.f32 %v5703_v38, 0.0  ;;  %v5188_v4 = vadd.f32 %v5187_v56, %v14621_v2  ;;  %v14240_v60 = vpop.f32.mrf.mxu1  ;;  %v14627_v38 = vld [vmem:[#allocation22_spill] sm:$0xff]  ;;  %6653 = vmatpush.bf16.msra.mxu1 %v12045_v9  ;;  %v12092_v56 = vld [vmem:[#allocation11 + $0x1d8] sm:$0xff] }
 0x57c   :  { %6303 = vmatpush.bf16.msrb.mxu3 %v12082_v33  ;;  %v14260_v2 = vperm.slane %v14627_v38, 3  ;;  %v12089_v9 = vld [vmem:[#allocation11 + $0x1c0] sm:$0xff] }
 0x57d   :  { %v5802_v34 = vpack.c.bf16 %v5763_v36, %v5762_v11  ;;  %v5227_v16 = vadd.f32 %v14153_v24, %v5188_v4  ;;  %6315 = vmatpush.bf16.msra.mxu2 %v12092_v56  ;;  %v14262_v48 = vpop.f32.mrf.mxu0  ;;  %v14632_v56 = vld [vmem:[#allocation32_spill] sm:$0xff] }
 0x57f   :  { %5838 = vst [vmem:[#allocation3 + $0xc8] sm:$0xff] %v5802_v34  ;;  %v5636_v53 = vadd.f32 %v5227_v16, %v14623_v13  ;;  %5481 = vmatmul.bf16.gmra.mxu3 %v14624_v30  ;;  %6654 = vmatpush.bf16.msra.mxu1 %v12044_v20  ;;  %v12091_v13 = vld [vmem:[#allocation11 + $0x1d0] sm:$0xff]  ;;  %v14629_v30 = vld [vmem:[#allocation45_spill] sm:$0xff] }
 0x580   :  { %6304 = vmatpush.bf16.msrb.mxu3 %v12081_v17 }
 0x581   :  { %v5708_v3 = vadd.f32 %v14104_v46, %v5636_v53  ;;  %v14250_v7 = vpop.f32.mrf.mxu2  ;;  %v12102_v53 = vld [vmem:[#allocation11 + $0x228] sm:$0xff]  ;;  %6316 = vmatpush.bf16.msra.mxu2 %v12091_v13 }
 0x582   :  { %v5316_v24 = vpop.f32.mrf.mxu3 }
 0x583   :  { %v5768_v47 = vmax.f32 %v5708_v3, 0.0  ;;  %v5317_v32 = vadd.f32 %v5316_v24, %v14115_v8  ;;  %v5394_v35 = vpop.f32.mrf.mxu1  ;;  %v14256_v8 = vperm.slane %v14627_v38, 2  ;;  %7056 = vmatpush.bf16.msrb.mxu1 %v12133_v12  ;;  %v14630_v3 = vld [vmem:[#allocation59_spill] sm:$0xff]  ;;  %v12100_v38 = vld [vmem:[#allocation11 + $0x218] sm:$0xff]  ;;  %v5285_v12 = vadd.f32 %v14150_v42, %v14142_v45 }
 0x584   :  { %6325 = vmatpush.bf16.msra.mxu3 %v12104_v29  ;;  %v5395_v51 = vadd.f32 %v5394_v35, %v14171_v58  ;;  %v12132_v24 = vld [vmem:[#allocation11 + $0x2f0] sm:$0xff] }
 0x585   :  { %v5805_v61 = vpack.c.bf16 %v5768_v47, %v5767_v37  ;;  %v5582_v46 = vadd.f32 %v5317_v32, %v14625_v5  ;;  %v12090_v37 = vld [vmem:[#allocation11 + $0x1c8] sm:$0xff]  ;;  %v12101_v47 = vld [vmem:[#allocation11 + $0x220] sm:$0xff] }
 0x586   :  { %5559 = vmatmul.bf16.gmra.mxu1 %v14626_v55  ;;  %6317 = vmatpush.bf16.msra.mxu2 %v12090_v37  ;;  %v12131_v5 = vld [vmem:[#allocation11 + $0x2e8] sm:$0xff] }
 0x587   :  { %5841 = vst [vmem:[#allocation3 + $0xdc] sm:$0xff] %v5805_v61  ;;  %6641 = vmatmul.bf16.vlgmr.msra.gmra.mxu0 %v10614_v41  ;;  %v5654_v58 = vadd.f32 %v14256_v8, %v5582_v46  ;;  %7057 = vmatpush.bf16.msrb.mxu1 %v12132_v24  ;;  %v14631_v41 = vld [vmem:[#allocation65_spill] sm:$0xff]  ;;  %v14634_v24 = vld [vmem:[#allocation46_spill] sm:$0xff] }
 0x588   :  { %6326 = vmatpush.bf16.msra.mxu3 %v12103_v15 }
 0x589   :  { %v5433_v11 = vpop.f32.mrf.mxu2 }
 0x58a   :  { %v5434_v36 = vadd.f32 %v5433_v11, %v5395_v51  ;;  %v5318_v4 = vpop.f32.mrf.mxu3  ;;  %v14274_v51 = vpop.f32.mrf.mxu0  ;;  %6318 = vmatpush.bf16.msra.mxu2 %v12089_v9  ;;  %v14637_v9 = vld [vmem:[#allocation33_spill] sm:$0xff] }
 0x58b   :  { %v5319_v34 = vadd.f32 %v5318_v4, %v14126_v50  ;;  %v5396_v16 = vpop.f32.mrf.mxu1  ;;  %v5714_v50 = vmax.f32 %v5654_v58, 0.0  ;;  %7058 = vmatpush.bf16.msrb.mxu1 %v12131_v5 }
 0x58c   :  { %v5583_v6 = vadd.f32 %v5434_v36, %v14628_v21  ;;  %v5397_v43 = vadd.f32 %v5396_v16, %v14186_v59  ;;  %6327 = vmatpush.bf16.msra.mxu3 %v12102_v53  ;;  %v10789_v59 = vld [vmem:[#allocation3 + $0x50] sm:$0xf] }
 0x58d   :  { %v5587_v33 = vadd.f32 %v5319_v34, %v14629_v30  ;;  %v10790_v11 = vor.u32 %v12115_v62, %v10789_v59  ;;  %v12099_v16 = vld [vmem:[#allocation11 + $0x210] sm:$0xff] }
 0x58e   :  { %v5655_v25 = vadd.f32 %v14260_v2, %v5583_v6 }
 0x58f   :  { %5486 = vmatmul.bf16.gmra.mxu3 %v14630_v3  ;;  %v5659_v46 = vadd.f32 %v14256_v8, %v5587_v33 }
 0x590   :  { %v5715_v19 = vmax.f32 %v5655_v25, 0.0  ;;  %6328 = vmatpush.bf16.msra.mxu3 %v12101_v47  ;;  %v14633_v25 = vld [vmem:[#allocation67_spill] sm:$0xff] }
 0x591   :  { %v5435_v32 = vpop.f32.mrf.mxu2  ;;  %v5719_v4 = vmax.f32 %v5659_v46, 0.0  ;;  %v12127_v46 = vld [vmem:[#allocation11 + $0x2c8] sm:$0xff] }
 0x592   :  { %v5773_v35 = vpack.c.bf16 %v5715_v19, %v5714_v50  ;;  %v5436_v17 = vadd.f32 %v5435_v32, %v5397_v43  ;;  %v5321_v57 = vpop.f32.mrf.mxu3  ;;  %v14286_v42 = vpop.f32.mrf.mxu0  ;;  %v14635_v19 = vld [vmem:[#allocation63_spill] sm:$0xff] }
 0x593   :  { %v5322_v29 = vadd.f32 %v5321_v57, %v14137_v14  ;;  %v5399_v61 = vpop.f32.mrf.mxu1  ;;  %v12130_v14 = vld [vmem:[#allocation11 + $0x2e0] sm:$0xff]  ;;  %v12128_v43 = vld [vmem:[#allocation11 + $0x2d0] sm:$0xff] }
 0x594   :  { %5809 = vst [vmem:[#allocation3 + $0x8] sm:$0xff] %v5773_v35  ;;  %v5588_v55 = vadd.f32 %v5436_v17, %v14631_v41  ;;  %v5400_v34 = vadd.f32 %v5399_v61, %v14202_v54  ;;  %6329 = vmatpush.bf16.msra.mxu3 %v12100_v38  ;;  %7059 = vmatpush.bf16.msrb.mxu1 %v12130_v14  ;;  %v12098_v54 = vld [vmem:[#allocation11 + $0x208] sm:$0xff]  ;;  %v12097_v35 = vld [vmem:[#allocation11 + $0x200] sm:$0xff] }
 0x595   :  { %v5592_v15 = vadd.f32 %v5322_v29, %v14632_v56  ;;  %v12126_v56 = vld [vmem:[#allocation11 + $0x2c0] sm:$0xff] }
 0x596   :  { %v5660_v36 = vadd.f32 %v14260_v2, %v5588_v55  ;;  %5564 = vmatmul.bf16.gmra.mxu1 %v13868_v22  ;;  %v12129_v22 = vld [vmem:[#allocation11 + $0x2d8] sm:$0xff] }
 0x597   :  { %7050 = vmatmul.bf16.vlgmr.msrb.gmra.mxu0 %v10790_v11  ;;  %v5664_v33 = vadd.f32 %v14256_v8, %v5592_v15  ;;  %v14636_v55 = vld [vmem:[#allocation68_spill] sm:$0xff] }
 0x598   :  { %v5720_v20 = vmax.f32 %v5660_v36, 0.0  ;;  %6330 = vmatpush.bf16.msra.mxu3 %v12099_v16  ;;  %7060 = vmatpush.bf16.msrb.mxu1 %v12129_v22  ;;  %v5290_v36 = vadd.f32 %v14176_v49, %v14166_v63 }
 0x599   :  { %v5438_v58 = vpop.f32.mrf.mxu2  ;;  %v5724_v37 = vmax.f32 %v5664_v33, 0.0 }
 0x59a   :  { %v5776_v21 = vpack.c.bf16 %v5720_v20, %v5719_v4  ;;  %v5439_v6 = vadd.f32 %v5438_v58, %v5400_v34  ;;  %v5323_v13 = vpop.f32.mrf.mxu3  ;;  %v14299_v14 = vpop.f32.mrf.mxu0 }
 0x59b   :  { %v5324_v53 = vadd.f32 %v5323_v13, %v5285_v12  ;;  %v5401_v30 = vpop.f32.mrf.mxu1  ;;  %v14639_v13 = vld [vmem:[#allocation48_spill] sm:$0xff] }
 0x59c   :  { %5812 = vst [vmem:[#allocation3 + $0x1c] sm:$0xff] %v5776_v21  ;;  %v5593_v3 = vadd.f32 %v5439_v6, %v14633_v25  ;;  %v5402_v32 = vadd.f32 %v5401_v30, %v14217_v31  ;;  %6331 = vmatpush.bf16.msra.mxu3 %v12098_v54  ;;  %7061 = vmatpush.bf16.msrb.mxu1 %v12128_v43  ;;  %v14638_v21 = vld [vmem:[#allocation70_spill] sm:$0xff]  ;;  %v14640_v30 = vld [vmem:[#allocation73_spill] sm:$0xff] }
 0x59d   :  { %v5597_v50 = vadd.f32 %v5324_v53, %v14634_v24 }
 0x59e   :  { %v5665_v45 = vadd.f32 %v14260_v2, %v5593_v3 }
 0x59f   :  { %5491 = vmatmul.bf16.gmra.mxu3 %v14635_v19  ;;  %v5669_v41 = vadd.f32 %v14256_v8, %v5597_v50 }
 0x5a0   :  { %v5725_v47 = vmax.f32 %v5665_v45, 0.0  ;;  %6332 = vmatpush.bf16.msra.mxu3 %v12097_v35  ;;  %7062 = vmatpush.bf16.msrb.mxu1 %v12127_v46  ;;  %v12112_v46 = vld [vmem:[#allocation11 + $0x278] sm:$0xff] }
 0x5a1   :  { %v5440_v17 = vpop.f32.mrf.mxu2  ;;  %v5729_v15 = vmax.f32 %v5669_v41, 0.0  ;;  %6339 = vmatpush.bf16.msrb.mxu2 %v12112_v46 }
 0x5a2   :  { %v5779_v57 = vpack.c.bf16 %v5725_v47, %v5724_v37  ;;  %v5441_v62 = vadd.f32 %v5440_v17, %v5402_v32  ;;  %v5326_v29 = vpop.f32.mrf.mxu3  ;;  %v14307_v24 = vpop.f32.mrf.mxu0  ;;  %v14641_v47 = vld [vmem:[#allocation72_spill] sm:$0xff]  ;;  %v14642_v17 = vld [vmem:[#allocation34_spill] sm:$0xff] }
 0x5a3   :  { %v5327_v61 = vadd.f32 %v5326_v29, %v14163_v0  ;;  %v5404_v5 = vpop.f32.mrf.mxu1 }
 0x5a4   :  { %5815 = vst [vmem:[#allocation3 + $0x30] sm:$0xff] %v5779_v57  ;;  %v5598_v59 = vadd.f32 %v5441_v62, %v14636_v55  ;;  %v5405_v0 = vadd.f32 %v5404_v5, %v14232_v18  ;;  %7063 = vmatpush.bf16.msrb.mxu1 %v12126_v56  ;;  %v14643_v56 = vld [vmem:[#allocation75_spill] sm:$0xff] }
 0x5a5   :  { %v5602_v38 = vadd.f32 %v5327_v61, %v14637_v9  ;;  %v5295_v61 = vadd.f32 %v14200_v1, %v14192_v26  ;;  %v10431_v9 = vld [vmem:[#allocation3 + $0x3c] sm:$0xf0] }
 0x5a6   :  { %v5670_v31 = vadd.f32 %v14260_v2, %v5598_v59  ;;  %5569 = vmatmul.bf16.gmra.mxu1 %v13896_v23 }
 0x5a7   :  { %v5674_v23 = vadd.f32 %v14256_v8, %v5602_v38 }
 0x5a8   :  { %v5730_v11 = vmax.f32 %v5670_v31, 0.0 }
 0x5a9   :  { %v5443_v4 = vpop.f32.mrf.mxu2  ;;  %v5734_v63 = vmax.f32 %v5674_v23, 0.0 }
 0x5aa   :  { %v5782_v20 = vpack.c.bf16 %v5730_v11, %v5729_v15  ;;  %v5444_v34 = vadd.f32 %v5443_v4, %v5405_v0  ;;  %v5328_v16 = vpop.f32.mrf.mxu3  ;;  %v12068_v11 = vld [vmem:[#allocation3 + $0x2c] sm:$0xf]  ;;  %v12035_v0 = vld [vmem:[#allocation11 + $0x38] sm:$0xff] }
 0x5ab   :  { %v5329_v12 = vadd.f32 %v5328_v16, %v5290_v36  ;;  %v5406_v58 = vpop.f32.mrf.mxu1  ;;  %v10437_v19 = vld [vmem:[#allocation3 + $0x30] sm:$0xf]  ;;  %v14644_v36 = vld [vmem:[#allocation49_spill] sm:$0xff]  ;;  %v10434_v1 = vor.u32 %v12068_v11, %v10431_v9  ;;  %v14647_v9 = vld [vmem:[#allocation79_spill] sm:$0xff] }
 0x5ac   :  { %5818 = vst [vmem:[#allocation3 + $0x44] sm:$0xff] %v5782_v20  ;;  %v5603_v6 = vadd.f32 %v5444_v34, %v14638_v21  ;;  %v5407_v22 = vadd.f32 %v5406_v58, %v14247_v39  ;;  %v12111_v4 = vld [vmem:[#allocation11 + $0x270] sm:$0xff]  ;;  %v12026_v21 = vld [vmem:[#allocation3 + $0x18] sm:$0xf0] }
 0x5ad   :  { %v5607_v53 = vadd.f32 %v5329_v12, %v14639_v13  ;;  %6340 = vmatpush.bf16.msrb.mxu2 %v12111_v4  ;;  %v12034_v58 = vld [vmem:[#allocation11 + $0x30] sm:$0xff] }
 0x5ae   :  { %v5675_v18 = vadd.f32 %v14260_v2, %v5603_v6  ;;  %v12110_v6 = vld [vmem:[#allocation11 + $0x268] sm:$0xff]  ;;  %v12156_v11 = vld [vmem:[#allocation11 + $0x3b0] sm:$0xff] }
 0x5af   :  { %5496 = vmatmul.bf16.gmra.mxu3 %v14640_v30  ;;  %v5679_v37 = vadd.f32 %v14256_v8, %v5607_v53 }
 0x5b0   :  { %v5735_v49 = vmax.f32 %v5675_v18, 0.0 }
 0x5b1   :  { %v5445_v33 = vpop.f32.mrf.mxu2  ;;  %v5739_v62 = vmax.f32 %v5679_v37, 0.0  ;;  %6341 = vmatpush.bf16.msrb.mxu2 %v12110_v6 }
 0x5b2   :  { %v5785_v25 = vpack.c.bf16 %v5735_v49, %v5734_v63  ;;  %v5446_v3 = vadd.f32 %v5445_v33, %v5407_v22  ;;  %v5331_v54 = vpop.f32.mrf.mxu3  ;;  %v10617_v49 = vld [vmem:[#allocation3 + $0x8] sm:$0xf]  ;;  %v12170_v22 = vld [vmem:[#allocation11 + $0x3f8] sm:$0xff] }
 0x5b3   :  { %v5332_v50 = vadd.f32 %v5331_v54, %v14189_v27  ;;  %v5409_v45 = vpop.f32.mrf.mxu1  ;;  %v12071_v43 = vld [vmem:[#allocation3 + $0x40] sm:$0xf0]  ;;  %v10439_v46 = vld [vmem:[#allocation3 + $0x44] sm:$0xf0] }
 0x5b4   :  { %5821 = vst [vmem:[#allocation3 + $0x58] sm:$0xff] %v5785_v25  ;;  %v5608_v32 = vadd.f32 %v5446_v3, %v14641_v47  ;;  %v10438_v35 = vor.u32 %v12071_v43, %v10437_v19  ;;  %v5410_v27 = vadd.f32 %v5409_v45, %v14262_v48  ;;  %v14320_v48 = vpop.f32.mrf.mxu0  ;;  %v14645_v25 = vld [vmem:[#allocation77_spill] sm:$0xff]  ;;  %v12033_v54 = vld [vmem:[#allocation11 + $0x28] sm:$0xff] }
 0x5b5   :  { %v5612_v57 = vadd.f32 %v5332_v50, %v14642_v17  ;;  %v14646_v50 = vld [vmem:[#allocation36_spill] sm:$0xff]  ;;  %v12109_v19 = vld [vmem:[#allocation11 + $0x260] sm:$0xff] }
 0x5b6   :  { %v5680_v39 = vadd.f32 %v14260_v2, %v5608_v32  ;;  %5574 = vmatmul.bf16.gmra.mxu1 %v13914_v28  ;;  %6319 = vmatmul.bf16.vlgmr.msra.gmra.mxu2 %v10438_v35  ;;  %v12032_v17 = vld [vmem:[#allocation11 + $0x20] sm:$0xff] }
 0x5b7   :  { %v5684_v28 = vadd.f32 %v14256_v8, %v5612_v57  ;;  %6342 = vmatpush.bf16.msrb.mxu2 %v12109_v19  ;;  %v5300_v57 = vadd.f32 %v14225_v52, %v14215_v44  ;;  %v12031_v44 = vld [vmem:[#allocation11 + $0x18] sm:$0xff]  ;;  %v14648_v52 = vld [vmem:[#allocation50_spill] sm:$0xff]  ;;  %v12165_v19 = vld [vmem:[#allocation11 + $0x3d0] sm:$0xff] }
 0x5b8   :  { %v5740_v29 = vmax.f32 %v5680_v39, 0.0 }
 0x5b9   :  { %v5448_v5 = vpop.f32.mrf.mxu2  ;;  %v5744_v34 = vmax.f32 %v5684_v28, 0.0 }
 0x5ba   :  { %v5788_v41 = vpack.c.bf16 %v5740_v29, %v5739_v62  ;;  %v5449_v55 = vadd.f32 %v5448_v5, %v5410_v27  ;;  %v5333_v59 = vpop.f32.mrf.mxu3  ;;  %v12108_v62 = vld [vmem:[#allocation11 + $0x258] sm:$0xff] }
 0x5bb   :  { %v5334_v38 = vadd.f32 %v5333_v59, %v5295_v61  ;;  %v5411_v31 = vpop.f32.mrf.mxu1  ;;  %v12157_v29 = vld [vmem:[#allocation11 + $0x3b8] sm:$0xff]  ;;  %v12168_v59 = vld [vmem:[#allocation11 + $0x3e8] sm:$0xff]  ;;  %6343 = vmatpush.bf16.msrb.mxu2 %v12108_v62 }
 0x5bc   :  { %5824 = vst [vmem:[#allocation3 + $0x6c] sm:$0xff] %v5788_v41  ;;  %v5613_v15 = vadd.f32 %v5449_v55, %v14643_v56  ;;  %v5412_v12 = vadd.f32 %v5411_v31, %v14274_v51  ;;  %v10618_v51 = vor.u32 %v12026_v21, %v10617_v49  ;;  %v14330_v37 = vpop.f32.mrf.mxu0  ;;  %v12069_v31 = vld [vmem:[#allocation3 + $0x34] sm:$0xf]  ;;  %7098 = vmatpush.bf16.msra.mxu0 %v12157_v29 }
 0x5bd   :  { %v5617_v26 = vadd.f32 %v5334_v38, %v14644_v36  ;;  %v10442_v56 = vor.u32 %v12069_v31, %v10439_v46  ;;  %v12167_v36 = vld [vmem:[#allocation11 + $0x3e0] sm:$0xff] }
 0x5be   :  { %v5685_v20 = vadd.f32 %v14260_v2, %v5613_v15  ;;  %v12107_v15 = vld [vmem:[#allocation11 + $0x250] sm:$0xff]  ;;  %v14649_v49 = vld [vmem:[#allocation81_spill] sm:$0xff] }
 0x5bf   :  { %6305 = vmatmul.bf16.vlgmr.msrb.gmra.mxu3 %v10434_v1  ;;  %v5689_v33 = vadd.f32 %v14256_v8, %v5617_v26  ;;  %6344 = vmatpush.bf16.msrb.mxu2 %v12107_v15  ;;  %v12163_v15 = vld [vmem:[#allocation11 + $0x3c0] sm:$0xff] }
 0x5c0   :  { %v5745_v16 = vmax.f32 %v5685_v20, 0.0  ;;  %6619 = vmatpush.bf16.msrb.mxu3 %v12035_v0  ;;  %v12030_v20 = vld [vmem:[#allocation11 + $0x10] sm:$0xff]  ;;  %7099 = vmatpush.bf16.msra.mxu0 %v12156_v11 }
 0x5c1   :  { %v5450_v23 = vpop.f32.mrf.mxu2  ;;  %v5749_v47 = vmax.f32 %v5689_v33, 0.0 }
 0x5c2   :  { %v5791_v13 = vpack.c.bf16 %v5745_v16, %v5744_v34  ;;  %v5451_v53 = vadd.f32 %v5450_v23, %v5412_v12  ;;  %v5336_v18 = vpop.f32.mrf.mxu3  ;;  %v10791_v12 = vld [vmem:[#allocation3 + $0x64] sm:$0xf0] }
 0x5c3   :  { %v5337_v30 = vadd.f32 %v5336_v18, %v14212_v40  ;;  %v5414_v63 = vpop.f32.mrf.mxu1  ;;  %v12169_v40 = vld [vmem:[#allocation11 + $0x3f0] sm:$0xff]  ;;  %v12155_v23 = vld [vmem:[#allocation11 + $0x3a8] sm:$0xff] }
 0x5c4   :  { %5827 = vst [vmem:[#allocation3 + $0x80] sm:$0xff] %v5791_v13  ;;  %v5618_v3 = vadd.f32 %v5451_v53, %v14645_v25  ;;  %6620 = vmatpush.bf16.msrb.mxu3 %v12034_v58  ;;  %v5415_v35 = vadd.f32 %v5414_v63, %v14286_v42  ;;  %v14340_v34 = vpop.f32.mrf.mxu0  ;;  %v12106_v58 = vld [vmem:[#allocation11 + $0x248] sm:$0xff]  ;;  %v12166_v63 = vld [vmem:[#allocation11 + $0x3d8] sm:$0xff]  ;;  %7100 = vmatpush.bf16.msra.mxu0 %v12155_v23 }
 0x5c5   :  { %v5622_v45 = vadd.f32 %v5337_v30, %v14646_v50  ;;  %v12113_v30 = vld [vmem:[#allocation3 + $0x54] sm:$0xf]  ;;  %v12029_v25 = vld [vmem:[#allocation11 + $0x8] sm:$0xff]  ;;  %6345 = vmatpush.bf16.msrb.mxu2 %v12106_v58  ;;  %v12154_v50 = vld [vmem:[#allocation11 + $0x3a0] sm:$0xff] }
 0x5c6   :  { %v5690_v43 = vadd.f32 %v14260_v2, %v5618_v3  ;;  %6655 = vmatmul.bf16.vlgmr.msra.gmra.mxu1 %v10618_v51  ;;  %v10794_v33 = vor.u32 %v12113_v30, %v10791_v12  ;;  %v14650_v3 = vld [vmem:[#allocation38_spill] sm:$0xff] }
 0x5c7   :  { %7467 = vmatpush.bf16.msra.mxu1 %v12170_v22  ;;  %v5694_v42 = vadd.f32 %v14256_v8, %v5622_v45  ;;  %v12059_v45 = vld [vmem:[#allocation11 + $0xf8] sm:$0xff] }
 0x5c8   :  { %v5750_v32 = vmax.f32 %v5690_v43, 0.0  ;;  %6621 = vmatpush.bf16.msrb.mxu3 %v12033_v54  ;;  %v12105_v54 = vld [vmem:[#allocation11 + $0x240] sm:$0xff]  ;;  %7101 = vmatpush.bf16.msra.mxu0 %v12154_v50 }
 0x5c9   :  { %v5453_v39 = vpop.f32.mrf.mxu2  ;;  %v5754_v26 = vmax.f32 %v5694_v42, 0.0  ;;  %6346 = vmatpush.bf16.msrb.mxu2 %v12105_v54  ;;  %v10609_v42 = vld [vmem:[#allocation3] sm:$0xf]  ;;  %v12194_v54 = vld [vmem:[#allocation11 + $0x4b8] sm:$0xff] }
 0x5ca   :  { %v5794_v27 = vpack.c.bf16 %v5750_v32, %v5749_v47  ;;  %v5454_v61 = vadd.f32 %v5453_v39, %v5415_v35  ;;  %v5338_v5 = vpop.f32.mrf.mxu3  ;;  %v12028_v32 = vld [vmem:[#allocation11] sm:$0xff]  ;;  %v5305_v35 = vadd.f32 %v14250_v7, %v14240_v60  ;;  %v12153_v39 = vld [vmem:[#allocation11 + $0x398] sm:$0xff]  ;;  %v14651_v60 = vld [vmem:[#allocation83_spill] sm:$0xff] }
 0x5cb   :  { %v5339_v41 = vadd.f32 %v5338_v5, %v5300_v57  ;;  %v5416_v55 = vpop.f32.mrf.mxu1  ;;  %7468 = vmatpush.bf16.msra.mxu1 %v12169_v40  ;;  %v12067_v57 = vld [vmem:[#allocation11 + $0x138] sm:$0xff]  ;;  %v12058_v5 = vld [vmem:[#allocation11 + $0xf0] sm:$0xff] }
 0x5cc   :  { %5830 = vst [vmem:[#allocation3 + $0x94] sm:$0xff] %v5794_v27  ;;  %v5623_v38 = vadd.f32 %v5454_v61, %v14647_v9  ;;  %6622 = vmatpush.bf16.msrb.mxu3 %v12032_v17  ;;  %v5417_v4 = vadd.f32 %v5416_v55, %v14299_v14  ;;  %v12025_v61 = vld [vmem:[#allocation3 + $0x10] sm:$0xf0]  ;;  %v14350_v46 = vpop.f32.mrf.mxu0  ;;  %v12164_v55 = vld [vmem:[#allocation11 + $0x3c8] sm:$0xff]  ;;  %7102 = vmatpush.bf16.msra.mxu0 %v12153_v39 }
 0x5cd   :  { %v5627_v28 = vadd.f32 %v5339_v41, %v14648_v52  ;;  %6661 = vmatpush.bf16.msra.mxu2 %v12059_v45  ;;  %v14652_v9 = vld [vmem:[#allocation51_spill] sm:$0xff]  ;;  %v10610_v31 = vor.u32 %v12025_v61, %v10609_v42  ;;  %v14654_v50 = vld [vmem:[#allocation57_spill] sm:$0xff] }
 0x5ce   :  { %v5695_v0 = vadd.f32 %v14260_v2, %v5623_v38  ;;  %v12152_v52 = vld [vmem:[#allocation11 + $0x390] sm:$0xff]  ;;  %v12061_v42 = vld [vmem:[#allocation11 + $0x108] sm:$0xff] }
 0x5cf   :  { %7469 = vmatpush.bf16.msra.mxu1 %v12168_v59  ;;  %6333 = vmatmul.bf16.vlgmr.msra.gmra.mxu3 %v10442_v56  ;;  %v5699_v14 = vadd.f32 %v14256_v8, %v5627_v28  ;;  %v12057_v56 = vld [vmem:[#allocation11 + $0xe8] sm:$0xff] }
 0x5d0   :  { %v5755_v1 = vmax.f32 %v5695_v0, 0.0  ;;  %6623 = vmatpush.bf16.msrb.mxu3 %v12031_v44  ;;  %v12066_v44 = vld [vmem:[#allocation11 + $0x130] sm:$0xff]  ;;  %7103 = vmatpush.bf16.msra.mxu0 %v12152_v52 }
 0x5d1   :  { %v5455_v16 = vpop.f32.mrf.mxu2  ;;  %v5759_v43 = vmax.f32 %v5699_v14, 0.0  ;;  %6662 = vmatpush.bf16.msra.mxu2 %v12058_v5  ;;  %v12201_v14 = vld [vmem:[#allocation11 + $0x4f0] sm:$0xff] }
 0x5d2   :  { %v5797_v21 = vpack.c.bf16 %v5755_v1, %v5754_v26  ;;  %v5456_v6 = vadd.f32 %v5455_v16, %v5417_v4  ;;  %v5341_v13 = vpop.f32.mrf.mxu3  ;;  %v12202_v26 = vld [vmem:[#allocation11 + $0x4f8] sm:$0xff]  ;;  %v12065_v4 = vld [vmem:[#allocation11 + $0x128] sm:$0xff]  ;;  %v12062_v5 = vld [vmem:[#allocation11 + $0x110] sm:$0xff] }
 0x5d3   :  { %v5342_v53 = vadd.f32 %v5341_v13, %v14237_v10  ;;  %v5419_v18 = vpop.f32.mrf.mxu1  ;;  %7470 = vmatpush.bf16.msra.mxu1 %v12167_v36  ;;  %v12151_v16 = vld [vmem:[#allocation11 + $0x388] sm:$0xff] }
 0x5d4   :  { %5833 = vst [vmem:[#allocation3 + $0xa8] sm:$0xff] %v5797_v21  ;;  %v5628_v22 = vadd.f32 %v5456_v6, %v14649_v49  ;;  %6624 = vmatpush.bf16.msrb.mxu3 %v12030_v20  ;;  %v5420_v47 = vadd.f32 %v5419_v18, %v14307_v24  ;;  %v12160_v20 = vld [vmem:[#allocation3 + $0x88] sm:$0xf0]  ;;  %v12056_v21 = vld [vmem:[#allocation11 + $0xe0] sm:$0xff]  ;;  %v14360_v49 = vpop.f32.mrf.mxu0  ;;  %7104 = vmatpush.bf16.msra.mxu0 %v12151_v16 }
 0x5d5   :  { %v5632_v51 = vadd.f32 %v5342_v53, %v14650_v3  ;;  %6663 = vmatpush.bf16.msra.mxu2 %v12057_v56  ;;  %v10969_v53 = vld [vmem:[#allocation3 + $0x78] sm:$0xf]  ;;  %v12197_v56 = vld [vmem:[#allocation11 + $0x4d0] sm:$0xff] }
 0x5d6   :  { %v5700_v10 = vadd.f32 %v14260_v2, %v5628_v22  ;;  %7064 = vmatmul.bf16.vlgmr.msrb.gmra.mxu1 %v10794_v33  ;;  %v14653_v18 = vld [vmem:[#allocation85_spill] sm:$0xff] }
 0x5d7   :  { %7471 = vmatpush.bf16.msra.mxu1 %v12166_v63  ;;  %v5704_v59 = vadd.f32 %v14256_v8, %v5632_v51  ;;  %v10970_v63 = vor.u32 %v12160_v20, %v10969_v53  ;;  %v12318_v33 = vld [vmem:[#allocation9] sm:$0x1f]  ;;  %v12064_v3 = vld [vmem:[#allocation11 + $0x120] sm:$0xff]  ;;  %v12196_v20 = vld [vmem:[#allocation11 + $0x4c8] sm:$0xff] }
 0x5d8   :  { %v5760_v40 = vmax.f32 %v5700_v10, 0.0  ;;  %6625 = vmatpush.bf16.msrb.mxu3 %v12029_v25  ;;  %v14362_v25 = vperm.slane %v12318_v33, 4  ;;  %v12195_v53 = vld [vmem:[#allocation11 + $0x4c0] sm:$0xff]  ;;  %v12188_v33 = vld [vmem:[#allocation11 + $0x488] sm:$0xff] }
 0x5d9   :  { %v5458_v17 = vpop.f32.mrf.mxu2  ;;  %v5764_v11 = vmax.f32 %v5704_v59, 0.0  ;;  %6664 = vmatpush.bf16.msra.mxu2 %v12056_v21  ;;  %v14655_v59 = vld [vmem:[#allocation66_spill] sm:$0xff] }
 0x5da   :  { %v5800_v62 = vpack.c.bf16 %v5760_v40, %v5759_v43  ;;  %v5459_v29 = vadd.f32 %v5458_v17, %v5420_v47  ;;  %v5343_v27 = vpop.f32.mrf.mxu3  ;;  %v12200_v43 = vld [vmem:[#allocation11 + $0x4e8] sm:$0xff]  ;;  %v12063_v47 = vld [vmem:[#allocation11 + $0x118] sm:$0xff]  ;;  %v12193_v17 = vld [vmem:[#allocation11 + $0x4b0] sm:$0xff] }
 0x5db   :  { %v5344_v41 = vadd.f32 %v5343_v27, %v5305_v35  ;;  %v5421_v24 = vpop.f32.mrf.mxu1  ;;  %7472 = vmatpush.bf16.msra.mxu1 %v12165_v19 }
 0x5dc   :  { %5836 = vst [vmem:[#allocation3 + $0xbc] sm:$0xff] %v5800_v62  ;;  %v5633_v7 = vadd.f32 %v5459_v29, %v14651_v60  ;;  %6626 = vmatpush.bf16.msrb.mxu3 %v12028_v32  ;;  %v5422_v36 = vadd.f32 %v5421_v24, %v14320_v48  ;;  %v12199_v29 = vld [vmem:[#allocation11 + $0x4e0] sm:$0xff]  ;;  %v12192_v24 = vld [vmem:[#allocation11 + $0x4a8] sm:$0xff] }
 0x5dd   :  { %v5637_v38 = vadd.f32 %v5344_v41, %v14652_v9  ;;  %v12053_v41 = vld [vmem:[#allocation11 + $0xc8] sm:$0xff] }
 0x5de   :  { %v5705_v28 = vadd.f32 %v14260_v2, %v5633_v7  ;;  %v12198_v7 = vld [vmem:[#allocation11 + $0x4d8] sm:$0xff] }
 0x5df   :  { %7473 = vmatpush.bf16.msra.mxu1 %v12164_v55  ;;  %6627 = vmatmul.bf16.vlgmr.msrb.gmra.mxu3 %v10610_v31  ;;  %v5709_v48 = vadd.f32 %v14256_v8, %v5637_v38  ;;  %v12055_v8 = vld [vmem:[#allocation11 + $0xd8] sm:$0xff]  ;;  %v14368_v55 = vpop.f32.mrf.mxu0  ;;  %v12052_v38 = vld [vmem:[#allocation11 + $0xc0] sm:$0xff] }
 0x5e0   :  { %6675 = vmatpush.bf16.msra.mxu3 %v12067_v57  ;;  %v5765_v0 = vmax.f32 %v5705_v28, 0.0  ;;  %6665 = vmatpush.bf16.msra.mxu2 %v12055_v8  ;;  %v12191_v31 = vld [vmem:[#allocation11 + $0x4a0] sm:$0xff] }
 0x5e1   :  { %v5460_v1 = vpop.f32.mrf.mxu2  ;;  %v5769_v45 = vmax.f32 %v5709_v48, 0.0 }
 0x5e2   :  { %v5803_v12 = vpack.c.bf16 %v5765_v0, %v5764_v11  ;;  %v5461_v58 = vadd.f32 %v5460_v1, %v5422_v36  ;;  %v5472_v23 = vpop.f32.mrf.mxu3  ;;  %v12060_v0 = vld [vmem:[#allocation11 + $0x100] sm:$0xff]  ;;  %v12149_v36 = vld [vmem:[#allocation11 + $0x378] sm:$0xff] }
 0x5e3   :  { %v5512_v6 = vadd.f32 %v14330_v37, %v5472_v23  ;;  %v5550_v13 = vpop.f32.mrf.mxu1  ;;  %7474 = vmatpush.bf16.msra.mxu1 %v12163_v15  ;;  %v12150_v37 = vld [vmem:[#allocation11 + $0x380] sm:$0xff]  ;;  %v12189_v23 = vld [vmem:[#allocation11 + $0x490] sm:$0xff] }
 0x5e4   :  { %6676 = vmatpush.bf16.msra.mxu3 %v12066_v44  ;;  %5839 = vst [vmem:[#allocation3 + $0xd0] sm:$0xff] %v5803_v12  ;;  %v5638_v30 = vadd.f32 %v5461_v58, %v14653_v18  ;;  %7105 = vmatpush.bf16.msra.mxu0 %v12150_v37  ;;  %v14656_v1 = vld [vmem:[#allocation61_spill] sm:$0xff]  ;;  %v12148_v58 = vld [vmem:[#allocation11 + $0x370] sm:$0xff] }
 0x5e5   :  { %v5551_v22 = vadd.f32 %v5550_v13, %v5512_v6 }
 0x5e6   :  { %v5710_v51 = vadd.f32 %v14260_v2, %v5638_v30  ;;  %7475 = vmatmul.bf16.vlgmr.msra.gmra.mxu1 %v10970_v63  ;;  %v12054_v2 = vld [vmem:[#allocation11 + $0xd0] sm:$0xff]  ;;  %v12147_v30 = vld [vmem:[#allocation11 + $0x368] sm:$0xff]  ;;  %v12239_v63 = vld [vmem:[#allocation11 + $0x5f8] sm:$0xff] }
 0x5e7   :  { %7523 = vmatpush.bf16.msrb.mxu1 %v12202_v26  ;;  %v5584_v10 = vadd.f32 %v5551_v22, %v14654_v50  ;;  %6666 = vmatpush.bf16.msra.mxu2 %v12054_v2  ;;  %v12190_v26 = vld [vmem:[#allocation11 + $0x498] sm:$0xff]  ;;  %v5523_v16 = vpop.f32.mrf.mxu0  ;;  %v12146_v50 = vld [vmem:[#allocation11 + $0x360] sm:$0xff] }
 0x5e8   :  { %6677 = vmatpush.bf16.msra.mxu3 %v12065_v4  ;;  %v5770_v19 = vmax.f32 %v5710_v51, 0.0  ;;  %7509 = vmatpush.bf16.msrb.mxu0 %v12194_v54  ;;  %v12145_v2 = vld [vmem:[#allocation11 + $0x358] sm:$0xff] }
 0x5e9   :  { %v5656_v40 = vadd.f32 %v14362_v25, %v5584_v10  ;;  %v12187_v10 = vld [vmem:[#allocation11 + $0x480] sm:$0xff] }
 0x5ea   :  { %v5806_v32 = vpack.c.bf16 %v5770_v19, %v5769_v45  ;;  %v5474_v35 = vpop.f32.mrf.mxu3 }
 0x5eb   :  { %7524 = vmatpush.bf16.msrb.mxu1 %v12201_v14  ;;  %v5716_v57 = vmax.f32 %v5656_v40, 0.0  ;;  %v5514_v39 = vadd.f32 %v14340_v34, %v5474_v35  ;;  %v5552_v62 = vpop.f32.mrf.mxu1  ;;  %6667 = vmatpush.bf16.msra.mxu2 %v12053_v41  ;;  %v12237_v35 = vld [vmem:[#allocation11 + $0x5e8] sm:$0xff] }
 0x5ec   :  { %6678 = vmatpush.bf16.msra.mxu3 %v12064_v3  ;;  %5842 = vst [vmem:[#allocation3 + $0xe4] sm:$0xff] %v5806_v32  ;;  %7510 = vmatpush.bf16.msrb.mxu0 %v12193_v17  ;;  %v14657_v3 = vld [vmem:[#allocation69_spill] sm:$0xff]  ;;  %v14658_v17 = vld [vmem:[#allocation71_spill] sm:$0xff] }
 0x5ed   :  { %v5774_v27 = vpack.c.bf16 %v5716_v57, %v5716_v57  ;;  %v5553_v61 = vadd.f32 %v5552_v62, %v5514_v39  ;;  %v12236_v62 = vld [vmem:[#allocation11 + $0x5e0] sm:$0xff] }
 0x5ef   :  { %7525 = vmatpush.bf16.msrb.mxu1 %v12200_v43  ;;  %5810 = vst [vmem:[#allocation3 + $0x10] sm:$0xf] %v5774_v27  ;;  %v5589_v60 = vadd.f32 %v5553_v61, %v14655_v59  ;;  %6668 = vmatpush.bf16.msra.mxu2 %v12052_v38  ;;  %v5526_v45 = vpop.f32.mrf.mxu0  ;;  %v12144_v27 = vld [vmem:[#allocation11 + $0x350] sm:$0xff]  ;;  %v14659_v38 = vld [vmem:[#allocation74_spill] sm:$0xff] }
 0x5f0   :  { %6679 = vmatpush.bf16.msra.mxu3 %v12063_v47  ;;  %7511 = vmatpush.bf16.msrb.mxu0 %v12192_v24 }
 0x5f1   :  { %v5661_v34 = vadd.f32 %v14362_v25, %v5589_v60  ;;  %v12141_v60 = vld [vmem:[#allocation11 + $0x338] sm:$0xff] }
 0x5f2   :  { %v5477_v9 = vpop.f32.mrf.mxu3 }
 0x5f3   :  { %7526 = vmatpush.bf16.msrb.mxu1 %v12199_v29  ;;  %v5721_v44 = vmax.f32 %v5661_v34, 0.0  ;;  %v5517_v52 = vadd.f32 %v14350_v46, %v5477_v9  ;;  %v5555_v28 = vpop.f32.mrf.mxu1  ;;  %v12143_v9 = vld [vmem:[#allocation11 + $0x348] sm:$0xff] }
 0x5f4   :  { %6680 = vmatpush.bf16.msra.mxu3 %v12062_v5  ;;  %7512 = vmatpush.bf16.msrb.mxu0 %v12191_v31 }
 0x5f5   :  { %v5777_v15 = vpack.c.bf16 %v5721_v44, %v5721_v44  ;;  %v5556_v11 = vadd.f32 %v5555_v28, %v5517_v52  ;;  %v12234_v28 = vld [vmem:[#allocation11 + $0x5d0] sm:$0xff] }
 0x5f6   :  { %v10625_v14 = vld [vmem:[#allocation3 + $0x10] sm:$0xf] }
 0x5f7   :  { %7527 = vmatpush.bf16.msrb.mxu1 %v12198_v7  ;;  %5813 = vst [vmem:[#allocation3 + $0x24] sm:$0xf] %v5777_v15  ;;  %v5594_v4 = vadd.f32 %v5556_v11, %v14656_v1  ;;  %v5528_v24 = vpop.f32.mrf.mxu0  ;;  %v12235_v7 = vld [vmem:[#allocation11 + $0x5d8] sm:$0xff]  ;;  %v12140_v15 = vld [vmem:[#allocation11 + $0x330] sm:$0xff]  ;;  %v12142_v11 = vld [vmem:[#allocation11 + $0x340] sm:$0xff] }
 0x5f8   :  { %6681 = vmatpush.bf16.msra.mxu3 %v12061_v42  ;;  %7513 = vmatpush.bf16.msrb.mxu0 %v12190_v26  ;;  %v12186_v1 = vld [vmem:[#allocation11 + $0x478] sm:$0xff] }
 0x5f9   :  { %v5666_v12 = vadd.f32 %v14362_v25, %v5594_v4  ;;  %v10799_v4 = vld [vmem:[#allocation3 + $0x6c] sm:$0xf0] }
 0x5fa   :  { %v5479_v46 = vpop.f32.mrf.mxu3 }
 0x5fb   :  { %7528 = vmatpush.bf16.msrb.mxu1 %v12197_v56  ;;  %v5726_v21 = vmax.f32 %v5666_v12, 0.0  ;;  %v5519_v6 = vadd.f32 %v14360_v49, %v5479_v46  ;;  %v5557_v13 = vpop.f32.mrf.mxu1  ;;  %v12238_v49 = vld [vmem:[#allocation11 + $0x5f0] sm:$0xff]  ;;  %v12233_v12 = vld [vmem:[#allocation11 + $0x5c8] sm:$0xff]  ;;  %v12114_v46 = vld [vmem:[#allocation3 + $0x5c] sm:$0xf] }
 0x5fc   :  { %6682 = vmatpush.bf16.msra.mxu3 %v12060_v0  ;;  %7514 = vmatpush.bf16.msrb.mxu0 %v12189_v23 }
 0x5fd   :  { %v5780_v48 = vpack.c.bf16 %v5726_v21, %v5726_v21  ;;  %v5558_v18 = vadd.f32 %v5557_v13, %v5519_v6  ;;  %v14660_v21 = vld [vmem:[#allocation76_spill] sm:$0xff]  ;;  %v10802_v13 = vor.u32 %v12114_v46, %v10799_v4  ;;  %v12159_v4 = vld [vmem:[#allocation3 + $0x84] sm:$0xf] }
 0x5fe   :  { %v12027_v22 = vld [vmem:[#allocation3 + $0x20] sm:$0xf0]  ;;  %v12227_v46 = vld [vmem:[#allocation11 + $0x598] sm:$0xff] }
 0x5ff   :  { %7529 = vmatpush.bf16.msrb.mxu1 %v12196_v20  ;;  %5816 = vst [vmem:[#allocation3 + $0x38] sm:$0xf] %v5780_v48  ;;  %v5599_v37 = vadd.f32 %v5558_v18, %v14657_v3  ;;  %v10626_v51 = vor.u32 %v12027_v22, %v10625_v14  ;;  %v5531_v23 = vpop.f32.mrf.mxu0  ;;  %v12232_v18 = vld [vmem:[#allocation11 + $0x5c0] sm:$0xff]  ;;  %v12184_v3 = vld [vmem:[#allocation11 + $0x468] sm:$0xff] }
 0x600   :  { %7084 = vmatpush.bf16.msrb.mxu3 %v12149_v36  ;;  %7515 = vmatpush.bf16.msrb.mxu0 %v12188_v33 }
 0x601   :  { %v5671_v8 = vadd.f32 %v14362_v25, %v5599_v37  ;;  %6683 = vmatmul.bf16.vlgmr.msra.gmra.mxu3 %v10626_v51  ;;  %v10619_v37 = vld [vmem:[#allocation3 + $0x1c] sm:$0xf0] }
 0x602   :  { %v5482_v54 = vpop.f32.mrf.mxu3 }
 0x603   :  { %7530 = vmatpush.bf16.msrb.mxu1 %v12195_v53  ;;  %v5731_v19 = vmax.f32 %v5671_v8, 0.0  ;;  %v5522_v43 = vadd.f32 %v14368_v55, %v5482_v54  ;;  %v5560_v40 = vpop.f32.mrf.mxu1  ;;  %v12185_v53 = vld [vmem:[#allocation11 + $0x470] sm:$0xff]  ;;  %v12137_v54 = vld [vmem:[#allocation11 + $0x318] sm:$0xff] }
 0x604   :  { %7085 = vmatpush.bf16.msrb.mxu3 %v12148_v58  ;;  %7516 = vmatpush.bf16.msrb.mxu0 %v12187_v10  ;;  %v12139_v58 = vld [vmem:[#allocation11 + $0x328] sm:$0xff] }
 0x605   :  { %v5783_v47 = vpack.c.bf16 %v5731_v19, %v5731_v19  ;;  %v5561_v32 = vadd.f32 %v5560_v40, %v5522_v43  ;;  %v14661_v19 = vld [vmem:[#allocation78_spill] sm:$0xff] }
 0x606   :  { %v10445_v34 = vld [vmem:[#allocation3 + $0x38] sm:$0xf] }
 0x607   :  { %7934 = vmatpush.bf16.msra.mxu1 %v12239_v63  ;;  %5819 = vst [vmem:[#allocation3 + $0x4c] sm:$0xf] %v5783_v47  ;;  %v5604_v57 = vadd.f32 %v5561_v32, %v14658_v17  ;;  %v12138_v63 = vld [vmem:[#allocation11 + $0x320] sm:$0xff] }
 0x608   :  { %7086 = vmatpush.bf16.msrb.mxu3 %v12147_v30  ;;  %v12183_v32 = vld [vmem:[#allocation11 + $0x460] sm:$0xff] }
 0x609   :  { %v5676_v39 = vadd.f32 %v14362_v25, %v5604_v57  ;;  %v12136_v57 = vld [vmem:[#allocation11 + $0x310] sm:$0xff] }
 0x60a   :  { %v5484_v29 = vpop.f32.mrf.mxu3 }
 0x60b   :  { %7935 = vmatpush.bf16.msra.mxu1 %v12238_v49  ;;  %v5736_v61 = vmax.f32 %v5676_v39, 0.0  ;;  %v5524_v5 = vadd.f32 %v5523_v16, %v5484_v29  ;;  %v5562_v41 = vpop.f32.mrf.mxu1  ;;  %v12024_v49 = vld [vmem:[#allocation3 + $0xc] sm:$0xf] }
 0x60c   :  { %7087 = vmatpush.bf16.msrb.mxu3 %v12146_v50  ;;  %v10622_v40 = vor.u32 %v12024_v49, %v10619_v37  ;;  %v12230_v39 = vld [vmem:[#allocation11 + $0x5b0] sm:$0xff]  ;;  %v12176_v49 = vld [vmem:[#allocation11 + $0x428] sm:$0xff] }
 0x60d   :  { %v5786_v55 = vpack.c.bf16 %v5736_v61, %v5736_v61  ;;  %v5563_v59 = vadd.f32 %v5562_v41, %v5524_v5  ;;  %v12182_v61 = vld [vmem:[#allocation11 + $0x458] sm:$0xff] }
 0x60e   :  { %v12072_v42 = vld [vmem:[#allocation3 + $0x48] sm:$0xf0] }
 0x60f   :  { %7936 = vmatpush.bf16.msra.mxu1 %v12237_v35  ;;  %5822 = vst [vmem:[#allocation3 + $0x60] sm:$0xf] %v5786_v55  ;;  %v5609_v31 = vadd.f32 %v5563_v59, %v14659_v38  ;;  %v10446_v44 = vor.u32 %v12072_v42, %v10445_v34  ;;  %v5533_v35 = vpop.f32.mrf.mxu0  ;;  %v12229_v55 = vld [vmem:[#allocation11 + $0x5a8] sm:$0xff]  ;;  %v14662_v59 = vld [vmem:[#allocation80_spill] sm:$0xff]  ;;  %v12228_v38 = vld [vmem:[#allocation11 + $0x5a0] sm:$0xff] }
 0x610   :  { %7088 = vmatpush.bf16.msrb.mxu3 %v12145_v2 }
 0x611   :  { %v5681_v52 = vadd.f32 %v14362_v25, %v5609_v31  ;;  %6347 = vmatmul.bf16.vlgmr.msrb.gmra.mxu2 %v10446_v44 }
 0x612   :  { %7070 = vmatpush.bf16.msrb.mxu2 %v12141_v60  ;;  %v5487_v56 = vpop.f32.mrf.mxu3 }
 0x613   :  { %7937 = vmatpush.bf16.msra.mxu1 %v12236_v62  ;;  %v5741_v0 = vmax.f32 %v5681_v52, 0.0  ;;  %v5527_v36 = vadd.f32 %v5526_v45, %v5487_v56  ;;  %v5565_v26 = vpop.f32.mrf.mxu1  ;;  %v12231_v45 = vld [vmem:[#allocation11 + $0x5b8] sm:$0xff] }
 0x614   :  { %7089 = vmatpush.bf16.msrb.mxu3 %v12144_v27  ;;  %v12178_v56 = vld [vmem:[#allocation11 + $0x438] sm:$0xff] }
 0x615   :  { %v5789_v20 = vpack.c.bf16 %v5741_v0, %v5741_v0  ;;  %v5566_v16 = vadd.f32 %v5565_v26, %v5527_v36  ;;  %v10979_v0 = vld [vmem:[#allocation3 + $0x94] sm:$0xf0] }
 0x616   :  { %7071 = vmatpush.bf16.msrb.mxu2 %v12140_v15  ;;  %v10805_v50 = vld [vmem:[#allocation3 + $0x60] sm:$0xf] }
 0x617   :  { %7938 = vmatpush.bf16.msra.mxu1 %v12235_v7  ;;  %5825 = vst [vmem:[#allocation3 + $0x74] sm:$0xf] %v5789_v20  ;;  %v5614_v6 = vadd.f32 %v5566_v16, %v14660_v21  ;;  %v12181_v7 = vld [vmem:[#allocation11 + $0x450] sm:$0xff]  ;;  %v5536_v31 = vpop.f32.mrf.mxu0  ;;  %v12180_v15 = vld [vmem:[#allocation11 + $0x448] sm:$0xff]  ;;  %v10982_v21 = vor.u32 %v12159_v4, %v10979_v0  ;;  %v12272_v0 = vld [vmem:[#allocation11 + $0x6d8] sm:$0xff] }
 0x618   :  { %7090 = vmatpush.bf16.msrb.mxu3 %v12143_v9  ;;  %v12134_v9 = vld [vmem:[#allocation11 + $0x300] sm:$0xff] }
 0x619   :  { %v5686_v48 = vadd.f32 %v14362_v25, %v5614_v6 }
 0x61a   :  { %7072 = vmatpush.bf16.msrb.mxu2 %v12139_v58  ;;  %v5489_v30 = vpop.f32.mrf.mxu3  ;;  %v14663_v58 = vld [vmem:[#allocation82_spill] sm:$0xff] }
 0x61b   :  { %7939 = vmatpush.bf16.msra.mxu1 %v12234_v28  ;;  %v5746_v14 = vmax.f32 %v5686_v48, 0.0  ;;  %v5529_v22 = vadd.f32 %v5528_v24, %v5489_v30  ;;  %v5567_v33 = vpop.f32.mrf.mxu1  ;;  %v12135_v24 = vld [vmem:[#allocation11 + $0x308] sm:$0xff]  ;;  %v12276_v48 = vld [vmem:[#allocation11 + $0x6f8] sm:$0xff] }
 0x61c   :  { %7091 = vmatpush.bf16.msrb.mxu3 %v12142_v11  ;;  %v12116_v11 = vld [vmem:[#allocation3 + $0x68] sm:$0xf0] }
 0x61d   :  { %v5792_v51 = vpack.c.bf16 %v5746_v14, %v5746_v14  ;;  %v5568_v8 = vadd.f32 %v5567_v33, %v5529_v22  ;;  %v14391_v14 = vpop.f32.mrf.mxu2  ;;  %v12226_v33 = vld [vmem:[#allocation11 + $0x590] sm:$0xff] }
 0x61e   :  { %7073 = vmatpush.bf16.msrb.mxu2 %v12138_v63  ;;  %v12117_v10 = vld [vmem:[#allocation3 + $0x70] sm:$0xf0] }
 0x61f   :  { %7092 = vmatmul.bf16.vlgmr.msrb.gmra.mxu3 %v10802_v13  ;;  %7940 = vmatpush.bf16.msra.mxu1 %v12233_v12  ;;  %5828 = vst [vmem:[#allocation3 + $0x88] sm:$0xf] %v5792_v51  ;;  %v5619_v43 = vadd.f32 %v5568_v8, %v14661_v19  ;;  %v10806_v47 = vor.u32 %v12117_v10, %v10805_v50  ;;  %v12177_v13 = vld [vmem:[#allocation11 + $0x430] sm:$0xff]  ;;  %v12161_v63 = vld [vmem:[#allocation3 + $0x90] sm:$0xf0] }
 0x620   :  { %7495 = vmatpush.bf16.msra.mxu3 %v12186_v1  ;;  %v10797_v1 = vld [vmem:[#allocation3 + $0x58] sm:$0xf]  ;;  %v10977_v8 = vld [vmem:[#allocation3 + $0x80] sm:$0xf]  ;;  %v12275_v50 = vld [vmem:[#allocation11 + $0x6f0] sm:$0xff] }
 0x621   :  { %v5691_v2 = vadd.f32 %v14362_v25, %v5619_v43  ;;  %6669 = vmatmul.bf16.vlgmr.msra.gmra.mxu2 %v10622_v40  ;;  %7106 = vmatmul.bf16.vlgmr.msra.gmra.mxu0 %v10806_v47  ;;  %v10798_v20 = vor.u32 %v12116_v11, %v10797_v1  ;;  %v12222_v10 = vld [vmem:[#allocation11 + $0x570] sm:$0xff]  ;;  %v12225_v40 = vld [vmem:[#allocation11 + $0x588] sm:$0xff] }
 0x622   :  { %7074 = vmatpush.bf16.msrb.mxu2 %v12137_v54  ;;  %7920 = vmatpush.bf16.msra.mxu0 %v12231_v45  ;;  %v5492_v17 = vpop.f32.mrf.mxu3  ;;  %v10978_v54 = vor.u32 %v12161_v63, %v10977_v8  ;;  %v5538_v45 = vpop.f32.mrf.mxu0  ;;  %v14664_v47 = vld [vmem:[#allocation84_spill] sm:$0xff]  ;;  %v12217_v63 = vld [vmem:[#allocation11 + $0x548] sm:$0xff] }
 0x623   :  { %7941 = vmatpush.bf16.msra.mxu1 %v12232_v18  ;;  %v5751_v62 = vmax.f32 %v5691_v2, 0.0  ;;  %v5532_v29 = vadd.f32 %v5531_v23, %v5492_v17  ;;  %v5570_v27 = vpop.f32.mrf.mxu1  ;;  %v12223_v18 = vld [vmem:[#allocation11 + $0x578] sm:$0xff]  ;;  %v12274_v2 = vld [vmem:[#allocation11 + $0x6e8] sm:$0xff] }
 0x624   :  { %7496 = vmatpush.bf16.msra.mxu3 %v12185_v53  ;;  %v12179_v53 = vld [vmem:[#allocation11 + $0x440] sm:$0xff]  ;;  %v12221_v17 = vld [vmem:[#allocation11 + $0x568] sm:$0xff] }
 0x625   :  { %v5795_v5 = vpack.c.bf16 %v5751_v62, %v5751_v62  ;;  %v5571_v41 = vadd.f32 %v5570_v27, %v5532_v29  ;;  %v12224_v62 = vld [vmem:[#allocation11 + $0x580] sm:$0xff] }
 0x626   :  { %7075 = vmatpush.bf16.msrb.mxu2 %v12136_v57  ;;  %7921 = vmatpush.bf16.msra.mxu0 %v12230_v39  ;;  %v10985_v16 = vld [vmem:[#allocation3 + $0x88] sm:$0xf] }
 0x627   :  { %5831 = vst [vmem:[#allocation3 + $0x9c] sm:$0xf] %v5795_v5  ;;  %v5624_v60 = vadd.f32 %v5571_v41, %v14662_v59  ;;  %v12174_v5 = vld [vmem:[#allocation11 + $0x418] sm:$0xff]  ;;  %v12220_v59 = vld [vmem:[#allocation11 + $0x560] sm:$0xff] }
 0x628   :  { %7497 = vmatpush.bf16.msra.mxu3 %v12184_v3  ;;  %v12268_v41 = vld [vmem:[#allocation11 + $0x6b8] sm:$0xff] }
 0x629   :  { %v5696_v34 = vadd.f32 %v14362_v25, %v5624_v60  ;;  %v12206_v60 = vld [vmem:[#allocation3 + $0xb8] sm:$0xf0] }
 0x62a   :  { %7076 = vmatpush.bf16.msrb.mxu2 %v12135_v24  ;;  %7922 = vmatpush.bf16.msra.mxu0 %v12229_v55  ;;  %v5494_v42 = vpop.f32.mrf.mxu3  ;;  %v6294_v24 = vpop.f32.mrf.mxu2  ;;  %v12273_v55 = vld [vmem:[#allocation11 + $0x6e0] sm:$0xff] }
 0x62b   :  { %v5756_v44 = vmax.f32 %v5696_v34, 0.0  ;;  %v5534_v52 = vadd.f32 %v5533_v35, %v5494_v42  ;;  %v5572_v28 = vpop.f32.mrf.mxu1  ;;  %v12175_v35 = vld [vmem:[#allocation11 + $0x420] sm:$0xff] }
 0x62c   :  { %7498 = vmatpush.bf16.msra.mxu3 %v12183_v32  ;;  %v11159_v42 = vld [vmem:[#allocation3 + $0xbc] sm:$0xf0] }
 0x62d   :  { %v5798_v36 = vpack.c.bf16 %v5756_v44, %v5756_v44  ;;  %v5573_v26 = vadd.f32 %v5572_v28, %v5534_v52  ;;  %v12204_v28 = vld [vmem:[#allocation3 + $0xac] sm:$0xf] }
 0x62e   :  { %7077 = vmatpush.bf16.msrb.mxu2 %v12134_v9  ;;  %7923 = vmatpush.bf16.msra.mxu0 %v12228_v38  ;;  %v12162_v12 = vld [vmem:[#allocation3 + $0x98] sm:$0xf0]  ;;  %v11157_v9 = vld [vmem:[#allocation3 + $0xa8] sm:$0xf]  ;;  %v14395_v38 = vpop.f32.mrf.mxu0  ;;  %v11162_v11 = vor.u32 %v12204_v28, %v11159_v42  ;;  %v12256_v28 = vld [vmem:[#allocation11 + $0x658] sm:$0xff] }
 0x62f   :  { %5834 = vst [vmem:[#allocation3 + $0xb0] sm:$0xf] %v5798_v36  ;;  %v5629_v23 = vadd.f32 %v5573_v26, %v14663_v58  ;;  %v10986_v6 = vor.u32 %v12162_v12, %v10985_v16  ;;  %v11158_v52 = vor.u32 %v12206_v60, %v11157_v9  ;;  %v12219_v36 = vld [vmem:[#allocation11 + $0x558] sm:$0xff]  ;;  %v12172_v12 = vld [vmem:[#allocation11 + $0x408] sm:$0xff]  ;;  %v12257_v42 = vld [vmem:[#allocation11 + $0x660] sm:$0xff] }
 0x630   :  { %7499 = vmatpush.bf16.msra.mxu3 %v12182_v61 }
 0x631   :  { %v5701_v30 = vadd.f32 %v14362_v25, %v5629_v23  ;;  %7078 = vmatmul.bf16.vlgmr.msrb.gmra.mxu2 %v10798_v20  ;;  %7517 = vmatmul.bf16.vlgmr.msrb.gmra.mxu0 %v10982_v21  ;;  %v12271_v23 = vld [vmem:[#allocation11 + $0x6d0] sm:$0xff] }
 0x632   :  { %7481 = vmatpush.bf16.msra.mxu2 %v12178_v56  ;;  %7531 = vmatmul.bf16.vlgmr.msrb.gmra.mxu1 %v10986_v6  ;;  %v5497_v22 = vpop.f32.mrf.mxu3  ;;  %v12173_v56 = vld [vmem:[#allocation11 + $0x410] sm:$0xff] }
 0x633   :  { %7924 = vmatpush.bf16.msra.mxu0 %v12227_v46  ;;  %v5761_v3 = vmax.f32 %v5701_v30, 0.0  ;;  %v5537_v37 = vadd.f32 %v5536_v31, %v5497_v22  ;;  %v5575_v51 = vpop.f32.mrf.mxu1  ;;  %8345 = vmatpush.bf16.msrb.mxu1 %v12276_v48  ;;  %v14665_v31 = vld [vmem:[#allocation86_spill] sm:$0xff]  ;;  %v12218_v21 = vld [vmem:[#allocation11 + $0x550] sm:$0xff] }
 0x634   :  { %7500 = vmatpush.bf16.msra.mxu3 %v12181_v7  ;;  %v12266_v46 = vld [vmem:[#allocation11 + $0x6a8] sm:$0xff] }
 0x635   :  { %v5801_v19 = vpack.c.bf16 %v5761_v3, %v5761_v3  ;;  %v5576_v43 = vadd.f32 %v5575_v51, %v5537_v37  ;;  %v12270_v48 = vld [vmem:[#allocation11 + $0x6c8] sm:$0xff]  ;;  %v12158_v37 = vld [vmem:[#allocation3 + $0x7c] sm:$0xf]  ;;  %v12264_v51 = vld [vmem:[#allocation11 + $0x698] sm:$0xff] }
 0x636   :  { %7482 = vmatpush.bf16.msra.mxu2 %v12177_v13  ;;  %v14402_v30 = vpop.f32.mrf.mxu0 }
 0x637   :  { %7925 = vmatpush.bf16.msra.mxu0 %v12226_v33  ;;  %5837 = vst [vmem:[#allocation3 + $0xc4] sm:$0xf] %v5801_v19  ;;  %v5634_v32 = vadd.f32 %v5576_v43, %v14664_v47  ;;  %8346 = vmatpush.bf16.msrb.mxu1 %v12275_v50  ;;  %v12216_v50 = vld [vmem:[#allocation11 + $0x540] sm:$0xff]  ;;  %v12263_v43 = vld [vmem:[#allocation11 + $0x690] sm:$0xff]  ;;  %v12213_v47 = vld [vmem:[#allocation11 + $0x528] sm:$0xff] }
 0x638   :  { %7501 = vmatpush.bf16.msra.mxu3 %v12180_v15  ;;  %v12267_v15 = vld [vmem:[#allocation11 + $0x6b0] sm:$0xff]  ;;  %v11151_v19 = vld [vmem:[#allocation3 + $0xb4] sm:$0xf0] }
 0x639   :  { %v5706_v57 = vadd.f32 %v14362_v25, %v5634_v32  ;;  %v6320_v58 = vpop.f32.mrf.mxu2 }
 0x63a   :  { %7483 = vmatpush.bf16.msra.mxu2 %v12176_v49  ;;  %v5499_v39 = vpop.f32.mrf.mxu3  ;;  %v12269_v49 = vld [vmem:[#allocation11 + $0x6c0] sm:$0xff] }
 0x63b   :  { %7926 = vmatpush.bf16.msra.mxu0 %v12225_v40  ;;  %v5766_v29 = vmax.f32 %v5706_v57, 0.0  ;;  %v5539_v27 = vadd.f32 %v5538_v45, %v5499_v39  ;;  %v5577_v61 = vpop.f32.mrf.mxu1  ;;  %8347 = vmatpush.bf16.msrb.mxu1 %v12274_v2  ;;  %v12251_v45 = vld [vmem:[#allocation3 + $0xe0] sm:$0xf0]  ;;  %v11337_v40 = vld [vmem:[#allocation3 + $0xd0] sm:$0xf] }
 0x63c   :  { %7502 = vmatpush.bf16.msra.mxu3 %v12179_v53  ;;  %v12265_v53 = vld [vmem:[#allocation11 + $0x6a0] sm:$0xff]  ;;  %v11338_v32 = vor.u32 %v12251_v45, %v11337_v40  ;;  %v12259_v57 = vld [vmem:[#allocation11 + $0x670] sm:$0xff] }
 0x63d   :  { %v5804_v7 = vpack.c.bf16 %v5766_v29, %v5766_v29  ;;  %v5578_v34 = vadd.f32 %v5577_v61, %v5539_v27  ;;  %v12262_v27 = vld [vmem:[#allocation11 + $0x688] sm:$0xff]  ;;  %v12285_v45 = vld [vmem:[#allocation11 + $0x740] sm:$0xff] }
 0x63e   :  { %7484 = vmatpush.bf16.msra.mxu2 %v12175_v35  ;;  %v12203_v35 = vld [vmem:[#allocation3 + $0xa4] sm:$0xf]  ;;  %v7051_v39 = vpop.f32.mrf.mxu0 }
 0x63f   :  { %7503 = vmatmul.bf16.vlgmr.msra.gmra.mxu3 %v10978_v54  ;;  %7927 = vmatpush.bf16.msra.mxu0 %v12224_v62  ;;  %5840 = vst [vmem:[#allocation3 + $0xd8] sm:$0xf] %v5804_v7  ;;  %v5639_v44 = vadd.f32 %v5578_v34, %v14665_v31  ;;  %v12214_v54 = vld [vmem:[#allocation11 + $0x530] sm:$0xff]  ;;  %v11331_v7 = vld [vmem:[#allocation3 + $0xdc] sm:$0xf0] }
 0x640   :  { %7906 = vmatpush.bf16.msrb.mxu3 %v12223_v18  ;;  %8348 = vmatpush.bf16.msrb.mxu1 %v12273_v55  ;;  %v12215_v18 = vld [vmem:[#allocation11 + $0x538] sm:$0xff]  ;;  %v12248_v31 = vld [vmem:[#allocation3 + $0xcc] sm:$0xf] }
 0x641   :  { %v5711_v26 = vadd.f32 %v14362_v25, %v5639_v44  ;;  %v12171_v25 = vld [vmem:[#allocation11 + $0x400] sm:$0xff]  ;;  %v6322_v55 = vpop.f32.mrf.mxu2  ;;  %v11334_v44 = vor.u32 %v12248_v31, %v11331_v7  ;;  %v11339_v7 = vld [vmem:[#allocation3 + $0xe4] sm:$0xf0] }
 0x642   :  { %7485 = vmatpush.bf16.msra.mxu2 %v12174_v5  ;;  %7928 = vmatmul.bf16.vlgmr.msra.gmra.mxu0 %v11158_v52  ;;  %v6306_v1 = vpop.f32.mrf.mxu3  ;;  %v12212_v5 = vld [vmem:[#allocation11 + $0x520] sm:$0xff]  ;;  %v12210_v52 = vld [vmem:[#allocation11 + $0x510] sm:$0xff] }
 0x643   :  { %8331 = vmatpush.bf16.msrb.mxu0 %v12268_v41  ;;  %7942 = vmatmul.bf16.vlgmr.msra.gmra.mxu1 %v11162_v11  ;;  %v5771_v4 = vmax.f32 %v5711_v26, 0.0  ;;  %v6307_v20 = vadd.f32 %v6306_v1, %v14391_v14  ;;  %v14400_v16 = vpop.f32.mrf.mxu1  ;;  %v10971_v14 = vld [vmem:[#allocation3 + $0x8c] sm:$0xf0]  ;;  %v12258_v41 = vld [vmem:[#allocation11 + $0x668] sm:$0xff]  ;;  %v12208_v11 = vld [vmem:[#allocation11 + $0x500] sm:$0xff] }
 0x644   :  { %7907 = vmatpush.bf16.msrb.mxu3 %v12222_v10  ;;  %8349 = vmatpush.bf16.msrb.mxu1 %v12272_v0  ;;  %v10974_v8 = vor.u32 %v12158_v37, %v10971_v14  ;;  %v12260_v10 = vld [vmem:[#allocation11 + $0x678] sm:$0xff]  ;;  %v11149_v1 = vld [vmem:[#allocation3 + $0xa0] sm:$0xf] }
 0x645   :  { %v5807_v6 = vpack.c.bf16 %v5771_v4, %v5771_v4  ;;  %v6321_v13 = vadd.f32 %v6320_v58, %v6307_v20  ;;  %v12247_v0 = vld [vmem:[#allocation11 + $0x638] sm:$0xff]  ;;  %v12246_v20 = vld [vmem:[#allocation11 + $0x630] sm:$0xff]  ;;  %v12250_v58 = vld [vmem:[#allocation3 + $0xd8] sm:$0xf0] }
 0x646   :  { %7486 = vmatpush.bf16.msra.mxu2 %v12173_v56  ;;  %v12209_v56 = vld [vmem:[#allocation11 + $0x508] sm:$0xff]  ;;  %v12205_v26 = vld [vmem:[#allocation3 + $0xb0] sm:$0xf0]  ;;  %v12240_v37 = vld [vmem:[#allocation11 + $0x600] sm:$0xff] }
 0x647   :  { %8332 = vmatpush.bf16.msrb.mxu0 %v12267_v15  ;;  %5843 = vst [vmem:[#allocation3 + $0xec] sm:$0xf] %v5807_v6  ;;  %v12255_v15 = vld [vmem:[#allocation11 + $0x650] sm:$0xff]  ;;  %v11150_v4 = vor.u32 %v12205_v26, %v11149_v1  ;;  %v12288_v14 = vld [vmem:[#allocation11 + $0x758] sm:$0xff] }
 0x648   :  { %7908 = vmatpush.bf16.msrb.mxu3 %v12221_v17  ;;  %8350 = vmatpush.bf16.msrb.mxu1 %v12271_v23  ;;  %v11154_v17 = vor.u32 %v12203_v35, %v11151_v19  ;;  %v12245_v23 = vld [vmem:[#allocation11 + $0x628] sm:$0xff]  ;;  %v11345_v40 = vld [vmem:[#allocation3 + $0xd8] sm:$0xf] }
 0x64a   :  { %7487 = vmatpush.bf16.msra.mxu2 %v12172_v12  ;;  %v6308_v22 = vpop.f32.mrf.mxu3  ;;  %v12253_v12 = vld [vmem:[#allocation11 + $0x640] sm:$0xff] }
 0x64b   :  { %8333 = vmatpush.bf16.msrb.mxu0 %v12266_v46  ;;  %v6309_v33 = vadd.f32 %v6308_v22, %v6294_v24  ;;  %v14404_v3 = vpop.f32.mrf.mxu1  ;;  %v12261_v24 = vld [vmem:[#allocation11 + $0x680] sm:$0xff]  ;;  %v12292_v46 = vld [vmem:[#allocation11 + $0x778] sm:$0xff]  ;;  %v12241_v22 = vld [vmem:[#allocation11 + $0x608] sm:$0xff] }
 0x64c   :  { %7909 = vmatpush.bf16.msrb.mxu3 %v12220_v59  ;;  %8351 = vmatpush.bf16.msrb.mxu1 %v12270_v48  ;;  %v12211_v59 = vld [vmem:[#allocation11 + $0x518] sm:$0xff] }
 0x64d   :  { %v6323_v60 = vadd.f32 %v6322_v55, %v6309_v33  ;;  %v12243_v48 = vld [vmem:[#allocation11 + $0x618] sm:$0xff]  ;;  %v12287_v33 = vld [vmem:[#allocation11 + $0x750] sm:$0xff]  ;;  %v12277_v55 = vld [vmem:[#allocation11 + $0x700] sm:$0xff] }
 0x64e   :  { %7488 = vmatpush.bf16.msra.mxu2 %v12171_v25  ;;  %v12244_v25 = vld [vmem:[#allocation11 + $0x620] sm:$0xff]  ;;  %v12252_v19 = vld [vmem:[#allocation3 + $0xe8] sm:$0xf0] }
 0x64f   :  { %8334 = vmatpush.bf16.msrb.mxu0 %v12265_v53  ;;  %v12290_v53 = vld [vmem:[#allocation11 + $0x768] sm:$0xff] }
 0x650   :  { %7910 = vmatpush.bf16.msrb.mxu3 %v12219_v36  ;;  %8352 = vmatpush.bf16.msrb.mxu1 %v12269_v49  ;;  %v12254_v36 = vld [vmem:[#allocation11 + $0x648] sm:$0xff] }
 0x651   :  { %7489 = vmatmul.bf16.vlgmr.msra.gmra.mxu2 %v10974_v8  ;;  %v12286_v8 = vld [vmem:[#allocation11 + $0x748] sm:$0xff] }
 0x652   :  { %7892 = vmatpush.bf16.msrb.mxu2 %v12215_v18  ;;  %v6334_v2 = vpop.f32.mrf.mxu3  ;;  %v12289_v18 = vld [vmem:[#allocation11 + $0x760] sm:$0xff]  ;;  %v12207_v49 = vld [vmem:[#allocation3 + $0xc0] sm:$0xf0] }
 0x653   :  { %8335 = vmatpush.bf16.msrb.mxu0 %v12264_v51  ;;  %8353 = vmatmul.bf16.vlgmr.msrb.gmra.mxu1 %v11338_v32  ;;  %v14406_v62 = vadd.f32 %v6334_v2, %v6321_v13  ;;  %v7065_v29 = vpop.f32.mrf.mxu1  ;;  %v12291_v13 = vld [vmem:[#allocation11 + $0x770] sm:$0xff]  ;;  %v12284_v51 = vld [vmem:[#allocation11 + $0x738] sm:$0xff]  ;;  %v12281_v32 = vld [vmem:[#allocation11 + $0x720] sm:$0xff] }
 0x654   :  { %7911 = vmatpush.bf16.msrb.mxu3 %v12218_v21  ;;  %v14408_v61 = vadd.f32 %v7065_v29, %v7051_v39  ;;  %v11329_v21 = vld [vmem:[#allocation3 + $0xc8] sm:$0xf]  ;;  %v12280_v2 = vld [vmem:[#allocation11 + $0x718] sm:$0xff] }
 0x655   :  { %v11330_v6 = vor.u32 %v12250_v58, %v11329_v21  ;;  %v12279_v39 = vld [vmem:[#allocation11 + $0x710] sm:$0xff] }
 0x656   :  { %7893 = vmatpush.bf16.msrb.mxu2 %v12214_v54  ;;  %v11165_v54 = vld [vmem:[#allocation3 + $0xb0] sm:$0xf] }
 0x657   :  { %8336 = vmatpush.bf16.msrb.mxu0 %v12263_v43  ;;  %v12282_v43 = vld [vmem:[#allocation11 + $0x728] sm:$0xff] }
 0x658   :  { %7912 = vmatpush.bf16.msrb.mxu3 %v12217_v63  ;;  %v12242_v63 = vld [vmem:[#allocation11 + $0x610] sm:$0xff] }
 0x65a   :  { %7894 = vmatpush.bf16.msrb.mxu2 %v12213_v47  ;;  %v6336_v34 = vpop.f32.mrf.mxu3  ;;  %v11346_v47 = vor.u32 %v12252_v19, %v11345_v40 }
 0x65b   :  { %8337 = vmatpush.bf16.msrb.mxu0 %v12262_v27  ;;  %v14410_v9 = vadd.f32 %v6336_v34, %v6323_v60  ;;  %v12278_v27 = vld [vmem:[#allocation11 + $0x708] sm:$0xff]  ;;  %v12249_v34 = vld [vmem:[#allocation3 + $0xd4] sm:$0xf]  ;;  %v7067_v58 = vpop.f32.mrf.mxu1 }
 0x65c   :  { %7913 = vmatpush.bf16.msrb.mxu3 %v12216_v50  ;;  %v11166_v50 = vor.u32 %v12207_v49, %v11165_v54  ;;  %v12297_v49 = vld [vmem:[#allocation14 + $0x20] sm:$0xff] }
 0x65e   :  { %7895 = vmatpush.bf16.msrb.mxu2 %v12212_v5 }
 0x65f   :  { %7914 = vmatmul.bf16.vlgmr.msrb.gmra.mxu3 %v11154_v17  ;;  %8338 = vmatpush.bf16.msrb.mxu0 %v12261_v24 }
 0x660   :  { %8317 = vmatpush.bf16.msra.mxu3 %v12260_v10  ;;  %v12283_v10 = vld [vmem:[#allocation11 + $0x730] sm:$0xff] }
 0x662   :  { %7896 = vmatpush.bf16.msrb.mxu2 %v12211_v59  ;;  %8339 = vmatmul.bf16.vlgmr.msrb.gmra.mxu0 %v11334_v44  ;;  %v6628_v35 = vpop.f32.mrf.mxu3 }
 0x664   :  { %8318 = vmatpush.bf16.msra.mxu3 %v12259_v57 }
 0x666   :  { %7897 = vmatpush.bf16.msrb.mxu2 %v12210_v52 }
 0x668   :  { %8319 = vmatpush.bf16.msra.mxu3 %v12258_v41 }
 0x66a   :  { %7898 = vmatpush.bf16.msrb.mxu2 %v12209_v56  ;;  %v6630_v5 = vpop.f32.mrf.mxu3 }
 0x66c   :  { %8320 = vmatpush.bf16.msra.mxu3 %v12257_v42 }
 0x66e   :  { %7899 = vmatpush.bf16.msrb.mxu2 %v12208_v11 }
 0x670   :  { %8321 = vmatpush.bf16.msra.mxu3 %v12256_v28 }
 0x671   :  { %7900 = vmatmul.bf16.vlgmr.msrb.gmra.mxu2 %v11150_v4 }
 0x672   :  { %7948 = vmatpush.bf16.msra.mxu2 %v12247_v0 }
 0x674   :  { %8322 = vmatpush.bf16.msra.mxu3 %v12255_v15 }
 0x676   :  { %7949 = vmatpush.bf16.msra.mxu2 %v12246_v20 }
 0x678   :  { %8323 = vmatpush.bf16.msra.mxu3 %v12254_v36 }
 0x67a   :  { %7950 = vmatpush.bf16.msra.mxu2 %v12245_v23  ;;  %v7476_v23 = vpop.f32.mrf.mxu1 }
 0x67c   :  { %8324 = vmatpush.bf16.msra.mxu3 %v12253_v12 }
 0x67e   :  { %7951 = vmatpush.bf16.msra.mxu2 %v12244_v25 }
 0x67f   :  { %8325 = vmatmul.bf16.vlgmr.msra.gmra.mxu3 %v11330_v6 }
 0x680   :  { %8373 = vmatpush.bf16.msrb.mxu3 %v12292_v46 }
 0x682   :  { %7952 = vmatpush.bf16.msra.mxu2 %v12243_v48  ;;  %v7478_v25 = vpop.f32.mrf.mxu1  ;;  %v12300_v48 = vld [vmem:[#allocation14 + $0x38] sm:$0xff] }
 0x683   :  { %8466 = vmatpush.bf16.msra.mxu0 %v12300_v48 }
 0x684   :  { %8374 = vmatpush.bf16.msrb.mxu3 %v12291_v13  ;;  %v6684_v31 = vpop.f32.mrf.mxu3 }
 0x686   :  { %7953 = vmatpush.bf16.msra.mxu2 %v12242_v63  ;;  %v12299_v63 = vld [vmem:[#allocation14 + $0x30] sm:$0xff] }
 0x687   :  { %8467 = vmatpush.bf16.msra.mxu0 %v12299_v63  ;;  %v12316_v63 = vld [vmem:[#allocation12] ss:$0 sm:$0xff] }
 0x688   :  { %8375 = vmatpush.bf16.msrb.mxu3 %v12290_v53 }
 0x68a   :  { %7954 = vmatpush.bf16.msra.mxu2 %v12241_v22  ;;  %v12298_v22 = vld [vmem:[#allocation14 + $0x28] sm:$0xff] }
 0x68b   :  { %8468 = vmatpush.bf16.msra.mxu0 %v12298_v22 }
 0x68c   :  { %8376 = vmatpush.bf16.msrb.mxu3 %v12289_v18  ;;  %v6686_v0 = vpop.f32.mrf.mxu3 }
 0x68e   :  { %7955 = vmatpush.bf16.msra.mxu2 %v12240_v37 }
 0x68f   :  { %8469 = vmatpush.bf16.msra.mxu0 %v12297_v49 }
 0x690   :  { %8377 = vmatpush.bf16.msrb.mxu3 %v12288_v14 }
 0x691   :  { %7956 = vmatmul.bf16.vlgmr.msra.gmra.mxu2 %v11166_v50 }
 0x692   :  { %8359 = vmatpush.bf16.msrb.mxu2 %v12284_v51 }
 0x694   :  { %8378 = vmatpush.bf16.msrb.mxu3 %v12287_v33  ;;  %v6348_v17 = vpop.f32.mrf.mxu2 }
 0x695   :  { %v6349_v57 = vadd.f32 %v6348_v17, %v14406_v62  ;;  %v11342_v62 = vor.u32 %v12249_v34, %v11339_v7  ;;  %v12293_v17 = vld [vmem:[#allocation14] sm:$0xff] }
 0x696   :  { %8360 = vmatpush.bf16.msrb.mxu2 %v12283_v10 }
 0x697   :  { %v6629_v29 = vadd.f32 %v6628_v35, %v6349_v57  ;;  %v12294_v35 = vld [vmem:[#allocation14 + $0x8] sm:$0xff] }
 0x698   :  { %8379 = vmatpush.bf16.msrb.mxu3 %v12286_v8 }
 0x699   :  { %v6643_v60 = vadd.f32 %v14395_v38, %v6629_v29  ;;  %v7053_v38 = vpop.f32.mrf.mxu0 }
 0x69a   :  { %8361 = vmatpush.bf16.msrb.mxu2 %v12282_v43  ;;  %v12295_v43 = vld [vmem:[#allocation14 + $0x10] sm:$0xff] }
 0x69b   :  { %v6657_v42 = vadd.f32 %v14400_v16, %v6643_v60 }
 0x69c   :  { %8380 = vmatpush.bf16.msrb.mxu3 %v12285_v45  ;;  %v6350_v41 = vpop.f32.mrf.mxu2  ;;  %v12296_v45 = vld [vmem:[#allocation14 + $0x18] sm:$0xff] }
 0x69d   :  { %v6351_v24 = vadd.f32 %v6350_v41, %v14410_v9  ;;  %8470 = vmatpush.bf16.msra.mxu0 %v12296_v45  ;;  %v7068_v41 = vadd.f32 %v7067_v58, %v7053_v38 }
 0x69e   :  { %8362 = vmatpush.bf16.msrb.mxu2 %v12281_v32 }
 0x69f   :  { %8381 = vmatmul.bf16.vlgmr.msrb.gmra.mxu3 %v11346_v47  ;;  %v6631_v59 = vadd.f32 %v6630_v5, %v6351_v24 }
 0x6a1   :  { %v6645_v56 = vadd.f32 %v14402_v30, %v6631_v59  ;;  %v7107_v20 = vpop.f32.mrf.mxu0  ;;  %8471 = vmatpush.bf16.msra.mxu0 %v12295_v43 }
 0x6a2   :  { %8363 = vmatpush.bf16.msrb.mxu2 %v12280_v2  ;;  %v7093_v16 = vpop.f32.mrf.mxu3 }
 0x6a3   :  { %v6659_v9 = vadd.f32 %v14404_v3, %v6645_v56 }
 0x6a4   :  { %v6670_v44 = vpop.f32.mrf.mxu2 }
 0x6a5   :  { %v6671_v52 = vadd.f32 %v6670_v44, %v6657_v42  ;;  %8472 = vmatpush.bf16.msra.mxu0 %v12294_v35 }
 0x6a6   :  { %8364 = vmatpush.bf16.msrb.mxu2 %v12279_v39 }
 0x6a7   :  { %v6685_v28 = vadd.f32 %v6684_v31, %v6671_v52 }
 0x6a9   :  { %v7109_v3 = vpop.f32.mrf.mxu0  ;;  %8473 = vmatpush.bf16.msra.mxu0 %v12293_v17 }
 0x6aa   :  { %8365 = vmatpush.bf16.msrb.mxu2 %v12278_v27  ;;  %v7095_v30 = vpop.f32.mrf.mxu3 }
 0x6ac   :  { %v6672_v15 = vpop.f32.mrf.mxu2 }
 0x6ad   :  { %v6673_v11 = vadd.f32 %v6672_v15, %v6659_v9 }
 0x6ae   :  { %8366 = vmatpush.bf16.msrb.mxu2 %v12277_v55 }
 0x6af   :  { %v14418_v36 = vadd.f32 %v6686_v0, %v6673_v11  ;;  %v7532_v18 = vpop.f32.mrf.mxu1 }
 0x6b1   :  { %8367 = vmatmul.bf16.vlgmr.msrb.gmra.mxu2 %v11342_v62  ;;  %v7518_v53 = vpop.f32.mrf.mxu0 }
 0x6b4   :  { %v7079_v26 = vpop.f32.mrf.mxu2 }
 0x6b5   :  { %v7080_v1 = vadd.f32 %v7079_v26, %v14408_v61 }
 0x6b7   :  { %v7094_v4 = vadd.f32 %v7093_v16, %v7080_v1  ;;  %v7534_v8 = vpop.f32.mrf.mxu1 }
 0x6b9   :  { %v7108_v12 = vadd.f32 %v7107_v20, %v7094_v4  ;;  %v7520_v33 = vpop.f32.mrf.mxu0 }
 0x6bb   :  { %v14421_v46 = vadd.f32 %v7108_v12, %v6685_v28 }
 0x6bc   :  { %v7081_v21 = vpop.f32.mrf.mxu2 }
 0x6bd   :  { %v7082_v59 = vadd.f32 %v7081_v21, %v7068_v41 }
 0x6bf   :  { %v7096_v44 = vadd.f32 %v7095_v30, %v7082_v59 }
 0x6c0   :  { %v7943_v19 = vpop.f32.mrf.mxu1 }
 0x6c1   :  { %v7929_v54 = vpop.f32.mrf.mxu0  ;;  %v7110_v38 = vadd.f32 %v7109_v3, %v7096_v44 }
 0x6c2   :  { %v7504_v6 = vpop.f32.mrf.mxu3 }
 0x6c3   :  { %v7113_v30 = vadd.f32 %v7110_v38, %v14418_v36 }
 0x6c8   :  { %v7945_v2 = vpop.f32.mrf.mxu1 }
 0x6c9   :  { %v7931_v32 = vpop.f32.mrf.mxu0 }
 0x6ca   :  { %v7506_v61 = vpop.f32.mrf.mxu3 }
 0x6d0   :  { %v8354_v7 = vpop.f32.mrf.mxu1 }
 0x6d4   :  { %v7490_v13 = vpop.f32.mrf.mxu2 }
 0x6d5   :  { %v7491_v57 = vadd.f32 %v7490_v13, %v7476_v23 }
 0x6d7   :  { %v7505_v29 = vadd.f32 %v7504_v6, %v7491_v57 }
 0x6d8   :  { %v8356_v21 = vpop.f32.mrf.mxu1 }
 0x6d9   :  { %v7519_v34 = vadd.f32 %v7518_v53, %v7505_v29 }
 0x6db   :  { %v7533_v28 = vadd.f32 %v7532_v18, %v7519_v34 }
 0x6dc   :  { %v7492_v14 = vpop.f32.mrf.mxu2 }
 0x6dd   :  { %v7493_v24 = vadd.f32 %v7492_v14, %v7478_v25  ;;  %v7537_v20 = vadd.f32 %v7533_v28, %v14421_v46 }
 0x6df   :  { %v8340_v39 = vpop.f32.mrf.mxu0  ;;  %v7507_v42 = vadd.f32 %v7506_v61, %v7493_v24 }
 0x6e1   :  { %v7521_v15 = vadd.f32 %v7520_v33, %v7507_v42 }
 0x6e2   :  { %v7915_v37 = vpop.f32.mrf.mxu3 }
 0x6e3   :  { %v7535_v12 = vadd.f32 %v7534_v8, %v7521_v15 }
 0x6e5   :  { %v7538_v48 = vadd.f32 %v7535_v12, %v7113_v30 }
 0x6e7   :  { %v8342_v1 = vpop.f32.mrf.mxu0 }
 0x6ea   :  { %v7917_v50 = vpop.f32.mrf.mxu3 }
 0x6f4   :  { %v7901_v51 = vpop.f32.mrf.mxu2 }
 0x6f5   :  { %v7916_v55 = vadd.f32 %v7915_v37, %v7901_v51 }
 0x6f7   :  { %v7930_v62 = vadd.f32 %v7929_v54, %v7916_v55  ;;  %v12317_v54 = vld [vmem:[#allocation15] ss:$0 sm:$0xff] }
 0x6f9   :  { %v7944_v0 = vadd.f32 %v7943_v19, %v7930_v62 }
 0x6fc   :  { %v7903_v10 = vpop.f32.mrf.mxu2 }
 0x6fd   :  { %v7918_v31 = vadd.f32 %v7917_v50, %v7903_v10 }
 0x6ff   :  { %v7932_v11 = vadd.f32 %v7931_v32, %v7918_v31 }
 0x701   :  { %v7946_v58 = vadd.f32 %v7945_v2, %v7932_v11 }
 0x702   :  { %v8326_v40 = vpop.f32.mrf.mxu3 }
 0x703   :  { %v8341_v60 = vadd.f32 %v8340_v39, %v8326_v40 }
 0x705   :  { %v8355_v52 = vadd.f32 %v8354_v7, %v8341_v60 }
 0x70a   :  { %v8328_v27 = vpop.f32.mrf.mxu3 }
 0x70b   :  { %v8343_v16 = vadd.f32 %v8342_v1, %v8328_v27 }
 0x70d   :  { %v8357_v25 = vadd.f32 %v8356_v21, %v8343_v16 }
 0x714   :  { %v7957_v47 = vpop.f32.mrf.mxu2 }
 0x715   :  { %v7958_v4 = vadd.f32 %v7957_v47, %v7944_v0 }
 0x717   :  { %v7962_v6 = vadd.f32 %v7958_v4, %v7537_v20 }
 0x71c   :  { %v7959_v5 = vpop.f32.mrf.mxu2 }
 0x71d   :  { %v7960_v13 = vadd.f32 %v7959_v5, %v7946_v58 }
 0x71f   :  { %v7963_v3 = vadd.f32 %v7960_v13, %v7538_v48 }
 0x722   :  { %v8382_v56 = vpop.f32.mrf.mxu3 }
 0x72a   :  { %v8384_v14 = vpop.f32.mrf.mxu3 }
 0x734   :  { %v8368_v9 = vpop.f32.mrf.mxu2 }
 0x735   :  { %v8369_v26 = vadd.f32 %v8368_v9, %v8355_v52 }
 0x737   :  { %v8383_v23 = vadd.f32 %v8382_v56, %v8369_v26 }
 0x739   :  { %v8387_v18 = vadd.f32 %v8383_v23, %v7962_v6 }
 0x73b   :  { %v8393_v33 = vadd.f32 %v12316_v63, %v8387_v18 }
 0x73c   :  { %v8370_v53 = vpop.f32.mrf.mxu2 }
 0x73d   :  { %v8371_v61 = vadd.f32 %v8370_v53, %v8357_v25  ;;  %v8395_v51 = vmax.f32 %v8393_v33, 0.0 }
 0x73f   :  { %v8385_v22 = vadd.f32 %v8384_v14, %v8371_v61 }
 0x741   :  { %v8388_v37 = vadd.f32 %v8385_v22, %v7963_v3 }
 0x743   :  { %v8394_v46 = vadd.f32 %v12316_v63, %v8388_v37 }
 0x745   :  { %v8396_v8 = vmax.f32 %v8394_v46, 0.0 }
 0x747   :  { %v8397_v49 = vpack.c.bf16 %v8396_v8, %v8395_v51 }
 0x749   :  { %8474 = vmatmul.bf16.vlgmr.msra.gmra.mxu0 %v8397_v49 }
 0x7c6   :  { %v8475_v50 = vpop.f32.mrf.mxu0 }
 0x7c7   :  { %v8476_v36 = vadd.f32 %v12317_v54, %v8475_v50 }
 0x7c9   :  { %8480 = vst [vmem:[%s14440_s9] sm:$0xff] %v8476_v36 }
 0x7ce   :  { %v8477_v10 = vpop.f32.mrf.mxu0 }
 0x7cf   :  { %v8478_v45 = vadd.f32 %v12317_v54, %v8477_v10 }
 0x7d1   :  { %8481 = vst [vmem:[%s14440_s9 + $0x8] sm:$0xff] %v8478_v45 }
 0x7d2   :  { %8486 = vsyncpa [#allocation5], 1 }
 0x7d3   :  { %8487 = vsyncpa [#allocation7], 1 }
 0x7d4   :  { %8488 = vsyncpa [#allocation10], 1 }
 0x7d5   :  { %8489 = vsyncpa [#allocation13], 1 }
 0x7d6   :  { %8490 = vsyncpa [#allocation16], 1 }

</bundles_post_ra>
